<compile_context>
chip_gen: v7x
topology: tpu7x:2x2x1
jax: 0.10.0
libtpu: 0.0.40
codegen_flags: <defaults>
</compile_context>

<pallas_src>
import functools

import jax
import jax.numpy as jnp
from jax.experimental import pallas as pl
from jax.experimental.pallas import tpu as pltpu

# ------------------------- configuration (small) -------------------------
B = 2            # batch
IMG = 32         # image size
PATCH = 8        # patch size  -> grid 4x4, L = 16 patch tokens
CIN = 3          # image channels
D = 32           # vit embed dim (num_features)
DEPTH = 2        # vit blocks
HEADS = 4        # vit attention heads
MLP_HIDDEN = 64  # vit mlp hidden (ratio 2)
Q = 8            # num_queries
CLIP_C = 16      # clip feature channels
TEXT_C = 512     # clip text feature channels (fixed 512 in the module)
E = 16           # mask-decoder embed_channels
MC = 32          # mask-decoder mlp_channels
NH_BIAS = 2      # attn-bias total_heads
NL_BIAS = 1      # attn-bias total_layers
FUSION_MAP = {0: 0, 2: 1}        # block_idx -> clip feature index
DEEP_SUP_IDXS = [1, DEPTH]       # eval path only uses the last one
LN_EPS = 1e-6                    # timm ViT LayerNorm eps
L2_EPS = 1e-12                   # F.normalize eps

GRID_H = IMG // PATCH
GRID_W = IMG // PATCH
L = GRID_H * GRID_W
T = Q + L
DH = D // HEADS

_BLOCK_KEYS = ("ln1_g", "ln1_b", "q_w", "q_b", "k_w", "k_b", "v_w", "v_b",
               "proj_w", "proj_b", "ln2_g", "ln2_b",
               "fc1_w", "fc1_b", "fc2_w", "fc2_b")


# ------------------------------ in-kernel helpers ------------------------------
def _ln(x, g_ref, b_ref):
    mu = jnp.mean(x, axis=-1, keepdims=True)
    xc = x - mu
    var = jnp.mean(xc * xc, axis=-1, keepdims=True)
    return xc * jax.lax.rsqrt(var + LN_EPS) * g_ref[...] + b_ref[...]


def _lin(x, w_ref, b_ref, act=None):
    y = jnp.dot(x, w_ref[...], preferred_element_type=jnp.float32) + b_ref[...]
    if act == "relu":
        y = jnp.maximum(y, 0.0)
    elif act == "gelu":  # exact (erf) GELU, matching torch.nn.GELU default
        y = 0.5 * y * (1.0 + jax.lax.erf(y * 0.7071067811865476))
    return y


def _l2n(x):
    n = jnp.sqrt(jnp.sum(x * x, axis=-1, keepdims=True))
    return x / jnp.maximum(n, L2_EPS)


# ------------------------------ fused kernel ------------------------------
def _fused_san_kernel(patch_ref, clip0_ref, clip1_ref, text_ref, *rest):
    # rest = weight refs ..., heat_ref, mask_ref, ab_ref, x_scr
    w = rest[:-4]
    heat_ref, maskp_ref, ab_ref, x_scr = rest[-4:]

    # ---- unpack weight refs (order must match _flatten_params) ----
    wi = 0

    def take(n):
        nonlocal wi
        chunk = w[wi:wi + n]
        wi += n
        return chunk

    pe_w, pe_b, qe_ref, pos_ref = take(4)
    block_refs = [take(len(_BLOCK_KEYS)) for _ in range(DEPTH)]
    fuse_keys = sorted(FUSION_MAP)
    fuse_refs = {k: take(2) for k in fuse_keys}
    text_w, text_b = take(2)
    qm_w1, qm_b1, qm_w2, qm_b2, qh_w, qh_b, qmk_w, qmk_b = take(8)
    pm_w1, pm_b1, pm_w2, pm_b2, pm_w3, pm_b3 = take(6)
    am_w1, am_b1, am_w2, am_b2 = take(4)
    amlp_heads = [take(2) for _ in range(NL_BIAS * NH_BIAS)]
    grp_ref = take(1)[0]            # (L, L) same-image-row grouping matrix
    assert wi == len(w)

    # ---- per-head column masks (computed once, reused by every block) ----
    col = jax.lax.broadcasted_iota(jnp.int32, (1, D), 1)
    head_masks = [
        jnp.where((col >= h * DH) & (col < (h + 1) * DH),
                  jnp.float32(1.0), jnp.float32(0.0))
        for h in range(HEADS)
    ]

    # ---- patch embed + query/pos embeds ----
    patch_tok = _lin(patch_ref[0], pe_w, pe_b)                       # (L, D)
    x_scr[pl.ds(0, Q), :] = qe_ref[...] + pos_ref[pl.ds(0, Q), :]
    x_scr[pl.ds(Q, L), :] = patch_tok + pos_ref[pl.ds(Q, L), :]

    clip_vals = (clip0_ref[0], clip1_ref[0])                         # (L, CLIP_C)

    def fuse(block_idx):
        # TODO(synk): exact build_fusion_layer impl is not in the source; this
        # is the canonical SAN 'add' fusion (1x1 proj of clip feature + add);
        # spatial shapes already match so no bilinear resize is needed.
        if block_idx in FUSION_MAP:
            fw, fb = fuse_refs[block_idx]
            proj = _lin(clip_vals[FUSION_MAP[block_idx]], fw, fb)    # (L, D)
            x_scr[pl.ds(Q, L), :] = x_scr[pl.ds(Q, L), :] + proj

    # TODO(synk): 'add_text' fusion layer definition unavailable; implemented
    # as Linear(512 -> D) projection broadcast-added to every token.
    t = _lin(text_ref[0], text_w, text_b)                            # (1, D)

    fuse(0)
    x_scr[...] = x_scr[...] + t

    # ---- ViT blocks ----
    scale = jnp.float32(DH ** -0.5)
    query_feat = None
    x_sp = None
    for i in range(1, DEPTH + 1):
        (ln1_g, ln1_b, q_w, q_b, k_w, k_b, v_w, v_b,
         pr_w, pr_b, ln2_g, ln2_b, f1_w, f1_b, f2_w, f2_b) = block_refs[i - 1]

        x = x_scr[...]
        # --- attention (all heads in-kernel, per-head column masks) ---
        h1 = _ln(x, ln1_g, ln1_b)
        q_all = _lin(h1, q_w, q_b)
        k_all = _lin(h1, k_w, k_b)
        v_all = _lin(h1, v_w, v_b)
        attn_out = jnp.zeros((T, D), jnp.float32)
        for hm in head_masks:
            s = jax.lax.dot_general(q_all * hm, k_all,
                                    (((1,), (1,)), ((), ())),
                                    preferred_element_type=jnp.float32) * scale
            m = jnp.max(s, axis=-1, keepdims=True)
            p = jnp.exp(s - m)
            denom = jnp.sum(p, axis=-1, keepdims=True)
            p = p * pl.reciprocal(denom, approx=True)
            attn_out = attn_out + jnp.dot(p, v_all * hm,
                                          preferred_element_type=jnp.float32)
        x = x + _lin(attn_out, pr_w, pr_b)
        # --- mlp ---
        h2 = _ln(x, ln2_g, ln2_b)
        x = x + _lin(_lin(h2, f1_w, f1_b, act="gelu"), f2_w, f2_b)
        x_scr[...] = x

        # --- fuse / text add / L2 normalize ---
        fuse(i)
        x = x_scr[...] + t
        x = _l2n(x)

        if i < DEPTH:
            x_scr[...] = x + pos_ref[...]
        else:
            # eval-mode decode_masks uses only the last deep-supervision output
            query_feat = x[:Q, :]      # (Q, D)
            x_sp = x[Q:, :]            # (L, D), row = ih*W + iw, col = channel

    # ---- MLP mask decoder (fully in-kernel) ----
    q_hidden = _lin(_lin(query_feat, qm_w1, qm_b1, "relu"), qm_w2, qm_b2, "relu")
    q_heat = _lin(q_hidden, qh_w, qh_b)          # (Q, E)  (first half of 2E)
    q_mask = _lin(q_hidden, qmk_w, qmk_b)        # (Q, E)  (second half of 2E)

    pix = _lin(_lin(_lin(x_sp, pm_w1, pm_b1, "relu"),
                    pm_w2, pm_b2, "relu"), pm_w3, pm_b3)             # (L, E)

    heat = jax.lax.dot_general(q_heat, pix, (((1,), (1,)), ((), ())),
                               preferred_element_type=jnp.float32)   # (Q, L)
    maskp = jax.lax.dot_general(q_mask, pix, (((1,), (1,)), ((), ())),
                                preferred_element_type=jnp.float32)  # (Q, L)
    heat_ref[0] = heat.astype(heat_ref.dtype)
    maskp_ref[0] = maskp.astype(maskp_ref.dtype)

    # attn_mlp: shared hidden, per-(layer,head) output chunk of E channels.
    a_hidden = _lin(_lin(x_sp, am_w1, am_b1, "relu"), am_w2, am_b2, "relu")
    grp = grp_ref[...]                                               # (L, L)
    for kk, (aw, abk) in enumerate(amlp_heads):
        a_k = _lin(a_hidden, aw, abk)                                # (L, E)
        # F.normalize(attn, dim=-1) == per-channel L2 norm over the W axis:
        # lane-dense group-sum via (L, L) matmul (no last-dim-of-4 reshapes).
        gs = jnp.dot(grp, a_k * a_k, preferred_element_type=jnp.float32)
        a_kn = a_k / jnp.maximum(jnp.sqrt(gs), L2_EPS)
        abias = jax.lax.dot_general(q_heat, a_kn, (((1,), (1,)), ((), ())),
                                    preferred_element_type=jnp.float32)  # (Q, L)
        ab_ref[0, kk] = abias.astype(ab_ref.dtype)


# ------------------------------ parameters ------------------------------
def init_params(key):
    keys = iter(jax.random.split(key, 160))

    def nrm(shape, std=0.02):
        return jax.random.normal(next(keys), shape, jnp.float32) * std

    def zeros(shape):
        return jnp.zeros(shape, jnp.float32)

    p = {}
    # patch embed (Conv2d kernel=stride=PATCH) as a matmul
    p["pe_w"] = nrm((CIN * PATCH * PATCH, D))
    p["pe_b"] = zeros((1, D))
    # positional / query embeddings
    p["pos_embed"] = nrm((L, D))
    p["query_embed"] = nrm((Q, D))
    p["query_pos_embed"] = nrm((Q, D))
    # ViT blocks (qkv pre-split into q/k/v so the kernel never lane-slices)
    p["blocks"] = []
    for _ in range(DEPTH):
        blk = {
            "ln1_g": jnp.ones((1, D), jnp.float32), "ln1_b": zeros((1, D)),
            "q_w": nrm((D, D)), "q_b": zeros((1, D)),
            "k_w": nrm((D, D)), "k_b": zeros((1, D)),
            "v_w": nrm((D, D)), "v_b": zeros((1, D)),
            "proj_w": nrm((D, D)), "proj_b": zeros((1, D)),
            "ln2_g": jnp.ones((1, D), jnp.float32), "ln2_b": zeros((1, D)),
            "fc1_w": nrm((D, MLP_HIDDEN)), "fc1_b": zeros((1, MLP_HIDDEN)),
            "fc2_w": nrm((MLP_HIDDEN, D)), "fc2_b": zeros((1, D)),
        }
        p["blocks"].append(blk)
    # fusion layers (one per target block index)
    for tgt in sorted(FUSION_MAP):
        p[f"fuse{tgt}_w"] = nrm((CLIP_C, D))
        p[f"fuse{tgt}_b"] = zeros((1, D))
    # text fusion ('add_text', 512 -> D)
    p["text_w"] = nrm((TEXT_C, D))
    p["text_b"] = zeros((1, D))
    # mask decoder MLPs (3 layers each; last layers pre-split along outputs)
    p["qmlp_w1"], p["qmlp_b1"] = nrm((D, MC)), zeros((1, MC))
    p["qmlp_w2"], p["qmlp_b2"] = nrm((MC, MC)), zeros((1, MC))
    p["qmlp_w3h"], p["qmlp_b3h"] = nrm((MC, E)), zeros((1, E))   # heatmap half
    p["qmlp_w3m"], p["qmlp_b3m"] = nrm((MC, E)), zeros((1, E))   # mask half
    p["pmlp_w1"], p["pmlp_b1"] = nrm((D, MC)), zeros((1, MC))
    p["pmlp_w2"], p["pmlp_b2"] = nrm((MC, MC)), zeros((1, MC))
    p["pmlp_w3"], p["pmlp_b3"] = nrm((MC, E)), zeros((1, E))
    p["amlp_w1"], p["amlp_b1"] = nrm((D, MC)), zeros((1, MC))
    p["amlp_w2"], p["amlp_b2"] = nrm((MC, MC)), zeros((1, MC))
    p["amlp_w3"] = [nrm((MC, E)) for _ in range(NL_BIAS * NH_BIAS)]
    p["amlp_b3"] = [zeros((1, E)) for _ in range(NL_BIAS * NH_BIAS)]
    return p


def _flatten_params(p):
    """Ordered weight list; must match the kernel's unpack order exactly."""
    pos_full = jnp.concatenate([p["query_pos_embed"], p["pos_embed"]], axis=0)  # (T, D)
    w = [p["pe_w"], p["pe_b"], p["query_embed"], pos_full]
    for blk in p["blocks"]:
        w += [blk[k] for k in _BLOCK_KEYS]
    for tgt in sorted(FUSION_MAP):
        w += [p[f"fuse{tgt}_w"], p[f"fuse{tgt}_b"]]
    w += [p["text_w"], p["text_b"]]
    w += [p["qmlp_w1"], p["qmlp_b1"], p["qmlp_w2"], p["qmlp_b2"],
          p["qmlp_w3h"], p["qmlp_b3h"], p["qmlp_w3m"], p["qmlp_b3m"]]
    w += [p["pmlp_w1"], p["pmlp_b1"], p["pmlp_w2"], p["pmlp_b2"],
          p["pmlp_w3"], p["pmlp_b3"]]
    w += [p["amlp_w1"], p["amlp_b1"], p["amlp_w2"], p["amlp_b2"]]
    for k in range(NL_BIAS * NH_BIAS):
        w += [p["amlp_w3"][k], p["amlp_b3"][k]]
    # (L, L) grouping matrix: 1 iff two flat spatial positions share the same
    # image row -> used for the F.normalize(attn, dim=-1) group sums.
    ridx = jnp.arange(L, dtype=jnp.int32) // GRID_W
    w.append((ridx[:, None] == ridx[None, :]).astype(jnp.float32))
    return w


# ------------------------------ specs ------------------------------
def _full_spec(a):
    nd = a.ndim
    return pl.BlockSpec(a.shape, lambda b, _nd=nd: (0,) * _nd)


def _batch_spec(a):
    nd = a.ndim
    return pl.BlockSpec((1,) + a.shape[1:],
                        lambda b, _nd=nd: (b,) + (0,) * (_nd - 1))


# ------------------------------ forward ------------------------------
def forward(image, clip_features, clip_text_features, p):
    Bn = image.shape[0]
    # layout plumbing (tiny XLA ops): patch unfold, clip NCHW->NLC, text 3-D.
    patch = image.reshape(Bn, CIN, GRID_H, PATCH, GRID_W, PATCH)
    patch = patch.transpose(0, 2, 4, 1, 3, 5).reshape(Bn, L, CIN * PATCH * PATCH)
    clip0 = clip_features[0].reshape(Bn, CLIP_C, L).transpose(0, 2, 1)
    clip1 = clip_features[1].reshape(Bn, CLIP_C, L).transpose(0, 2, 1)
    text = clip_text_features.reshape(Bn, 1, TEXT_C)

    weights = _flatten_params(p)
    data = [patch, clip0, clip1, text]

    in_specs = [_batch_spec(a) for a in data] + [_full_spec(a) for a in weights]
    out_shape = (jax.ShapeDtypeStruct((Bn, Q, L), jnp.float32),
                 jax.ShapeDtypeStruct((Bn, Q, L), jnp.float32),
                 jax.ShapeDtypeStruct((Bn, NL_BIAS * NH_BIAS, Q, L), jnp.float32))
    out_specs = (pl.BlockSpec((1, Q, L), lambda b: (b, 0, 0)),
                 pl.BlockSpec((1, Q, L), lambda b: (b, 0, 0)),
                 pl.BlockSpec((1, NL_BIAS * NH_BIAS, Q, L), lambda b: (b, 0, 0, 0)))

    heat, maskp, ab = pl.pallas_call(
        _fused_san_kernel,
        out_shape=out_shape,
        grid=(Bn,),
        in_specs=in_specs,
        out_specs=out_specs,
        scratch_shapes=[pltpu.VMEM((T, D), jnp.float32)],   # resident token buffer
        compiler_params=pltpu.CompilerParams(
            dimension_semantics=("parallel",)),              # v7x: 2 TCs split batch
    )(*data, *weights)

    heatmap_preds = [heat.reshape(Bn, Q, GRID_H, GRID_W)]
    mask_preds = [maskp.reshape(Bn, Q, GRID_H, GRID_W)]
    ab6 = ab.reshape(Bn, NL_BIAS, NH_BIAS, Q, GRID_H, GRID_W)
    attn_biases = [[ab6[:, li] for li in range(NL_BIAS)]]
    return heatmap_preds, mask_preds, attn_biases


# ------------------------------ main ------------------------------
if __name__ == "__main__":
    key = jax.random.PRNGKey(0)
    k_p, k_img, k_c0, k_c1, k_t = jax.random.split(key, 5)
    params = init_params(k_p)

    image = jax.random.normal(k_img, (B, CIN, IMG, IMG), jnp.float32)
    clip_features = [
        jax.random.normal(k_c0, (B, CLIP_C, GRID_H, GRID_W), jnp.float32),
        jax.random.normal(k_c1, (B, CLIP_C, GRID_H, GRID_W), jnp.float32),
    ]
    clip_text_features = jax.random.normal(k_t, (B, TEXT_C), jnp.float32)

    fwd = jax.jit(forward)
    heatmap_preds, mask_preds, attn_biases = fwd(
        image, clip_features, clip_text_features, params)

    jax.block_until_ready((heatmap_preds, mask_preds, attn_biases))
    assert heatmap_preds[0].shape == (B, Q, GRID_H, GRID_W)
    assert mask_preds[0].shape == (B, Q, GRID_H, GRID_W)
    assert attn_biases[0][0].shape == (B, NH_BIAS, Q, GRID_H, GRID_W)
    print("KERNEL_OK")
</pallas_src>

<mosaic_0001>
module attributes {stable_mosaic.version = 11 : i64} {
  func.func @_fused_san_kernel(%arg0: i32, %arg1: memref<1x16x192xf32, #tpu.memory_space<vmem>>, %arg2: memref<1x16x16xf32, #tpu.memory_space<vmem>>, %arg3: memref<1x16x16xf32, #tpu.memory_space<vmem>>, %arg4: memref<1x1x512xf32, #tpu.memory_space<vmem>>, %arg5: memref<192x32xf32, #tpu.memory_space<vmem>>, %arg6: memref<1x32xf32, #tpu.memory_space<vmem>>, %arg7: memref<8x32xf32, #tpu.memory_space<vmem>>, %arg8: memref<24x32xf32, #tpu.memory_space<vmem>>, %arg9: memref<1x32xf32, #tpu.memory_space<vmem>>, %arg10: memref<1x32xf32, #tpu.memory_space<vmem>>, %arg11: memref<32x32xf32, #tpu.memory_space<vmem>>, %arg12: memref<1x32xf32, #tpu.memory_space<vmem>>, %arg13: memref<32x32xf32, #tpu.memory_space<vmem>>, %arg14: memref<1x32xf32, #tpu.memory_space<vmem>>, %arg15: memref<32x32xf32, #tpu.memory_space<vmem>>, %arg16: memref<1x32xf32, #tpu.memory_space<vmem>>, %arg17: memref<32x32xf32, #tpu.memory_space<vmem>>, %arg18: memref<1x32xf32, #tpu.memory_space<vmem>>, %arg19: memref<1x32xf32, #tpu.memory_space<vmem>>, %arg20: memref<1x32xf32, #tpu.memory_space<vmem>>, %arg21: memref<32x64xf32, #tpu.memory_space<vmem>>, %arg22: memref<1x64xf32, #tpu.memory_space<vmem>>, %arg23: memref<64x32xf32, #tpu.memory_space<vmem>>, %arg24: memref<1x32xf32, #tpu.memory_space<vmem>>, %arg25: memref<1x32xf32, #tpu.memory_space<vmem>>, %arg26: memref<1x32xf32, #tpu.memory_space<vmem>>, %arg27: memref<32x32xf32, #tpu.memory_space<vmem>>, %arg28: memref<1x32xf32, #tpu.memory_space<vmem>>, %arg29: memref<32x32xf32, #tpu.memory_space<vmem>>, %arg30: memref<1x32xf32, #tpu.memory_space<vmem>>, %arg31: memref<32x32xf32, #tpu.memory_space<vmem>>, %arg32: memref<1x32xf32, #tpu.memory_space<vmem>>, %arg33: memref<32x32xf32, #tpu.memory_space<vmem>>, %arg34: memref<1x32xf32, #tpu.memory_space<vmem>>, %arg35: memref<1x32xf32, #tpu.memory_space<vmem>>, %arg36: memref<1x32xf32, #tpu.memory_space<vmem>>, %arg37: memref<32x64xf32, #tpu.memory_space<vmem>>, %arg38: memref<1x64xf32, #tpu.memory_space<vmem>>, %arg39: memref<64x32xf32, #tpu.memory_space<vmem>>, %arg40: memref<1x32xf32, #tpu.memory_space<vmem>>, %arg41: memref<16x32xf32, #tpu.memory_space<vmem>>, %arg42: memref<1x32xf32, #tpu.memory_space<vmem>>, %arg43: memref<16x32xf32, #tpu.memory_space<vmem>>, %arg44: memref<1x32xf32, #tpu.memory_space<vmem>>, %arg45: memref<512x32xf32, #tpu.memory_space<vmem>>, %arg46: memref<1x32xf32, #tpu.memory_space<vmem>>, %arg47: memref<32x32xf32, #tpu.memory_space<vmem>>, %arg48: memref<1x32xf32, #tpu.memory_space<vmem>>, %arg49: memref<32x32xf32, #tpu.memory_space<vmem>>, %arg50: memref<1x32xf32, #tpu.memory_space<vmem>>, %arg51: memref<32x16xf32, #tpu.memory_space<vmem>>, %arg52: memref<1x16xf32, #tpu.memory_space<vmem>>, %arg53: memref<32x16xf32, #tpu.memory_space<vmem>>, %arg54: memref<1x16xf32, #tpu.memory_space<vmem>>, %arg55: memref<32x32xf32, #tpu.memory_space<vmem>>, %arg56: memref<1x32xf32, #tpu.memory_space<vmem>>, %arg57: memref<32x32xf32, #tpu.memory_space<vmem>>, %arg58: memref<1x32xf32, #tpu.memory_space<vmem>>, %arg59: memref<32x16xf32, #tpu.memory_space<vmem>>, %arg60: memref<1x16xf32, #tpu.memory_space<vmem>>, %arg61: memref<32x32xf32, #tpu.memory_space<vmem>>, %arg62: memref<1x32xf32, #tpu.memory_space<vmem>>, %arg63: memref<32x32xf32, #tpu.memory_space<vmem>>, %arg64: memref<1x32xf32, #tpu.memory_space<vmem>>, %arg65: memref<32x16xf32, #tpu.memory_space<vmem>>, %arg66: memref<1x16xf32, #tpu.memory_space<vmem>>, %arg67: memref<32x16xf32, #tpu.memory_space<vmem>>, %arg68: memref<1x16xf32, #tpu.memory_space<vmem>>, %arg69: memref<16x16xf32, #tpu.memory_space<vmem>>, %arg70: memref<1x8x16xf32, #tpu.memory_space<vmem>>, %arg71: memref<1x8x16xf32, #tpu.memory_space<vmem>>, %arg72: memref<1x2x8x16xf32, #tpu.memory_space<vmem>>, %arg73: memref<24x32xf32, #tpu.memory_space<vmem>>) attributes {dimension_semantics = [#tpu.dimension_semantics<parallel>], iteration_bounds = array<i64: 2>, scalar_prefetch = 0 : i64, scratch_operands = 1 : i64, tpu.core_type = #tpu.core_type<tc>, window_params = [{transform_indices = @transform_0, window_bounds = array<i64: 1, 16, 192>}, {transform_indices = @transform_1, window_bounds = array<i64: 1, 16, 16>}, {transform_indices = @transform_2, window_bounds = array<i64: 1, 16, 16>}, {transform_indices = @transform_3, window_bounds = array<i64: 1, 1, 512>}, {pipeline_mode = #tpu.pipeline_mode<synchronous>, transform_indices = @transform_4, window_bounds = array<i64: 192, 32>}, {pipeline_mode = #tpu.pipeline_mode<synchronous>, transform_indices = @transform_5, window_bounds = array<i64: 1, 32>}, {pipeline_mode = #tpu.pipeline_mode<synchronous>, transform_indices = @transform_6, window_bounds = array<i64: 8, 32>}, {pipeline_mode = #tpu.pipeline_mode<synchronous>, transform_indices = @transform_7, window_bounds = array<i64: 24, 32>}, {pipeline_mode = #tpu.pipeline_mode<synchronous>, transform_indices = @transform_8, window_bounds = array<i64: 1, 32>}, {pipeline_mode = #tpu.pipeline_mode<synchronous>, transform_indices = @transform_9, window_bounds = array<i64: 1, 32>}, {pipeline_mode = #tpu.pipeline_mode<synchronous>, transform_indices = @transform_10, window_bounds = array<i64: 32, 32>}, {pipeline_mode = #tpu.pipeline_mode<synchronous>, transform_indices = @transform_11, window_bounds = array<i64: 1, 32>}, {pipeline_mode = #tpu.pipeline_mode<synchronous>, transform_indices = @transform_12, window_bounds = array<i64: 32, 32>}, {pipeline_mode = #tpu.pipeline_mode<synchronous>, transform_indices = @transform_13, window_bounds = array<i64: 1, 32>}, {pipeline_mode = #tpu.pipeline_mode<synchronous>, transform_indices = @transform_14, window_bounds = array<i64: 32, 32>}, {pipeline_mode = #tpu.pipeline_mode<synchronous>, transform_indices = @transform_15, window_bounds = array<i64: 1, 32>}, {pipeline_mode = #tpu.pipeline_mode<synchronous>, transform_indices = @transform_16, window_bounds = array<i64: 32, 32>}, {pipeline_mode = #tpu.pipeline_mode<synchronous>, transform_indices = @transform_17, window_bounds = array<i64: 1, 32>}, {pipeline_mode = #tpu.pipeline_mode<synchronous>, transform_indices = @transform_18, window_bounds = array<i64: 1, 32>}, {pipeline_mode = #tpu.pipeline_mode<synchronous>, transform_indices = @transform_19, window_bounds = array<i64: 1, 32>}, {pipeline_mode = #tpu.pipeline_mode<synchronous>, transform_indices = @transform_20, window_bounds = array<i64: 32, 64>}, {pipeline_mode = #tpu.pipeline_mode<synchronous>, transform_indices = @transform_21, window_bounds = array<i64: 1, 64>}, {pipeline_mode = #tpu.pipeline_mode<synchronous>, transform_indices = @transform_22, window_bounds = array<i64: 64, 32>}, {pipeline_mode = #tpu.pipeline_mode<synchronous>, transform_indices = @transform_23, window_bounds = array<i64: 1, 32>}, {pipeline_mode = #tpu.pipeline_mode<synchronous>, transform_indices = @transform_24, window_bounds = array<i64: 1, 32>}, {pipeline_mode = #tpu.pipeline_mode<synchronous>, transform_indices = @transform_25, window_bounds = array<i64: 1, 32>}, {pipeline_mode = #tpu.pipeline_mode<synchronous>, transform_indices = @transform_26, window_bounds = array<i64: 32, 32>}, {pipeline_mode = #tpu.pipeline_mode<synchronous>, transform_indices = @transform_27, window_bounds = array<i64: 1, 32>}, {pipeline_mode = #tpu.pipeline_mode<synchronous>, transform_indices = @transform_28, window_bounds = array<i64: 32, 32>}, {pipeline_mode = #tpu.pipeline_mode<synchronous>, transform_indices = @transform_29, window_bounds = array<i64: 1, 32>}, {pipeline_mode = #tpu.pipeline_mode<synchronous>, transform_indices = @transform_30, window_bounds = array<i64: 32, 32>}, {pipeline_mode = #tpu.pipeline_mode<synchronous>, transform_indices = @transform_31, window_bounds = array<i64: 1, 32>}, {pipeline_mode = #tpu.pipeline_mode<synchronous>, transform_indices = @transform_32, window_bounds = array<i64: 32, 32>}, {pipeline_mode = #tpu.pipeline_mode<synchronous>, transform_indices = @transform_33, window_bounds = array<i64: 1, 32>}, {pipeline_mode = #tpu.pipeline_mode<synchronous>, transform_indices = @transform_34, window_bounds = array<i64: 1, 32>}, {pipeline_mode = #tpu.pipeline_mode<synchronous>, transform_indices = @transform_35, window_bounds = array<i64: 1, 32>}, {pipeline_mode = #tpu.pipeline_mode<synchronous>, transform_indices = @transform_36, window_bounds = array<i64: 32, 64>}, {pipeline_mode = #tpu.pipeline_mode<synchronous>, transform_indices = @transform_37, window_bounds = array<i64: 1, 64>}, {pipeline_mode = #tpu.pipeline_mode<synchronous>, transform_indices = @transform_38, window_bounds = array<i64: 64, 32>}, {pipeline_mode = #tpu.pipeline_mode<synchronous>, transform_indices = @transform_39, window_bounds = array<i64: 1, 32>}, {pipeline_mode = #tpu.pipeline_mode<synchronous>, transform_indices = @transform_40, window_bounds = array<i64: 16, 32>}, {pipeline_mode = #tpu.pipeline_mode<synchronous>, transform_indices = @transform_41, window_bounds = array<i64: 1, 32>}, {pipeline_mode = #tpu.pipeline_mode<synchronous>, transform_indices = @transform_42, window_bounds = array<i64: 16, 32>}, {pipeline_mode = #tpu.pipeline_mode<synchronous>, transform_indices = @transform_43, window_bounds = array<i64: 1, 32>}, {pipeline_mode = #tpu.pipeline_mode<synchronous>, transform_indices = @transform_44, window_bounds = array<i64: 512, 32>}, {pipeline_mode = #tpu.pipeline_mode<synchronous>, transform_indices = @transform_45, window_bounds = array<i64: 1, 32>}, {pipeline_mode = #tpu.pipeline_mode<synchronous>, transform_indices = @transform_46, window_bounds = array<i64: 32, 32>}, {pipeline_mode = #tpu.pipeline_mode<synchronous>, transform_indices = @transform_47, window_bounds = array<i64: 1, 32>}, {pipeline_mode = #tpu.pipeline_mode<synchronous>, transform_indices = @transform_48, window_bounds = array<i64: 32, 32>}, {pipeline_mode = #tpu.pipeline_mode<synchronous>, transform_indices = @transform_49, window_bounds = array<i64: 1, 32>}, {pipeline_mode = #tpu.pipeline_mode<synchronous>, transform_indices = @transform_50, window_bounds = array<i64: 32, 16>}, {pipeline_mode = #tpu.pipeline_mode<synchronous>, transform_indices = @transform_51, window_bounds = array<i64: 1, 16>}, {pipeline_mode = #tpu.pipeline_mode<synchronous>, transform_indices = @transform_52, window_bounds = array<i64: 32, 16>}, {pipeline_mode = #tpu.pipeline_mode<synchronous>, transform_indices = @transform_53, window_bounds = array<i64: 1, 16>}, {pipeline_mode = #tpu.pipeline_mode<synchronous>, transform_indices = @transform_54, window_bounds = array<i64: 32, 32>}, {pipeline_mode = #tpu.pipeline_mode<synchronous>, transform_indices = @transform_55, window_bounds = array<i64: 1, 32>}, {pipeline_mode = #tpu.pipeline_mode<synchronous>, transform_indices = @transform_56, window_bounds = array<i64: 32, 32>}, {pipeline_mode = #tpu.pipeline_mode<synchronous>, transform_indices = @transform_57, window_bounds = array<i64: 1, 32>}, {pipeline_mode = #tpu.pipeline_mode<synchronous>, transform_indices = @transform_58, window_bounds = array<i64: 32, 16>}, {pipeline_mode = #tpu.pipeline_mode<synchronous>, transform_indices = @transform_59, window_bounds = array<i64: 1, 16>}, {pipeline_mode = #tpu.pipeline_mode<synchronous>, transform_indices = @transform_60, window_bounds = array<i64: 32, 32>}, {pipeline_mode = #tpu.pipeline_mode<synchronous>, transform_indices = @transform_61, window_bounds = array<i64: 1, 32>}, {pipeline_mode = #tpu.pipeline_mode<synchronous>, transform_indices = @transform_62, window_bounds = array<i64: 32, 32>}, {pipeline_mode = #tpu.pipeline_mode<synchronous>, transform_indices = @transform_63, window_bounds = array<i64: 1, 32>}, {pipeline_mode = #tpu.pipeline_mode<synchronous>, transform_indices = @transform_64, window_bounds = array<i64: 32, 16>}, {pipeline_mode = #tpu.pipeline_mode<synchronous>, transform_indices = @transform_65, window_bounds = array<i64: 1, 16>}, {pipeline_mode = #tpu.pipeline_mode<synchronous>, transform_indices = @transform_66, window_bounds = array<i64: 32, 16>}, {pipeline_mode = #tpu.pipeline_mode<synchronous>, transform_indices = @transform_67, window_bounds = array<i64: 1, 16>}, {pipeline_mode = #tpu.pipeline_mode<synchronous>, transform_indices = @transform_68, window_bounds = array<i64: 16, 16>}, {transform_indices = @transform_69, window_bounds = array<i64: 1, 8, 16>}, {transform_indices = @transform_70, window_bounds = array<i64: 1, 8, 16>}, {transform_indices = @transform_71, window_bounds = array<i64: 1, 2, 8, 16>}]} {
    %0 = tpu.iota {dimensions = array<i32: 1>} : vector<1x32xi32>
    %c0_i32 = arith.constant 0 : i32
    %1 = vector.broadcast %c0_i32 : i32 to vector<1x32xi32>
    %2 = arith.cmpi sge, %0, %1 : vector<1x32xi32>
    %c8_i32 = arith.constant 8 : i32
    %3 = vector.broadcast %c8_i32 : i32 to vector<1x32xi32>
    %4 = arith.cmpi slt, %0, %3 : vector<1x32xi32>
    %5 = arith.andi %2, %4 : vector<1x32xi1>
    %cst = arith.constant 1.000000e+00 : f32
    %cst_0 = arith.constant 0.000000e+00 : f32
    %6 = vector.broadcast %cst : f32 to vector<1x32xf32>
    %7 = vector.broadcast %cst_0 : f32 to vector<1x32xf32>
    %8 = arith.select %5, %6, %7 : vector<1x32xi1>, vector<1x32xf32>
    %c8_i32_1 = arith.constant 8 : i32
    %9 = vector.broadcast %c8_i32_1 : i32 to vector<1x32xi32>
    %10 = arith.cmpi sge, %0, %9 : vector<1x32xi32>
    %c16_i32 = arith.constant 16 : i32
    %11 = vector.broadcast %c16_i32 : i32 to vector<1x32xi32>
    %12 = arith.cmpi slt, %0, %11 : vector<1x32xi32>
    %13 = arith.andi %10, %12 : vector<1x32xi1>
    %cst_2 = arith.constant 1.000000e+00 : f32
    %cst_3 = arith.constant 0.000000e+00 : f32
    %14 = vector.broadcast %cst_2 : f32 to vector<1x32xf32>
    %15 = vector.broadcast %cst_3 : f32 to vector<1x32xf32>
    %16 = arith.select %13, %14, %15 : vector<1x32xi1>, vector<1x32xf32>
    %c16_i32_4 = arith.constant 16 : i32
    %17 = vector.broadcast %c16_i32_4 : i32 to vector<1x32xi32>
    %18 = arith.cmpi sge, %0, %17 : vector<1x32xi32>
    %c24_i32 = arith.constant 24 : i32
    %19 = vector.broadcast %c24_i32 : i32 to vector<1x32xi32>
    %20 = arith.cmpi slt, %0, %19 : vector<1x32xi32>
    %21 = arith.andi %18, %20 : vector<1x32xi1>
    %cst_5 = arith.constant 1.000000e+00 : f32
    %cst_6 = arith.constant 0.000000e+00 : f32
    %22 = vector.broadcast %cst_5 : f32 to vector<1x32xf32>
    %23 = vector.broadcast %cst_6 : f32 to vector<1x32xf32>
    %24 = arith.select %21, %22, %23 : vector<1x32xi1>, vector<1x32xf32>
    %c24_i32_7 = arith.constant 24 : i32
    %25 = vector.broadcast %c24_i32_7 : i32 to vector<1x32xi32>
    %26 = arith.cmpi sge, %0, %25 : vector<1x32xi32>
    %c32_i32 = arith.constant 32 : i32
    %27 = vector.broadcast %c32_i32 : i32 to vector<1x32xi32>
    %28 = arith.cmpi slt, %0, %27 : vector<1x32xi32>
    %29 = arith.andi %26, %28 : vector<1x32xi1>
    %cst_8 = arith.constant 1.000000e+00 : f32
    %cst_9 = arith.constant 0.000000e+00 : f32
    %30 = vector.broadcast %cst_8 : f32 to vector<1x32xf32>
    %31 = vector.broadcast %cst_9 : f32 to vector<1x32xf32>
    %32 = arith.select %29, %30, %31 : vector<1x32xi1>, vector<1x32xf32>
    %c0 = arith.constant 0 : index
    %c0_10 = arith.constant 0 : index
    %c0_11 = arith.constant 0 : index
    %33 = vector.load %arg1[%c0, %c0_10, %c0_11] : memref<1x16x192xf32, #tpu.memory_space<vmem>>, vector<1x16x192xf32>
    %34 = vector.shape_cast %33 : vector<1x16x192xf32> to vector<16x192xf32>
    %c0_12 = arith.constant 0 : index
    %c0_13 = arith.constant 0 : index
    %35 = vector.load %arg5[%c0_12, %c0_13] : memref<192x32xf32, #tpu.memory_space<vmem>>, vector<192x32xf32>
    %cst_14 = arith.constant dense<0.000000e+00> : vector<16x32xf32>
    %36 = tpu.matmul %34, %35, %cst_14 {dimension_numbers = #tpu.dot_dimension_numbers<[1], [0], [0], [1], [0, 0, 1, 1], [], []>} : vector<16x192xf32>, vector<192x32xf32>, vector<16x32xf32> -> vector<16x32xf32>
    %c0_15 = arith.constant 0 : index
    %c0_16 = arith.constant 0 : index
    %37 = vector.load %arg6[%c0_15, %c0_16] : memref<1x32xf32, #tpu.memory_space<vmem>>, vector<1x32xf32>
    %38 = vector.broadcast %37 : vector<1x32xf32> to vector<16x32xf32>
    %39 = arith.addf %36, %38 : vector<16x32xf32>
    %c0_17 = arith.constant 0 : index
    %c0_18 = arith.constant 0 : index
    %40 = vector.load %arg7[%c0_17, %c0_18] : memref<8x32xf32, #tpu.memory_space<vmem>>, vector<8x32xf32>
    %c0_19 = arith.constant 0 : index
    %c0_20 = arith.constant 0 : index
    %41 = vector.load %arg8[%c0_19, %c0_20] : memref<24x32xf32, #tpu.memory_space<vmem>>, vector<8x32xf32>
    %42 = arith.addf %40, %41 : vector<8x32xf32>
    %c0_21 = arith.constant 0 : index
    %c0_22 = arith.constant 0 : index
    %43 = vector.load %arg73[%c0_21, %c0_22] : memref<24x32xf32, #tpu.memory_space<vmem>>, vector<8x32xf32>
    tpu.vector_store %arg73[%c0_21, %c0_22], %42 {strides = array<i32>} : memref<24x32xf32, #tpu.memory_space<vmem>>, vector<8x32xf32>,
    %c8 = arith.constant 8 : index
    %c0_23 = arith.constant 0 : index
    %44 = vector.load %arg8[%c8, %c0_23] : memref<24x32xf32, #tpu.memory_space<vmem>>, vector<16x32xf32>
    %45 = arith.addf %39, %44 : vector<16x32xf32>
    %c8_24 = arith.constant 8 : index
    %c0_25 = arith.constant 0 : index
    %46 = vector.load %arg73[%c8_24, %c0_25] : memref<24x32xf32, #tpu.memory_space<vmem>>, vector<16x32xf32>
    tpu.vector_store %arg73[%c8_24, %c0_25], %45 {strides = array<i32>} : memref<24x32xf32, #tpu.memory_space<vmem>>, vector<16x32xf32>,
    %c0_26 = arith.constant 0 : index
    %c0_27 = arith.constant 0 : index
    %c0_28 = arith.constant 0 : index
    %47 = vector.load %arg2[%c0_26, %c0_27, %c0_28] : memref<1x16x16xf32, #tpu.memory_space<vmem>>, vector<1x16x16xf32>
    %48 = vector.shape_cast %47 : vector<1x16x16xf32> to vector<16x16xf32>
    %c0_29 = arith.constant 0 : index
    %c0_30 = arith.constant 0 : index
    %c0_31 = arith.constant 0 : index
    %49 = vector.load %arg3[%c0_29, %c0_30, %c0_31] : memref<1x16x16xf32, #tpu.memory_space<vmem>>, vector<1x16x16xf32>
    %50 = vector.shape_cast %49 : vector<1x16x16xf32> to vector<16x16xf32>
    %c0_32 = arith.constant 0 : index
    %c0_33 = arith.constant 0 : index
    %c0_34 = arith.constant 0 : index
    %51 = vector.load %arg4[%c0_32, %c0_33, %c0_34] : memref<1x1x512xf32, #tpu.memory_space<vmem>>, vector<1x1x512xf32>
    %52 = vector.shape_cast %51 : vector<1x1x512xf32> to vector<1x512xf32>
    %c0_35 = arith.constant 0 : index
    %c0_36 = arith.constant 0 : index
    %53 = vector.load %arg45[%c0_35, %c0_36] : memref<512x32xf32, #tpu.memory_space<vmem>>, vector<512x32xf32>
    %cst_37 = arith.constant dense<0.000000e+00> : vector<1x32xf32>
    %54 = tpu.matmul %52, %53, %cst_37 {dimension_numbers = #tpu.dot_dimension_numbers<[1], [0], [0], [1], [0, 0, 1, 1], [], []>} : vector<1x512xf32>, vector<512x32xf32>, vector<1x32xf32> -> vector<1x32xf32>
    %c0_38 = arith.constant 0 : index
    %c0_39 = arith.constant 0 : index
    %55 = vector.load %arg46[%c0_38, %c0_39] : memref<1x32xf32, #tpu.memory_space<vmem>>, vector<1x32xf32>
    %56 = arith.addf %54, %55 : vector<1x32xf32>
    %c0_40 = arith.constant 0 : index
    %c0_41 = arith.constant 0 : index
    %57 = vector.load %arg41[%c0_40, %c0_41] : memref<16x32xf32, #tpu.memory_space<vmem>>, vector<16x32xf32>
    %cst_42 = arith.constant dense<0.000000e+00> : vector<16x32xf32>
    %58 = tpu.matmul %48, %57, %cst_42 {dimension_numbers = #tpu.dot_dimension_numbers<[1], [0], [0], [1], [0, 0, 1, 1], [], []>} : vector<16x16xf32>, vector<16x32xf32>, vector<16x32xf32> -> vector<16x32xf32>
    %c0_43 = arith.constant 0 : index
    %c0_44 = arith.constant 0 : index
    %59 = vector.load %arg42[%c0_43, %c0_44] : memref<1x32xf32, #tpu.memory_space<vmem>>, vector<1x32xf32>
    %60 = vector.broadcast %59 : vector<1x32xf32> to vector<16x32xf32>
    %61 = arith.addf %58, %60 : vector<16x32xf32>
    %c8_45 = arith.constant 8 : index
    %c0_46 = arith.constant 0 : index
    %62 = vector.load %arg73[%c8_45, %c0_46] : memref<24x32xf32, #tpu.memory_space<vmem>>, vector<16x32xf32>
    %63 = arith.addf %62, %61 : vector<16x32xf32>
    %c8_47 = arith.constant 8 : index
    %c0_48 = arith.constant 0 : index
    %64 = vector.load %arg73[%c8_47, %c0_48] : memref<24x32xf32, #tpu.memory_space<vmem>>, vector<16x32xf32>
    tpu.vector_store %arg73[%c8_47, %c0_48], %63 {strides = array<i32>} : memref<24x32xf32, #tpu.memory_space<vmem>>, vector<16x32xf32>,
    %c0_49 = arith.constant 0 : index
    %c0_50 = arith.constant 0 : index
    %65 = vector.load %arg73[%c0_49, %c0_50] : memref<24x32xf32, #tpu.memory_space<vmem>>, vector<24x32xf32>
    %66 = vector.broadcast %56 : vector<1x32xf32> to vector<24x32xf32>
    %67 = arith.addf %65, %66 : vector<24x32xf32>
    %c0_51 = arith.constant 0 : index
    %c0_52 = arith.constant 0 : index
    %68 = vector.load %arg73[%c0_51, %c0_52] : memref<24x32xf32, #tpu.memory_space<vmem>>, vector<24x32xf32>
    tpu.vector_store %arg73[%c0_51, %c0_52], %67 {strides = array<i32>} : memref<24x32xf32, #tpu.memory_space<vmem>>, vector<24x32xf32>,
    %c0_53 = arith.constant 0 : index
    %c0_54 = arith.constant 0 : index
    %69 = vector.load %arg73[%c0_53, %c0_54] : memref<24x32xf32, #tpu.memory_space<vmem>>, vector<24x32xf32>
    %cst_55 = arith.constant dense<0.000000e+00> : vector<24xf32>
    %70 = vector.multi_reduction <add>, %69, %cst_55 [1] : vector<24x32xf32> to vector<24xf32>
    %71 = vector.shape_cast %70 : vector<24xf32> to vector<24x1xf32>
    %cst_56 = arith.constant 3.200000e+01 : f32
    %72 = vector.broadcast %cst_56 : f32 to vector<24x1xf32>
    %73 = arith.divf %71, %72 : vector<24x1xf32>
    %74 = vector.broadcast %73 : vector<24x1xf32> to vector<24x32xf32>
    %75 = arith.subf %69, %74 : vector<24x32xf32>
    %76 = arith.mulf %75, %75 : vector<24x32xf32>
    %cst_57 = arith.constant dense<0.000000e+00> : vector<24xf32>
    %77 = vector.multi_reduction <add>, %76, %cst_57 [1] : vector<24x32xf32> to vector<24xf32>
    %78 = vector.shape_cast %77 : vector<24xf32> to vector<24x1xf32>
    %cst_58 = arith.constant 3.200000e+01 : f32
    %79 = vector.broadcast %cst_58 : f32 to vector<24x1xf32>
    %80 = arith.divf %78, %79 : vector<24x1xf32>
    %cst_59 = arith.constant 9.99999997E-7 : f32
    %81 = vector.broadcast %cst_59 : f32 to vector<24x1xf32>
    %82 = arith.addf %80, %81 : vector<24x1xf32>
    %83 = math.rsqrt %82 : vector<24x1xf32>
    %84 = vector.broadcast %83 : vector<24x1xf32> to vector<24x32xf32>
    %85 = arith.mulf %75, %84 : vector<24x32xf32>
    %c0_60 = arith.constant 0 : index
    %c0_61 = arith.constant 0 : index
    %86 = vector.load %arg9[%c0_60, %c0_61] : memref<1x32xf32, #tpu.memory_space<vmem>>, vector<1x32xf32>
    %87 = vector.broadcast %86 : vector<1x32xf32> to vector<24x32xf32>
    %88 = arith.mulf %85, %87 : vector<24x32xf32>
    %c0_62 = arith.constant 0 : index
    %c0_63 = arith.constant 0 : index
    %89 = vector.load %arg10[%c0_62, %c0_63] : memref<1x32xf32, #tpu.memory_space<vmem>>, vector<1x32xf32>
    %90 = vector.broadcast %89 : vector<1x32xf32> to vector<24x32xf32>
    %91 = arith.addf %88, %90 : vector<24x32xf32>
    %c0_64 = arith.constant 0 : index
    %c0_65 = arith.constant 0 : index
    %92 = vector.load %arg11[%c0_64, %c0_65] : memref<32x32xf32, #tpu.memory_space<vmem>>, vector<32x32xf32>
    %cst_66 = arith.constant dense<0.000000e+00> : vector<24x32xf32>
    %93 = tpu.matmul %91, %92, %cst_66 {dimension_numbers = #tpu.dot_dimension_numbers<[1], [0], [0], [1], [0, 0, 1, 1], [], []>} : vector<24x32xf32>, vector<32x32xf32>, vector<24x32xf32> -> vector<24x32xf32>
    %c0_67 = arith.constant 0 : index
    %c0_68 = arith.constant 0 : index
    %94 = vector.load %arg12[%c0_67, %c0_68] : memref<1x32xf32, #tpu.memory_space<vmem>>, vector<1x32xf32>
    %95 = vector.broadcast %94 : vector<1x32xf32> to vector<24x32xf32>
    %96 = arith.addf %93, %95 : vector<24x32xf32>
    %c0_69 = arith.constant 0 : index
    %c0_70 = arith.constant 0 : index
    %97 = vector.load %arg13[%c0_69, %c0_70] : memref<32x32xf32, #tpu.memory_space<vmem>>, vector<32x32xf32>
    %cst_71 = arith.constant dense<0.000000e+00> : vector<24x32xf32>
    %98 = tpu.matmul %91, %97, %cst_71 {dimension_numbers = #tpu.dot_dimension_numbers<[1], [0], [0], [1], [0, 0, 1, 1], [], []>} : vector<24x32xf32>, vector<32x32xf32>, vector<24x32xf32> -> vector<24x32xf32>
    %c0_72 = arith.constant 0 : index
    %c0_73 = arith.constant 0 : index
    %99 = vector.load %arg14[%c0_72, %c0_73] : memref<1x32xf32, #tpu.memory_space<vmem>>, vector<1x32xf32>
    %100 = vector.broadcast %99 : vector<1x32xf32> to vector<24x32xf32>
    %101 = arith.addf %98, %100 : vector<24x32xf32>
    %c0_74 = arith.constant 0 : index
    %c0_75 = arith.constant 0 : index
    %102 = vector.load %arg15[%c0_74, %c0_75] : memref<32x32xf32, #tpu.memory_space<vmem>>, vector<32x32xf32>
    %cst_76 = arith.constant dense<0.000000e+00> : vector<24x32xf32>
    %103 = tpu.matmul %91, %102, %cst_76 {dimension_numbers = #tpu.dot_dimension_numbers<[1], [0], [0], [1], [0, 0, 1, 1], [], []>} : vector<24x32xf32>, vector<32x32xf32>, vector<24x32xf32> -> vector<24x32xf32>
    %c0_77 = arith.constant 0 : index
    %c0_78 = arith.constant 0 : index
    %104 = vector.load %arg16[%c0_77, %c0_78] : memref<1x32xf32, #tpu.memory_space<vmem>>, vector<1x32xf32>
    %105 = vector.broadcast %104 : vector<1x32xf32> to vector<24x32xf32>
    %106 = arith.addf %103, %105 : vector<24x32xf32>
    %cst_79 = arith.constant 0.000000e+00 : f32
    %107 = vector.broadcast %cst_79 : f32 to vector<24x32xf32>
    %108 = vector.broadcast %8 : vector<1x32xf32> to vector<24x32xf32>
    %109 = arith.mulf %96, %108 : vector<24x32xf32>
    %cst_80 = arith.constant dense<0.000000e+00> : vector<24x24xf32>
    %110 = tpu.matmul %109, %101, %cst_80 {dimension_numbers = #tpu.dot_dimension_numbers<[1], [1], [0], [0], [0, 0, 1, 0], [], []>} : vector<24x32xf32>, vector<24x32xf32>, vector<24x24xf32> -> vector<24x24xf32>
    %cst_81 = arith.constant 0.353553385 : f32
    %111 = vector.broadcast %cst_81 : f32 to vector<24x24xf32>
    %112 = arith.mulf %110, %111 : vector<24x24xf32>
    %cst_82 = arith.constant dense<0xFF800000> : vector<24xf32>
    %113 = vector.multi_reduction <maximumf>, %112, %cst_82 [1] : vector<24x24xf32> to vector<24xf32>
    %114 = vector.shape_cast %113 : vector<24xf32> to vector<24x1xf32>
    %115 = vector.broadcast %114 : vector<24x1xf32> to vector<24x24xf32>
    %116 = arith.subf %112, %115 : vector<24x24xf32>
    %117 = math.exp %116 : vector<24x24xf32>
    %cst_83 = arith.constant dense<0.000000e+00> : vector<24xf32>
    %118 = vector.multi_reduction <add>, %117, %cst_83 [1] : vector<24x24xf32> to vector<24xf32>
    %119 = vector.shape_cast %118 : vector<24xf32> to vector<24x1xf32>
    %120 = tpu.reciprocal %119 {approx = true} : vector<24x1xf32> -> vector<24x1xf32>
    %121 = vector.broadcast %120 : vector<24x1xf32> to vector<24x24xf32>
    %122 = arith.mulf %117, %121 : vector<24x24xf32>
    %123 = vector.broadcast %8 : vector<1x32xf32> to vector<24x32xf32>
    %124 = arith.mulf %106, %123 : vector<24x32xf32>
    %cst_84 = arith.constant dense<0.000000e+00> : vector<24x32xf32>
    %125 = tpu.matmul %122, %124, %cst_84 {dimension_numbers = #tpu.dot_dimension_numbers<[1], [0], [0], [1], [0, 0, 1, 1], [], []>} : vector<24x24xf32>, vector<24x32xf32>, vector<24x32xf32> -> vector<24x32xf32>
    %126 = arith.addf %107, %125 : vector<24x32xf32>
    %127 = vector.broadcast %16 : vector<1x32xf32> to vector<24x32xf32>
    %128 = arith.mulf %96, %127 : vector<24x32xf32>
    %cst_85 = arith.constant dense<0.000000e+00> : vector<24x24xf32>
    %129 = tpu.matmul %128, %101, %cst_85 {dimension_numbers = #tpu.dot_dimension_numbers<[1], [1], [0], [0], [0, 0, 1, 0], [], []>} : vector<24x32xf32>, vector<24x32xf32>, vector<24x24xf32> -> vector<24x24xf32>
    %cst_86 = arith.constant 0.353553385 : f32
    %130 = vector.broadcast %cst_86 : f32 to vector<24x24xf32>
    %131 = arith.mulf %129, %130 : vector<24x24xf32>
    %cst_87 = arith.constant dense<0xFF800000> : vector<24xf32>
    %132 = vector.multi_reduction <maximumf>, %131, %cst_87 [1] : vector<24x24xf32> to vector<24xf32>
    %133 = vector.shape_cast %132 : vector<24xf32> to vector<24x1xf32>
    %134 = vector.broadcast %133 : vector<24x1xf32> to vector<24x24xf32>
    %135 = arith.subf %131, %134 : vector<24x24xf32>
    %136 = math.exp %135 : vector<24x24xf32>
    %cst_88 = arith.constant dense<0.000000e+00> : vector<24xf32>
    %137 = vector.multi_reduction <add>, %136, %cst_88 [1] : vector<24x24xf32> to vector<24xf32>
    %138 = vector.shape_cast %137 : vector<24xf32> to vector<24x1xf32>
    %139 = tpu.reciprocal %138 {approx = true} : vector<24x1xf32> -> vector<24x1xf32>
    %140 = vector.broadcast %139 : vector<24x1xf32> to vector<24x24xf32>
    %141 = arith.mulf %136, %140 : vector<24x24xf32>
    %142 = vector.broadcast %16 : vector<1x32xf32> to vector<24x32xf32>
    %143 = arith.mulf %106, %142 : vector<24x32xf32>
    %cst_89 = arith.constant dense<0.000000e+00> : vector<24x32xf32>
    %144 = tpu.matmul %141, %143, %cst_89 {dimension_numbers = #tpu.dot_dimension_numbers<[1], [0], [0], [1], [0, 0, 1, 1], [], []>} : vector<24x24xf32>, vector<24x32xf32>, vector<24x32xf32> -> vector<24x32xf32>
    %145 = arith.addf %126, %144 : vector<24x32xf32>
    %146 = vector.broadcast %24 : vector<1x32xf32> to vector<24x32xf32>
    %147 = arith.mulf %96, %146 : vector<24x32xf32>
    %cst_90 = arith.constant dense<0.000000e+00> : vector<24x24xf32>
    %148 = tpu.matmul %147, %101, %cst_90 {dimension_numbers = #tpu.dot_dimension_numbers<[1], [1], [0], [0], [0, 0, 1, 0], [], []>} : vector<24x32xf32>, vector<24x32xf32>, vector<24x24xf32> -> vector<24x24xf32>
    %cst_91 = arith.constant 0.353553385 : f32
    %149 = vector.broadcast %cst_91 : f32 to vector<24x24xf32>
    %150 = arith.mulf %148, %149 : vector<24x24xf32>
    %cst_92 = arith.constant dense<0xFF800000> : vector<24xf32>
    %151 = vector.multi_reduction <maximumf>, %150, %cst_92 [1] : vector<24x24xf32> to vector<24xf32>
    %152 = vector.shape_cast %151 : vector<24xf32> to vector<24x1xf32>
    %153 = vector.broadcast %152 : vector<24x1xf32> to vector<24x24xf32>
    %154 = arith.subf %150, %153 : vector<24x24xf32>
    %155 = math.exp %154 : vector<24x24xf32>
    %cst_93 = arith.constant dense<0.000000e+00> : vector<24xf32>
    %156 = vector.multi_reduction <add>, %155, %cst_93 [1] : vector<24x24xf32> to vector<24xf32>
    %157 = vector.shape_cast %156 : vector<24xf32> to vector<24x1xf32>
    %158 = tpu.reciprocal %157 {approx = true} : vector<24x1xf32> -> vector<24x1xf32>
    %159 = vector.broadcast %158 : vector<24x1xf32> to vector<24x24xf32>
    %160 = arith.mulf %155, %159 : vector<24x24xf32>
    %161 = vector.broadcast %24 : vector<1x32xf32> to vector<24x32xf32>
    %162 = arith.mulf %106, %161 : vector<24x32xf32>
    %cst_94 = arith.constant dense<0.000000e+00> : vector<24x32xf32>
    %163 = tpu.matmul %160, %162, %cst_94 {dimension_numbers = #tpu.dot_dimension_numbers<[1], [0], [0], [1], [0, 0, 1, 1], [], []>} : vector<24x24xf32>, vector<24x32xf32>, vector<24x32xf32> -> vector<24x32xf32>
    %164 = arith.addf %145, %163 : vector<24x32xf32>
    %165 = vector.broadcast %32 : vector<1x32xf32> to vector<24x32xf32>
    %166 = arith.mulf %96, %165 : vector<24x32xf32>
    %cst_95 = arith.constant dense<0.000000e+00> : vector<24x24xf32>
    %167 = tpu.matmul %166, %101, %cst_95 {dimension_numbers = #tpu.dot_dimension_numbers<[1], [1], [0], [0], [0, 0, 1, 0], [], []>} : vector<24x32xf32>, vector<24x32xf32>, vector<24x24xf32> -> vector<24x24xf32>
    %cst_96 = arith.constant 0.353553385 : f32
    %168 = vector.broadcast %cst_96 : f32 to vector<24x24xf32>
    %169 = arith.mulf %167, %168 : vector<24x24xf32>
    %cst_97 = arith.constant dense<0xFF800000> : vector<24xf32>
    %170 = vector.multi_reduction <maximumf>, %169, %cst_97 [1] : vector<24x24xf32> to vector<24xf32>
    %171 = vector.shape_cast %170 : vector<24xf32> to vector<24x1xf32>
    %172 = vector.broadcast %171 : vector<24x1xf32> to vector<24x24xf32>
    %173 = arith.subf %169, %172 : vector<24x24xf32>
    %174 = math.exp %173 : vector<24x24xf32>
    %cst_98 = arith.constant dense<0.000000e+00> : vector<24xf32>
    %175 = vector.multi_reduction <add>, %174, %cst_98 [1] : vector<24x24xf32> to vector<24xf32>
    %176 = vector.shape_cast %175 : vector<24xf32> to vector<24x1xf32>
    %177 = tpu.reciprocal %176 {approx = true} : vector<24x1xf32> -> vector<24x1xf32>
    %178 = vector.broadcast %177 : vector<24x1xf32> to vector<24x24xf32>
    %179 = arith.mulf %174, %178 : vector<24x24xf32>
    %180 = vector.broadcast %32 : vector<1x32xf32> to vector<24x32xf32>
    %181 = arith.mulf %106, %180 : vector<24x32xf32>
    %cst_99 = arith.constant dense<0.000000e+00> : vector<24x32xf32>
    %182 = tpu.matmul %179, %181, %cst_99 {dimension_numbers = #tpu.dot_dimension_numbers<[1], [0], [0], [1], [0, 0, 1, 1], [], []>} : vector<24x24xf32>, vector<24x32xf32>, vector<24x32xf32> -> vector<24x32xf32>
    %183 = arith.addf %164, %182 : vector<24x32xf32>
    %c0_100 = arith.constant 0 : index
    %c0_101 = arith.constant 0 : index
    %184 = vector.load %arg17[%c0_100, %c0_101] : memref<32x32xf32, #tpu.memory_space<vmem>>, vector<32x32xf32>
    %cst_102 = arith.constant dense<0.000000e+00> : vector<24x32xf32>
    %185 = tpu.matmul %183, %184, %cst_102 {dimension_numbers = #tpu.dot_dimension_numbers<[1], [0], [0], [1], [0, 0, 1, 1], [], []>} : vector<24x32xf32>, vector<32x32xf32>, vector<24x32xf32> -> vector<24x32xf32>
    %c0_103 = arith.constant 0 : index
    %c0_104 = arith.constant 0 : index
    %186 = vector.load %arg18[%c0_103, %c0_104] : memref<1x32xf32, #tpu.memory_space<vmem>>, vector<1x32xf32>
    %187 = vector.broadcast %186 : vector<1x32xf32> to vector<24x32xf32>
    %188 = arith.addf %185, %187 : vector<24x32xf32>
    %189 = arith.addf %69, %188 : vector<24x32xf32>
    %cst_105 = arith.constant dense<0.000000e+00> : vector<24xf32>
    %190 = vector.multi_reduction <add>, %189, %cst_105 [1] : vector<24x32xf32> to vector<24xf32>
    %191 = vector.shape_cast %190 : vector<24xf32> to vector<24x1xf32>
    %cst_106 = arith.constant 3.200000e+01 : f32
    %192 = vector.broadcast %cst_106 : f32 to vector<24x1xf32>
    %193 = arith.divf %191, %192 : vector<24x1xf32>
    %194 = vector.broadcast %193 : vector<24x1xf32> to vector<24x32xf32>
    %195 = arith.subf %189, %194 : vector<24x32xf32>
    %196 = arith.mulf %195, %195 : vector<24x32xf32>
    %cst_107 = arith.constant dense<0.000000e+00> : vector<24xf32>
    %197 = vector.multi_reduction <add>, %196, %cst_107 [1] : vector<24x32xf32> to vector<24xf32>
    %198 = vector.shape_cast %197 : vector<24xf32> to vector<24x1xf32>
    %cst_108 = arith.constant 3.200000e+01 : f32
    %199 = vector.broadcast %cst_108 : f32 to vector<24x1xf32>
    %200 = arith.divf %198, %199 : vector<24x1xf32>
    %cst_109 = arith.constant 9.99999997E-7 : f32
    %201 = vector.broadcast %cst_109 : f32 to vector<24x1xf32>
    %202 = arith.addf %200, %201 : vector<24x1xf32>
    %203 = math.rsqrt %202 : vector<24x1xf32>
    %204 = vector.broadcast %203 : vector<24x1xf32> to vector<24x32xf32>
    %205 = arith.mulf %195, %204 : vector<24x32xf32>
    %c0_110 = arith.constant 0 : index
    %c0_111 = arith.constant 0 : index
    %206 = vector.load %arg19[%c0_110, %c0_111] : memref<1x32xf32, #tpu.memory_space<vmem>>, vector<1x32xf32>
    %207 = vector.broadcast %206 : vector<1x32xf32> to vector<24x32xf32>
    %208 = arith.mulf %205, %207 : vector<24x32xf32>
    %c0_112 = arith.constant 0 : index
    %c0_113 = arith.constant 0 : index
    %209 = vector.load %arg20[%c0_112, %c0_113] : memref<1x32xf32, #tpu.memory_space<vmem>>, vector<1x32xf32>
    %210 = vector.broadcast %209 : vector<1x32xf32> to vector<24x32xf32>
    %211 = arith.addf %208, %210 : vector<24x32xf32>
    %c0_114 = arith.constant 0 : index
    %c0_115 = arith.constant 0 : index
    %212 = vector.load %arg21[%c0_114, %c0_115] : memref<32x64xf32, #tpu.memory_space<vmem>>, vector<32x64xf32>
    %cst_116 = arith.constant dense<0.000000e+00> : vector<24x64xf32>
    %213 = tpu.matmul %211, %212, %cst_116 {dimension_numbers = #tpu.dot_dimension_numbers<[1], [0], [0], [1], [0, 0, 1, 1], [], []>} : vector<24x32xf32>, vector<32x64xf32>, vector<24x64xf32> -> vector<24x64xf32>
    %c0_117 = arith.constant 0 : index
    %c0_118 = arith.constant 0 : index
    %214 = vector.load %arg22[%c0_117, %c0_118] : memref<1x64xf32, #tpu.memory_space<vmem>>, vector<1x64xf32>
    %215 = vector.broadcast %214 : vector<1x64xf32> to vector<24x64xf32>
    %216 = arith.addf %213, %215 : vector<24x64xf32>
    %cst_119 = arith.constant 5.000000e-01 : f32
    %217 = vector.broadcast %cst_119 : f32 to vector<24x64xf32>
    %218 = arith.mulf %217, %216 : vector<24x64xf32>
    %cst_120 = arith.constant 0.707106769 : f32
    %219 = vector.broadcast %cst_120 : f32 to vector<24x64xf32>
    %220 = arith.mulf %216, %219 : vector<24x64xf32>
    %221 = math.erf %220 : vector<24x64xf32>
    %cst_121 = arith.constant 1.000000e+00 : f32
    %222 = vector.broadcast %cst_121 : f32 to vector<24x64xf32>
    %223 = arith.addf %222, %221 : vector<24x64xf32>
    %224 = arith.mulf %218, %223 : vector<24x64xf32>
    %c0_122 = arith.constant 0 : index
    %c0_123 = arith.constant 0 : index
    %225 = vector.load %arg23[%c0_122, %c0_123] : memref<64x32xf32, #tpu.memory_space<vmem>>, vector<64x32xf32>
    %cst_124 = arith.constant dense<0.000000e+00> : vector<24x32xf32>
    %226 = tpu.matmul %224, %225, %cst_124 {dimension_numbers = #tpu.dot_dimension_numbers<[1], [0], [0], [1], [0, 0, 1, 1], [], []>} : vector<24x64xf32>, vector<64x32xf32>, vector<24x32xf32> -> vector<24x32xf32>
    %c0_125 = arith.constant 0 : index
    %c0_126 = arith.constant 0 : index
    %227 = vector.load %arg24[%c0_125, %c0_126] : memref<1x32xf32, #tpu.memory_space<vmem>>, vector<1x32xf32>
    %228 = vector.broadcast %227 : vector<1x32xf32> to vector<24x32xf32>
    %229 = arith.addf %226, %228 : vector<24x32xf32>
    %230 = arith.addf %189, %229 : vector<24x32xf32>
    %c0_127 = arith.constant 0 : index
    %c0_128 = arith.constant 0 : index
    %231 = vector.load %arg73[%c0_127, %c0_128] : memref<24x32xf32, #tpu.memory_space<vmem>>, vector<24x32xf32>
    tpu.vector_store %arg73[%c0_127, %c0_128], %230 {strides = array<i32>} : memref<24x32xf32, #tpu.memory_space<vmem>>, vector<24x32xf32>,
    %c0_129 = arith.constant 0 : index
    %c0_130 = arith.constant 0 : index
    %232 = vector.load %arg73[%c0_129, %c0_130] : memref<24x32xf32, #tpu.memory_space<vmem>>, vector<24x32xf32>
    %233 = vector.broadcast %56 : vector<1x32xf32> to vector<24x32xf32>
    %234 = arith.addf %232, %233 : vector<24x32xf32>
    %235 = arith.mulf %234, %234 : vector<24x32xf32>
    %cst_131 = arith.constant dense<0.000000e+00> : vector<24xf32>
    %236 = vector.multi_reduction <add>, %235, %cst_131 [1] : vector<24x32xf32> to vector<24xf32>
    %237 = vector.shape_cast %236 : vector<24xf32> to vector<24x1xf32>
    %238 = math.sqrt %237 : vector<24x1xf32>
    %cst_132 = arith.constant 9.99999996E-13 : f32
    %239 = vector.broadcast %cst_132 : f32 to vector<24x1xf32>
    %240 = arith.maximumf %238, %239 : vector<24x1xf32>
    %241 = vector.broadcast %240 : vector<24x1xf32> to vector<24x32xf32>
    %242 = arith.divf %234, %241 : vector<24x32xf32>
    %c0_133 = arith.constant 0 : index
    %c0_134 = arith.constant 0 : index
    %243 = vector.load %arg8[%c0_133, %c0_134] : memref<24x32xf32, #tpu.memory_space<vmem>>, vector<24x32xf32>
    %244 = arith.addf %242, %243 : vector<24x32xf32>
    %c0_135 = arith.constant 0 : index
    %c0_136 = arith.constant 0 : index
    %245 = vector.load %arg73[%c0_135, %c0_136] : memref<24x32xf32, #tpu.memory_space<vmem>>, vector<24x32xf32>
    tpu.vector_store %arg73[%c0_135, %c0_136], %244 {strides = array<i32>} : memref<24x32xf32, #tpu.memory_space<vmem>>, vector<24x32xf32>,
    %c0_137 = arith.constant 0 : index
    %c0_138 = arith.constant 0 : index
    %246 = vector.load %arg73[%c0_137, %c0_138] : memref<24x32xf32, #tpu.memory_space<vmem>>, vector<24x32xf32>
    %cst_139 = arith.constant dense<0.000000e+00> : vector<24xf32>
    %247 = vector.multi_reduction <add>, %246, %cst_139 [1] : vector<24x32xf32> to vector<24xf32>
    %248 = vector.shape_cast %247 : vector<24xf32> to vector<24x1xf32>
    %cst_140 = arith.constant 3.200000e+01 : f32
    %249 = vector.broadcast %cst_140 : f32 to vector<24x1xf32>
    %250 = arith.divf %248, %249 : vector<24x1xf32>
    %251 = vector.broadcast %250 : vector<24x1xf32> to vector<24x32xf32>
    %252 = arith.subf %246, %251 : vector<24x32xf32>
    %253 = arith.mulf %252, %252 : vector<24x32xf32>
    %cst_141 = arith.constant dense<0.000000e+00> : vector<24xf32>
    %254 = vector.multi_reduction <add>, %253, %cst_141 [1] : vector<24x32xf32> to vector<24xf32>
    %255 = vector.shape_cast %254 : vector<24xf32> to vector<24x1xf32>
    %cst_142 = arith.constant 3.200000e+01 : f32
    %256 = vector.broadcast %cst_142 : f32 to vector<24x1xf32>
    %257 = arith.divf %255, %256 : vector<24x1xf32>
    %cst_143 = arith.constant 9.99999997E-7 : f32
    %258 = vector.broadcast %cst_143 : f32 to vector<24x1xf32>
    %259 = arith.addf %257, %258 : vector<24x1xf32>
    %260 = math.rsqrt %259 : vector<24x1xf32>
    %261 = vector.broadcast %260 : vector<24x1xf32> to vector<24x32xf32>
    %262 = arith.mulf %252, %261 : vector<24x32xf32>
    %c0_144 = arith.constant 0 : index
    %c0_145 = arith.constant 0 : index
    %263 = vector.load %arg25[%c0_144, %c0_145] : memref<1x32xf32, #tpu.memory_space<vmem>>, vector<1x32xf32>
    %264 = vector.broadcast %263 : vector<1x32xf32> to vector<24x32xf32>
    %265 = arith.mulf %262, %264 : vector<24x32xf32>
    %c0_146 = arith.constant 0 : index
    %c0_147 = arith.constant 0 : index
    %266 = vector.load %arg26[%c0_146, %c0_147] : memref<1x32xf32, #tpu.memory_space<vmem>>, vector<1x32xf32>
    %267 = vector.broadcast %266 : vector<1x32xf32> to vector<24x32xf32>
    %268 = arith.addf %265, %267 : vector<24x32xf32>
    %c0_148 = arith.constant 0 : index
    %c0_149 = arith.constant 0 : index
    %269 = vector.load %arg27[%c0_148, %c0_149] : memref<32x32xf32, #tpu.memory_space<vmem>>, vector<32x32xf32>
    %cst_150 = arith.constant dense<0.000000e+00> : vector<24x32xf32>
    %270 = tpu.matmul %268, %269, %cst_150 {dimension_numbers = #tpu.dot_dimension_numbers<[1], [0], [0], [1], [0, 0, 1, 1], [], []>} : vector<24x32xf32>, vector<32x32xf32>, vector<24x32xf32> -> vector<24x32xf32>
    %c0_151 = arith.constant 0 : index
    %c0_152 = arith.constant 0 : index
    %271 = vector.load %arg28[%c0_151, %c0_152] : memref<1x32xf32, #tpu.memory_space<vmem>>, vector<1x32xf32>
    %272 = vector.broadcast %271 : vector<1x32xf32> to vector<24x32xf32>
    %273 = arith.addf %270, %272 : vector<24x32xf32>
    %c0_153 = arith.constant 0 : index
    %c0_154 = arith.constant 0 : index
    %274 = vector.load %arg29[%c0_153, %c0_154] : memref<32x32xf32, #tpu.memory_space<vmem>>, vector<32x32xf32>
    %cst_155 = arith.constant dense<0.000000e+00> : vector<24x32xf32>
    %275 = tpu.matmul %268, %274, %cst_155 {dimension_numbers = #tpu.dot_dimension_numbers<[1], [0], [0], [1], [0, 0, 1, 1], [], []>} : vector<24x32xf32>, vector<32x32xf32>, vector<24x32xf32> -> vector<24x32xf32>
    %c0_156 = arith.constant 0 : index
    %c0_157 = arith.constant 0 : index
    %276 = vector.load %arg30[%c0_156, %c0_157] : memref<1x32xf32, #tpu.memory_space<vmem>>, vector<1x32xf32>
    %277 = vector.broadcast %276 : vector<1x32xf32> to vector<24x32xf32>
    %278 = arith.addf %275, %277 : vector<24x32xf32>
    %c0_158 = arith.constant 0 : index
    %c0_159 = arith.constant 0 : index
    %279 = vector.load %arg31[%c0_158, %c0_159] : memref<32x32xf32, #tpu.memory_space<vmem>>, vector<32x32xf32>
    %cst_160 = arith.constant dense<0.000000e+00> : vector<24x32xf32>
    %280 = tpu.matmul %268, %279, %cst_160 {dimension_numbers = #tpu.dot_dimension_numbers<[1], [0], [0], [1], [0, 0, 1, 1], [], []>} : vector<24x32xf32>, vector<32x32xf32>, vector<24x32xf32> -> vector<24x32xf32>
    %c0_161 = arith.constant 0 : index
    %c0_162 = arith.constant 0 : index
    %281 = vector.load %arg32[%c0_161, %c0_162] : memref<1x32xf32, #tpu.memory_space<vmem>>, vector<1x32xf32>
    %282 = vector.broadcast %281 : vector<1x32xf32> to vector<24x32xf32>
    %283 = arith.addf %280, %282 : vector<24x32xf32>
    %cst_163 = arith.constant 0.000000e+00 : f32
    %284 = vector.broadcast %cst_163 : f32 to vector<24x32xf32>
    %285 = vector.broadcast %8 : vector<1x32xf32> to vector<24x32xf32>
    %286 = arith.mulf %273, %285 : vector<24x32xf32>
    %cst_164 = arith.constant dense<0.000000e+00> : vector<24x24xf32>
    %287 = tpu.matmul %286, %278, %cst_164 {dimension_numbers = #tpu.dot_dimension_numbers<[1], [1], [0], [0], [0, 0, 1, 0], [], []>} : vector<24x32xf32>, vector<24x32xf32>, vector<24x24xf32> -> vector<24x24xf32>
    %cst_165 = arith.constant 0.353553385 : f32
    %288 = vector.broadcast %cst_165 : f32 to vector<24x24xf32>
    %289 = arith.mulf %287, %288 : vector<24x24xf32>
    %cst_166 = arith.constant dense<0xFF800000> : vector<24xf32>
    %290 = vector.multi_reduction <maximumf>, %289, %cst_166 [1] : vector<24x24xf32> to vector<24xf32>
    %291 = vector.shape_cast %290 : vector<24xf32> to vector<24x1xf32>
    %292 = vector.broadcast %291 : vector<24x1xf32> to vector<24x24xf32>
    %293 = arith.subf %289, %292 : vector<24x24xf32>
    %294 = math.exp %293 : vector<24x24xf32>
    %cst_167 = arith.constant dense<0.000000e+00> : vector<24xf32>
    %295 = vector.multi_reduction <add>, %294, %cst_167 [1] : vector<24x24xf32> to vector<24xf32>
    %296 = vector.shape_cast %295 : vector<24xf32> to vector<24x1xf32>
    %297 = tpu.reciprocal %296 {approx = true} : vector<24x1xf32> -> vector<24x1xf32>
    %298 = vector.broadcast %297 : vector<24x1xf32> to vector<24x24xf32>
    %299 = arith.mulf %294, %298 : vector<24x24xf32>
    %300 = vector.broadcast %8 : vector<1x32xf32> to vector<24x32xf32>
    %301 = arith.mulf %283, %300 : vector<24x32xf32>
    %cst_168 = arith.constant dense<0.000000e+00> : vector<24x32xf32>
    %302 = tpu.matmul %299, %301, %cst_168 {dimension_numbers = #tpu.dot_dimension_numbers<[1], [0], [0], [1], [0, 0, 1, 1], [], []>} : vector<24x24xf32>, vector<24x32xf32>, vector<24x32xf32> -> vector<24x32xf32>
    %303 = arith.addf %284, %302 : vector<24x32xf32>
    %304 = vector.broadcast %16 : vector<1x32xf32> to vector<24x32xf32>
    %305 = arith.mulf %273, %304 : vector<24x32xf32>
    %cst_169 = arith.constant dense<0.000000e+00> : vector<24x24xf32>
    %306 = tpu.matmul %305, %278, %cst_169 {dimension_numbers = #tpu.dot_dimension_numbers<[1], [1], [0], [0], [0, 0, 1, 0], [], []>} : vector<24x32xf32>, vector<24x32xf32>, vector<24x24xf32> -> vector<24x24xf32>
    %cst_170 = arith.constant 0.353553385 : f32
    %307 = vector.broadcast %cst_170 : f32 to vector<24x24xf32>
    %308 = arith.mulf %306, %307 : vector<24x24xf32>
    %cst_171 = arith.constant dense<0xFF800000> : vector<24xf32>
    %309 = vector.multi_reduction <maximumf>, %308, %cst_171 [1] : vector<24x24xf32> to vector<24xf32>
    %310 = vector.shape_cast %309 : vector<24xf32> to vector<24x1xf32>
    %311 = vector.broadcast %310 : vector<24x1xf32> to vector<24x24xf32>
    %312 = arith.subf %308, %311 : vector<24x24xf32>
    %313 = math.exp %312 : vector<24x24xf32>
    %cst_172 = arith.constant dense<0.000000e+00> : vector<24xf32>
    %314 = vector.multi_reduction <add>, %313, %cst_172 [1] : vector<24x24xf32> to vector<24xf32>
    %315 = vector.shape_cast %314 : vector<24xf32> to vector<24x1xf32>
    %316 = tpu.reciprocal %315 {approx = true} : vector<24x1xf32> -> vector<24x1xf32>
    %317 = vector.broadcast %316 : vector<24x1xf32> to vector<24x24xf32>
    %318 = arith.mulf %313, %317 : vector<24x24xf32>
    %319 = vector.broadcast %16 : vector<1x32xf32> to vector<24x32xf32>
    %320 = arith.mulf %283, %319 : vector<24x32xf32>
    %cst_173 = arith.constant dense<0.000000e+00> : vector<24x32xf32>
    %321 = tpu.matmul %318, %320, %cst_173 {dimension_numbers = #tpu.dot_dimension_numbers<[1], [0], [0], [1], [0, 0, 1, 1], [], []>} : vector<24x24xf32>, vector<24x32xf32>, vector<24x32xf32> -> vector<24x32xf32>
    %322 = arith.addf %303, %321 : vector<24x32xf32>
    %323 = vector.broadcast %24 : vector<1x32xf32> to vector<24x32xf32>
    %324 = arith.mulf %273, %323 : vector<24x32xf32>
    %cst_174 = arith.constant dense<0.000000e+00> : vector<24x24xf32>
    %325 = tpu.matmul %324, %278, %cst_174 {dimension_numbers = #tpu.dot_dimension_numbers<[1], [1], [0], [0], [0, 0, 1, 0], [], []>} : vector<24x32xf32>, vector<24x32xf32>, vector<24x24xf32> -> vector<24x24xf32>
    %cst_175 = arith.constant 0.353553385 : f32
    %326 = vector.broadcast %cst_175 : f32 to vector<24x24xf32>
    %327 = arith.mulf %325, %326 : vector<24x24xf32>
    %cst_176 = arith.constant dense<0xFF800000> : vector<24xf32>
    %328 = vector.multi_reduction <maximumf>, %327, %cst_176 [1] : vector<24x24xf32> to vector<24xf32>
    %329 = vector.shape_cast %328 : vector<24xf32> to vector<24x1xf32>
    %330 = vector.broadcast %329 : vector<24x1xf32> to vector<24x24xf32>
    %331 = arith.subf %327, %330 : vector<24x24xf32>
    %332 = math.exp %331 : vector<24x24xf32>
    %cst_177 = arith.constant dense<0.000000e+00> : vector<24xf32>
    %333 = vector.multi_reduction <add>, %332, %cst_177 [1] : vector<24x24xf32> to vector<24xf32>
    %334 = vector.shape_cast %333 : vector<24xf32> to vector<24x1xf32>
    %335 = tpu.reciprocal %334 {approx = true} : vector<24x1xf32> -> vector<24x1xf32>
    %336 = vector.broadcast %335 : vector<24x1xf32> to vector<24x24xf32>
    %337 = arith.mulf %332, %336 : vector<24x24xf32>
    %338 = vector.broadcast %24 : vector<1x32xf32> to vector<24x32xf32>
    %339 = arith.mulf %283, %338 : vector<24x32xf32>
    %cst_178 = arith.constant dense<0.000000e+00> : vector<24x32xf32>
    %340 = tpu.matmul %337, %339, %cst_178 {dimension_numbers = #tpu.dot_dimension_numbers<[1], [0], [0], [1], [0, 0, 1, 1], [], []>} : vector<24x24xf32>, vector<24x32xf32>, vector<24x32xf32> -> vector<24x32xf32>
    %341 = arith.addf %322, %340 : vector<24x32xf32>
    %342 = vector.broadcast %32 : vector<1x32xf32> to vector<24x32xf32>
    %343 = arith.mulf %273, %342 : vector<24x32xf32>
    %cst_179 = arith.constant dense<0.000000e+00> : vector<24x24xf32>
    %344 = tpu.matmul %343, %278, %cst_179 {dimension_numbers = #tpu.dot_dimension_numbers<[1], [1], [0], [0], [0, 0, 1, 0], [], []>} : vector<24x32xf32>, vector<24x32xf32>, vector<24x24xf32> -> vector<24x24xf32>
    %cst_180 = arith.constant 0.353553385 : f32
    %345 = vector.broadcast %cst_180 : f32 to vector<24x24xf32>
    %346 = arith.mulf %344, %345 : vector<24x24xf32>
    %cst_181 = arith.constant dense<0xFF800000> : vector<24xf32>
    %347 = vector.multi_reduction <maximumf>, %346, %cst_181 [1] : vector<24x24xf32> to vector<24xf32>
    %348 = vector.shape_cast %347 : vector<24xf32> to vector<24x1xf32>
    %349 = vector.broadcast %348 : vector<24x1xf32> to vector<24x24xf32>
    %350 = arith.subf %346, %349 : vector<24x24xf32>
    %351 = math.exp %350 : vector<24x24xf32>
    %cst_182 = arith.constant dense<0.000000e+00> : vector<24xf32>
    %352 = vector.multi_reduction <add>, %351, %cst_182 [1] : vector<24x24xf32> to vector<24xf32>
    %353 = vector.shape_cast %352 : vector<24xf32> to vector<24x1xf32>
    %354 = tpu.reciprocal %353 {approx = true} : vector<24x1xf32> -> vector<24x1xf32>
    %355 = vector.broadcast %354 : vector<24x1xf32> to vector<24x24xf32>
    %356 = arith.mulf %351, %355 : vector<24x24xf32>
    %357 = vector.broadcast %32 : vector<1x32xf32> to vector<24x32xf32>
    %358 = arith.mulf %283, %357 : vector<24x32xf32>
    %cst_183 = arith.constant dense<0.000000e+00> : vector<24x32xf32>
    %359 = tpu.matmul %356, %358, %cst_183 {dimension_numbers = #tpu.dot_dimension_numbers<[1], [0], [0], [1], [0, 0, 1, 1], [], []>} : vector<24x24xf32>, vector<24x32xf32>, vector<24x32xf32> -> vector<24x32xf32>
    %360 = arith.addf %341, %359 : vector<24x32xf32>
    %c0_184 = arith.constant 0 : index
    %c0_185 = arith.constant 0 : index
    %361 = vector.load %arg33[%c0_184, %c0_185] : memref<32x32xf32, #tpu.memory_space<vmem>>, vector<32x32xf32>
    %cst_186 = arith.constant dense<0.000000e+00> : vector<24x32xf32>
    %362 = tpu.matmul %360, %361, %cst_186 {dimension_numbers = #tpu.dot_dimension_numbers<[1], [0], [0], [1], [0, 0, 1, 1], [], []>} : vector<24x32xf32>, vector<32x32xf32>, vector<24x32xf32> -> vector<24x32xf32>
    %c0_187 = arith.constant 0 : index
    %c0_188 = arith.constant 0 : index
    %363 = vector.load %arg34[%c0_187, %c0_188] : memref<1x32xf32, #tpu.memory_space<vmem>>, vector<1x32xf32>
    %364 = vector.broadcast %363 : vector<1x32xf32> to vector<24x32xf32>
    %365 = arith.addf %362, %364 : vector<24x32xf32>
    %366 = arith.addf %246, %365 : vector<24x32xf32>
    %cst_189 = arith.constant dense<0.000000e+00> : vector<24xf32>
    %367 = vector.multi_reduction <add>, %366, %cst_189 [1] : vector<24x32xf32> to vector<24xf32>
    %368 = vector.shape_cast %367 : vector<24xf32> to vector<24x1xf32>
    %cst_190 = arith.constant 3.200000e+01 : f32
    %369 = vector.broadcast %cst_190 : f32 to vector<24x1xf32>
    %370 = arith.divf %368, %369 : vector<24x1xf32>
    %371 = vector.broadcast %370 : vector<24x1xf32> to vector<24x32xf32>
    %372 = arith.subf %366, %371 : vector<24x32xf32>
    %373 = arith.mulf %372, %372 : vector<24x32xf32>
    %cst_191 = arith.constant dense<0.000000e+00> : vector<24xf32>
    %374 = vector.multi_reduction <add>, %373, %cst_191 [1] : vector<24x32xf32> to vector<24xf32>
    %375 = vector.shape_cast %374 : vector<24xf32> to vector<24x1xf32>
    %cst_192 = arith.constant 3.200000e+01 : f32
    %376 = vector.broadcast %cst_192 : f32 to vector<24x1xf32>
    %377 = arith.divf %375, %376 : vector<24x1xf32>
    %cst_193 = arith.constant 9.99999997E-7 : f32
    %378 = vector.broadcast %cst_193 : f32 to vector<24x1xf32>
    %379 = arith.addf %377, %378 : vector<24x1xf32>
    %380 = math.rsqrt %379 : vector<24x1xf32>
    %381 = vector.broadcast %380 : vector<24x1xf32> to vector<24x32xf32>
    %382 = arith.mulf %372, %381 : vector<24x32xf32>
    %c0_194 = arith.constant 0 : index
    %c0_195 = arith.constant 0 : index
    %383 = vector.load %arg35[%c0_194, %c0_195] : memref<1x32xf32, #tpu.memory_space<vmem>>, vector<1x32xf32>
    %384 = vector.broadcast %383 : vector<1x32xf32> to vector<24x32xf32>
    %385 = arith.mulf %382, %384 : vector<24x32xf32>
    %c0_196 = arith.constant 0 : index
    %c0_197 = arith.constant 0 : index
    %386 = vector.load %arg36[%c0_196, %c0_197] : memref<1x32xf32, #tpu.memory_space<vmem>>, vector<1x32xf32>
    %387 = vector.broadcast %386 : vector<1x32xf32> to vector<24x32xf32>
    %388 = arith.addf %385, %387 : vector<24x32xf32>
    %c0_198 = arith.constant 0 : index
    %c0_199 = arith.constant 0 : index
    %389 = vector.load %arg37[%c0_198, %c0_199] : memref<32x64xf32, #tpu.memory_space<vmem>>, vector<32x64xf32>
    %cst_200 = arith.constant dense<0.000000e+00> : vector<24x64xf32>
    %390 = tpu.matmul %388, %389, %cst_200 {dimension_numbers = #tpu.dot_dimension_numbers<[1], [0], [0], [1], [0, 0, 1, 1], [], []>} : vector<24x32xf32>, vector<32x64xf32>, vector<24x64xf32> -> vector<24x64xf32>
    %c0_201 = arith.constant 0 : index
    %c0_202 = arith.constant 0 : index
    %391 = vector.load %arg38[%c0_201, %c0_202] : memref<1x64xf32, #tpu.memory_space<vmem>>, vector<1x64xf32>
    %392 = vector.broadcast %391 : vector<1x64xf32> to vector<24x64xf32>
    %393 = arith.addf %390, %392 : vector<24x64xf32>
    %cst_203 = arith.constant 5.000000e-01 : f32
    %394 = vector.broadcast %cst_203 : f32 to vector<24x64xf32>
    %395 = arith.mulf %394, %393 : vector<24x64xf32>
    %cst_204 = arith.constant 0.707106769 : f32
    %396 = vector.broadcast %cst_204 : f32 to vector<24x64xf32>
    %397 = arith.mulf %393, %396 : vector<24x64xf32>
    %398 = math.erf %397 : vector<24x64xf32>
    %cst_205 = arith.constant 1.000000e+00 : f32
    %399 = vector.broadcast %cst_205 : f32 to vector<24x64xf32>
    %400 = arith.addf %399, %398 : vector<24x64xf32>
    %401 = arith.mulf %395, %400 : vector<24x64xf32>
    %c0_206 = arith.constant 0 : index
    %c0_207 = arith.constant 0 : index
    %402 = vector.load %arg39[%c0_206, %c0_207] : memref<64x32xf32, #tpu.memory_space<vmem>>, vector<64x32xf32>
    %cst_208 = arith.constant dense<0.000000e+00> : vector<24x32xf32>
    %403 = tpu.matmul %401, %402, %cst_208 {dimension_numbers = #tpu.dot_dimension_numbers<[1], [0], [0], [1], [0, 0, 1, 1], [], []>} : vector<24x64xf32>, vector<64x32xf32>, vector<24x32xf32> -> vector<24x32xf32>
    %c0_209 = arith.constant 0 : index
    %c0_210 = arith.constant 0 : index
    %404 = vector.load %arg40[%c0_209, %c0_210] : memref<1x32xf32, #tpu.memory_space<vmem>>, vector<1x32xf32>
    %405 = vector.broadcast %404 : vector<1x32xf32> to vector<24x32xf32>
    %406 = arith.addf %403, %405 : vector<24x32xf32>
    %407 = arith.addf %366, %406 : vector<24x32xf32>
    %c0_211 = arith.constant 0 : index
    %c0_212 = arith.constant 0 : index
    %408 = vector.load %arg73[%c0_211, %c0_212] : memref<24x32xf32, #tpu.memory_space<vmem>>, vector<24x32xf32>
    tpu.vector_store %arg73[%c0_211, %c0_212], %407 {strides = array<i32>} : memref<24x32xf32, #tpu.memory_space<vmem>>, vector<24x32xf32>,
    %c0_213 = arith.constant 0 : index
    %c0_214 = arith.constant 0 : index
    %409 = vector.load %arg43[%c0_213, %c0_214] : memref<16x32xf32, #tpu.memory_space<vmem>>, vector<16x32xf32>
    %cst_215 = arith.constant dense<0.000000e+00> : vector<16x32xf32>
    %410 = tpu.matmul %50, %409, %cst_215 {dimension_numbers = #tpu.dot_dimension_numbers<[1], [0], [0], [1], [0, 0, 1, 1], [], []>} : vector<16x16xf32>, vector<16x32xf32>, vector<16x32xf32> -> vector<16x32xf32>
    %c0_216 = arith.constant 0 : index
    %c0_217 = arith.constant 0 : index
    %411 = vector.load %arg44[%c0_216, %c0_217] : memref<1x32xf32, #tpu.memory_space<vmem>>, vector<1x32xf32>
    %412 = vector.broadcast %411 : vector<1x32xf32> to vector<16x32xf32>
    %413 = arith.addf %410, %412 : vector<16x32xf32>
    %c8_218 = arith.constant 8 : index
    %c0_219 = arith.constant 0 : index
    %414 = vector.load %arg73[%c8_218, %c0_219] : memref<24x32xf32, #tpu.memory_space<vmem>>, vector<16x32xf32>
    %415 = arith.addf %414, %413 : vector<16x32xf32>
    %c8_220 = arith.constant 8 : index
    %c0_221 = arith.constant 0 : index
    %416 = vector.load %arg73[%c8_220, %c0_221] : memref<24x32xf32, #tpu.memory_space<vmem>>, vector<16x32xf32>
    tpu.vector_store %arg73[%c8_220, %c0_221], %415 {strides = array<i32>} : memref<24x32xf32, #tpu.memory_space<vmem>>, vector<16x32xf32>,
    %c0_222 = arith.constant 0 : index
    %c0_223 = arith.constant 0 : index
    %417 = vector.load %arg73[%c0_222, %c0_223] : memref<24x32xf32, #tpu.memory_space<vmem>>, vector<24x32xf32>
    %418 = vector.broadcast %56 : vector<1x32xf32> to vector<24x32xf32>
    %419 = arith.addf %417, %418 : vector<24x32xf32>
    %420 = arith.mulf %419, %419 : vector<24x32xf32>
    %cst_224 = arith.constant dense<0.000000e+00> : vector<24xf32>
    %421 = vector.multi_reduction <add>, %420, %cst_224 [1] : vector<24x32xf32> to vector<24xf32>
    %422 = vector.shape_cast %421 : vector<24xf32> to vector<24x1xf32>
    %423 = math.sqrt %422 : vector<24x1xf32>
    %cst_225 = arith.constant 9.99999996E-13 : f32
    %424 = vector.broadcast %cst_225 : f32 to vector<24x1xf32>
    %425 = arith.maximumf %423, %424 : vector<24x1xf32>
    %426 = vector.broadcast %425 : vector<24x1xf32> to vector<24x32xf32>
    %427 = arith.divf %419, %426 : vector<24x32xf32>
    %428 = vector.extract_strided_slice %427 {offsets = [0, 0], sizes = [8, 32], strides = [1, 1]} : vector<24x32xf32> to vector<8x32xf32>
    %429 = vector.extract_strided_slice %427 {offsets = [8, 0], sizes = [16, 32], strides = [1, 1]} : vector<24x32xf32> to vector<16x32xf32>
    %c0_226 = arith.constant 0 : index
    %c0_227 = arith.constant 0 : index
    %430 = vector.load %arg47[%c0_226, %c0_227] : memref<32x32xf32, #tpu.memory_space<vmem>>, vector<32x32xf32>
    %cst_228 = arith.constant dense<0.000000e+00> : vector<8x32xf32>
    %431 = tpu.matmul %428, %430, %cst_228 {dimension_numbers = #tpu.dot_dimension_numbers<[1], [0], [0], [1], [0, 0, 1, 1], [], []>} : vector<8x32xf32>, vector<32x32xf32>, vector<8x32xf32> -> vector<8x32xf32>
    %c0_229 = arith.constant 0 : index
    %c0_230 = arith.constant 0 : index
    %432 = vector.load %arg48[%c0_229, %c0_230] : memref<1x32xf32, #tpu.memory_space<vmem>>, vector<1x32xf32>
    %433 = vector.broadcast %432 : vector<1x32xf32> to vector<8x32xf32>
    %434 = arith.addf %431, %433 : vector<8x32xf32>
    %cst_231 = arith.constant 0.000000e+00 : f32
    %435 = vector.broadcast %cst_231 : f32 to vector<8x32xf32>
    %436 = arith.maximumf %434, %435 : vector<8x32xf32>
    %c0_232 = arith.constant 0 : index
    %c0_233 = arith.constant 0 : index
    %437 = vector.load %arg49[%c0_232, %c0_233] : memref<32x32xf32, #tpu.memory_space<vmem>>, vector<32x32xf32>
    %cst_234 = arith.constant dense<0.000000e+00> : vector<8x32xf32>
    %438 = tpu.matmul %436, %437, %cst_234 {dimension_numbers = #tpu.dot_dimension_numbers<[1], [0], [0], [1], [0, 0, 1, 1], [], []>} : vector<8x32xf32>, vector<32x32xf32>, vector<8x32xf32> -> vector<8x32xf32>
    %c0_235 = arith.constant 0 : index
    %c0_236 = arith.constant 0 : index
    %439 = vector.load %arg50[%c0_235, %c0_236] : memref<1x32xf32, #tpu.memory_space<vmem>>, vector<1x32xf32>
    %440 = vector.broadcast %439 : vector<1x32xf32> to vector<8x32xf32>
    %441 = arith.addf %438, %440 : vector<8x32xf32>
    %cst_237 = arith.constant 0.000000e+00 : f32
    %442 = vector.broadcast %cst_237 : f32 to vector<8x32xf32>
    %443 = arith.maximumf %441, %442 : vector<8x32xf32>
    %c0_238 = arith.constant 0 : index
    %c0_239 = arith.constant 0 : index
    %444 = vector.load %arg51[%c0_238, %c0_239] : memref<32x16xf32, #tpu.memory_space<vmem>>, vector<32x16xf32>
    %cst_240 = arith.constant dense<0.000000e+00> : vector<8x16xf32>
    %445 = tpu.matmul %443, %444, %cst_240 {dimension_numbers = #tpu.dot_dimension_numbers<[1], [0], [0], [1], [0, 0, 1, 1], [], []>} : vector<8x32xf32>, vector<32x16xf32>, vector<8x16xf32> -> vector<8x16xf32>
    %c0_241 = arith.constant 0 : index
    %c0_242 = arith.constant 0 : index
    %446 = vector.load %arg52[%c0_241, %c0_242] : memref<1x16xf32, #tpu.memory_space<vmem>>, vector<1x16xf32>
    %447 = vector.broadcast %446 : vector<1x16xf32> to vector<8x16xf32>
    %448 = arith.addf %445, %447 : vector<8x16xf32>
    %c0_243 = arith.constant 0 : index
    %c0_244 = arith.constant 0 : index
    %449 = vector.load %arg53[%c0_243, %c0_244] : memref<32x16xf32, #tpu.memory_space<vmem>>, vector<32x16xf32>
    %cst_245 = arith.constant dense<0.000000e+00> : vector<8x16xf32>
    %450 = tpu.matmul %443, %449, %cst_245 {dimension_numbers = #tpu.dot_dimension_numbers<[1], [0], [0], [1], [0, 0, 1, 1], [], []>} : vector<8x32xf32>, vector<32x16xf32>, vector<8x16xf32> -> vector<8x16xf32>
    %c0_246 = arith.constant 0 : index
    %c0_247 = arith.constant 0 : index
    %451 = vector.load %arg54[%c0_246, %c0_247] : memref<1x16xf32, #tpu.memory_space<vmem>>, vector<1x16xf32>
    %452 = vector.broadcast %451 : vector<1x16xf32> to vector<8x16xf32>
    %453 = arith.addf %450, %452 : vector<8x16xf32>
    %c0_248 = arith.constant 0 : index
    %c0_249 = arith.constant 0 : index
    %454 = vector.load %arg55[%c0_248, %c0_249] : memref<32x32xf32, #tpu.memory_space<vmem>>, vector<32x32xf32>
    %cst_250 = arith.constant dense<0.000000e+00> : vector<16x32xf32>
    %455 = tpu.matmul %429, %454, %cst_250 {dimension_numbers = #tpu.dot_dimension_numbers<[1], [0], [0], [1], [0, 0, 1, 1], [], []>} : vector<16x32xf32>, vector<32x32xf32>, vector<16x32xf32> -> vector<16x32xf32>
    %c0_251 = arith.constant 0 : index
    %c0_252 = arith.constant 0 : index
    %456 = vector.load %arg56[%c0_251, %c0_252] : memref<1x32xf32, #tpu.memory_space<vmem>>, vector<1x32xf32>
    %457 = vector.broadcast %456 : vector<1x32xf32> to vector<16x32xf32>
    %458 = arith.addf %455, %457 : vector<16x32xf32>
    %cst_253 = arith.constant 0.000000e+00 : f32
    %459 = vector.broadcast %cst_253 : f32 to vector<16x32xf32>
    %460 = arith.maximumf %458, %459 : vector<16x32xf32>
    %c0_254 = arith.constant 0 : index
    %c0_255 = arith.constant 0 : index
    %461 = vector.load %arg57[%c0_254, %c0_255] : memref<32x32xf32, #tpu.memory_space<vmem>>, vector<32x32xf32>
    %cst_256 = arith.constant dense<0.000000e+00> : vector<16x32xf32>
    %462 = tpu.matmul %460, %461, %cst_256 {dimension_numbers = #tpu.dot_dimension_numbers<[1], [0], [0], [1], [0, 0, 1, 1], [], []>} : vector<16x32xf32>, vector<32x32xf32>, vector<16x32xf32> -> vector<16x32xf32>
    %c0_257 = arith.constant 0 : index
    %c0_258 = arith.constant 0 : index
    %463 = vector.load %arg58[%c0_257, %c0_258] : memref<1x32xf32, #tpu.memory_space<vmem>>, vector<1x32xf32>
    %464 = vector.broadcast %463 : vector<1x32xf32> to vector<16x32xf32>
    %465 = arith.addf %462, %464 : vector<16x32xf32>
    %cst_259 = arith.constant 0.000000e+00 : f32
    %466 = vector.broadcast %cst_259 : f32 to vector<16x32xf32>
    %467 = arith.maximumf %465, %466 : vector<16x32xf32>
    %c0_260 = arith.constant 0 : index
    %c0_261 = arith.constant 0 : index
    %468 = vector.load %arg59[%c0_260, %c0_261] : memref<32x16xf32, #tpu.memory_space<vmem>>, vector<32x16xf32>
    %cst_262 = arith.constant dense<0.000000e+00> : vector<16x16xf32>
    %469 = tpu.matmul %467, %468, %cst_262 {dimension_numbers = #tpu.dot_dimension_numbers<[1], [0], [0], [1], [0, 0, 1, 1], [], []>} : vector<16x32xf32>, vector<32x16xf32>, vector<16x16xf32> -> vector<16x16xf32>
    %c0_263 = arith.constant 0 : index
    %c0_264 = arith.constant 0 : index
    %470 = vector.load %arg60[%c0_263, %c0_264] : memref<1x16xf32, #tpu.memory_space<vmem>>, vector<1x16xf32>
    %471 = vector.broadcast %470 : vector<1x16xf32> to vector<16x16xf32>
    %472 = arith.addf %469, %471 : vector<16x16xf32>
    %cst_265 = arith.constant dense<0.000000e+00> : vector<8x16xf32>
    %473 = tpu.matmul %448, %472, %cst_265 {dimension_numbers = #tpu.dot_dimension_numbers<[1], [1], [0], [0], [0, 0, 1, 0], [], []>} : vector<8x16xf32>, vector<16x16xf32>, vector<8x16xf32> -> vector<8x16xf32>
    %cst_266 = arith.constant dense<0.000000e+00> : vector<8x16xf32>
    %474 = tpu.matmul %453, %472, %cst_266 {dimension_numbers = #tpu.dot_dimension_numbers<[1], [1], [0], [0], [0, 0, 1, 0], [], []>} : vector<8x16xf32>, vector<16x16xf32>, vector<8x16xf32> -> vector<8x16xf32>
    %c0_267 = arith.constant 0 : index
    %c0_268 = arith.constant 0 : index
    %c0_269 = arith.constant 0 : index
    %475 = vector.load %arg70[%c0_267, %c0_268, %c0_269] : memref<1x8x16xf32, #tpu.memory_space<vmem>>, vector<1x8x16xf32>
    %476 = vector.shape_cast %475 : vector<1x8x16xf32> to vector<8x16xf32>
    %477 = vector.shape_cast %473 : vector<8x16xf32> to vector<1x8x16xf32>
    tpu.vector_store %arg70[%c0_267, %c0_268, %c0_269], %477 {strides = array<i32>} : memref<1x8x16xf32, #tpu.memory_space<vmem>>, vector<1x8x16xf32>,
    %c0_270 = arith.constant 0 : index
    %c0_271 = arith.constant 0 : index
    %c0_272 = arith.constant 0 : index
    %478 = vector.load %arg71[%c0_270, %c0_271, %c0_272] : memref<1x8x16xf32, #tpu.memory_space<vmem>>, vector<1x8x16xf32>
    %479 = vector.shape_cast %478 : vector<1x8x16xf32> to vector<8x16xf32>
    %480 = vector.shape_cast %474 : vector<8x16xf32> to vector<1x8x16xf32>
    tpu.vector_store %arg71[%c0_270, %c0_271, %c0_272], %480 {strides = array<i32>} : memref<1x8x16xf32, #tpu.memory_space<vmem>>, vector<1x8x16xf32>,
    %c0_273 = arith.constant 0 : index
    %c0_274 = arith.constant 0 : index
    %481 = vector.load %arg61[%c0_273, %c0_274] : memref<32x32xf32, #tpu.memory_space<vmem>>, vector<32x32xf32>
    %cst_275 = arith.constant dense<0.000000e+00> : vector<16x32xf32>
    %482 = tpu.matmul %429, %481, %cst_275 {dimension_numbers = #tpu.dot_dimension_numbers<[1], [0], [0], [1], [0, 0, 1, 1], [], []>} : vector<16x32xf32>, vector<32x32xf32>, vector<16x32xf32> -> vector<16x32xf32>
    %c0_276 = arith.constant 0 : index
    %c0_277 = arith.constant 0 : index
    %483 = vector.load %arg62[%c0_276, %c0_277] : memref<1x32xf32, #tpu.memory_space<vmem>>, vector<1x32xf32>
    %484 = vector.broadcast %483 : vector<1x32xf32> to vector<16x32xf32>
    %485 = arith.addf %482, %484 : vector<16x32xf32>
    %cst_278 = arith.constant 0.000000e+00 : f32
    %486 = vector.broadcast %cst_278 : f32 to vector<16x32xf32>
    %487 = arith.maximumf %485, %486 : vector<16x32xf32>
    %c0_279 = arith.constant 0 : index
    %c0_280 = arith.constant 0 : index
    %488 = vector.load %arg63[%c0_279, %c0_280] : memref<32x32xf32, #tpu.memory_space<vmem>>, vector<32x32xf32>
    %cst_281 = arith.constant dense<0.000000e+00> : vector<16x32xf32>
    %489 = tpu.matmul %487, %488, %cst_281 {dimension_numbers = #tpu.dot_dimension_numbers<[1], [0], [0], [1], [0, 0, 1, 1], [], []>} : vector<16x32xf32>, vector<32x32xf32>, vector<16x32xf32> -> vector<16x32xf32>
    %c0_282 = arith.constant 0 : index
    %c0_283 = arith.constant 0 : index
    %490 = vector.load %arg64[%c0_282, %c0_283] : memref<1x32xf32, #tpu.memory_space<vmem>>, vector<1x32xf32>
    %491 = vector.broadcast %490 : vector<1x32xf32> to vector<16x32xf32>
    %492 = arith.addf %489, %491 : vector<16x32xf32>
    %cst_284 = arith.constant 0.000000e+00 : f32
    %493 = vector.broadcast %cst_284 : f32 to vector<16x32xf32>
    %494 = arith.maximumf %492, %493 : vector<16x32xf32>
    %c0_285 = arith.constant 0 : index
    %c0_286 = arith.constant 0 : index
    %495 = vector.load %arg69[%c0_285, %c0_286] : memref<16x16xf32, #tpu.memory_space<vmem>>, vector<16x16xf32>
    %c0_287 = arith.constant 0 : index
    %c0_288 = arith.constant 0 : index
    %496 = vector.load %arg65[%c0_287, %c0_288] : memref<32x16xf32, #tpu.memory_space<vmem>>, vector<32x16xf32>
    %cst_289 = arith.constant dense<0.000000e+00> : vector<16x16xf32>
    %497 = tpu.matmul %494, %496, %cst_289 {dimension_numbers = #tpu.dot_dimension_numbers<[1], [0], [0], [1], [0, 0, 1, 1], [], []>} : vector<16x32xf32>, vector<32x16xf32>, vector<16x16xf32> -> vector<16x16xf32>
    %c0_290 = arith.constant 0 : index
    %c0_291 = arith.constant 0 : index
    %498 = vector.load %arg66[%c0_290, %c0_291] : memref<1x16xf32, #tpu.memory_space<vmem>>, vector<1x16xf32>
    %499 = vector.broadcast %498 : vector<1x16xf32> to vector<16x16xf32>
    %500 = arith.addf %497, %499 : vector<16x16xf32>
    %501 = arith.mulf %500, %500 : vector<16x16xf32>
    %cst_292 = arith.constant dense<0.000000e+00> : vector<16x16xf32>
    %502 = tpu.matmul %495, %501, %cst_292 {dimension_numbers = #tpu.dot_dimension_numbers<[1], [0], [0], [1], [0, 0, 1, 1], [], []>} : vector<16x16xf32>, vector<16x16xf32>, vector<16x16xf32> -> vector<16x16xf32>
    %503 = math.sqrt %502 : vector<16x16xf32>
    %cst_293 = arith.constant 9.99999996E-13 : f32
    %504 = vector.broadcast %cst_293 : f32 to vector<16x16xf32>
    %505 = arith.maximumf %503, %504 : vector<16x16xf32>
    %506 = arith.divf %500, %505 : vector<16x16xf32>
    %cst_294 = arith.constant dense<0.000000e+00> : vector<8x16xf32>
    %507 = tpu.matmul %448, %506, %cst_294 {dimension_numbers = #tpu.dot_dimension_numbers<[1], [1], [0], [0], [0, 0, 1, 0], [], []>} : vector<8x16xf32>, vector<16x16xf32>, vector<8x16xf32> -> vector<8x16xf32>
    %c0_295 = arith.constant 0 : index
    %c0_296 = arith.constant 0 : index
    %c0_297 = arith.constant 0 : index
    %c0_298 = arith.constant 0 : index
    %508 = vector.load %arg72[%c0_295, %c0_296, %c0_297, %c0_298] : memref<1x2x8x16xf32, #tpu.memory_space<vmem>>, vector<1x1x8x16xf32>
    %509 = vector.shape_cast %508 : vector<1x1x8x16xf32> to vector<8x16xf32>
    %510 = vector.shape_cast %507 : vector<8x16xf32> to vector<1x1x8x16xf32>
    tpu.vector_store %arg72[%c0_295, %c0_296, %c0_297, %c0_298], %510 {strides = array<i32>} : memref<1x2x8x16xf32, #tpu.memory_space<vmem>>, vector<1x1x8x16xf32>,
    %c0_299 = arith.constant 0 : index
    %c0_300 = arith.constant 0 : index
    %511 = vector.load %arg67[%c0_299, %c0_300] : memref<32x16xf32, #tpu.memory_space<vmem>>, vector<32x16xf32>
    %cst_301 = arith.constant dense<0.000000e+00> : vector<16x16xf32>
    %512 = tpu.matmul %494, %511, %cst_301 {dimension_numbers = #tpu.dot_dimension_numbers<[1], [0], [0], [1], [0, 0, 1, 1], [], []>} : vector<16x32xf32>, vector<32x16xf32>, vector<16x16xf32> -> vector<16x16xf32>
    %c0_302 = arith.constant 0 : index
    %c0_303 = arith.constant 0 : index
    %513 = vector.load %arg68[%c0_302, %c0_303] : memref<1x16xf32, #tpu.memory_space<vmem>>, vector<1x16xf32>
    %514 = vector.broadcast %513 : vector<1x16xf32> to vector<16x16xf32>
    %515 = arith.addf %512, %514 : vector<16x16xf32>
    %516 = arith.mulf %515, %515 : vector<16x16xf32>
    %cst_304 = arith.constant dense<0.000000e+00> : vector<16x16xf32>
    %517 = tpu.matmul %495, %516, %cst_304 {dimension_numbers = #tpu.dot_dimension_numbers<[1], [0], [0], [1], [0, 0, 1, 1], [], []>} : vector<16x16xf32>, vector<16x16xf32>, vector<16x16xf32> -> vector<16x16xf32>
    %518 = math.sqrt %517 : vector<16x16xf32>
    %cst_305 = arith.constant 9.99999996E-13 : f32
    %519 = vector.broadcast %cst_305 : f32 to vector<16x16xf32>
    %520 = arith.maximumf %518, %519 : vector<16x16xf32>
    %521 = arith.divf %515, %520 : vector<16x16xf32>
    %cst_306 = arith.constant dense<0.000000e+00> : vector<8x16xf32>
    %522 = tpu.matmul %448, %521, %cst_306 {dimension_numbers = #tpu.dot_dimension_numbers<[1], [1], [0], [0], [0, 0, 1, 0], [], []>} : vector<8x16xf32>, vector<16x16xf32>, vector<8x16xf32> -> vector<8x16xf32>
    %c0_307 = arith.constant 0 : index
    %c1 = arith.constant 1 : index
    %c0_308 = arith.constant 0 : index
    %c0_309 = arith.constant 0 : index
    %523 = vector.load %arg72[%c0_307, %c1, %c0_308, %c0_309] : memref<1x2x8x16xf32, #tpu.memory_space<vmem>>, vector<1x1x8x16xf32>
    %524 = vector.shape_cast %523 : vector<1x1x8x16xf32> to vector<8x16xf32>
    %525 = vector.shape_cast %522 : vector<8x16xf32> to vector<1x1x8x16xf32>
    tpu.vector_store %arg72[%c0_307, %c1, %c0_308, %c0_309], %525 {strides = array<i32>} : memref<1x2x8x16xf32, #tpu.memory_space<vmem>>, vector<1x1x8x16xf32>,
    return
  }
  func.func @transform_0(%arg0: i32) -> (i32, i32, i32) {
    %c0_i32 = arith.constant 0 : i32
    %c0_i32_0 = arith.constant 0 : i32
    %c0_i32_1 = arith.constant 0 : i32
    return %arg0, %c0_i32, %c0_i32_0 : i32, i32, i32
  }
  func.func @transform_1(%arg0: i32) -> (i32, i32, i32) {
    %c0_i32 = arith.constant 0 : i32
    %c0_i32_0 = arith.constant 0 : i32
    %c0_i32_1 = arith.constant 0 : i32
    return %arg0, %c0_i32, %c0_i32_0 : i32, i32, i32
  }
  func.func @transform_2(%arg0: i32) -> (i32, i32, i32) {
    %c0_i32 = arith.constant 0 : i32
    %c0_i32_0 = arith.constant 0 : i32
    %c0_i32_1 = arith.constant 0 : i32
    return %arg0, %c0_i32, %c0_i32_0 : i32, i32, i32
  }
  func.func @transform_3(%arg0: i32) -> (i32, i32, i32) {
    %c0_i32 = arith.constant 0 : i32
    %c0_i32_0 = arith.constant 0 : i32
    %c0_i32_1 = arith.constant 0 : i32
    return %arg0, %c0_i32, %c0_i32_0 : i32, i32, i32
  }
  func.func @transform_4(%arg0: i32) -> (i32, i32) {
    %c0_i32 = arith.constant 0 : i32
    %c0_i32_0 = arith.constant 0 : i32
    %c0_i32_1 = arith.constant 0 : i32
    return %c0_i32, %c0_i32_0 : i32, i32
  }
  func.func @transform_5(%arg0: i32) -> (i32, i32) {
    %c0_i32 = arith.constant 0 : i32
    %c0_i32_0 = arith.constant 0 : i32
    %c0_i32_1 = arith.constant 0 : i32
    return %c0_i32, %c0_i32_0 : i32, i32
  }
  func.func @transform_6(%arg0: i32) -> (i32, i32) {
    %c0_i32 = arith.constant 0 : i32
    %c0_i32_0 = arith.constant 0 : i32
    %c0_i32_1 = arith.constant 0 : i32
    return %c0_i32, %c0_i32_0 : i32, i32
  }
  func.func @transform_7(%arg0: i32) -> (i32, i32) {
    %c0_i32 = arith.constant 0 : i32
    %c0_i32_0 = arith.constant 0 : i32
    %c0_i32_1 = arith.constant 0 : i32
    return %c0_i32, %c0_i32_0 : i32, i32
  }
  func.func @transform_8(%arg0: i32) -> (i32, i32) {
    %c0_i32 = arith.constant 0 : i32
    %c0_i32_0 = arith.constant 0 : i32
    %c0_i32_1 = arith.constant 0 : i32
    return %c0_i32, %c0_i32_0 : i32, i32
  }
  func.func @transform_9(%arg0: i32) -> (i32, i32) {
    %c0_i32 = arith.constant 0 : i32
    %c0_i32_0 = arith.constant 0 : i32
    %c0_i32_1 = arith.constant 0 : i32
    return %c0_i32, %c0_i32_0 : i32, i32
  }
  func.func @transform_10(%arg0: i32) -> (i32, i32) {
    %c0_i32 = arith.constant 0 : i32
    %c0_i32_0 = arith.constant 0 : i32
    %c0_i32_1 = arith.constant 0 : i32
    return %c0_i32, %c0_i32_0 : i32, i32
  }
  func.func @transform_11(%arg0: i32) -> (i32, i32) {
    %c0_i32 = arith.constant 0 : i32
    %c0_i32_0 = arith.constant 0 : i32
    %c0_i32_1 = arith.constant 0 : i32
    return %c0_i32, %c0_i32_0 : i32, i32
  }
  func.func @transform_12(%arg0: i32) -> (i32, i32) {
    %c0_i32 = arith.constant 0 : i32
    %c0_i32_0 = arith.constant 0 : i32
    %c0_i32_1 = arith.constant 0 : i32
    return %c0_i32, %c0_i32_0 : i32, i32
  }
  func.func @transform_13(%arg0: i32) -> (i32, i32) {
    %c0_i32 = arith.constant 0 : i32
    %c0_i32_0 = arith.constant 0 : i32
    %c0_i32_1 = arith.constant 0 : i32
    return %c0_i32, %c0_i32_0 : i32, i32
  }
  func.func @transform_14(%arg0: i32) -> (i32, i32) {
    %c0_i32 = arith.constant 0 : i32
    %c0_i32_0 = arith.constant 0 : i32
    %c0_i32_1 = arith.constant 0 : i32
    return %c0_i32, %c0_i32_0 : i32, i32
  }
  func.func @transform_15(%arg0: i32) -> (i32, i32) {
    %c0_i32 = arith.constant 0 : i32
    %c0_i32_0 = arith.constant 0 : i32
    %c0_i32_1 = arith.constant 0 : i32
    return %c0_i32, %c0_i32_0 : i32, i32
  }
  func.func @transform_16(%arg0: i32) -> (i32, i32) {
    %c0_i32 = arith.constant 0 : i32
    %c0_i32_0 = arith.constant 0 : i32
    %c0_i32_1 = arith.constant 0 : i32
    return %c0_i32, %c0_i32_0 : i32, i32
  }
  func.func @transform_17(%arg0: i32) -> (i32, i32) {
    %c0_i32 = arith.constant 0 : i32
    %c0_i32_0 = arith.constant 0 : i32
    %c0_i32_1 = arith.constant 0 : i32
    return %c0_i32, %c0_i32_0 : i32, i32
  }
  func.func @transform_18(%arg0: i32) -> (i32, i32) {
    %c0_i32 = arith.constant 0 : i32
    %c0_i32_0 = arith.constant 0 : i32
    %c0_i32_1 = arith.constant 0 : i32
    return %c0_i32, %c0_i32_0 : i32, i32
  }
  func.func @transform_19(%arg0: i32) -> (i32, i32) {
    %c0_i32 = arith.constant 0 : i32
    %c0_i32_0 = arith.constant 0 : i32
    %c0_i32_1 = arith.constant 0 : i32
    return %c0_i32, %c0_i32_0 : i32, i32
  }
  func.func @transform_20(%arg0: i32) -> (i32, i32) {
    %c0_i32 = arith.constant 0 : i32
    %c0_i32_0 = arith.constant 0 : i32
    %c0_i32_1 = arith.constant 0 : i32
    return %c0_i32, %c0_i32_0 : i32, i32
  }
  func.func @transform_21(%arg0: i32) -> (i32, i32) {
    %c0_i32 = arith.constant 0 : i32
    %c0_i32_0 = arith.constant 0 : i32
    %c0_i32_1 = arith.constant 0 : i32
    return %c0_i32, %c0_i32_0 : i32, i32
  }
  func.func @transform_22(%arg0: i32) -> (i32, i32) {
    %c0_i32 = arith.constant 0 : i32
    %c0_i32_0 = arith.constant 0 : i32
    %c0_i32_1 = arith.constant 0 : i32
    return %c0_i32, %c0_i32_0 : i32, i32
  }
  func.func @transform_23(%arg0: i32) -> (i32, i32) {
    %c0_i32 = arith.constant 0 : i32
    %c0_i32_0 = arith.constant 0 : i32
    %c0_i32_1 = arith.constant 0 : i32
    return %c0_i32, %c0_i32_0 : i32, i32
  }
  func.func @transform_24(%arg0: i32) -> (i32, i32) {
    %c0_i32 = arith.constant 0 : i32
    %c0_i32_0 = arith.constant 0 : i32
    %c0_i32_1 = arith.constant 0 : i32
    return %c0_i32, %c0_i32_0 : i32, i32
  }
  func.func @transform_25(%arg0: i32) -> (i32, i32) {
    %c0_i32 = arith.constant 0 : i32
    %c0_i32_0 = arith.constant 0 : i32
    %c0_i32_1 = arith.constant 0 : i32
    return %c0_i32, %c0_i32_0 : i32, i32
  }
  func.func @transform_26(%arg0: i32) -> (i32, i32) {
    %c0_i32 = arith.constant 0 : i32
    %c0_i32_0 = arith.constant 0 : i32
    %c0_i32_1 = arith.constant 0 : i32
    return %c0_i32, %c0_i32_0 : i32, i32
  }
  func.func @transform_27(%arg0: i32) -> (i32, i32) {
    %c0_i32 = arith.constant 0 : i32
    %c0_i32_0 = arith.constant 0 : i32
    %c0_i32_1 = arith.constant 0 : i32
    return %c0_i32, %c0_i32_0 : i32, i32
  }
  func.func @transform_28(%arg0: i32) -> (i32, i32) {
    %c0_i32 = arith.constant 0 : i32
    %c0_i32_0 = arith.constant 0 : i32
    %c0_i32_1 = arith.constant 0 : i32
    return %c0_i32, %c0_i32_0 : i32, i32
  }
  func.func @transform_29(%arg0: i32) -> (i32, i32) {
    %c0_i32 = arith.constant 0 : i32
    %c0_i32_0 = arith.constant 0 : i32
    %c0_i32_1 = arith.constant 0 : i32
    return %c0_i32, %c0_i32_0 : i32, i32
  }
  func.func @transform_30(%arg0: i32) -> (i32, i32) {
    %c0_i32 = arith.constant 0 : i32
    %c0_i32_0 = arith.constant 0 : i32
    %c0_i32_1 = arith.constant 0 : i32
    return %c0_i32, %c0_i32_0 : i32, i32
  }
  func.func @transform_31(%arg0: i32) -> (i32, i32) {
    %c0_i32 = arith.constant 0 : i32
    %c0_i32_0 = arith.constant 0 : i32
    %c0_i32_1 = arith.constant 0 : i32
    return %c0_i32, %c0_i32_0 : i32, i32
  }
  func.func @transform_32(%arg0: i32) -> (i32, i32) {
    %c0_i32 = arith.constant 0 : i32
    %c0_i32_0 = arith.constant 0 : i32
    %c0_i32_1 = arith.constant 0 : i32
    return %c0_i32, %c0_i32_0 : i32, i32
  }
  func.func @transform_33(%arg0: i32) -> (i32, i32) {
    %c0_i32 = arith.constant 0 : i32
    %c0_i32_0 = arith.constant 0 : i32
    %c0_i32_1 = arith.constant 0 : i32
    return %c0_i32, %c0_i32_0 : i32, i32
  }
  func.func @transform_34(%arg0: i32) -> (i32, i32) {
    %c0_i32 = arith.constant 0 : i32
    %c0_i32_0 = arith.constant 0 : i32
    %c0_i32_1 = arith.constant 0 : i32
    return %c0_i32, %c0_i32_0 : i32, i32
  }
  func.func @transform_35(%arg0: i32) -> (i32, i32) {
    %c0_i32 = arith.constant 0 : i32
    %c0_i32_0 = arith.constant 0 : i32
    %c0_i32_1 = arith.constant 0 : i32
    return %c0_i32, %c0_i32_0 : i32, i32
  }
  func.func @transform_36(%arg0: i32) -> (i32, i32) {
    %c0_i32 = arith.constant 0 : i32
    %c0_i32_0 = arith.constant 0 : i32
    %c0_i32_1 = arith.constant 0 : i32
    return %c0_i32, %c0_i32_0 : i32, i32
  }
  func.func @transform_37(%arg0: i32) -> (i32, i32) {
    %c0_i32 = arith.constant 0 : i32
    %c0_i32_0 = arith.constant 0 : i32
    %c0_i32_1 = arith.constant 0 : i32
    return %c0_i32, %c0_i32_0 : i32, i32
  }
  func.func @transform_38(%arg0: i32) -> (i32, i32) {
    %c0_i32 = arith.constant 0 : i32
    %c0_i32_0 = arith.constant 0 : i32
    %c0_i32_1 = arith.constant 0 : i32
    return %c0_i32, %c0_i32_0 : i32, i32
  }
  func.func @transform_39(%arg0: i32) -> (i32, i32) {
    %c0_i32 = arith.constant 0 : i32
    %c0_i32_0 = arith.constant 0 : i32
    %c0_i32_1 = arith.constant 0 : i32
    return %c0_i32, %c0_i32_0 : i32, i32
  }
  func.func @transform_40(%arg0: i32) -> (i32, i32) {
    %c0_i32 = arith.constant 0 : i32
    %c0_i32_0 = arith.constant 0 : i32
    %c0_i32_1 = arith.constant 0 : i32
    return %c0_i32, %c0_i32_0 : i32, i32
  }
  func.func @transform_41(%arg0: i32) -> (i32, i32) {
    %c0_i32 = arith.constant 0 : i32
    %c0_i32_0 = arith.constant 0 : i32
    %c0_i32_1 = arith.constant 0 : i32
    return %c0_i32, %c0_i32_0 : i32, i32
  }
  func.func @transform_42(%arg0: i32) -> (i32, i32) {
    %c0_i32 = arith.constant 0 : i32
    %c0_i32_0 = arith.constant 0 : i32
    %c0_i32_1 = arith.constant 0 : i32
    return %c0_i32, %c0_i32_0 : i32, i32
  }
  func.func @transform_43(%arg0: i32) -> (i32, i32) {
    %c0_i32 = arith.constant 0 : i32
    %c0_i32_0 = arith.constant 0 : i32
    %c0_i32_1 = arith.constant 0 : i32
    return %c0_i32, %c0_i32_0 : i32, i32
  }
  func.func @transform_44(%arg0: i32) -> (i32, i32) {
    %c0_i32 = arith.constant 0 : i32
    %c0_i32_0 = arith.constant 0 : i32
    %c0_i32_1 = arith.constant 0 : i32
    return %c0_i32, %c0_i32_0 : i32, i32
  }
  func.func @transform_45(%arg0: i32) -> (i32, i32) {
    %c0_i32 = arith.constant 0 : i32
    %c0_i32_0 = arith.constant 0 : i32
    %c0_i32_1 = arith.constant 0 : i32
    return %c0_i32, %c0_i32_0 : i32, i32
  }
  func.func @transform_46(%arg0: i32) -> (i32, i32) {
    %c0_i32 = arith.constant 0 : i32
    %c0_i32_0 = arith.constant 0 : i32
    %c0_i32_1 = arith.constant 0 : i32
    return %c0_i32, %c0_i32_0 : i32, i32
  }
  func.func @transform_47(%arg0: i32) -> (i32, i32) {
    %c0_i32 = arith.constant 0 : i32
    %c0_i32_0 = arith.constant 0 : i32
    %c0_i32_1 = arith.constant 0 : i32
    return %c0_i32, %c0_i32_0 : i32, i32
  }
  func.func @transform_48(%arg0: i32) -> (i32, i32) {
    %c0_i32 = arith.constant 0 : i32
    %c0_i32_0 = arith.constant 0 : i32
    %c0_i32_1 = arith.constant 0 : i32
    return %c0_i32, %c0_i32_0 : i32, i32
  }
  func.func @transform_49(%arg0: i32) -> (i32, i32) {
    %c0_i32 = arith.constant 0 : i32
    %c0_i32_0 = arith.constant 0 : i32
    %c0_i32_1 = arith.constant 0 : i32
    return %c0_i32, %c0_i32_0 : i32, i32
  }
  func.func @transform_50(%arg0: i32) -> (i32, i32) {
    %c0_i32 = arith.constant 0 : i32
    %c0_i32_0 = arith.constant 0 : i32
    %c0_i32_1 = arith.constant 0 : i32
    return %c0_i32, %c0_i32_0 : i32, i32
  }
  func.func @transform_51(%arg0: i32) -> (i32, i32) {
    %c0_i32 = arith.constant 0 : i32
    %c0_i32_0 = arith.constant 0 : i32
    %c0_i32_1 = arith.constant 0 : i32
    return %c0_i32, %c0_i32_0 : i32, i32
  }
  func.func @transform_52(%arg0: i32) -> (i32, i32) {
    %c0_i32 = arith.constant 0 : i32
    %c0_i32_0 = arith.constant 0 : i32
    %c0_i32_1 = arith.constant 0 : i32
    return %c0_i32, %c0_i32_0 : i32, i32
  }
  func.func @transform_53(%arg0: i32) -> (i32, i32) {
    %c0_i32 = arith.constant 0 : i32
    %c0_i32_0 = arith.constant 0 : i32
    %c0_i32_1 = arith.constant 0 : i32
    return %c0_i32, %c0_i32_0 : i32, i32
  }
  func.func @transform_54(%arg0: i32) -> (i32, i32) {
    %c0_i32 = arith.constant 0 : i32
    %c0_i32_0 = arith.constant 0 : i32
    %c0_i32_1 = arith.constant 0 : i32
    return %c0_i32, %c0_i32_0 : i32, i32
  }
  func.func @transform_55(%arg0: i32) -> (i32, i32) {
    %c0_i32 = arith.constant 0 : i32
    %c0_i32_0 = arith.constant 0 : i32
    %c0_i32_1 = arith.constant 0 : i32
    return %c0_i32, %c0_i32_0 : i32, i32
  }
  func.func @transform_56(%arg0: i32) -> (i32, i32) {
    %c0_i32 = arith.constant 0 : i32
    %c0_i32_0 = arith.constant 0 : i32
    %c0_i32_1 = arith.constant 0 : i32
    return %c0_i32, %c0_i32_0 : i32, i32
  }
  func.func @transform_57(%arg0: i32) -> (i32, i32) {
    %c0_i32 = arith.constant 0 : i32
    %c0_i32_0 = arith.constant 0 : i32
    %c0_i32_1 = arith.constant 0 : i32
    return %c0_i32, %c0_i32_0 : i32, i32
  }
  func.func @transform_58(%arg0: i32) -> (i32, i32) {
    %c0_i32 = arith.constant 0 : i32
    %c0_i32_0 = arith.constant 0 : i32
    %c0_i32_1 = arith.constant 0 : i32
    return %c0_i32, %c0_i32_0 : i32, i32
  }
  func.func @transform_59(%arg0: i32) -> (i32, i32) {
    %c0_i32 = arith.constant 0 : i32
    %c0_i32_0 = arith.constant 0 : i32
    %c0_i32_1 = arith.constant 0 : i32
    return %c0_i32, %c0_i32_0 : i32, i32
  }
  func.func @transform_60(%arg0: i32) -> (i32, i32) {
    %c0_i32 = arith.constant 0 : i32
    %c0_i32_0 = arith.constant 0 : i32
    %c0_i32_1 = arith.constant 0 : i32
    return %c0_i32, %c0_i32_0 : i32, i32
  }
  func.func @transform_61(%arg0: i32) -> (i32, i32) {
    %c0_i32 = arith.constant 0 : i32
    %c0_i32_0 = arith.constant 0 : i32
    %c0_i32_1 = arith.constant 0 : i32
    return %c0_i32, %c0_i32_0 : i32, i32
  }
  func.func @transform_62(%arg0: i32) -> (i32, i32) {
    %c0_i32 = arith.constant 0 : i32
    %c0_i32_0 = arith.constant 0 : i32
    %c0_i32_1 = arith.constant 0 : i32
    return %c0_i32, %c0_i32_0 : i32, i32
  }
  func.func @transform_63(%arg0: i32) -> (i32, i32) {
    %c0_i32 = arith.constant 0 : i32
    %c0_i32_0 = arith.constant 0 : i32
    %c0_i32_1 = arith.constant 0 : i32
    return %c0_i32, %c0_i32_0 : i32, i32
  }
  func.func @transform_64(%arg0: i32) -> (i32, i32) {
    %c0_i32 = arith.constant 0 : i32
    %c0_i32_0 = arith.constant 0 : i32
    %c0_i32_1 = arith.constant 0 : i32
    return %c0_i32, %c0_i32_0 : i32, i32
  }
  func.func @transform_65(%arg0: i32) -> (i32, i32) {
    %c0_i32 = arith.constant 0 : i32
    %c0_i32_0 = arith.constant 0 : i32
    %c0_i32_1 = arith.constant 0 : i32
    return %c0_i32, %c0_i32_0 : i32, i32
  }
  func.func @transform_66(%arg0: i32) -> (i32, i32) {
    %c0_i32 = arith.constant 0 : i32
    %c0_i32_0 = arith.constant 0 : i32
    %c0_i32_1 = arith.constant 0 : i32
    return %c0_i32, %c0_i32_0 : i32, i32
  }
  func.func @transform_67(%arg0: i32) -> (i32, i32) {
    %c0_i32 = arith.constant 0 : i32
    %c0_i32_0 = arith.constant 0 : i32
    %c0_i32_1 = arith.constant 0 : i32
    return %c0_i32, %c0_i32_0 : i32, i32
  }
  func.func @transform_68(%arg0: i32) -> (i32, i32) {
    %c0_i32 = arith.constant 0 : i32
    %c0_i32_0 = arith.constant 0 : i32
    %c0_i32_1 = arith.constant 0 : i32
    return %c0_i32, %c0_i32_0 : i32, i32
  }
  func.func @transform_69(%arg0: i32) -> (i32, i32, i32) {
    %c0_i32 = arith.constant 0 : i32
    %c0_i32_0 = arith.constant 0 : i32
    %c0_i32_1 = arith.constant 0 : i32
    return %arg0, %c0_i32, %c0_i32_0 : i32, i32, i32
  }
  func.func @transform_70(%arg0: i32) -> (i32, i32, i32) {
    %c0_i32 = arith.constant 0 : i32
    %c0_i32_0 = arith.constant 0 : i32
    %c0_i32_1 = arith.constant 0 : i32
    return %arg0, %c0_i32, %c0_i32_0 : i32, i32, i32
  }
  func.func @transform_71(%arg0: i32) -> (i32, i32, i32, i32) {
    %c0_i32 = arith.constant 0 : i32
    %c0_i32_0 = arith.constant 0 : i32
    %c0_i32_1 = arith.constant 0 : i32
    %c0_i32_2 = arith.constant 0 : i32
    return %arg0, %c0_i32, %c0_i32_0, %c0_i32_1 : i32, i32, i32, i32
  }
}

</mosaic_0001>

<bundles_post_ra>
// kernel: forward.1
= control target key start
LH: loop header
LB: loop body
LE: loop exit
PB: predicated region body
PF: predicated region fallthrough
CT: control target
= control target key end

     0   :  { %s11450_s6 = smov 1   ;;  %s11451_s10 = smov 2   ;;  %s13474_s0 = inlined_call_operand.smem [shape: u32[72], index: -1, kind: input, shape index: {}] }
   0x1   :  { %s11560_s5 = sld [smem:[%s13474_s0]]   ;;  %s11452_s14 = smov 3  }
   0x2   :  { %s11565_s9 = sld [smem:[%s13474_s0 + %s11450_s6]]   ;;  %s11453_s18 = smov 4  }
   0x3   :  { %s11570_s13 = sld [smem:[%s13474_s0 + %s11451_s10]]   ;;  %s11454_s22 = smov 5  }
   0x4   :  { %s11575_s17 = sld [smem:[%s13474_s0 + %s11452_s14]]   ;;  %s11455_s26 = smov 6  }
   0x5   :  { %s11580_s21 = sld [smem:[%s13474_s0 + %s11453_s18]]   ;;  %s11456_s30 = smov 7  }
   0x6   :  { %s11585_s25 = sld [smem:[%s13474_s0 + %s11454_s22]]   ;;  %s11457_s4 = smov 8  }
   0x7   :  { %13554 = sst [smem:[#allocation61_spill]] %s11560_s5  ;;  %s11458_s10 = smov 9  }
   0x8   :  { %13555 = sst [smem:[#allocation62_spill]] %s11565_s9  ;;  %s11459_s15 = smov 10  }
   0x9   :  { %13556 = sst [smem:[#allocation63_spill]] %s11570_s13  ;;  %s11460_s20 = smov 11  }
   0xa   :  { %13557 = sst [smem:[#allocation64_spill]] %s11575_s17  ;;  %s11462_s1 = smov 13  }
   0xb   :  { %13558 = sst [smem:[#allocation65_spill]] %s11580_s21  ;;  %s11463_s7 = smov 14  }
   0xc   :  { %13559 = sst [smem:[#allocation66_spill]] %s11585_s25  ;;  %s11465_s22 = smov 16  }
   0xd   :  { %s11590_s29 = sld [smem:[%s13474_s0 + %s11455_s26]]   ;;  %s11461_s26 = smov 12  }
   0xe   :  { %s11595_s3 = sld [smem:[%s13474_s0 + %s11456_s30]]   ;;  %s11466_s28 = smov 17  }
   0xf   :  { %s11600_s8 = sld [smem:[%s13474_s0 + %s11457_s4]]  }
  0x10   :  { %s11605_s14 = sld [smem:[%s13474_s0 + %s11458_s10]]  }
  0x11   :  { %s11610_s19 = sld [smem:[%s13474_s0 + %s11459_s15]]   ;;  %s11464_s15 = smov 15  }
  0x12   :  { %s11615_s24 = sld [smem:[%s13474_s0 + %s11460_s20]]  }
  0x13   :  { %13560 = sst [smem:[#allocation67_spill]] %s11590_s29 }
  0x14   :  { %13561 = sst [smem:[#allocation68_spill]] %s11595_s3 }
  0x15   :  { %13562 = sst [smem:[#allocation69_spill]] %s11600_s8 }
  0x16   :  { %13563 = sst [smem:[#allocation70_spill]] %s11605_s14 }
  0x17   :  { %13564 = sst [smem:[#allocation71_spill]] %s11610_s19 }
  0x18   :  { %13565 = sst [smem:[#allocation72_spill]] %s11615_s24 }
  0x19   :  { %s11620_s30 = sld [smem:[%s13474_s0 + %s11461_s26]]  }
  0x1a   :  { %s11625_s6 = sld [smem:[%s13474_s0 + %s11462_s1]]  }
  0x1b   :  { %s11630_s12 = sld [smem:[%s13474_s0 + %s11463_s7]]   ;;  %s11467_s7 = smov 18  }
  0x1c   :  { %s11635_s20 = sld [smem:[%s13474_s0 + %s11464_s15]]   ;;  %s11468_s15 = smov 19  }
  0x1d   :  { %s11640_s27 = sld [smem:[%s13474_s0 + %s11465_s22]]   ;;  %s11469_s22 = smov 20  }
  0x1e   :  { %s11645_s4 = sld [smem:[%s13474_s0 + %s11466_s28]]   ;;  %s11470_s28 = smov 21  }
  0x1f   :  { %13566 = sst [smem:[#allocation73_spill]] %s11620_s30 }
  0x20   :  { %13567 = sst [smem:[#allocation74_spill]] %s11625_s6 }
  0x21   :  { %13568 = sst [smem:[#allocation75_spill]] %s11630_s12 }
  0x22   :  { %13569 = sst [smem:[#allocation76_spill]] %s11635_s20 }
  0x23   :  { %13570 = sst [smem:[#allocation77_spill]] %s11640_s27 }
  0x24   :  { %13571 = sst [smem:[#allocation78_spill]] %s11645_s4 }
  0x25   :  { %s11650_s13 = sld [smem:[%s13474_s0 + %s11467_s7]]   ;;  %s11471_s7 = smov 22  }
  0x26   :  { %s11655_s20 = sld [smem:[%s13474_s0 + %s11468_s15]]   ;;  %s11472_s15 = smov 23  }
  0x27   :  { %s11660_s27 = sld [smem:[%s13474_s0 + %s11469_s22]]   ;;  %s11473_s22 = smov 24  }
  0x28   :  { %s11665_s4 = sld [smem:[%s13474_s0 + %s11470_s28]]   ;;  %s11474_s28 = smov 25  }
  0x29   :  { %s11670_s24 = sld [smem:[%s13474_s0 + %s11471_s7]]   ;;  %s11475_s7 = smov 26  }
  0x2a   :  { %s11675_s6 = sld [smem:[%s13474_s0 + %s11472_s15]]   ;;  %s11476_s15 = smov 27  }
  0x2b   :  { %13572 = sst [smem:[#allocation79_spill]] %s11650_s13 }
  0x2c   :  { %s11685_s12 = sld [smem:[%s13474_s0 + %s11474_s28]]   ;;  %s11478_s28 = smov 29  }
  0x2d   :  { %13573 = sst [smem:[#allocation80_spill]] %s11660_s27 }
  0x2e   :  { %13574 = sst [smem:[#allocation81_spill]] %s11665_s4 }
  0x2f   :  { %13575 = sst [smem:[#allocation82_spill]] %s11670_s24 }
  0x30   :  { %13576 = sst [smem:[#allocation83_spill]] %s11675_s6 }
  0x31   :  { %s11680_s27 = sld [smem:[%s13474_s0 + %s11473_s22]]   ;;  %s11477_s22 = smov 28  }
  0x32   :  { %13578 = sst [smem:[#allocation85_spill]] %s11685_s12 }
  0x33   :  { %s11690_s24 = sld [smem:[%s13474_s0 + %s11475_s7]]   ;;  %s11479_s7 = smov 30  }
  0x34   :  { %s11695_s14 = sld [smem:[%s13474_s0 + %s11476_s15]]   ;;  %s11480_s15 = smov 31  }
  0x35   :  { %s11700_s8 = sld [smem:[%s13474_s0 + %s11477_s22]]   ;;  %s11481_s22 = smov 32  }
  0x36   :  { %s11705_s30 = sld [smem:[%s13474_s0 + %s11478_s28]]   ;;  %s11482_s28 = smov 33  }
  0x37   :  { %13577 = sst [smem:[#allocation84_spill]] %s11680_s27 }
  0x38   :  { %s11715_s19 = sld [smem:[%s13474_s0 + %s11480_s15]]   ;;  %s11484_s15 = smov 35  }
  0x39   :  { %13579 = sst [smem:[#allocation86_spill]] %s11690_s24 }
  0x3a   :  { %13580 = sst [smem:[#allocation87_spill]] %s11695_s14 }
  0x3b   :  { %13581 = sst [smem:[#allocation88_spill]] %s11700_s8 }
  0x3c   :  { %s11710_s24 = sld [smem:[%s13474_s0 + %s11479_s7]]   ;;  %s11483_s7 = smov 34  }
  0x3d   :  { %s11720_s8 = sld [smem:[%s13474_s0 + %s11481_s22]]   ;;  %s11485_s22 = smov 36  }
  0x3e   :  { %13583 = sst [smem:[#allocation90_spill]] %s11715_s19 }
  0x3f   :  { %s11725_s25 = sld [smem:[%s13474_s0 + %s11482_s28]]   ;;  %s11486_s28 = smov 37  }
  0x40   :  { %s11735_s3 = sld [smem:[%s13474_s0 + %s11484_s15]]   ;;  %s11488_s15 = smov 39  }
  0x41   :  { %s11745_s29 = sld [smem:[%s13474_s0 + %s11486_s28]]   ;;  %s11490_s28 = smov 41  }
  0x42   :  { %13582 = sst [smem:[#allocation89_spill]] %s11710_s24 }
  0x43   :  { %13584 = sst [smem:[#allocation91_spill]] %s11720_s8 }
  0x44   :  { %s11730_s24 = sld [smem:[%s13474_s0 + %s11483_s7]]   ;;  %s11487_s7 = smov 38  }
  0x45   :  { %s11740_s8 = sld [smem:[%s13474_s0 + %s11485_s22]]   ;;  %s11489_s22 = smov 40  }
  0x46   :  { %13586 = sst [smem:[#allocation93_spill]] %s11735_s3 }
  0x47   :  { %13588 = sst [smem:[#allocation95_spill]] %s11745_s29 }
  0x48   :  { %s11750_s9 = sld [smem:[%s13474_s0 + %s11487_s7]]   ;;  %s11491_s7 = smov 42  }
  0x49   :  { %s11755_s5 = sld [smem:[%s13474_s0 + %s11488_s15]]   ;;  %s11492_s15 = smov 43  }
  0x4a   :  { %13585 = sst [smem:[#allocation92_spill]] %s11730_s24 }
  0x4b   :  { %13587 = sst [smem:[#allocation94_spill]] %s11740_s8 }
  0x4c   :  { %s11760_s8 = sld [smem:[%s13474_s0 + %s11489_s22]]   ;;  %s11493_s22 = smov 44  }
  0x4d   :  { %s11765_s17 = sld [smem:[%s13474_s0 + %s11490_s28]]   ;;  %s11494_s28 = smov 45  }
  0x4e   :  { %13589 = sst [smem:[#allocation96_spill]] %s11750_s9 }
  0x4f   :  { %13590 = sst [smem:[#allocation97_spill]] %s11755_s5 }
  0x50   :  { %s11770_s9 = sld [smem:[%s13474_s0 + %s11491_s7]]   ;;  %s11495_s7 = smov 46  }
  0x51   :  { %s11775_s21 = sld [smem:[%s13474_s0 + %s11492_s15]]   ;;  %s11496_s15 = smov 47  }
  0x52   :  { %13591 = sst [smem:[#allocation98_spill]] %s11760_s8 }
  0x53   :  { %13592 = sst [smem:[#allocation99_spill]] %s11765_s17 }
  0x54   :  { %s11780_s8 = sld [smem:[%s13474_s0 + %s11493_s22]]   ;;  %s11497_s22 = smov 48  }
  0x55   :  { %s11785_s17 = sld [smem:[%s13474_s0 + %s11494_s28]]   ;;  %s11498_s28 = smov 49  }
  0x56   :  { %13593 = sst [smem:[#allocation100_spill]] %s11770_s9 }
  0x57   :  { %s11790_s9 = sld [smem:[%s13474_s0 + %s11495_s7]]   ;;  %s11499_s7 = smov 50  }
  0x58   :  { %s11795_s29 = sld [smem:[%s13474_s0 + %s11496_s15]]   ;;  %s11500_s15 = smov 51  }
  0x59   :  { %s11815_s24 = sld [smem:[%s13474_s0 + %s11500_s15]]   ;;  %s11504_s15 = smov 55  }
  0x5a   :  { %13594 = sst [smem:[#allocation101_spill]] %s11780_s8 }
  0x5b   :  { %13595 = sst [smem:[#allocation102_spill]] %s11785_s17 }
  0x5c   :  { %s11800_s8 = sld [smem:[%s13474_s0 + %s11497_s22]]   ;;  %s11501_s22 = smov 52  }
  0x5d   :  { %13596 = sst [smem:[#allocation103_spill]] %s11790_s9 }
  0x5e   :  { %s11805_s17 = sld [smem:[%s13474_s0 + %s11498_s28]]   ;;  %s11502_s28 = smov 53  }
  0x5f   :  { %s11810_s9 = sld [smem:[%s13474_s0 + %s11499_s7]]   ;;  %s11503_s7 = smov 54  }
  0x60   :  { %s11835_s19 = sld [smem:[%s13474_s0 + %s11504_s15]]   ;;  %s11508_s15 = smov 59  }
  0x61   :  { %s11855_s14 = sld [smem:[%s13474_s0 + %s11508_s15]]   ;;  %s11512_s15 = smov 63  }
  0x62   :  { %13597 = sst [smem:[#allocation104_spill]] %s11800_s8 }
  0x63   :  { %s11820_s8 = sld [smem:[%s13474_s0 + %s11501_s22]]   ;;  %s11505_s22 = smov 56  }
  0x64   :  { %13598 = sst [smem:[#allocation105_spill]] %s11805_s17 }
  0x65   :  { %13599 = sst [smem:[#allocation106_spill]] %s11810_s9 }
  0x66   :  { %s11825_s17 = sld [smem:[%s13474_s0 + %s11502_s28]]   ;;  %s11506_s28 = smov 57  }
  0x67   :  { %s11830_s9 = sld [smem:[%s13474_s0 + %s11503_s7]]   ;;  %s11507_s7 = smov 58  }
  0x68   :  { %13606 = sst [smem:[#allocation113_spill]] %s11855_s14 }
  0x69   :  { %13600 = sst [smem:[#allocation107_spill]] %s11820_s8 }
  0x6a   :  { %s11840_s8 = sld [smem:[%s13474_s0 + %s11505_s22]]   ;;  %s11509_s22 = smov 60  }
  0x6b   :  { %s11875_s27 = sld [smem:[%s13474_s0 + %s11512_s15]]   ;;  %s11516_s15 = smov 67  }
  0x6c   :  { %13601 = sst [smem:[#allocation108_spill]] %s11825_s17 }
  0x6d   :  { %13602 = sst [smem:[#allocation109_spill]] %s11830_s9 }
  0x6e   :  { %s11845_s17 = sld [smem:[%s13474_s0 + %s11506_s28]]   ;;  %s11510_s28 = smov 61  }
  0x6f   :  { %s11850_s9 = sld [smem:[%s13474_s0 + %s11507_s7]]   ;;  %s11511_s7 = smov 62  }
  0x70   :  { %13603 = sst [smem:[#allocation110_spill]] %s11840_s8 }
  0x71   :  { %s11860_s8 = sld [smem:[%s13474_s0 + %s11509_s22]]   ;;  %s11513_s22 = smov 64  }
  0x72   :  { %s11895_s4 = sld [smem:[%s13474_s0 + %s11516_s15]]   ;;  %s11520_s15 = smov 71  }
  0x74   :  { %13604 = sst [smem:[#allocation111_spill]] %s11845_s17 }
  0x75   :  { %13605 = sst [smem:[#allocation112_spill]] %s11850_s9 }
  0x76   :  { %s11865_s17 = sld [smem:[%s13474_s0 + %s11510_s28]]   ;;  %s11514_s28 = smov 65  }
  0x77   :  { %13607 = sst [smem:[#allocation114_spill]] %s11860_s8 }
  0x78   :  { %s11870_s9 = sld [smem:[%s13474_s0 + %s11511_s7]]   ;;  %s11515_s7 = smov 66  }
  0x79   :  { %s11880_s8 = sld [smem:[%s13474_s0 + %s11513_s22]]   ;;  %s11517_s22 = smov 68  }
  0x7a   :  { %13613 = sst [smem:[#allocation120_spill]] %s11895_s4 }
  0x7b   :  { %s11915_s4 = sld [smem:[%s13474_s0 + %s11520_s15]]  }
  0x7c   :  { %13608 = sst [smem:[#allocation115_spill]] %s11865_s17 }
  0x7d   :  { %s11885_s17 = sld [smem:[%s13474_s0 + %s11514_s28]]   ;;  %s11518_s28 = smov 69  }
  0x7e   :  { %13609 = sst [smem:[#allocation116_spill]] %s11870_s9 }
  0x7f   :  { %13610 = sst [smem:[#allocation117_spill]] %s11880_s8 }
  0x80   :  { %s11890_s9 = sld [smem:[%s13474_s0 + %s11515_s7]]   ;;  %s11519_s7 = smov 70  }
  0x81   :  { %s11900_s8 = sld [smem:[%s13474_s0 + %s11517_s22]]  }
  0x83   :  { %13611 = sst [smem:[#allocation118_spill]] %s11885_s17 }
  0x84   :  { %s11905_s17 = sld [smem:[%s13474_s0 + %s11518_s28]]  }
  0x86   :  { %13612 = sst [smem:[#allocation119_spill]] %s11890_s9 }
  0x87   :  { %s11910_s9 = sld [smem:[%s13474_s0 + %s11519_s7]]  }
  0x88   :  { %149 = vsyncpa [#allocation4], 0 }
  0x89   :  { %150 = vsyncpa [#allocation6], 0 }
  0x8a   :  { %151 = vsyncpa [#allocation9], 0 }
  0x8b   :  { %152 = vsyncpa [#allocation12], 0 }
  0x8c   :  { %153 = vsyncpa [#allocation15], 0 }
  0x8d   :  { %154 = vsyncpa [#allocation18], 0 }
  0x8e   :  { %155 = vsyncpa [#allocation21], 0 }
  0x8f   :  { %156 = vsyncpa [#allocation24], 0 }
  0x90   :  { %157 = vsyncpa [#allocation27], 0 }
  0x91   :  { %158 = vsyncpa [#allocation30], 0 }
  0x92   :  { %159 = vsyncpa [#allocation33], 0 }
  0x93   :  { %160 = vsyncpa [#allocation36], 0 }
  0x94   :  { %161 = vsyncpa [#allocation39], 0 }
  0x95   :  { %162 = vsyncpa [#allocation42], 0 }
  0x96   :  { %163 = vsyncpa [#allocation45], 0  ;;  %s11917_s22 = smov 0  }
  0x97 LB: > { %s13614_s14 = sld [smem:[#allocation113_spill]]  ;;  %s13615_s13 = sld [smem:[#allocation79_spill]]  ;;  %s11448_s22 = sphi %s11917_s22, %s169_s22  }
  0x98   : > { %s13616_s12 = sld [smem:[#allocation85_spill]]  ;;  %s13617_s6 = sld [smem:[#allocation83_spill]] }
  0x99   : > { %s13618_s5 = sld [smem:[#allocation97_spill]]  ;;  %s13619_s3 = sld [smem:[#allocation93_spill]] }
  0x9a   : > { %s11521_s0 = smov [#allocation5]   ;;  %s11923_s26 = sadd.s32 4294967295, %s11448_s22  }
  0x9b   : > { %s1787_s23 = sshll.u32 %s11521_s0, 4  ;;  %p8431_p0 = scmp.ge.s32.totalorder %s11448_s22, 1  ;;  %s11928_s23 = int_to_ptr.vmem [resolvable:$true] %s1787_s23 }
  0x9c   : > { %p1721_p1 = scmp.lt.s32.totalorder %s11448_s22, 3  ;;  %p13517_p2 = scmp.eq.s32.totalorder %s11923_s26, 0 }
  0x9d   : > { %s11522_s1 = smov [#allocation8]   ;;  %s11523_s7 = smov [#allocation11]  }
  0x9e   : > { %p11930_p3 = pnand %p8431_p0, %p1721_p1  ;;  %s1815_s2 = sshll.u32 %s11522_s1, 4  ;;  %s11936_s2 = int_to_ptr.vmem [resolvable:$true] %s1815_s2 }
  0x9f   : > { %s1837_s10 = sshll.u32 %s11523_s7, 4  ;;  %s11524_s15 = smov [#allocation14]   ;;  %s11944_s10 = int_to_ptr.vmem [resolvable:$true] %s1837_s10 }
  0xa0   : > { %s13620_s28 = scalar_select %p11930_p3, 1, 0 }
  0xa1   : > { %p10175_p4 = pneg %p11930_p3  ;;  %s1865_s16 = sshll.u32 %s11524_s15, 4  ;;  %s11946_s16 = int_to_ptr.vmem [resolvable:$true] %s1865_s16 }
  0xa2   : > { %s10598_s18 = scalar_lea.hbm %s11655_s20, 16 }
  0xa3   : > { %p11940_p5 = pnand %p13517_p2, %p10175_p4  ;;  %p10599_p6 = scmp.ne.s32.totalorder %s11655_s20, %s10598_s18 }
  0xa4   : > { %p10605_p10 = scmp.lt.u32.totalorder %s10598_s18, %s11655_s20 }
  0xa5   : > { %p11952_p7 = pneg %p11940_p5 }
  0xa7   : > { %p10601_p8 = pnand %p11952_p7, %p10599_p6 }
  0xa9   : > { %p10602_p9 = pneg %p10601_p8 }
  0xab   : > { %p10607_p11 = pnand %p10605_p10, %p10602_p9 }
  0xad   : > { %10610 = shalt.err (!%p10607_p11)
}
  0xae   : > { %s10611_s1 = scalar_lea.vmem %s11928_s23, 16  ;;  %s10618_s7 = scalar_lea.vmem %s11928_s23, 32 }
  0xaf   : > { %p10612_p12 = scmp.ne.s32.totalorder %s11928_s23, %s10611_s1  ;;  %p10619_p1 = scmp.lt.s32.totalorder %s11928_s23, %s11928_s23 }
  0xb0   : > { %p10620_p4 = scmp.lt.s32.totalorder %s10618_s7, %s10611_s1 }
  0xb1   : > { %p10614_p13 = pnand %p10612_p12, %p11952_p7 }
  0xb2   : > { %p10621_p2 = por %p10620_p4, %p10619_p1 }
  0xb3   : > { %p10615_p0 = pneg %p10614_p13 }
  0xb5   : > { %p10622_p6 = pnand %p10621_p2, %p10615_p0 }
  0xb7   : > { %10625 = shalt.err (!%p10622_p6)
}
  0xb8   : > { %10181 = dma.hbm_to_vmem [thread:$0]  (!%p11940_p5), %s11655_s20, 16, %s11928_s23, [#allocation6]  }
  0xb9   : > { %s10626_s15 = scalar_lea.hbm %s13617_s6, 16 }
  0xba   : > { %p10627_p8 = scmp.ne.s32.totalorder %s13617_s6, %s10626_s15  ;;  %p10633_p11 = scmp.lt.u32.totalorder %s10626_s15, %s13617_s6 }
  0xbc   : > { %p10629_p9 = pnand %p10627_p8, %p11952_p7 }
  0xbe   : > { %p10630_p10 = pneg %p10629_p9 }
  0xc0   : > { %p10635_p12 = pnand %p10633_p11, %p10630_p10 }
  0xc2   : > { %10638 = shalt.err (!%p10635_p12)
}
  0xc3   : > { %s10639_s18 = scalar_lea.vmem %s11936_s2, 16  ;;  %s10646_s1 = scalar_lea.vmem %s11936_s2, 32 }
  0xc4   : > { %p10640_p2 = scmp.ne.s32.totalorder %s11936_s2, %s10639_s18  ;;  %p10647_p1 = scmp.lt.s32.totalorder %s11936_s2, %s11936_s2 }
  0xc5   : > { %p10648_p4 = scmp.lt.s32.totalorder %s10646_s1, %s10639_s18 }
  0xc6   : > { %p10642_p13 = pnand %p10640_p2, %p11952_p7 }
  0xc7   : > { %p10649_p6 = por %p10648_p4, %p10647_p1 }
  0xc8   : > { %p10643_p0 = pneg %p10642_p13 }
  0xca   : > { %p10650_p8 = pnand %p10649_p6, %p10643_p0 }
  0xcc   : > { %10653 = shalt.err (!%p10650_p8)
}
  0xcd   : > { %10187 = dma.hbm_to_vmem [thread:$0]  (!%p11940_p5), %s13617_s6, 16, %s11936_s2, [#allocation9]  }
  0xce   : > { %s10654_s23 = scalar_lea.hbm %s13616_s12, 16 }
  0xcf   : > { %p10655_p9 = scmp.ne.s32.totalorder %s13616_s12, %s10654_s23  ;;  %p10661_p12 = scmp.lt.u32.totalorder %s10654_s23, %s13616_s12 }
  0xd1   : > { %p10657_p10 = pnand %p10655_p9, %p11952_p7 }
  0xd3   : > { %p10658_p11 = pneg %p10657_p10 }
  0xd5   : > { %p10663_p2 = pnand %p10661_p12, %p10658_p11 }
  0xd7   : > { %10666 = shalt.err (!%p10663_p2)
}
  0xd8   : > { %s10667_s7 = scalar_lea.vmem %s11944_s10, 16  ;;  %s10674_s15 = scalar_lea.vmem %s11944_s10, 32 }
  0xd9   : > { %p10668_p13 = scmp.ne.s32.totalorder %s11944_s10, %s10667_s7  ;;  %p10675_p4 = scmp.lt.s32.totalorder %s11944_s10, %s11944_s10 }
  0xda   : > { %p10676_p6 = scmp.lt.s32.totalorder %s10674_s15, %s10667_s7 }
  0xdb   : > { %p10670_p0 = pnand %p10668_p13, %p11952_p7 }
  0xdc   : > { %p10677_p8 = por %p10676_p6, %p10675_p4 }
  0xdd   : > { %p10671_p1 = pneg %p10670_p0 }
  0xdf   : > { %p10678_p9 = pnand %p10677_p8, %p10671_p1 }
  0xe1   : > { %10681 = shalt.err (!%p10678_p9)
}
  0xe2   : > { %10193 = dma.hbm_to_vmem [thread:$0]  (!%p11940_p5), %s13616_s12, 16, %s11944_s10, [#allocation12]  }
  0xe3   : > { %s10682_s2 = scalar_lea.hbm %s11705_s30, 16 }
  0xe4   : > { %p10683_p10 = scmp.ne.s32.totalorder %s11705_s30, %s10682_s2  ;;  %p10689_p2 = scmp.lt.u32.totalorder %s10682_s2, %s11705_s30 }
  0xe6   : > { %p10685_p11 = pnand %p10683_p10, %p11952_p7 }
  0xe8   : > { %p10686_p12 = pneg %p10685_p11 }
  0xea   : > { %p10691_p13 = pnand %p10689_p2, %p10686_p12 }
  0xec   : > { %10694 = shalt.err (!%p10691_p13)
}
  0xed   : > { %s10695_s18 = scalar_lea.vmem %s11946_s16, 16  ;;  %s10702_s1 = scalar_lea.vmem %s11946_s16, 32 }
  0xee   : > { %p10696_p0 = scmp.ne.s32.totalorder %s11946_s16, %s10695_s18  ;;  %p10703_p6 = scmp.lt.s32.totalorder %s11946_s16, %s11946_s16 }
  0xef   : > { %p10704_p8 = scmp.lt.s32.totalorder %s10702_s1, %s10695_s18 }
  0xf0   : > { %p10698_p1 = pnand %p10696_p0, %p11952_p7 }
  0xf1   : > { %p10705_p9 = por %p10704_p8, %p10703_p6 }
  0xf2   : > { %p10699_p4 = pneg %p10698_p1 }
  0xf4   : > { %p10706_p10 = pnand %p10705_p9, %p10699_p4 }
  0xf6   : > { %10709 = shalt.err (!%p10706_p10)
}
  0xf7   : > { %10199 = dma.hbm_to_vmem [thread:$0]  (!%p11940_p5), %s11705_s30, 16, %s11946_s16, [#allocation15]  }
  0xf8   : > { %s11525_s10 = smov [#allocation17]   ;;  %s11526_s7 = smov [#allocation20]  }
  0xf9   : > { %s1893_s23 = sshll.u32 %s11525_s10, 4  ;;  %s1915_s15 = sshll.u32 %s11526_s7, 4  ;;  %s1894_s23 = int_to_ptr.vmem [resolvable:$true] %s1893_s23  ;;  %s1916_s15 = int_to_ptr.vmem [resolvable:$true] %s1915_s15 }
  0xfa   : > { %s10710_s2 = scalar_lea.hbm %s11725_s25, 16 }
  0xfb   : > { %p10711_p11 = scmp.ne.s32.totalorder %s11725_s25, %s10710_s2  ;;  %p10717_p13 = scmp.lt.u32.totalorder %s10710_s2, %s11725_s25 }
  0xfd   : > { %p10713_p12 = pnand %p10711_p11, %p11952_p7 }
  0xff   : > { %p10714_p2 = pneg %p10713_p12 }
 0x101   : > { %p10719_p0 = pnand %p10717_p13, %p10714_p2 }
 0x103   : > { %10722 = shalt.err (!%p10719_p0)
}
 0x104   : > { %s10723_s18 = scalar_lea.vmem %s1894_s23, 16  ;;  %s10730_s16 = scalar_lea.vmem %s1894_s23, 32 }
 0x105   : > { %p10724_p1 = scmp.ne.s32.totalorder %s1894_s23, %s10723_s18  ;;  %p10731_p8 = scmp.lt.s32.totalorder %s1894_s23, %s1894_s23 }
 0x106   : > { %p10732_p9 = scmp.lt.s32.totalorder %s10730_s16, %s10723_s18 }
 0x107   : > { %p10726_p4 = pnand %p10724_p1, %p11952_p7 }
 0x108   : > { %p10733_p10 = por %p10732_p9, %p10731_p8 }
 0x109   : > { %p10727_p6 = pneg %p10726_p4 }
 0x10b   : > { %p10734_p3 = pnand %p10733_p10, %p10727_p6 }
 0x10d   : > { %10737 = shalt.err (!%p10734_p3)
}
 0x10e   : > { %10205 = dma.hbm_to_vmem [thread:$0]  (!%p11940_p5), %s11725_s25, 16, %s1894_s23, [#allocation18]  }
 0x10f   : > { %s10738_s1 = scalar_lea.hbm %s13619_s3, 16 }
 0x110   : > { %p10739_p11 = scmp.ne.s32.totalorder %s13619_s3, %s10738_s1  ;;  %p10745_p13 = scmp.lt.u32.totalorder %s10738_s1, %s13619_s3 }
 0x112   : > { %p10741_p12 = pnand %p10739_p11, %p11952_p7 }
 0x114   : > { %p10742_p2 = pneg %p10741_p12 }
 0x116   : > { %p10747_p0 = pnand %p10745_p13, %p10742_p2 }
 0x118   : > { %10750 = shalt.err (!%p10747_p0)
}
 0x119   : > { %s10751_s10 = scalar_lea.vmem %s1916_s15, 16  ;;  %s10758_s7 = scalar_lea.vmem %s1916_s15, 32 }
 0x11a   : > { %p10752_p3 = scmp.ne.s32.totalorder %s1916_s15, %s10751_s10  ;;  %p10759_p6 = scmp.lt.s32.totalorder %s1916_s15, %s1916_s15 }
 0x11b   : > { %p10760_p8 = scmp.lt.s32.totalorder %s10758_s7, %s10751_s10 }
 0x11c   : > { %p10754_p1 = pnand %p10752_p3, %p11952_p7 }
 0x11d   : > { %p10761_p9 = por %p10760_p8, %p10759_p6 }
 0x11e   : > { %p10755_p4 = pneg %p10754_p1 }
 0x120   : > { %p10762_p10 = pnand %p10761_p9, %p10755_p4 }
 0x122   : > { %10765 = shalt.err (!%p10762_p10)
}
 0x123   : > { %10211 = dma.hbm_to_vmem [thread:$0]  (!%p11940_p5), %s13619_s3, 16, %s1916_s15, [#allocation21]  }
 0x124   : > { %s11527_s23 = smov [#allocation23]   ;;  %s11528_s18 = smov [#allocation26]  }
 0x125   : > { %s1943_s2 = sshll.u32 %s11527_s23, 4  ;;  %s1971_s16 = sshll.u32 %s11528_s18, 4  ;;  %s1944_s2 = int_to_ptr.vmem [resolvable:$true] %s1943_s2  ;;  %s1972_s16 = int_to_ptr.vmem [resolvable:$true] %s1971_s16 }
 0x126   : > { %s10766_s1 = scalar_lea.hbm %s13618_s5, 16 }
 0x127   : > { %p10767_p11 = scmp.ne.s32.totalorder %s13618_s5, %s10766_s1  ;;  %p10773_p13 = scmp.lt.u32.totalorder %s10766_s1, %s13618_s5 }
 0x129   : > { %p10769_p12 = pnand %p10767_p11, %p11952_p7 }
 0x12b   : > { %p10770_p2 = pneg %p10769_p12 }
 0x12d   : > { %p10775_p0 = pnand %p10773_p13, %p10770_p2 }
 0x12f   : > { %10778 = shalt.err (!%p10775_p0)
}
 0x130   : > { %s10779_s10 = scalar_lea.vmem %s1944_s2, 16  ;;  %s10786_s15 = scalar_lea.vmem %s1944_s2, 32 }
 0x131   : > { %p10780_p3 = scmp.ne.s32.totalorder %s1944_s2, %s10779_s10  ;;  %p10787_p6 = scmp.lt.s32.totalorder %s1944_s2, %s1944_s2 }
 0x132   : > { %p10788_p8 = scmp.lt.s32.totalorder %s10786_s15, %s10779_s10 }
 0x133   : > { %p10782_p1 = pnand %p10780_p3, %p11952_p7 }
 0x134   : > { %p10789_p9 = por %p10788_p8, %p10787_p6 }
 0x135   : > { %p10783_p4 = pneg %p10782_p1 }
 0x137   : > { %p10790_p10 = pnand %p10789_p9, %p10783_p4 }
 0x139   : > { %10793 = shalt.err (!%p10790_p10)
}
 0x13a   : > { %10217 = dma.hbm_to_vmem [thread:$0]  (!%p11940_p5), %s13618_s5, 16, %s1944_s2, [#allocation24]  }
 0x13b   : > { %s10794_s7 = scalar_lea.hbm %s11775_s21, 16 }
 0x13c   : > { %p10795_p11 = scmp.ne.s32.totalorder %s11775_s21, %s10794_s7  ;;  %p10801_p13 = scmp.lt.u32.totalorder %s10794_s7, %s11775_s21 }
 0x13e   : > { %p10797_p12 = pnand %p10795_p11, %p11952_p7 }
 0x140   : > { %p10798_p2 = pneg %p10797_p12 }
 0x142   : > { %p10803_p0 = pnand %p10801_p13, %p10798_p2 }
 0x144   : > { %10806 = shalt.err (!%p10803_p0)
}
 0x145   : > { %s10807_s23 = scalar_lea.vmem %s1972_s16, 16  ;;  %s10814_s18 = scalar_lea.vmem %s1972_s16, 32 }
 0x146   : > { %p10808_p3 = scmp.ne.s32.totalorder %s1972_s16, %s10807_s23  ;;  %p10815_p6 = scmp.lt.s32.totalorder %s1972_s16, %s1972_s16 }
 0x147   : > { %p10816_p8 = scmp.lt.s32.totalorder %s10814_s18, %s10807_s23 }
 0x148   : > { %p10810_p1 = pnand %p10808_p3, %p11952_p7 }
 0x149   : > { %p10817_p9 = por %p10816_p8, %p10815_p6 }
 0x14a   : > { %p10811_p4 = pneg %p10810_p1 }
 0x14c   : > { %p10818_p10 = pnand %p10817_p9, %p10811_p4 }
 0x14e   : > { %10821 = shalt.err (!%p10818_p10)
}
 0x14f   : > { %10223 = dma.hbm_to_vmem [thread:$0]  (!%p11940_p5), %s11775_s21, 16, %s1972_s16, [#allocation27]  }
 0x150   : > { %s11529_s2 = smov [#allocation29]   ;;  %s11530_s10 = smov [#allocation32]  }
 0x151   : > { %s1999_s1 = sshll.u32 %s11529_s2, 4  ;;  %s2027_s15 = sshll.u32 %s11530_s10, 4  ;;  %s2000_s1 = int_to_ptr.vmem [resolvable:$true] %s1999_s1  ;;  %s2028_s15 = int_to_ptr.vmem [resolvable:$true] %s2027_s15 }
 0x152   : > { %s10822_s7 = scalar_lea.hbm %s11795_s29, 16 }
 0x153   : > { %p10823_p11 = scmp.ne.s32.totalorder %s11795_s29, %s10822_s7  ;;  %p10829_p13 = scmp.lt.u32.totalorder %s10822_s7, %s11795_s29 }
 0x155   : > { %p10825_p12 = pnand %p10823_p11, %p11952_p7 }
 0x157   : > { %p10826_p2 = pneg %p10825_p12 }
 0x159   : > { %p10831_p0 = pnand %p10829_p13, %p10826_p2 }
 0x15b   : > { %10834 = shalt.err (!%p10831_p0)
}
 0x15c   : > { %s10835_s23 = scalar_lea.vmem %s2000_s1, 16  ;;  %s10842_s16 = scalar_lea.vmem %s2000_s1, 32 }
 0x15d   : > { %p10836_p3 = scmp.ne.s32.totalorder %s2000_s1, %s10835_s23  ;;  %p10843_p6 = scmp.lt.s32.totalorder %s2000_s1, %s2000_s1 }
 0x15e   : > { %p10844_p8 = scmp.lt.s32.totalorder %s10842_s16, %s10835_s23 }
 0x15f   : > { %p10838_p1 = pnand %p10836_p3, %p11952_p7 }
 0x160   : > { %p10845_p9 = por %p10844_p8, %p10843_p6 }
 0x161   : > { %p10839_p4 = pneg %p10838_p1 }
 0x163   : > { %p10846_p10 = pnand %p10845_p9, %p10839_p4 }
 0x165   : > { %10849 = shalt.err (!%p10846_p10)
}
 0x166   : > { %10229 = dma.hbm_to_vmem [thread:$0]  (!%p11940_p5), %s11795_s29, 16, %s2000_s1, [#allocation30]  }
 0x167   : > { %s10850_s18 = scalar_lea.hbm %s11815_s24, 16 }
 0x168   : > { %p10851_p11 = scmp.ne.s32.totalorder %s11815_s24, %s10850_s18  ;;  %p10857_p13 = scmp.lt.u32.totalorder %s10850_s18, %s11815_s24 }
 0x16a   : > { %p10853_p12 = pnand %p10851_p11, %p11952_p7 }
 0x16c   : > { %p10854_p2 = pneg %p10853_p12 }
 0x16e   : > { %p10859_p0 = pnand %p10857_p13, %p10854_p2 }
 0x170   : > { %10862 = shalt.err (!%p10859_p0)
}
 0x171   : > { %s10863_s2 = scalar_lea.vmem %s2028_s15, 16  ;;  %s10870_s10 = scalar_lea.vmem %s2028_s15, 32 }
 0x172   : > { %p10864_p3 = scmp.ne.s32.totalorder %s2028_s15, %s10863_s2  ;;  %p10871_p6 = scmp.lt.s32.totalorder %s2028_s15, %s2028_s15 }
 0x173   : > { %p10872_p8 = scmp.lt.s32.totalorder %s10870_s10, %s10863_s2 }
 0x174   : > { %p10866_p1 = pnand %p10864_p3, %p11952_p7 }
 0x175   : > { %p10873_p9 = por %p10872_p8, %p10871_p6 }
 0x176   : > { %p10867_p4 = pneg %p10866_p1 }
 0x178   : > { %p10874_p10 = pnand %p10873_p9, %p10867_p4 }
 0x17a   : > { %10877 = shalt.err (!%p10874_p10)
}
 0x17b   : > { %10235 = dma.hbm_to_vmem [thread:$0]  (!%p11940_p5), %s11815_s24, 16, %s2028_s15, [#allocation33]  }
 0x17c   : > { %s11531_s1 = smov [#allocation35]   ;;  %s11532_s23 = smov [#allocation38]  }
 0x17d   : > { %s2055_s7 = sshll.u32 %s11531_s1, 4  ;;  %s2083_s16 = sshll.u32 %s11532_s23, 4  ;;  %s2056_s7 = int_to_ptr.vmem [resolvable:$true] %s2055_s7  ;;  %s2084_s16 = int_to_ptr.vmem [resolvable:$true] %s2083_s16 }
 0x17e   : > { %s10878_s18 = scalar_lea.hbm %s11835_s19, 16 }
 0x17f   : > { %p10879_p11 = scmp.ne.s32.totalorder %s11835_s19, %s10878_s18  ;;  %p10885_p13 = scmp.lt.u32.totalorder %s10878_s18, %s11835_s19 }
 0x181   : > { %p10881_p12 = pnand %p10879_p11, %p11952_p7 }
 0x183   : > { %p10882_p2 = pneg %p10881_p12 }
 0x185   : > { %p10887_p0 = pnand %p10885_p13, %p10882_p2 }
 0x187   : > { %10890 = shalt.err (!%p10887_p0)
}
 0x188   : > { %s10891_s2 = scalar_lea.vmem %s2056_s7, 16  ;;  %s10898_s15 = scalar_lea.vmem %s2056_s7, 32 }
 0x189   : > { %p10892_p3 = scmp.ne.s32.totalorder %s2056_s7, %s10891_s2  ;;  %p10899_p6 = scmp.lt.s32.totalorder %s2056_s7, %s2056_s7 }
 0x18a   : > { %p10900_p8 = scmp.lt.s32.totalorder %s10898_s15, %s10891_s2 }
 0x18b   : > { %p10894_p1 = pnand %p10892_p3, %p11952_p7 }
 0x18c   : > { %p10901_p9 = por %p10900_p8, %p10899_p6 }
 0x18d   : > { %p10895_p4 = pneg %p10894_p1 }
 0x18f   : > { %p10902_p10 = pnand %p10901_p9, %p10895_p4 }
 0x191   : > { %10905 = shalt.err (!%p10902_p10)
}
 0x192   : > { %10241 = dma.hbm_to_vmem [thread:$0]  (!%p11940_p5), %s11835_s19, 16, %s2056_s7, [#allocation36]  }
 0x193   : > { %s10906_s10 = scalar_lea.hbm %s13614_s14, 16 }
 0x194   : > { %p10907_p11 = scmp.ne.s32.totalorder %s13614_s14, %s10906_s10  ;;  %p10913_p13 = scmp.lt.u32.totalorder %s10906_s10, %s13614_s14 }
 0x196   : > { %p10909_p12 = pnand %p10907_p11, %p11952_p7 }
 0x198   : > { %p10910_p2 = pneg %p10909_p12 }
 0x19a   : > { %p10915_p0 = pnand %p10913_p13, %p10910_p2 }
 0x19c   : > { %10918 = shalt.err (!%p10915_p0)
}
 0x19d   : > { %s10919_s1 = scalar_lea.vmem %s2084_s16, 16  ;;  %s10926_s23 = scalar_lea.vmem %s2084_s16, 32 }
 0x19e   : > { %p10920_p3 = scmp.ne.s32.totalorder %s2084_s16, %s10919_s1  ;;  %p10927_p6 = scmp.lt.s32.totalorder %s2084_s16, %s2084_s16 }
 0x19f   : > { %p10928_p8 = scmp.lt.s32.totalorder %s10926_s23, %s10919_s1 }
 0x1a0   : > { %p10922_p1 = pnand %p10920_p3, %p11952_p7 }
 0x1a1   : > { %p10929_p9 = por %p10928_p8, %p10927_p6 }
 0x1a2   : > { %p10923_p4 = pneg %p10922_p1 }
 0x1a4   : > { %p10930_p10 = pnand %p10929_p9, %p10923_p4 }
 0x1a6   : > { %10933 = shalt.err (!%p10930_p10)
}
 0x1a7   : > { %10247 = dma.hbm_to_vmem [thread:$0]  (!%p11940_p5), %s13614_s14, 16, %s2084_s16, [#allocation39]  }
 0x1a8   : > { %s11533_s7 = smov [#allocation41]   ;;  %s11534_s2 = smov [#allocation3]  }
 0x1a9   : > { %s2111_s18 = sshll.u32 %s11533_s7, 4  ;;  %s1776_s15 = sshll.u32 %s11534_s2, 4  ;;  %s2112_s18 = int_to_ptr.vmem [resolvable:$true] %s2111_s18  ;;  %s1777_s15 = int_to_ptr.vmem [resolvable:$true] %s1776_s15 }
 0x1aa   : > { %s10934_s10 = scalar_lea.hbm %s11875_s27, 16 }
 0x1ab   : > { %p10935_p11 = scmp.ne.s32.totalorder %s11875_s27, %s10934_s10  ;;  %p10941_p13 = scmp.lt.u32.totalorder %s10934_s10, %s11875_s27 }
 0x1ad   : > { %p10937_p12 = pnand %p10935_p11, %p11952_p7 }
 0x1af   : > { %p10938_p2 = pneg %p10937_p12 }
 0x1b1   : > { %p10943_p0 = pnand %p10941_p13, %p10938_p2 }
 0x1b3   : > { %10946 = shalt.err (!%p10943_p0)
}
 0x1b4   : > { %s10947_s1 = scalar_lea.vmem %s2112_s18, 16  ;;  %s10954_s16 = scalar_lea.vmem %s2112_s18, 32 }
 0x1b5   : > { %p10948_p3 = scmp.ne.s32.totalorder %s2112_s18, %s10947_s1  ;;  %p10955_p6 = scmp.lt.s32.totalorder %s2112_s18, %s2112_s18 }
 0x1b6   : > { %p10956_p8 = scmp.lt.s32.totalorder %s10954_s16, %s10947_s1 }
 0x1b7   : > { %p10950_p1 = pnand %p10948_p3, %p11952_p7 }
 0x1b8   : > { %p10957_p9 = por %p10956_p8, %p10955_p6 }
 0x1b9   : > { %p10951_p4 = pneg %p10950_p1 }
 0x1bb   : > { %p10958_p10 = pnand %p10957_p9, %p10951_p4 }
 0x1bd   : > { %10961 = shalt.err (!%p10958_p10)
}
 0x1be   : > { %10253 = dma.hbm_to_vmem [thread:$0]  (!%p11940_p5), %s11875_s27, 16, %s2112_s18, [#allocation42]  }
 0x1bf   : > { %s10962_s23 = scalar_lea.hbm %s13615_s13, 16 }
 0x1c0   : > { %p10963_p11 = scmp.ne.s32.totalorder %s13615_s13, %s10962_s23  ;;  %p10969_p13 = scmp.lt.u32.totalorder %s10962_s23, %s13615_s13 }
 0x1c2   : > { %p10965_p12 = pnand %p10963_p11, %p11952_p7 }
 0x1c4   : > { %p10966_p2 = pneg %p10965_p12 }
 0x1c6   : > { %p10971_p0 = pnand %p10969_p13, %p10966_p2 }
 0x1c8   : > { %10974 = shalt.err (!%p10971_p0)
}
 0x1c9   : > { %s10975_s7 = scalar_lea.vmem %s1777_s15, 16  ;;  %s10982_s2 = scalar_lea.vmem %s1777_s15, 32 }
 0x1ca   : > { %p10976_p3 = scmp.ne.s32.totalorder %s1777_s15, %s10975_s7  ;;  %p10983_p6 = scmp.lt.s32.totalorder %s1777_s15, %s1777_s15 }
 0x1cb   : > { %p10984_p8 = scmp.lt.s32.totalorder %s10982_s2, %s10975_s7 }
 0x1cc   : > { %p10978_p1 = pnand %p10976_p3, %p11952_p7 }
 0x1cd   : > { %p10985_p9 = por %p10984_p8, %p10983_p6 }
 0x1ce   : > { %p10979_p4 = pneg %p10978_p1 }
 0x1d0   : > { %p10986_p10 = pnand %p10985_p9, %p10979_p4 }
 0x1d2   : > { %10989 = shalt.err (!%p10986_p10)
}
 0x1d3   : > { %s13623_s18 = sld [smem:[#allocation81_spill]]  ;;  %s11535_s10 = smov [#allocation7]  }
 0x1d4   : > { %10178 = dma.hbm_to_vmem [thread:$0]  (!%p11940_p5), %s13615_s13, 16, %s1777_s15, [#allocation4]  }
 0x1d5   : > { %s1801_s1 = sshll.u32 %s11535_s10, 4  ;;  %s11536_s16 = smov [#allocation10]   ;;  %s1802_s1 = int_to_ptr.vmem [resolvable:$true] %s1801_s1 }
 0x1d6   : > { %s1826_s23 = sshll.u32 %s11536_s16, 4  ;;  %s1827_s23 = int_to_ptr.vmem [resolvable:$true] %s1826_s23 }
 0x1d9   : > { %s10990_s3 = scalar_lea.hbm %s13623_s18, 16 }
 0x1da   : > { %p10991_p11 = scmp.ne.s32.totalorder %s13623_s18, %s10990_s3  ;;  %p10997_p13 = scmp.lt.u32.totalorder %s10990_s3, %s13623_s18 }
 0x1dc   : > { %p10993_p12 = pnand %p10991_p11, %p11952_p7 }
 0x1de   : > { %p10994_p2 = pneg %p10993_p12 }
 0x1e0   : > { %p10999_p0 = pnand %p10997_p13, %p10994_p2 }
 0x1e2   : > { %11002 = shalt.err (!%p10999_p0)
}
 0x1e3   : > { %s11003_s7 = scalar_lea.vmem %s1802_s1, 16  ;;  %s11010_s15 = scalar_lea.vmem %s1802_s1, 32 }
 0x1e4   : > { %p11004_p3 = scmp.ne.s32.totalorder %s1802_s1, %s11003_s7  ;;  %p11011_p6 = scmp.lt.s32.totalorder %s1802_s1, %s1802_s1 }
 0x1e5   : > { %p11012_p8 = scmp.lt.s32.totalorder %s11010_s15, %s11003_s7 }
 0x1e6   : > { %p11006_p1 = pnand %p11004_p3, %p11952_p7 }
 0x1e7   : > { %p11013_p9 = por %p11012_p8, %p11011_p6 }
 0x1e8   : > { %p11007_p4 = pneg %p11006_p1 }
 0x1ea   : > { %p11014_p10 = pnand %p11013_p9, %p11007_p4 }
 0x1ec   : > { %11017 = shalt.err (!%p11014_p10)
}
 0x1ed   : > { %s13624_s2 = sld [smem:[#allocation84_spill]] }
 0x1ee   : > { %10184 = dma.hbm_to_vmem [thread:$0]  (!%p11940_p5), %s13623_s18, 16, %s1802_s1, [#allocation6]  }
 0x1f3   : > { %s11018_s3 = scalar_lea.hbm %s13624_s2, 16 }
 0x1f4   : > { %p11019_p11 = scmp.ne.s32.totalorder %s13624_s2, %s11018_s3  ;;  %p11025_p13 = scmp.lt.u32.totalorder %s11018_s3, %s13624_s2 }
 0x1f6   : > { %p11021_p12 = pnand %p11019_p11, %p11952_p7 }
 0x1f8   : > { %p11022_p2 = pneg %p11021_p12 }
 0x1fa   : > { %p11027_p0 = pnand %p11025_p13, %p11022_p2 }
 0x1fc   : > { %11030 = shalt.err (!%p11027_p0)
}
 0x1fd   : > { %s11031_s10 = scalar_lea.vmem %s1827_s23, 16  ;;  %s11038_s16 = scalar_lea.vmem %s1827_s23, 32 }
 0x1fe   : > { %p11032_p3 = scmp.ne.s32.totalorder %s1827_s23, %s11031_s10  ;;  %p11039_p6 = scmp.lt.s32.totalorder %s1827_s23, %s1827_s23 }
 0x1ff   : > { %p11040_p8 = scmp.lt.s32.totalorder %s11038_s16, %s11031_s10 }
 0x200   : > { %p11034_p1 = pnand %p11032_p3, %p11952_p7 }
 0x201   : > { %p11041_p9 = por %p11040_p8, %p11039_p6 }
 0x202   : > { %p11035_p4 = pneg %p11034_p1 }
 0x204   : > { %p11042_p10 = pnand %p11041_p9, %p11035_p4 }
 0x206   : > { %11045 = shalt.err (!%p11042_p10)
}
 0x207   : > { %s13625_s1 = sld [smem:[#allocation87_spill]]  ;;  %s11537_s7 = smov [#allocation13]  }
 0x208   : > { %10190 = dma.hbm_to_vmem [thread:$0]  (!%p11940_p5), %s13624_s2, 16, %s1827_s23, [#allocation9]  }
 0x209   : > { %s1851_s15 = sshll.u32 %s11537_s7, 4  ;;  %s11538_s3 = smov [#allocation16]   ;;  %s1852_s15 = int_to_ptr.vmem [resolvable:$true] %s1851_s15 }
 0x20a   : > { %s1879_s5 = sshll.u32 %s11538_s3, 4  ;;  %s1880_s5 = int_to_ptr.vmem [resolvable:$true] %s1879_s5 }
 0x20d   : > { %s11046_s6 = scalar_lea.hbm %s13625_s1, 16 }
 0x20e   : > { %p11047_p11 = scmp.ne.s32.totalorder %s13625_s1, %s11046_s6  ;;  %p11053_p13 = scmp.lt.u32.totalorder %s11046_s6, %s13625_s1 }
 0x210   : > { %p11049_p12 = pnand %p11047_p11, %p11952_p7 }
 0x212   : > { %p11050_p2 = pneg %p11049_p12 }
 0x214   : > { %p11055_p0 = pnand %p11053_p13, %p11050_p2 }
 0x216   : > { %11058 = shalt.err (!%p11055_p0)
}
 0x217   : > { %s11059_s10 = scalar_lea.vmem %s1852_s15, 16  ;;  %s11066_s23 = scalar_lea.vmem %s1852_s15, 32 }
 0x218   : > { %p11060_p3 = scmp.ne.s32.totalorder %s1852_s15, %s11059_s10  ;;  %p11067_p6 = scmp.lt.s32.totalorder %s1852_s15, %s1852_s15 }
 0x219   : > { %p11068_p8 = scmp.lt.s32.totalorder %s11066_s23, %s11059_s10 }
 0x21a   : > { %p11062_p1 = pnand %p11060_p3, %p11952_p7 }
 0x21b   : > { %p11069_p9 = por %p11068_p8, %p11067_p6 }
 0x21c   : > { %p11063_p4 = pneg %p11062_p1 }
 0x21e   : > { %p11070_p10 = pnand %p11069_p9, %p11063_p4 }
 0x220   : > { %11073 = shalt.err (!%p11070_p10)
}
 0x221   : > { %s13626_s16 = sld [smem:[#allocation90_spill]] }
 0x222   : > { %10196 = dma.hbm_to_vmem [thread:$0]  (!%p11940_p5), %s13625_s1, 16, %s1852_s15, [#allocation12]  }
 0x227   : > { %s11074_s6 = scalar_lea.hbm %s13626_s16, 16 }
 0x228   : > { %p11075_p11 = scmp.ne.s32.totalorder %s13626_s16, %s11074_s6  ;;  %p11081_p13 = scmp.lt.u32.totalorder %s11074_s6, %s13626_s16 }
 0x22a   : > { %p11077_p12 = pnand %p11075_p11, %p11952_p7 }
 0x22c   : > { %p11078_p2 = pneg %p11077_p12 }
 0x22e   : > { %p11083_p0 = pnand %p11081_p13, %p11078_p2 }
 0x230   : > { %11086 = shalt.err (!%p11083_p0)
}
 0x231   : > { %s11087_s7 = scalar_lea.vmem %s1880_s5, 16  ;;  %s11094_s3 = scalar_lea.vmem %s1880_s5, 32 }
 0x232   : > { %p11088_p3 = scmp.ne.s32.totalorder %s1880_s5, %s11087_s7  ;;  %p11095_p6 = scmp.lt.s32.totalorder %s1880_s5, %s1880_s5 }
 0x233   : > { %p11096_p8 = scmp.lt.s32.totalorder %s11094_s3, %s11087_s7 }
 0x234   : > { %p11090_p1 = pnand %p11088_p3, %p11952_p7 }
 0x235   : > { %p11097_p9 = por %p11096_p8, %p11095_p6 }
 0x236   : > { %p11091_p4 = pneg %p11090_p1 }
 0x238   : > { %p11098_p10 = pnand %p11097_p9, %p11091_p4 }
 0x23a   : > { %11101 = shalt.err (!%p11098_p10)
}
 0x23b   : > { %s13627_s15 = sld [smem:[#allocation92_spill]]  ;;  %s11539_s10 = smov [#allocation19]  }
 0x23c   : > { %10202 = dma.hbm_to_vmem [thread:$0]  (!%p11940_p5), %s13626_s16, 16, %s1880_s5, [#allocation15]  }
 0x23d   : > { %s1904_s23 = sshll.u32 %s11539_s10, 4  ;;  %s11540_s6 = smov [#allocation22]   ;;  %s1905_s23 = int_to_ptr.vmem [resolvable:$true] %s1904_s23 }
 0x23e   : > { %s1929_s1 = sshll.u32 %s11540_s6, 4  ;;  %s1930_s1 = int_to_ptr.vmem [resolvable:$true] %s1929_s1 }
 0x241   : > { %s11102_s2 = scalar_lea.hbm %s13627_s15, 16 }
 0x242   : > { %p11103_p11 = scmp.ne.s32.totalorder %s13627_s15, %s11102_s2  ;;  %p11109_p13 = scmp.lt.u32.totalorder %s11102_s2, %s13627_s15 }
 0x244   : > { %p11105_p12 = pnand %p11103_p11, %p11952_p7 }
 0x246   : > { %p11106_p2 = pneg %p11105_p12 }
 0x248   : > { %p11111_p0 = pnand %p11109_p13, %p11106_p2 }
 0x24a   : > { %11114 = shalt.err (!%p11111_p0)
}
 0x24b   : > { %s11115_s7 = scalar_lea.vmem %s1905_s23, 16  ;;  %s11122_s5 = scalar_lea.vmem %s1905_s23, 32 }
 0x24c   : > { %p11116_p3 = scmp.ne.s32.totalorder %s1905_s23, %s11115_s7  ;;  %p11123_p6 = scmp.lt.s32.totalorder %s1905_s23, %s1905_s23 }
 0x24d   : > { %p11124_p8 = scmp.lt.s32.totalorder %s11122_s5, %s11115_s7 }
 0x24e   : > { %p11118_p1 = pnand %p11116_p3, %p11952_p7 }
 0x24f   : > { %p11125_p9 = por %p11124_p8, %p11123_p6 }
 0x250   : > { %p11119_p4 = pneg %p11118_p1 }
 0x252   : > { %p11126_p10 = pnand %p11125_p9, %p11119_p4 }
 0x254   : > { %11129 = shalt.err (!%p11126_p10)
}
 0x255   : > { %s13628_s3 = sld [smem:[#allocation95_spill]] }
 0x256   : > { %10208 = dma.hbm_to_vmem [thread:$0]  (!%p11940_p5), %s13627_s15, 16, %s1905_s23, [#allocation18]  }
 0x25b   : > { %s11130_s2 = scalar_lea.hbm %s13628_s3, 16 }
 0x25c   : > { %p11131_p11 = scmp.ne.s32.totalorder %s13628_s3, %s11130_s2  ;;  %p11137_p13 = scmp.lt.u32.totalorder %s11130_s2, %s13628_s3 }
 0x25e   : > { %p11133_p12 = pnand %p11131_p11, %p11952_p7 }
 0x260   : > { %p11134_p2 = pneg %p11133_p12 }
 0x262   : > { %p11139_p0 = pnand %p11137_p13, %p11134_p2 }
 0x264   : > { %11142 = shalt.err (!%p11139_p0)
}
 0x265   : > { %s11143_s10 = scalar_lea.vmem %s1930_s1, 16  ;;  %s11150_s6 = scalar_lea.vmem %s1930_s1, 32 }
 0x266   : > { %p11144_p3 = scmp.ne.s32.totalorder %s1930_s1, %s11143_s10  ;;  %p11151_p6 = scmp.lt.s32.totalorder %s1930_s1, %s1930_s1 }
 0x267   : > { %p11152_p8 = scmp.lt.s32.totalorder %s11150_s6, %s11143_s10 }
 0x268   : > { %p11146_p1 = pnand %p11144_p3, %p11952_p7 }
 0x269   : > { %p11153_p9 = por %p11152_p8, %p11151_p6 }
 0x26a   : > { %p11147_p4 = pneg %p11146_p1 }
 0x26c   : > { %p11154_p10 = pnand %p11153_p9, %p11147_p4 }
 0x26e   : > { %11157 = shalt.err (!%p11154_p10)
}
 0x26f   : > { %s13629_s23 = sld [smem:[#allocation99_spill]]  ;;  %s11541_s7 = smov [#allocation25]  }
 0x270   : > { %10214 = dma.hbm_to_vmem [thread:$0]  (!%p11940_p5), %s13628_s3, 16, %s1930_s1, [#allocation21]  }
 0x271   : > { %s1957_s5 = sshll.u32 %s11541_s7, 4  ;;  %s11542_s2 = smov [#allocation28]   ;;  %s1958_s5 = int_to_ptr.vmem [resolvable:$true] %s1957_s5 }
 0x272   : > { %s1985_s12 = sshll.u32 %s11542_s2, 4  ;;  %s1986_s12 = int_to_ptr.vmem [resolvable:$true] %s1985_s12 }
 0x275   : > { %s11158_s13 = scalar_lea.hbm %s13629_s23, 16 }
 0x276   : > { %p11159_p11 = scmp.ne.s32.totalorder %s13629_s23, %s11158_s13  ;;  %p11165_p13 = scmp.lt.u32.totalorder %s11158_s13, %s13629_s23 }
 0x278   : > { %p11161_p12 = pnand %p11159_p11, %p11952_p7 }
 0x27a   : > { %p11162_p2 = pneg %p11161_p12 }
 0x27c   : > { %p11167_p0 = pnand %p11165_p13, %p11162_p2 }
 0x27e   : > { %11170 = shalt.err (!%p11167_p0)
}
 0x27f   : > { %s11171_s10 = scalar_lea.vmem %s1958_s5, 16  ;;  %s11178_s1 = scalar_lea.vmem %s1958_s5, 32 }
 0x280   : > { %p11172_p3 = scmp.ne.s32.totalorder %s1958_s5, %s11171_s10  ;;  %p11179_p6 = scmp.lt.s32.totalorder %s1958_s5, %s1958_s5 }
 0x281   : > { %p11180_p8 = scmp.lt.s32.totalorder %s11178_s1, %s11171_s10 }
 0x282   : > { %p11174_p1 = pnand %p11172_p3, %p11952_p7 }
 0x283   : > { %p11181_p9 = por %p11180_p8, %p11179_p6 }
 0x284   : > { %p11175_p4 = pneg %p11174_p1 }
 0x286   : > { %p11182_p10 = pnand %p11181_p9, %p11175_p4 }
 0x288   : > { %11185 = shalt.err (!%p11182_p10)
}
 0x289   : > { %s13630_s6 = sld [smem:[#allocation102_spill]] }
 0x28a   : > { %10220 = dma.hbm_to_vmem [thread:$0]  (!%p11940_p5), %s13629_s23, 16, %s1958_s5, [#allocation24]  }
 0x28f   : > { %s11186_s13 = scalar_lea.hbm %s13630_s6, 16 }
 0x290   : > { %p11187_p11 = scmp.ne.s32.totalorder %s13630_s6, %s11186_s13  ;;  %p11193_p13 = scmp.lt.u32.totalorder %s11186_s13, %s13630_s6 }
 0x292   : > { %p11189_p12 = pnand %p11187_p11, %p11952_p7 }
 0x294   : > { %p11190_p2 = pneg %p11189_p12 }
 0x296   : > { %p11195_p0 = pnand %p11193_p13, %p11190_p2 }
 0x298   : > { %11198 = shalt.err (!%p11195_p0)
}
 0x299   : > { %s11199_s7 = scalar_lea.vmem %s1986_s12, 16  ;;  %s11206_s2 = scalar_lea.vmem %s1986_s12, 32 }
 0x29a   : > { %p11200_p3 = scmp.ne.s32.totalorder %s1986_s12, %s11199_s7  ;;  %p11207_p6 = scmp.lt.s32.totalorder %s1986_s12, %s1986_s12 }
 0x29b   : > { %p11208_p8 = scmp.lt.s32.totalorder %s11206_s2, %s11199_s7 }
 0x29c   : > { %p11202_p1 = pnand %p11200_p3, %p11952_p7 }
 0x29d   : > { %p11209_p9 = por %p11208_p8, %p11207_p6 }
 0x29e   : > { %p11203_p4 = pneg %p11202_p1 }
 0x2a0   : > { %p11210_p10 = pnand %p11209_p9, %p11203_p4 }
 0x2a2   : > { %11213 = shalt.err (!%p11210_p10)
}
 0x2a3   : > { %s13631_s5 = sld [smem:[#allocation105_spill]]  ;;  %s11543_s10 = smov [#allocation31]  }
 0x2a4   : > { %10226 = dma.hbm_to_vmem [thread:$0]  (!%p11940_p5), %s13630_s6, 16, %s1986_s12, [#allocation27]  }
 0x2a5   : > { %s2013_s1 = sshll.u32 %s11543_s10, 4  ;;  %s11544_s13 = smov [#allocation34]   ;;  %s2014_s1 = int_to_ptr.vmem [resolvable:$true] %s2013_s1 }
 0x2a6   : > { %s2041_s3 = sshll.u32 %s11544_s13, 4  ;;  %s2042_s3 = int_to_ptr.vmem [resolvable:$true] %s2041_s3 }
 0x2a9   : > { %s11214_s14 = scalar_lea.hbm %s13631_s5, 16 }
 0x2aa   : > { %p11215_p11 = scmp.ne.s32.totalorder %s13631_s5, %s11214_s14  ;;  %p11221_p13 = scmp.lt.u32.totalorder %s11214_s14, %s13631_s5 }
 0x2ac   : > { %p11217_p12 = pnand %p11215_p11, %p11952_p7 }
 0x2ae   : > { %p11218_p2 = pneg %p11217_p12 }
 0x2b0   : > { %p11223_p0 = pnand %p11221_p13, %p11218_p2 }
 0x2b2   : > { %11226 = shalt.err (!%p11223_p0)
}
 0x2b3   : > { %s11227_s7 = scalar_lea.vmem %s2014_s1, 16  ;;  %s11234_s12 = scalar_lea.vmem %s2014_s1, 32 }
 0x2b4   : > { %p11228_p3 = scmp.ne.s32.totalorder %s2014_s1, %s11227_s7  ;;  %p11235_p6 = scmp.lt.s32.totalorder %s2014_s1, %s2014_s1 }
 0x2b5   : > { %p11236_p8 = scmp.lt.s32.totalorder %s11234_s12, %s11227_s7 }
 0x2b6   : > { %p11230_p1 = pnand %p11228_p3, %p11952_p7 }
 0x2b7   : > { %p11237_p9 = por %p11236_p8, %p11235_p6 }
 0x2b8   : > { %p11231_p4 = pneg %p11230_p1 }
 0x2ba   : > { %p11238_p10 = pnand %p11237_p9, %p11231_p4 }
 0x2bc   : > { %11241 = shalt.err (!%p11238_p10)
}
 0x2bd   : > { %s13632_s2 = sld [smem:[#allocation108_spill]] }
 0x2be   : > { %10232 = dma.hbm_to_vmem [thread:$0]  (!%p11940_p5), %s13631_s5, 16, %s2014_s1, [#allocation30]  }
 0x2c3   : > { %s11242_s14 = scalar_lea.hbm %s13632_s2, 16 }
 0x2c4   : > { %p11243_p11 = scmp.ne.s32.totalorder %s13632_s2, %s11242_s14  ;;  %p11249_p13 = scmp.lt.u32.totalorder %s11242_s14, %s13632_s2 }
 0x2c6   : > { %p11245_p12 = pnand %p11243_p11, %p11952_p7 }
 0x2c8   : > { %p11246_p2 = pneg %p11245_p12 }
 0x2ca   : > { %p11251_p0 = pnand %p11249_p13, %p11246_p2 }
 0x2cc   : > { %11254 = shalt.err (!%p11251_p0)
}
 0x2cd   : > { %s11255_s10 = scalar_lea.vmem %s2042_s3, 16  ;;  %s11262_s13 = scalar_lea.vmem %s2042_s3, 32 }
 0x2ce   : > { %p11256_p3 = scmp.ne.s32.totalorder %s2042_s3, %s11255_s10  ;;  %p11263_p6 = scmp.lt.s32.totalorder %s2042_s3, %s2042_s3 }
 0x2cf   : > { %p11264_p8 = scmp.lt.s32.totalorder %s11262_s13, %s11255_s10 }
 0x2d0   : > { %p11258_p1 = pnand %p11256_p3, %p11952_p7 }
 0x2d1   : > { %p11265_p9 = por %p11264_p8, %p11263_p6 }
 0x2d2   : > { %p11259_p4 = pneg %p11258_p1 }
 0x2d4   : > { %p11266_p10 = pnand %p11265_p9, %p11259_p4 }
 0x2d6   : > { %11269 = shalt.err (!%p11266_p10)
}
 0x2d7   : > { %s13633_s1 = sld [smem:[#allocation111_spill]]  ;;  %s11545_s7 = smov [#allocation37]  }
 0x2d8   : > { %10238 = dma.hbm_to_vmem [thread:$0]  (!%p11940_p5), %s13632_s2, 16, %s2042_s3, [#allocation33]  }
 0x2d9   : > { %s2069_s12 = sshll.u32 %s11545_s7, 4  ;;  %s11546_s14 = smov [#allocation40]   ;;  %s2070_s12 = int_to_ptr.vmem [resolvable:$true] %s2069_s12 }
 0x2da   : > { %s2097_s5 = sshll.u32 %s11546_s14, 4  ;;  %s2098_s5 = int_to_ptr.vmem [resolvable:$true] %s2097_s5 }
 0x2dd   : > { %s11270_s6 = scalar_lea.hbm %s13633_s1, 16 }
 0x2de   : > { %p11271_p11 = scmp.ne.s32.totalorder %s13633_s1, %s11270_s6  ;;  %p11277_p13 = scmp.lt.u32.totalorder %s11270_s6, %s13633_s1 }
 0x2e0   : > { %p11273_p12 = pnand %p11271_p11, %p11952_p7 }
 0x2e2   : > { %p11274_p2 = pneg %p11273_p12 }
 0x2e4   : > { %p11279_p0 = pnand %p11277_p13, %p11274_p2 }
 0x2e6   : > { %11282 = shalt.err (!%p11279_p0)
}
 0x2e7   : > { %s11283_s10 = scalar_lea.vmem %s2070_s12, 16  ;;  %s11290_s3 = scalar_lea.vmem %s2070_s12, 32 }
 0x2e8   : > { %p11284_p3 = scmp.ne.s32.totalorder %s2070_s12, %s11283_s10  ;;  %p11291_p6 = scmp.lt.s32.totalorder %s2070_s12, %s2070_s12 }
 0x2e9   : > { %p11292_p8 = scmp.lt.s32.totalorder %s11290_s3, %s11283_s10 }
 0x2ea   : > { %p11286_p1 = pnand %p11284_p3, %p11952_p7 }
 0x2eb   : > { %p11293_p9 = por %p11292_p8, %p11291_p6 }
 0x2ec   : > { %p11287_p4 = pneg %p11286_p1 }
 0x2ee   : > { %p11294_p10 = pnand %p11293_p9, %p11287_p4 }
 0x2f0   : > { %11297 = shalt.err (!%p11294_p10)
}
 0x2f1   : > { %s13634_s13 = sld [smem:[#allocation115_spill]] }
 0x2f2   : > { %10244 = dma.hbm_to_vmem [thread:$0]  (!%p11940_p5), %s13633_s1, 16, %s2070_s12, [#allocation36]  }
 0x2f7   : > { %s11298_s6 = scalar_lea.hbm %s13634_s13, 16 }
 0x2f8   : > { %p11299_p11 = scmp.ne.s32.totalorder %s13634_s13, %s11298_s6  ;;  %p11305_p13 = scmp.lt.u32.totalorder %s11298_s6, %s13634_s13 }
 0x2fa   : > { %p11301_p12 = pnand %p11299_p11, %p11952_p7 }
 0x2fc   : > { %p11302_p2 = pneg %p11301_p12 }
 0x2fe   : > { %p11307_p0 = pnand %p11305_p13, %p11302_p2 }
 0x300   : > { %11310 = shalt.err (!%p11307_p0)
}
 0x301   : > { %s11311_s7 = scalar_lea.vmem %s2098_s5, 16  ;;  %s11318_s14 = scalar_lea.vmem %s2098_s5, 32 }
 0x302   : > { %p11312_p3 = scmp.ne.s32.totalorder %s2098_s5, %s11311_s7  ;;  %p11319_p6 = scmp.lt.s32.totalorder %s2098_s5, %s2098_s5 }
 0x303   : > { %p11320_p8 = scmp.lt.s32.totalorder %s11318_s14, %s11311_s7 }
 0x304   : > { %p11314_p1 = pnand %p11312_p3, %p11952_p7 }
 0x305   : > { %p11321_p9 = por %p11320_p8, %p11319_p6 }
 0x306   : > { %p11315_p4 = pneg %p11314_p1 }
 0x308   : > { %p11322_p10 = pnand %p11321_p9, %p11315_p4 }
 0x30a   : > { %11325 = shalt.err (!%p11322_p10)
}
 0x30b   : > { %s13635_s12 = sld [smem:[#allocation118_spill]]  ;;  %s11547_s10 = smov [#allocation43]  }
 0x30c   : > { %10250 = dma.hbm_to_vmem [thread:$0]  (!%p11940_p5), %s13634_s13, 16, %s2098_s5, [#allocation39]  }
 0x30d   : > { %s2125_s3 = sshll.u32 %s11547_s10, 4  ;;  %s11548_s6 = smov [#allocation44]   ;;  %s2126_s3 = int_to_ptr.vmem [resolvable:$true] %s2125_s3 }
 0x30e   : > { %s2139_s1 = sshll.u32 %s11548_s6, 4  ;;  %s2140_s1 = int_to_ptr.vmem [resolvable:$true] %s2139_s1 }
 0x311   : > { %s11326_s2 = scalar_lea.hbm %s13635_s12, 16 }
 0x312   : > { %p11327_p11 = scmp.ne.s32.totalorder %s13635_s12, %s11326_s2  ;;  %p11333_p13 = scmp.lt.u32.totalorder %s11326_s2, %s13635_s12 }
 0x314   : > { %p11329_p12 = pnand %p11327_p11, %p11952_p7 }
 0x316   : > { %p11330_p2 = pneg %p11329_p12 }
 0x318   : > { %p11335_p0 = pnand %p11333_p13, %p11330_p2 }
 0x31a   : > { %11338 = shalt.err (!%p11335_p0)
}
 0x31b   : > { %s11339_s7 = scalar_lea.vmem %s2126_s3, 16  ;;  %s11346_s5 = scalar_lea.vmem %s2126_s3, 32 }
 0x31c   : > { %p11340_p3 = scmp.ne.s32.totalorder %s2126_s3, %s11339_s7  ;;  %p11347_p6 = scmp.lt.s32.totalorder %s2126_s3, %s2126_s3 }
 0x31d   : > { %p11348_p8 = scmp.lt.s32.totalorder %s11346_s5, %s11339_s7 }
 0x31e   : > { %p11342_p1 = pnand %p11340_p3, %p11952_p7 }
 0x31f   : > { %p11349_p9 = por %p11348_p8, %p11347_p6 }
 0x320   : > { %p11343_p4 = pneg %p11342_p1 }
 0x322   : > { %p11350_p10 = pnand %p11349_p9, %p11343_p4 }
 0x324   : > { %11353 = shalt.err (!%p11350_p10)
}
 0x325   : > { %s13636_s14 = sld [smem:[#allocation120_spill]] }
 0x326   : > { %10256 = dma.hbm_to_vmem [thread:$0]  (!%p11940_p5), %s13635_s12, 16, %s2126_s3, [#allocation42]  }
 0x32b   : > { %s11354_s2 = scalar_lea.hbm %s13636_s14, 16 }
 0x32c   : > { %p11355_p11 = scmp.ne.s32.totalorder %s13636_s14, %s11354_s2  ;;  %p11361_p13 = scmp.lt.u32.totalorder %s11354_s2, %s13636_s14 }
 0x32e   : > { %p11357_p12 = pnand %p11355_p11, %p11952_p7 }
 0x330   : > { %p11358_p2 = pneg %p11357_p12 }
 0x332   : > { %p11363_p0 = pnand %p11361_p13, %p11358_p2 }
 0x334   : > { %11366 = shalt.err (!%p11363_p0)
}
 0x335   : > { %s11367_s10 = scalar_lea.vmem %s2140_s1, 16  ;;  %s11374_s6 = scalar_lea.vmem %s2140_s1, 32 }
 0x336   : > { %p11368_p3 = scmp.ne.s32.totalorder %s2140_s1, %s11367_s10  ;;  %p11375_p6 = scmp.lt.s32.totalorder %s2140_s1, %s2140_s1 }
 0x337   : > { %p11376_p8 = scmp.lt.s32.totalorder %s11374_s6, %s11367_s10 }
 0x338   : > { %p11370_p1 = pnand %p11368_p3, %p11952_p7 }
 0x339   : > { %p11377_p9 = por %p11376_p8, %p11375_p6 }
 0x33a   : > { %p11371_p4 = pneg %p11370_p1 }
 0x33c   : > { %p11378_p10 = pnand %p11377_p9, %p11371_p4 }
 0x33e   : > { %11381 = shalt.err (!%p11378_p10)
}
 0x33f   : > { %10259 = dma.hbm_to_vmem [thread:$0]  (!%p11940_p5), %s13636_s14, 16, %s2140_s1, [#allocation45]  }
 0x340   : > { %p13637_p11 = scmp.ne.s32.totalorder %s13620_s28, 0 }
 0x341   : > { %p13638_p12 = scmp.eq.s32.totalorder (!%p13637_p11), %s11923_s26, 0 }
 0x342   : > { %2186 = sbr.rel (%p13637_p11) target bundleno = 8666 (0x21da), region = 296 }
 0x349   : > { %11387 = dma.done.wait (%p13638_p12), [#allocation4], 16   ;;  %p13639_p2 = pmov %p13638_p12 }
 0x34b   : > { %11389 = vsyncadd (%p13639_p2), [#allocation4], 4294967280  ;;  %p13640_p7 = pmov %p13639_p2 }
 0x34c   : > { %p13641_p13 = pmov %p13639_p2 }
 0x34d   : > { %11391 = dma.done.wait (%p13640_p7), [#allocation6], 32  }
 0x34e   : > { %11393 = vsyncadd (%p13641_p13), [#allocation6], 4294967264  ;;  %p13642_p0 = pmov %p13639_p2 }
 0x350   : > { %11395 = dma.done.wait (%p13642_p0), [#allocation9], 32   ;;  %p13643_p5 = pmov %p13642_p0 }
 0x351   : > { %p13644_p3 = pmov %p13642_p0 }
 0x352   : > { %11397 = vsyncadd (%p13643_p5), [#allocation9], 4294967264 }
 0x353   : > { %11399 = dma.done.wait (%p13644_p3), [#allocation12], 32   ;;  %p13645_p1 = pmov %p13642_p0 }
 0x354   : > { %p13646_p4 = pmov %p13642_p0 }
 0x355   : > { %11401 = vsyncadd (%p13645_p1), [#allocation12], 4294967264 }
 0x356   : > { %11403 = dma.done.wait (%p13646_p4), [#allocation15], 32   ;;  %p13647_p6 = pmov %p13642_p0 }
 0x357   : > { %p13648_p8 = pmov %p13642_p0 }
 0x358   : > { %11405 = vsyncadd (%p13647_p6), [#allocation15], 4294967264 }
 0x359   : > { %11407 = dma.done.wait (%p13648_p8), [#allocation18], 32   ;;  %p13649_p9 = pmov %p13642_p0 }
 0x35a   : > { %p13650_p10 = pmov %p13642_p0 }
 0x35b   : > { %11409 = vsyncadd (%p13649_p9), [#allocation18], 4294967264 }
 0x35c   : > { %11411 = dma.done.wait (%p13650_p10), [#allocation21], 32   ;;  %p13651_p11 = pmov %p13642_p0 }
 0x35d   : > { %p13652_p12 = pmov %p13642_p0 }
 0x35e   : > { %11413 = vsyncadd (%p13651_p11), [#allocation21], 4294967264 }
 0x35f   : > { %11415 = dma.done.wait (%p13652_p12), [#allocation24], 32   ;;  %p13653_p2 = pmov %p13642_p0 }
 0x360   : > { %p13654_p7 = pmov %p13642_p0 }
 0x361   : > { %11417 = vsyncadd (%p13653_p2), [#allocation24], 4294967264 }
 0x362   : > { %11419 = dma.done.wait (%p13654_p7), [#allocation27], 32   ;;  %p13655_p13 = pmov %p13642_p0 }
 0x364   : > { %11421 = vsyncadd (%p13655_p13), [#allocation27], 4294967264 }
 0x365   : > { %11423 = dma.done.wait (%p13642_p0), [#allocation30], 32   ;;  %p13656_p5 = pmov %p13642_p0 }
 0x366   : > { %p13657_p3 = pmov %p13642_p0 }
 0x367   : > { %11425 = vsyncadd (%p13656_p5), [#allocation30], 4294967264 }
 0x368   : > { %11427 = dma.done.wait (%p13657_p3), [#allocation33], 32   ;;  %p13658_p1 = pmov %p13642_p0 }
 0x369   : > { %p13659_p4 = pmov %p13642_p0 }
 0x36a   : > { %11429 = vsyncadd (%p13658_p1), [#allocation33], 4294967264 }
 0x36b   : > { %11431 = dma.done.wait (%p13659_p4), [#allocation36], 32   ;;  %p13660_p6 = pmov %p13642_p0 }
 0x36c   : > { %p13661_p8 = pmov %p13642_p0 }
 0x36d   : > { %11433 = vsyncadd (%p13660_p6), [#allocation36], 4294967264 }
 0x36e   : > { %11435 = dma.done.wait (%p13661_p8), [#allocation39], 32   ;;  %p13662_p9 = pmov %p13642_p0 }
 0x36f   : > { %p13663_p10 = pmov %p13642_p0 }
 0x370   : > { %11437 = vsyncadd (%p13662_p9), [#allocation39], 4294967264 }
 0x371   : > { %11439 = dma.done.wait (%p13663_p10), [#allocation42], 32   ;;  %p13664_p11 = pmov %p13642_p0 }
 0x372   : > { %p13665_p12 = pmov %p13642_p0 }
 0x373   : > { %11441 = vsyncadd (%p13664_p11), [#allocation42], 4294967264 }
 0x374   : > { %11443 = dma.done.wait (%p13665_p12), [#allocation45], 16   ;;  %p13666_p2 = pmov %p13642_p0 }
 0x375   : > { %s13667_s28 = sld [smem:[#allocation101_spill]]  ;;  %s13668_s11 = sld [smem:[#allocation65_spill]]  ;;  %v11549_v0 = vmov 0.0|0.0   ;;  %v2508_v19 = vlaneseq  ;;  %vm2561_vm0 = vcmask 523264   ;;  %vm2894_vm1 = vcmask 130048  }
 0x376   : > { %11445 = vsyncadd (%p13666_p2), [#allocation45], 4294967280  ;;  %9675 = vmatprep.subr.bf16.mxu0 %v11549_v0  ;;  %p2476_p7 = scmp.lt.s32.totalorder %s11923_s26, 1  ;;  %s13669_s0 = sld [smem:[#allocation64_spill]]  ;;  %vm2646_vm2 = vcmask 261120   ;;  %vm11550_vm3 = vmmov 0  }
 0x377   : > { %v12349_v30 = vshrl.u32 %v2508_v19, 7  ;;  %s13670_s7 = sld [smem:[#allocation61_spill]]  ;;  %s13671_s10 = sld [smem:[#allocation98_spill]]  ;;  %vm12567_vm4 = vmpackc.low %vm2646_vm2, %vm2646_vm2  ;;  %vm3444_vm15 = vcmask 195584  }
 0x378   : > { %s13712_s26 = smov (!%p2476_p7, %s11923_s26), 1  ;;  %s13672_s6 = sld [smem:[#allocation62_spill]] }
 0x379   : > { %s8496_s1 = sshll.u32 %s13712_s26, 2  ;;  %v2731_v40 = vsub.s32 1, %v12349_v30  ;;  %s8686_s5 = sshll.u32 %s13712_s26, 5 }
 0x37b   : > { %v2675_v1 = vld [vmem:[%s13667_s28 + $0x80] sm:$0xff]  ;;  %v2676_v2 = vld [vmem:[%s13667_s28 + $0x88] sm:$0xff]  ;;  %v2677_v6 = vld [vmem:[%s13667_s28 + $0x90] sm:$0xff] }
 0x37c   : > { %v2659_v3 = vld [vmem:[%s13667_s28] sm:$0xff]  ;;  %v9711_v4 = vpack.c.bf16 %v2676_v2, %v2675_v1  ;;  %v2660_v5 = vld [vmem:[%s13667_s28 + $0x8] sm:$0xff]  ;;  %v2678_v7 = vld [vmem:[%s13667_s28 + $0x98] sm:$0xff]  ;;  %s2494_s3 = scalar_lea.vmem %s13669_s0, %s8496_s1  ;;  %s12456_s0 = sshll.u32 %s13712_s26, 4 }
 0x37d   : > { %v9713_v8 = vpack.c.bf16 %v2660_v5, %v2659_v3  ;;  %v9715_v9 = vpack.c.bf16 %v2678_v7, %v2677_v6  ;;  %v2661_v10 = vld [vmem:[%s13667_s28 + $0x10] sm:$0xff]  ;;  %v2662_v11 = vld [vmem:[%s13667_s28 + $0x18] sm:$0xff]  ;;  %v2530_v12 = vld [vmem:[%s13668_s11] sm:$0xff]  ;;  %s12387_s2 = scalar_lea.vmem %s13670_s7, %s8686_s5  ;;  %s13673_s1 = sld [smem:[#allocation67_spill]] }
 0x37e   : > { %9712 = vmatprep.subr.bf16.mxu1 %v9711_v4  ;;  %v2531_v13 = vld [vmem:[%s13668_s11 + $0x8] sm:$0xff]  ;;  %v2679_v14 = vld [vmem:[%s13667_s28 + $0xa0] sm:$0xff]  ;;  %v9717_v16 = vpack.c.bf16 %v2662_v11, %v2661_v10  ;;  %v2532_v18 = vld [vmem:[%s13668_s11 + $0x10] sm:$0xff]  ;;  %s2485_s7 = scalar_lea.vmem %s13672_s6, %s12456_s0  ;;  %s13675_s5 = sld [smem:[#allocation66_spill]] }
 0x37f   : > { %v2680_v15 = vld [vmem:[%s13667_s28 + $0xa8] sm:$0xff]  ;;  %9714 = vmatpush3.bf16.msra.mxu1 %v9713_v8  ;;  %v9676_v17 = vpack.c.bf16 %v2531_v13, %v2530_v12  ;;  %v2663_v21 = vld [vmem:[%s13667_s28 + $0x20] sm:$0xff]  ;;  %v2533_v23 = vld [vmem:[%s13668_s11 + $0x18] sm:$0xff]  ;;  %s13677_s6 = sld [smem:[#allocation73_spill]] }
 0x380   : > { %9716 = vmatprep.subr.bf16.mxu1 %v9715_v9  ;;  %v9719_v20 = vpack.c.bf16 %v2680_v15, %v2679_v14  ;;  %v2664_v22 = vld [vmem:[%s13667_s28 + $0x28] sm:$0xff]  ;;  %v9679_v24 = vpack.c.bf16 %v2533_v23, %v2532_v18  ;;  %v2681_v25 = vld [vmem:[%s13667_s28 + $0xb0] sm:$0xff]  ;;  %v2682_v26 = vld [vmem:[%s13667_s28 + $0xb8] sm:$0xff]  ;;  %v2727_v14 = vsub.s32 0, %v12349_v30  ;;  %v2739_v18 = vsub.s32 3, %v12349_v30 }
 0x381   : > { %9677 = vmatpush1.bf16.msra.mxu0 %v9676_v17  ;;  %v2534_v27 = vld [vmem:[%s13668_s11 + $0x20] sm:$0xff]  ;;  %v2535_v28 = vld [vmem:[%s13668_s11 + $0x28] sm:$0xff]  ;;  %v9721_v29 = vpack.c.bf16 %v2664_v22, %v2663_v21  ;;  %v9723_v31 = vpack.c.bf16 %v2682_v26, %v2681_v25  ;;  %v2665_v32 = vld [vmem:[%s13667_s28 + $0x30] sm:$0xff] }
 0x382   : > { %9678 = vmatprep.subr.bf16.mxu0 %v11549_v0  ;;  %v2666_v33 = vld [vmem:[%s13667_s28 + $0x38] sm:$0xff]  ;;  %v9682_v34 = vpack.c.bf16 %v2535_v28, %v2534_v27  ;;  %v2683_v35 = vld [vmem:[%s13667_s28 + $0xc0] sm:$0xff]  ;;  %v2684_v36 = vld [vmem:[%s13667_s28 + $0xc8] sm:$0xff] }
 0x383   : > { %9718 = vmatpush3.bf16.msra.mxu1 %v9717_v16  ;;  %v2536_v37 = vld [vmem:[%s13668_s11 + $0x30] sm:$0xff]  ;;  %v2537_v38 = vld [vmem:[%s13668_s11 + $0x38] sm:$0xff]  ;;  %v9725_v39 = vpack.c.bf16 %v2666_v33, %v2665_v32  ;;  %v9727_v41 = vpack.c.bf16 %v2684_v36, %v2683_v35  ;;  %v2667_v42 = vld [vmem:[%s13667_s28 + $0x40] sm:$0xff] }
 0x384   : > { %9720 = vmatprep.subr.bf16.mxu1 %v9719_v20  ;;  %v2668_v43 = vld [vmem:[%s13667_s28 + $0x48] sm:$0xff]  ;;  %v9685_v44 = vpack.c.bf16 %v2537_v38, %v2536_v37  ;;  %v2685_v45 = vld [vmem:[%s13667_s28 + $0xd0] sm:$0xff]  ;;  %v2686_v46 = vld [vmem:[%s13667_s28 + $0xd8] sm:$0xff] }
 0x385   : > { %9680 = vmatpush1.bf16.msra.mxu0 %v9679_v24  ;;  %v2538_v47 = vld [vmem:[%s13668_s11 + $0x40] sm:$0xff]  ;;  %v2539_v48 = vld [vmem:[%s13668_s11 + $0x48] sm:$0xff]  ;;  %v9729_v50 = vpack.c.bf16 %v2668_v43, %v2667_v42  ;;  %v9731_v52 = vpack.c.bf16 %v2686_v46, %v2685_v45  ;;  %v2669_v53 = vld [vmem:[%s13667_s28 + $0x50] sm:$0xff] }
 0x386   : > { %9681 = vmatprep.subr.bf16.mxu0 %v11549_v0  ;;  %v12368_v49 = vld [vmem:[%s2494_s3] sm:$0xf]  ;;  %v2670_v54 = vld [vmem:[%s13667_s28 + $0x58] sm:$0xff]  ;;  %v9688_v55 = vpack.c.bf16 %v2539_v48, %v2538_v47  ;;  %v2688_v57 = vld [vmem:[%s13667_s28 + $0xe8] sm:$0xff]  ;;  %s13674_s3 = sld [smem:[#allocation68_spill]] }
 0x387   : > { %9722 = vmatpush3.bf16.msra.mxu1 %v9721_v29  ;;  %v2732_v51 = vrot.slane %v12368_v49, %v2731_v40  ;;  %v2687_v56 = vld [vmem:[%s13667_s28 + $0xe0] sm:$0xff]  ;;  %v2540_v58 = vld [vmem:[%s13668_s11 + $0x50] sm:$0xff]  ;;  %v2541_v59 = vld [vmem:[%s13668_s11 + $0x58] sm:$0xff]  ;;  %v9733_v60 = vpack.c.bf16 %v2670_v54, %v2669_v53  ;;  %v2728_v26 = vrot.slane %v12368_v49, %v2727_v14 }
 0x388   : > { %9724 = vmatprep.subr.bf16.mxu1 %v9723_v31  ;;  %v9735_v61 = vpack.c.bf16 %v2688_v57, %v2687_v56  ;;  %v2671_v62 = vld [vmem:[%s13667_s28 + $0x60] sm:$0xff]  ;;  %v2672_v63 = vld [vmem:[%s13667_s28 + $0x68] sm:$0xff]  ;;  %v9691_v1 = vpack.c.bf16 %v2541_v59, %v2540_v58  ;;  %v2689_v2 = vld [vmem:[%s13667_s28 + $0xf0] sm:$0xff]  ;;  %v2740_v31 = vrot.slane %v12368_v49, %v2739_v18 }
 0x389   : > { %9683 = vmatpush1.bf16.msra.mxu0 %v9682_v34  ;;  %2809 = vmatprep.mubr.f32.mxu1 %v2732_v51  ;;  %v2690_v3 = vld [vmem:[%s13667_s28 + $0xf8] sm:$0xff]  ;;  %v2542_v4 = vld [vmem:[%s13668_s11 + $0x60] sm:$0xff]  ;;  %v2543_v5 = vld [vmem:[%s13668_s11 + $0x68] sm:$0xff]  ;;  %v9737_v6 = vpack.c.bf16 %v2672_v63, %v2671_v62 }
 0x38a   : > { %9684 = vmatprep.subr.bf16.mxu0 %v11549_v0  ;;  %v9739_v7 = vpack.c.bf16 %v2690_v3, %v2689_v2  ;;  %v2673_v8 = vld [vmem:[%s13667_s28 + $0x70] sm:$0xff]  ;;  %v2674_v9 = vld [vmem:[%s13667_s28 + $0x78] sm:$0xff]  ;;  %v9694_v10 = vpack.c.bf16 %v2543_v5, %v2542_v4  ;;  %v2707_v11 = vld [vmem:[%s13667_s28 + $0x180] sm:$0xff] }
 0x38b   : > { %9726 = vmatpush3.bf16.msra.mxu1 %v9725_v39  ;;  %v2708_v12 = vld [vmem:[%s13667_s28 + $0x188] sm:$0xff]  ;;  %v2544_v15 = vld [vmem:[%s13668_s11 + $0x70] sm:$0xff]  ;;  %v2545_v16 = vld [vmem:[%s13668_s11 + $0x78] sm:$0xff]  ;;  %v9741_v17 = vpack.c.bf16 %v2674_v9, %v2673_v8 }
 0x38c   : > { %9728 = vmatprep.subr.bf16.mxu1 %v9727_v41  ;;  %v2527_v13 = vld [vmem:[%s12387_s2 + $0x8] sm:$0xff]  ;;  %v9743_v20 = vpack.c.bf16 %v2708_v12, %v2707_v11  ;;  %v2691_v21 = vld [vmem:[%s13667_s28 + $0x100] sm:$0xff]  ;;  %v9697_v23 = vpack.c.bf16 %v2545_v16, %v2544_v15  ;;  %v2709_v24 = vld [vmem:[%s13667_s28 + $0x190] sm:$0xff] }
 0x38d   : > { %9686 = vmatpush1.bf16.msra.mxu0 %v9685_v44  ;;  %8502 = vmatprep.mubr.msk.f32.mxu0 %vm2561_vm0, %v2527_v13  ;;  %v2692_v22 = vld [vmem:[%s13667_s28 + $0x108] sm:$0xff]  ;;  %v2710_v25 = vld [vmem:[%s13667_s28 + $0x198] sm:$0xff]  ;;  %v2546_v27 = vld [vmem:[%s13668_s11 + $0x80] sm:$0xff] }
 0x38e   : > { %9687 = vmatprep.subr.bf16.mxu0 %v11549_v0  ;;  %v2547_v28 = vld [vmem:[%s13668_s11 + $0x88] sm:$0xff]  ;;  %v9745_v29 = vpack.c.bf16 %v2692_v22, %v2691_v21  ;;  %v9747_v32 = vpack.c.bf16 %v2710_v25, %v2709_v24  ;;  %v2693_v33 = vld [vmem:[%s13667_s28 + $0x110] sm:$0xff]  ;;  %v2694_v34 = vld [vmem:[%s13667_s28 + $0x118] sm:$0xff] }
 0x38f   : > { %9730 = vmatpush3.bf16.msra.mxu1 %v9729_v50  ;;  %v9700_v35 = vpack.c.bf16 %v2547_v28, %v2546_v27  ;;  %v2711_v36 = vld [vmem:[%s13667_s28 + $0x1a0] sm:$0xff]  ;;  %v2712_v37 = vld [vmem:[%s13667_s28 + $0x1a8] sm:$0xff]  ;;  %v2548_v38 = vld [vmem:[%s13668_s11 + $0x90] sm:$0xff]  ;;  %v9749_v40 = vpack.c.bf16 %v2694_v34, %v2693_v33 }
 0x390   : > { %9732 = vmatprep.subr.bf16.mxu1 %v9731_v52  ;;  %v2549_v39 = vld [vmem:[%s13668_s11 + $0x98] sm:$0xff]  ;;  %v9751_v41 = vpack.c.bf16 %v2712_v37, %v2711_v36  ;;  %v2695_v42 = vld [vmem:[%s13667_s28 + $0x120] sm:$0xff]  ;;  %v2696_v43 = vld [vmem:[%s13667_s28 + $0x128] sm:$0xff] }
 0x391   : > { %9689 = vmatpush1.bf16.msra.mxu0 %v9688_v55  ;;  %v9703_v44 = vpack.c.bf16 %v2549_v39, %v2548_v38  ;;  %v2713_v45 = vld [vmem:[%s13667_s28 + $0x1b0] sm:$0xff]  ;;  %v2714_v46 = vld [vmem:[%s13667_s28 + $0x1b8] sm:$0xff]  ;;  %v2550_v47 = vld [vmem:[%s13668_s11 + $0xa0] sm:$0xff]  ;;  %v9753_v50 = vpack.c.bf16 %v2696_v43, %v2695_v42 }
 0x392   : > { %9690 = vmatprep.subr.bf16.mxu0 %v11549_v0  ;;  %v2551_v48 = vld [vmem:[%s13668_s11 + $0xa8] sm:$0xff]  ;;  %v9755_v51 = vpack.c.bf16 %v2714_v46, %v2713_v45  ;;  %v2697_v52 = vld [vmem:[%s13667_s28 + $0x130] sm:$0xff]  ;;  %v2698_v53 = vld [vmem:[%s13667_s28 + $0x138] sm:$0xff] }
 0x393   : > { %9734 = vmatpush3.bf16.msra.mxu1 %v9733_v60  ;;  %v9706_v54 = vpack.c.bf16 %v2551_v48, %v2550_v47  ;;  %v2715_v55 = vld [vmem:[%s13667_s28 + $0x1c0] sm:$0xff]  ;;  %v2716_v56 = vld [vmem:[%s13667_s28 + $0x1c8] sm:$0xff]  ;;  %v2552_v57 = vld [vmem:[%s13668_s11 + $0xb0] sm:$0xff]  ;;  %v9757_v59 = vpack.c.bf16 %v2698_v53, %v2697_v52 }
 0x394   : > { %9736 = vmatprep.subr.bf16.mxu1 %v9735_v61  ;;  %v2553_v58 = vld [vmem:[%s13668_s11 + $0xb8] sm:$0xff]  ;;  %v9759_v60 = vpack.c.bf16 %v2716_v56, %v2715_v55  ;;  %v2699_v61 = vld [vmem:[%s13667_s28 + $0x140] sm:$0xff]  ;;  %v2700_v62 = vld [vmem:[%s13667_s28 + $0x148] sm:$0xff] }
 0x395   : > { %9692 = vmatpush1.bf16.msra.mxu0 %v9691_v1  ;;  %v9709_v63 = vpack.c.bf16 %v2553_v58, %v2552_v57  ;;  %v2717_v1 = vld [vmem:[%s13667_s28 + $0x1d0] sm:$0xff]  ;;  %v2718_v2 = vld [vmem:[%s13667_s28 + $0x1d8] sm:$0xff]  ;;  %v9761_v3 = vpack.c.bf16 %v2700_v62, %v2699_v61  ;;  %v2719_v8 = vld [vmem:[%s13667_s28 + $0x1e0] sm:$0xff] }
 0x396   : > { %9693 = vmatprep.subr.bf16.mxu0 %v11549_v0  ;;  %v9763_v4 = vpack.c.bf16 %v2718_v2, %v2717_v1  ;;  %v2701_v5 = vld [vmem:[%s13667_s28 + $0x150] sm:$0xff]  ;;  %v2720_v9 = vld [vmem:[%s13667_s28 + $0x1e8] sm:$0xff]  ;;  %v2703_v13 = vld [vmem:[%s13667_s28 + $0x160] sm:$0xff] }
 0x397   : > { %9738 = vmatpush3.bf16.msra.mxu1 %v9737_v6  ;;  %v2702_v6 = vld [vmem:[%s13667_s28 + $0x158] sm:$0xff]  ;;  %v9767_v12 = vpack.c.bf16 %v2720_v9, %v2719_v8  ;;  %v2704_v15 = vld [vmem:[%s13667_s28 + $0x168] sm:$0xff]  ;;  %v2528_v16 = vld [vmem:[%s12387_s2 + $0x10] sm:$0xff] }
 0x398   : > { %9740 = vmatprep.subr.bf16.mxu1 %v9739_v7  ;;  %v2526_v7 = vld [vmem:[%s12387_s2] sm:$0xff]  ;;  %v9765_v11 = vpack.c.bf16 %v2702_v6, %v2701_v5  ;;  %v2722_v18 = vld [vmem:[%s13667_s28 + $0x1f8] sm:$0xff]  ;;  %v2705_v22 = vld [vmem:[%s13667_s28 + $0x170] sm:$0xff] }
 0x399   : > { %9695 = vmatpush1.bf16.msra.mxu0 %v9694_v10  ;;  %v2529_v10 = vld [vmem:[%s12387_s2 + $0x18] sm:$0xff]  ;;  %v2885_v24 = vld [vmem:[%s13671_s10] sm:$0xff]  ;;  %v2886_v25 = vld [vmem:[%s13671_s10 + $0x8] sm:$0xff]  ;;  %s13676_s2 = sld [smem:[#allocation71_spill]] }
 0x39a   : > { %9696 = vmatprep.subr.bf16.mxu0 %v11549_v0  ;;  %v9775_v28 = vpack.c.bf16 %v2886_v25, %v2885_v24  ;;  %v2643_v33 = vld [vmem:[%s13673_s1] sm:$0xff]  ;;  %v2649_v45 = vld [vmem:[%s13674_s3 + $0x10] sm:$0xff]  ;;  %s13678_s1 = sld [smem:[#allocation69_spill]] }
 0x39b   : > { %9742 = vmatpush3.bf16.msra.mxu1 %v9741_v17  ;;  %v2721_v17 = vld [vmem:[%s13667_s28 + $0x1f0] sm:$0xff]  ;;  %v2644_v34 = vld [vmem:[%s13674_s3] sm:$0xff] }
 0x39c   : > { %9744 = vmatprep.subr.bf16.mxu1 %v9743_v20  ;;  %v9769_v20 = vpack.c.bf16 %v2704_v15, %v2703_v13  ;;  %v9771_v21 = vpack.c.bf16 %v2722_v18, %v2721_v17  ;;  %v8501_v38 = vld [vmem:[%s13675_s5] ss:$0 sm:$0xff]  ;;  %v8504_v55 = vld [vmem:[#allocation25] ss:$0 sm:$0xff]  ;;  %s13680_s5 = sld [smem:[#allocation75_spill]] }
 0x39d   : > { %9698 = vmatpush1.bf16.msra.mxu0 %v9697_v23  ;;  %v2706_v23 = vld [vmem:[%s13667_s28 + $0x178] sm:$0xff] }
 0x39e   : > { %2810 = vmatmul.mubr.f32.vlgmr.msra.gmra.mrb[0].mxu1 %v2728_v26  ;;  %9699 = vmatprep.subr.bf16.mxu0 %v11549_v0  ;;  %v2735_v26 = vsub.s32 2, %v12349_v30  ;;  %v9773_v27 = vpack.c.bf16 %v2706_v23, %v2705_v22 }
 0x39f   : > { %9746 = vmatpush3.bf16.msra.mxu1 %v9745_v29  ;;  %2879 = vmatprep.mubr.f32.mxu1 %v2740_v31  ;;  %v2654_v31 = vld [vmem:[%s2485_s7] sm:$0xff] }
 0x3a0   : > { %9748 = vmatprep.subr.bf16.mxu1 %v9747_v32  ;;  %v2736_v29 = vrot.slane %v12368_v49, %v2735_v26  ;;  %v2655_v32 = vld [vmem:[%s2485_s7 + $0x8] sm:$0xff]  ;;  %v2645_v49 = vadd.f32 %v2644_v34, %v2643_v33  ;;  %v3158_v33 = vld [vmem:[%s13677_s6] sm:$0xff]  ;;  %s13679_s7 = sld [smem:[#allocation70_spill]] }
 0x3a1   : > { %9701 = vmatpush1.bf16.msra.mxu0 %v9700_v35 }
 0x3a2   : > { %9702 = vmatprep.subr.bf16.mxu0 %v11549_v0  ;;  %2647 = vst.msk [vmem:[#allocation2] sm:$0xff] %vm2646_vm2, %v2645_v49  ;;  %v3159_v49 = vld [vmem:[%s13677_s6 + $0x8] sm:$0xff] }
 0x3a3   : > { %9750 = vmatpush3.bf16.msra.mxu1 %v9749_v40  ;;  %v2648_v40 = vld [vmem:[%s13674_s3 + $0x8] sm:$0xff] }
 0x3a4   : > { %9752 = vmatprep.subr.bf16.mxu1 %v9751_v41 }
 0x3a5   : > { %9704 = vmatpush1.bf16.msra.mxu0 %v9703_v44 }
 0x3a6   : > { %9705 = vmatprep.subr.bf16.mxu0 %v11549_v0 }
 0x3a7   : > { %9754 = vmatpush3.bf16.msra.mxu1 %v9753_v50  ;;  %v2723_v50 = vld [vmem:[#allocation28] sm:$0x1] }
 0x3a8   : > { %9756 = vmatprep.subr.bf16.mxu1 %v9755_v51 }
 0x3a9   : > { %9707 = vmatpush1.bf16.msra.mxu0 %v9706_v54  ;;  %v2982_v62 = vld [vmem:[#allocation2] sm:$0xff] }
 0x3aa   : > { %9708 = vmatprep.subr.bf16.mxu0 %v11549_v0 }
 0x3ab   : > { %9758 = vmatpush3.bf16.msra.mxu1 %v9757_v59 }
 0x3ac   : > { %9760 = vmatprep.subr.bf16.mxu1 %v9759_v60 }
 0x3ad   : > { %9710 = vmatpush1.bf16.msra.mxu0 %v9709_v63 }
 0x3ae   : > { %9779 = vmatprep.subr.bf16.mxu0 %v11549_v0 }
 0x3af   : > { %9762 = vmatpush3.bf16.msra.mxu1 %v9761_v3 }
 0x3b0   : > { %9764 = vmatprep.subr.bf16.mxu1 %v9763_v4  ;;  %2633 = vmatmul.mubr.f32.vlgmr.msra.gmra.mrb[0].mxu0 %v2526_v7 }
 0x3b1   : > { %8503 = vmatprep.mubr.msk.f32.mxu0 %vm2561_vm0, %v2529_v10 }
 0x3b3   : > { %9766 = vmatpush3.bf16.msra.mxu1 %v9765_v11 }
 0x3b4   : > { %9768 = vmatprep.subr.bf16.mxu1 %v9767_v12  ;;  %2638 = vmatmul.mubr.f32.gmra.mrb[2].mxu0 %v2528_v16 }
 0x3b7   : > { %9770 = vmatpush3.bf16.msra.mxu1 %v9769_v20 }
 0x3b8   : > { %9772 = vmatprep.subr.bf16.mxu1 %v9771_v21 }
 0x3bb   : > { %9774 = vmatpush3.bf16.msra.mxu1 %v9773_v27 }
 0x3bc   : > { %9776 = vmatprep.subr.bf16.mxu1 %v9775_v28 }
 0x3be   : > { %2880 = vmatmul.mubr.f32.vlgmr.msra.gmra.mrb[2].mxu1 %v2736_v29 }
 0x3bf   : > { %9778 = vmatpush3.bf16.msra.mxu1 %v9775_v28  ;;  %9042 = vmatprep.mubr.msk.f32.mxu1 %vm2894_vm1, %v2654_v31  ;;  %v3058_v31 = vld [vmem:[%s13676_s2] sm:$0xff] }
 0x3c0   : > { %9785 = vmatprep.subr.bf16.mxu1 %v11549_v0 }
 0x3c2   : > { %9043 = vmatmul.mubr.msk.f32.vlgmr.msra.gmra.mrb[4].mxu1 %vm2894_vm1, %v2655_v32  ;;  %v3059_v32 = vld [vmem:[%s13676_s2 + $0x8] sm:$0xff] }
 0x3c3   : > { %v9780_v34 = vpack.c.bf16 %v3059_v32, %v3058_v31 }
 0x3c5   : > { %9781 = vmatpush3.bf16.msra.mxu0 %v9780_v34 }
 0x3c6   : > { %9782 = vmatprep.subr.bf16.mxu0 %v11549_v0 }
 0x471   : > { %v8722_v35 = vpop.f32.mrb[0].mxu1 }
 0x472   : > { %v8723_v36 = vpop.f32.mrb[1].mxu1 }
 0x473   : > { %v8724_v37 = vadd.f32 %v8723_v36, %v8722_v35  ;;  %v9786_v35 = vpack.c.bf16 %v3159_v49, %v3158_v33  ;;  %v3060_v36 = vld [vmem:[%s13676_s2 + $0x10] sm:$0xff] }
 0x475   : > { %v2812_v53 = vadd.f32 %v8724_v37, %v2723_v50  ;;  %9787 = vmatpush3.bf16.msra.mxu1 %v9786_v35  ;;  %v3061_v37 = vld [vmem:[%s13676_s2 + $0x18] sm:$0xff]  ;;  %s13685_s2 = sld [smem:[#allocation76_spill]] }
 0x476   : > { %9788 = vmatprep.subr.bf16.mxu1 %v11549_v0 }
 0x47b   : > { %v8517_v33 = vld [vmem:[%s13685_s2] ss:$0 sm:$0xff]  ;;  %s13686_s2 = sld [smem:[#allocation77_spill]] }
 0x483   : > { %v2634_v39 = vpop.f32.mrb[0].mxu0 }
 0x484   : > { %v2635_v41 = vadd.f32 %v8501_v38, %v2634_v39  ;;  %v2636_v42 = vpop.f32.mrb[1].mxu0  ;;  %v9783_v39 = vpack.c.bf16 %v3061_v37, %v3060_v36 }
 0x485   : > { %v11551_v42 = vmov 0.0  }
 0x486   : > { %v2650_v43 = vadd.f32 %v2648_v40, %v2635_v41  ;;  %v3161_v40 = vld [vmem:[%s13677_s6 + $0x18] sm:$0xff]  ;;  %9784 = vmatpush3.bf16.msra.mxu0 %v9783_v39  ;;  %9053 = vmatprep.mubr.msk.f32.mxu0 %vm11550_vm3, %v11551_v42 }
 0x487   : > { %v2639_v44 = vpop.f32.mrb[2].mxu0  ;;  %9791 = vmatprep.subr.bf16.mxu0 %v11549_v0  ;;  %9070 = vmatprep.mubr.msk.f32.mxu1 %vm11550_vm3, %v11551_v42 }
 0x488   : > { %2652 = vst.msk [vmem:[#allocation2 + $0x8] sm:$0xff] %vm2646_vm2, %v2650_v43  ;;  %v2640_v46 = vadd.f32 %v8501_v38, %v2639_v44  ;;  %v2641_v47 = vpop.f32.mrb[3].mxu0  ;;  %v3160_v38 = vld [vmem:[%s13677_s6 + $0x10] sm:$0xff] }
 0x489   : > { %v9789_v41 = vpack.c.bf16 %v3161_v40, %v3160_v38 }
 0x48a   : > { %v2651_v48 = vadd.f32 %v2649_v45, %v2640_v46 }
 0x48b   : > { %9790 = vmatpush3.bf16.msra.mxu1 %v9789_v41 }
 0x48c   : > { %2653 = vst.msk [vmem:[#allocation2 + $0x10] sm:$0xff] %vm2646_vm2, %v2651_v48  ;;  %9797 = vmatprep.subr.bf16.mxu1 %v11549_v0 }
 0x48f   : > { %v2976_v61 = vld [vmem:[#allocation2 + $0x8] sm:$0xff] }
 0x491   : > { %v8757_v51 = vpop.f32.mrb[2].mxu1 }
 0x492   : > { %v8758_v52 = vpop.f32.mrb[3].mxu1 }
 0x493   : > { %v8759_v54 = vadd.f32 %v8758_v52, %v8757_v51  ;;  %v2977_v58 = vld [vmem:[#allocation2 + $0x10] sm:$0xff] }
 0x495   : > { %v2882_v56 = vadd.f32 %v8759_v54, %v2812_v53  ;;  %v9044_v57 = vpop.f32.mrb[4].mxu1  ;;  %v8507_v54 = vld [vmem:[%s13678_s1] ss:$0 sm:$0xff]  ;;  %s13681_s1 = sld [smem:[#allocation74_spill]] }
 0x496   : > { %v2973_v59 = vadd.f32 %v9044_v57, %v8504_v55  ;;  %v2967_v60 = vpop.f32.mrb[5].mxu1  ;;  %v3249_v57 = vld [vmem:[%s13680_s5] sm:$0xff] }
 0x497   : > { %v12474_v63 = vrot.slane %v2882_v56, %v2727_v14  ;;  %v2968_v1 = vadd.f32 %v8504_v55, %v2967_v60  ;;  %v8508_v56 = vld [vmem:[%s13679_s7] ss:$0 sm:$0xff]  ;;  %s13682_s7 = sld [smem:[#allocation72_spill]] }
 0x498   : > { %v2979_v2 = vadd.f32 %v2977_v58, %v2973_v59  ;;  %v3250_v58 = vld [vmem:[%s13680_s5 + $0x8] sm:$0xff] }
 0x499   : > { %v2978_v3 = vadd.f32 %v2976_v61, %v2968_v1  ;;  %v2989_v4 = vadd.f32 %v12474_v63, %v2982_v62  ;;  %v9792_v61 = vpack.c.bf16 %v3250_v58, %v3249_v57  ;;  %v3251_v62 = vld [vmem:[%s13680_s5 + $0x10] sm:$0xff]  ;;  %v3252_v1 = vld [vmem:[%s13680_s5 + $0x18] sm:$0xff]  ;;  %s13702_s5 = sld [smem:[#allocation109_spill]] }
 0x49a   : > { %2981 = vst.msk [vmem:[#allocation2 + $0x10] sm:$0xff] %vm2646_vm2, %v2979_v2 }
 0x49b   : > { %2980 = vst.msk [vmem:[#allocation2 + $0x8] sm:$0xff] %vm2646_vm2, %v2978_v3  ;;  %2992 = vst.msk [vmem:[#allocation2] sm:$0xff] %vm2646_vm2, %v2989_v4  ;;  %v9795_v3 = vpack.c.bf16 %v3252_v1, %v3251_v62 }
 0x49d   : > { %v8509_v32 = vld [vmem:[%s13682_s7] ss:$0 sm:$0xff]  ;;  %s13688_s7 = sld [smem:[#allocation80_spill]] }
 0x4a1   : > { %v2984_v5 = vld [vmem:[#allocation2 + $0x10] sm:$0xff] }
 0x4a2   : > { %v2991_v6 = vadd.f32 %v12474_v63, %v2984_v5  ;;  %v2983_v7 = vld [vmem:[#allocation2 + $0x8] sm:$0xff]  ;;  %v12481_v8 = vld [vmem:[#allocation2] sm:$0xff] }
 0x4a3   : > { %v2990_v30 = vadd.f32 %v12474_v63, %v2983_v7  ;;  %v2998_v14 = vsel %vm2646_vm2, %v12481_v8, 0.0 }
 0x4a4   : > { %2994 = vst.msk [vmem:[#allocation2 + $0x10] sm:$0xff] %vm2646_vm2, %v2991_v6  ;;  %2999 = vadd.xlane.f32.xlu0 %v2998_v14 }
 0x4a5   : > { %2993 = vst.msk [vmem:[#allocation2 + $0x8] sm:$0xff] %vm2646_vm2, %v2990_v30 }
 0x4ab   : > { %v12488_v9 = vld [vmem:[#allocation2 + $0x10] sm:$0xff] }
 0x4ac   : > { %v3004_v10 = vsel %vm2646_vm2, %v12488_v9, 0.0  ;;  %v12492_v11 = vld [vmem:[#allocation2 + $0x8] sm:$0xff] }
 0x4ad   : > { %3005 = vadd.xlane.f32.xlu1 %v3004_v10  ;;  %v3001_v12 = vsel %vm2646_vm2, %v12492_v11, 0.0 }
 0x4ae   : > { %3002 = vadd.xlane.f32.xlu0 %v3001_v12 }
 0x531   : > { %v3000_v13 = vpop.xlane.xlu0 %2999 }
 0x532   : > { %v3008_v15 = vmul.f32 0.03125, %v3000_v13 }
 0x534   : > { %v3011_v16 = vsub.f32 %v12481_v8, %v3008_v15 }
 0x536   : > { %v3014_v17 = vmul.f32 %v3011_v16, %v3011_v16 }
 0x538   : > { %v3017_v18 = vsel %vm2646_vm2, %v3014_v17, 0.0  ;;  %v8513_v17 = vld [vmem:[%s13681_s1] ss:$0 sm:$0xff]  ;;  %s13687_s1 = sld [smem:[#allocation78_spill]] }
 0x539   : > { %3018 = vadd.xlane.f32.xlu1 %v3017_v18  ;;  %v2509_v18 = vand.u32 127, %v2508_v19 }
 0x53a   : > { %v3006_v20 = vpop.xlane.xlu1 %3005 }
 0x53b   : > { %v3010_v21 = vmul.f32 0.03125, %v3006_v20  ;;  %v3003_v22 = vpop.xlane.xlu0 %3002  ;;  %vm2514_vm5 = vcmp.ge.s32.totalorder %v2509_v18, 8  ;;  %vm2515_vm6 = vcmp.lt.s32.totalorder %v2509_v18, 16  ;;  %vm2511_vm7 = vcmp.lt.s32.totalorder %v2509_v18, 8 }
 0x53c   : > { %v3009_v23 = vmul.f32 0.03125, %v3003_v22  ;;  %vm2516_vm8 = vmand %vm2514_vm5, %vm2515_vm6  ;;  %vm2518_vm9 = vcmp.ge.s32.totalorder %v2509_v18, 16  ;;  %vm2519_vm10 = vcmp.lt.s32.totalorder %v2509_v18, 24  ;;  %vm2522_vm11 = vcmp.ge.s32.totalorder %v2509_v18, 24 }
 0x53d   : > { %v12499_v24 = vsub.f32 %v12488_v9, %v3010_v21  ;;  %vm2523_vm12 = vcmp.lt.s32.totalorder %v2509_v18, 32  ;;  %v12586_v36 = vsel %vm2511_vm7, 1.0, %v11551_v42  ;;  %v12589_v37 = vsel %vm2516_vm8, 1.0, %v11551_v42  ;;  %vm2520_vm13 = vmand %vm2518_vm9, %vm2519_vm10 }
 0x53e   : > { %v12502_v25 = vsub.f32 %v12492_v11, %v3009_v23  ;;  %vm2524_vm14 = vmand %vm2522_vm11, %vm2523_vm12 }
 0x53f   : > { %v3016_v26 = vmul.f32 %v12499_v24, %v12499_v24 }
 0x540   : > { %v3015_v27 = vmul.f32 %v12502_v25, %v12502_v25 }
 0x541   : > { %v3023_v28 = vsel %vm2646_vm2, %v3016_v26, 0.0 }
 0x542   : > { %3024 = vadd.xlane.f32.xlu1 %v3023_v28  ;;  %v3020_v29 = vsel %vm2646_vm2, %v3015_v27, 0.0 }
 0x543   : > { %3021 = vadd.xlane.f32.xlu0 %v3020_v29 }
 0x5c6   : > { %v3019_v43 = vpop.xlane.xlu1 %3018 }
 0x5c7   : > { %v3026_v44 = vmul.f32 0.03125, %v3019_v43  ;;  %v12596_v43 = vsel %vm2520_vm13, 1.0, %v11551_v42 }
 0x5c9   : > { %v3029_v45 = vadd.f32 1e-06, %v3026_v44 }
 0x5cb   : > { %10426 = vrsqrt.f32 %v3029_v45 }
 0x5cf   : > { %v3025_v46 = vpop.xlane.xlu1 %3024 }
 0x5d0   : > { %v3028_v47 = vmul.f32 0.03125, %v3025_v46  ;;  %v3022_v48 = vpop.xlane.xlu0 %3021 }
 0x5d1   : > { %v3027_v50 = vmul.f32 0.03125, %v3022_v48  ;;  %v12607_v48 = vsel %vm2524_vm14, 1.0, %v11551_v42 }
 0x5d2   : > { %v3031_v51 = vadd.f32 1e-06, %v3028_v47 }
 0x5d3   : > { %v3030_v52 = vadd.f32 1e-06, %v3027_v50 }
 0x5d4   : > { %10428 = vrsqrt.f32 %v3031_v51 }
 0x5d5   : > { %v10427_v53 = vpop.eup %10426  ;;  %10430 = vrsqrt.f32 %v3030_v52 }
 0x5d6   : > { %v3035_v55 = vmul.f32 %v10427_v53, %v3011_v16 }
 0x5d8   : > { %v3045_v59 = vmul.f32 %v8507_v54, %v3035_v55 }
 0x5da   : > { %v3055_v60 = vadd.f32 %v8508_v56, %v3045_v59 }
 0x5dc   : > { %9054 = vmatmul.mubr.msk.f32.vlgmr.msra.gmra.mrb[4].mxu0 %vm2646_vm2, %v3055_v60  ;;  %9071 = vmatmul.mubr.msk.f32.vlgmr.msra.gmra.mrb[6].mxu1 %vm2646_vm2, %v3055_v60 }
 0x5dd   : > { %9056 = vmatprep.mubr.msk.f32.mxu0 %vm11550_vm3, %v11551_v42  ;;  %9073 = vmatprep.mubr.msk.f32.mxu1 %vm11550_vm3, %v11551_v42 }
 0x5de   : > { %v10429_v2 = vpop.eup %10428  ;;  %9793 = vmatpush3.bf16.msra.mxu0 %v9792_v61 }
 0x5df   : > { %v10431_v4 = vpop.eup %10430  ;;  %9794 = vmatprep.subr.bf16.mxu0 %v11549_v0  ;;  %v3037_v6 = vmul.f32 %v10429_v2, %v12499_v24 }
 0x5e0   : > { %v3036_v5 = vmul.f32 %v10431_v4, %v12502_v25 }
 0x5e1   : > { %v3047_v14 = vmul.f32 %v8507_v54, %v3037_v6 }
 0x5e2   : > { %v3046_v7 = vmul.f32 %v8507_v54, %v3036_v5  ;;  %9796 = vmatpush3.bf16.msra.mxu0 %v9795_v3 }
 0x5e3   : > { %9801 = vmatprep.subr.bf16.mxu0 %v11549_v0  ;;  %v3057_v10 = vadd.f32 %v8508_v56, %v3047_v14 }
 0x5e4   : > { %v3056_v30 = vadd.f32 %v8508_v56, %v3046_v7 }
 0x5e6   : > { %9057 = vmatmul.mubr.msk.f32.gmra.mrb[6].mxu0 %vm2646_vm2, %v3056_v30  ;;  %9074 = vmatmul.mubr.msk.f32.gmra.mrb[8].mxu1 %vm2646_vm2, %v3056_v30 }
 0x5e7   : > { %9059 = vmatprep.mubr.msk.f32.mxu0 %vm11550_vm3, %v11551_v42  ;;  %9076 = vmatprep.mubr.msk.f32.mxu1 %vm11550_vm3, %v11551_v42 }
 0x5ea   : > { %9060 = vmatmul.mubr.msk.f32.gmra.mrb[8].mxu0 %vm2646_vm2, %v3057_v10  ;;  %9077 = vmatmul.mubr.msk.f32.gmra.mrb[10].mxu1 %vm2646_vm2, %v3057_v10 }
 0x5eb   : > { %9087 = vmatprep.mubr.msk.f32.mxu0 %vm11550_vm3, %v11551_v42  ;;  %9102 = vmatprep.mubr.msk.f32.mxu1 %vm11550_vm3, %v11551_v42 }
 0x5ee   : > { %9088 = vmatmul.mubr.msk.f32.vlgmr.msra.gmra.mrb[10].mxu0 %vm2646_vm2, %v3055_v60 }
 0x5ef   : > { %9090 = vmatprep.mubr.msk.f32.mxu0 %vm11550_vm3, %v11551_v42 }
 0x5f2   : > { %9091 = vmatmul.mubr.msk.f32.gmra.mrb[12].mxu0 %vm2646_vm2, %v3056_v30 }
 0x5f3   : > { %9093 = vmatprep.mubr.msk.f32.mxu0 %vm11550_vm3, %v11551_v42 }
 0x5f6   : > { %9094 = vmatmul.mubr.msk.f32.gmra.mrb[14].mxu0 %vm2646_vm2, %v3057_v10 }
 0x5f7   : > { %9117 = vmatprep.mubr.msk.f32.mxu0 %vm11550_vm3, %v11551_v42 }
 0x6af   : > { %v3144_v12 = vpop.f32.mrb[4].mxu0  ;;  %v3235_v13 = vpop.f32.mrb[6].mxu1 }
 0x6b0   : > { %v9055_v15 = vpop.f32.mrb[5].mxu0  ;;  %v9072_v16 = vpop.f32.mrb[7].mxu1  ;;  %v3236_v22 = vadd.f32 %v8513_v17, %v3235_v13  ;;  %v12583_v49 = vadd.f32 %v8509_v32, %v3144_v12 }
 0x6b2   : > { %v3340_v44 = vmul.f32 %v12583_v49, %v12586_v36  ;;  %v3481_v45 = vmul.f32 %v12583_v49, %v12589_v37  ;;  %v3790_v14 = vmul.f32 %v12583_v49, %v12596_v43  ;;  %v4013_v13 = vmul.f32 %v12583_v49, %v12607_v48 }
 0x6b9   : > { %v3149_v20 = vpop.f32.mrb[6].mxu0  ;;  %v3240_v21 = vpop.f32.mrb[8].mxu1 }
 0x6ba   : > { %v3241_v23 = vadd.f32 %v8513_v17, %v3240_v21  ;;  %v9058_v24 = vpop.f32.mrb[7].mxu0  ;;  %v9075_v25 = vpop.f32.mrb[9].mxu1  ;;  %v12591_v38 = vadd.f32 %v8509_v32, %v3149_v20 }
 0x6bc   : > { %v12571_v27 = vpack.c.bf16 %v3241_v23, %v3236_v22  ;;  %v3341_v52 = vmul.f32 %v12591_v38, %v12586_v36  ;;  %v3482_v60 = vmul.f32 %v12591_v38, %v12589_v37  ;;  %v3791_v10 = vmul.f32 %v12591_v38, %v12596_v43 }
 0x6bd   : > { %v3154_v28 = vpop.f32.mrb[8].mxu0  ;;  %v3245_v19 = vpop.f32.mrb[10].mxu1  ;;  %v4014_v15 = vmul.f32 %v12591_v38, %v12607_v48 }
 0x6be   : > { %v9061_v29 = vpop.f32.mrb[9].mxu0  ;;  %v9078_v31 = vpop.f32.mrb[11].mxu1  ;;  %9800 = vmatpush3.bf16.xpose.msk.msra.mxu1 %vm12567_vm4, %v12571_v27  ;;  %9804 = vmatpush3.bf16.xpose.msk.msra.mxu0 %vm12567_vm4, %v12571_v27  ;;  %v12593_v40 = vadd.f32 %v8513_v17, %v3245_v19  ;;  %v3155_v3 = vadd.f32 %v8509_v32, %v3154_v28 }
 0x6bf   : > { %9100 = vmatprep.subr.mxu1 %v11551_v42  ;;  %9115 = vmatprep.subr.mxu0 %v11551_v42 }
 0x6c0   : > { %v3342_v7 = vmul.f32 %v3155_v3, %v12586_v36  ;;  %v3483_v30 = vmul.f32 %v3155_v3, %v12589_v37  ;;  %v3792_v12 = vmul.f32 %v3155_v3, %v12596_v43  ;;  %v4015_v16 = vmul.f32 %v3155_v3, %v12607_v48 }
 0x6c1   : > { %v3326_v34 = vpop.f32.mrb[10].mxu0 }
 0x6c2   : > { %v9089_v35 = vpop.f32.mrb[11].mxu0  ;;  %v3327_v39 = vadd.f32 %v8517_v33, %v3326_v34 }
 0x6c4   : > { %v12610_v50 = vmul.f32 %v3327_v39, %v12586_v36  ;;  %v3609_v51 = vmul.f32 %v3327_v39, %v12589_v37  ;;  %v12628_v57 = vmul.f32 %v3327_v39, %v12596_v43  ;;  %v12631_v58 = vmul.f32 %v3327_v39, %v12607_v48 }
 0x6c5   : > { %v3331_v41 = vpop.f32.mrb[12].mxu0 }
 0x6c6   : > { %v3332_v46 = vadd.f32 %v8517_v33, %v3331_v41  ;;  %v9092_v47 = vpop.f32.mrb[13].mxu0  ;;  %9101 = vmatpush3.xpose.msk.msra.mxu1 %vm2646_vm2, %v12593_v40  ;;  %9116 = vmatpush3.xpose.msk.msra.mxu0 %vm2646_vm2, %v12593_v40 }
 0x6c7   : > { %9811 = vmatprep.subr.bf16.mxu0 %v11549_v0  ;;  %9805 = vmatprep.subr.bf16.mxu1 %v11549_v0 }
 0x6c8   : > { %v12618_v53 = vmul.f32 %v3332_v46, %v12586_v36  ;;  %v3610_v54 = vmul.f32 %v3332_v46, %v12589_v37  ;;  %v12622_v55 = vmul.f32 %v3332_v46, %v12596_v43  ;;  %v12625_v56 = vmul.f32 %v3332_v46, %v12607_v48 }
 0x6c9   : > { %v3336_v59 = vpop.f32.mrb[14].mxu0  ;;  %9103 = vmatmul.mubr.msk.f32.vlgmr.msra.gmra.mrb[12].mxu1 %vm2646_vm2, %v3340_v44  ;;  %9118 = vmatmul.mubr.msk.f32.vlgmr.msra.gmra.mrb[16].mxu0 %vm2646_vm2, %v3481_v45 }
 0x6ca   : > { %v12637_v61 = vadd.f32 %v8517_v33, %v3336_v59  ;;  %v9095_v62 = vpop.f32.mrb[15].mxu0  ;;  %9814 = vmatpush3.bf16.xpose.msk.msra.mxu0 %vm12567_vm4, %v12571_v27  ;;  %9105 = vmatprep.mubr.msk.f32.mxu1 %vm11550_vm3, %v11551_v42  ;;  %v9806_v1 = vpack.c.bf16 %v3610_v54, %v3609_v51  ;;  %v9809_v2 = vpack.c.bf16 %v12618_v53, %v12610_v50 }
 0x6cb   : > { %9120 = vmatprep.mubr.msk.f32.mxu0 %vm11550_vm3, %v11551_v42  ;;  %9160 = vmatprep.subr.mxu0 %v11551_v42  ;;  %v9816_v4 = vpack.c.bf16 %v12622_v55, %v12628_v57  ;;  %v9823_v5 = vpack.c.bf16 %v12625_v56, %v12631_v58 }
 0x6cc   : > { %9807 = vmatpush3.bf16.msra.mxu1 %v9806_v1  ;;  %v3611_v6 = vmul.f32 %v12637_v61, %v12589_v37 }
 0x6cd   : > { %9106 = vmatmul.mubr.msk.f32.gmra.mrb[14].mxu1 %vm2646_vm2, %v3341_v52  ;;  %9121 = vmatmul.mubr.msk.f32.gmra.mrb[18].mxu0 %vm2646_vm2, %v3482_v60 }
 0x6ce   : > { %9130 = vmatprep.subr.mxu1 %v11551_v42  ;;  %9108 = vmatprep.mubr.msk.f32.mxu1 %vm11550_vm3, %v11551_v42 }
 0x6cf   : > { %9123 = vmatprep.mubr.msk.f32.mxu0 %vm11550_vm3, %v11551_v42 }
 0x6d0   : > { %9131 = vmatpush3.msra.mxu1 %v3611_v6 }
 0x6d1   : > { %9109 = vmatmul.mubr.msk.f32.gmra.mrb[16].mxu1 %vm2646_vm2, %v3342_v7  ;;  %9124 = vmatmul.mubr.msk.f32.gmra.mrb[20].mxu0 %vm2646_vm2, %v3483_v30 }
 0x6d2   : > { %9161 = vmatpush3.xpose.msk.msra.mxu0 %vm2646_vm2, %v12593_v40  ;;  %9162 = vmatprep.mubr.msk.f32.mxu0 %vm11550_vm3, %v11551_v42 }
 0x6d3   : > { %9818 = vmatprep.subr.bf16.mxu0 %v11549_v0  ;;  %9132 = vmatprep.mubr.msk.f32.mxu1 %vm11550_vm3, %v11551_v42 }
 0x6d4   : > { %9808 = vmatprep.subr.bf16.mxu1 %v11549_v0 }
 0x6d5   : > { %9163 = vmatmul.mubr.msk.f32.vlgmr.msra.gmra.mrb[22].mxu0 %vm2646_vm2, %v3790_v14 }
 0x6d6   : > { %9821 = vmatpush3.bf16.xpose.msk.msra.mxu0 %vm12567_vm4, %v12571_v27  ;;  %9165 = vmatprep.mubr.msk.f32.mxu0 %vm11550_vm3, %v11551_v42 }
 0x6d7   : > { %9190 = vmatprep.subr.mxu0 %v11551_v42 }
 0x6d9   : > { %9166 = vmatmul.mubr.msk.f32.gmra.mrb[24].mxu0 %vm2646_vm2, %v3791_v10 }
 0x6da   : > { %9168 = vmatprep.mubr.msk.f32.mxu0 %vm11550_vm3, %v11551_v42 }
 0x6dd   : > { %9169 = vmatmul.mubr.msk.f32.gmra.mrb[26].mxu0 %vm2646_vm2, %v3792_v12 }
 0x6de   : > { %9191 = vmatpush3.xpose.msk.msra.mxu0 %vm2646_vm2, %v12593_v40  ;;  %9192 = vmatprep.mubr.msk.f32.mxu0 %vm11550_vm3, %v11551_v42 }
 0x6df   : > { %9825 = vmatprep.subr.bf16.mxu0 %v11549_v0 }
 0x6e1   : > { %9193 = vmatmul.mubr.msk.f32.vlgmr.msra.gmra.mrb[28].mxu0 %vm2646_vm2, %v4013_v13 }
 0x6e2   : > { %9195 = vmatprep.mubr.msk.f32.mxu0 %vm11550_vm3, %v11551_v42 }
 0x6e5   : > { %9196 = vmatmul.mubr.msk.f32.gmra.mrb[30].mxu0 %vm2646_vm2, %v4014_v15 }
 0x6e6   : > { %9198 = vmatprep.mubr.msk.f32.mxu0 %vm11550_vm3, %v11551_v42 }
 0x6e9   : > { %9199 = vmatmul.mubr.msk.f32.gmra.mrb[32].mxu0 %vm2646_vm2, %v4015_v16 }
 0x6ea   : > { %9224 = vmatprep.mubr.msk.f32.mxu0 %vm11550_vm3, %v11551_v42 }
 0x79c   : > { %v3427_v17 = vpop.f32.mrb[12].mxu1  ;;  %v3559_v18 = vpop.f32.mrb[16].mxu0 }
 0x79d   : > { %v3573_v20 = vmul.f32 0.35355338, %v3559_v18  ;;  %v9104_v21 = vpop.f32.mrb[13].mxu1  ;;  %v9119_v22 = vpop.f32.mrb[17].mxu0  ;;  %v3441_v29 = vmul.f32 0.35355338, %v3427_v17 }
 0x79f   : > { %v3576_v23 = vsel %vm3444_vm15, %v3573_v20, -inf  ;;  %v3445_v40 = vsel %vm3444_vm15, %v3441_v29, -inf }
 0x7a0   : > { %v3432_v24 = vpop.f32.mrb[14].mxu1  ;;  %3577 = vmax.xlane.f32.xlu0 %v3576_v23  ;;  %v3564_v25 = vpop.f32.mrb[18].mxu0 }
 0x7a1   : > { %v3574_v27 = vmul.f32 0.35355338, %v3564_v25  ;;  %v9107_v28 = vpop.f32.mrb[15].mxu1  ;;  %v9122_v19 = vpop.f32.mrb[19].mxu0  ;;  %v3442_v38 = vmul.f32 0.35355338, %v3432_v24 }
 0x7a3   : > { %v3579_v31 = vsel %vm3444_vm15, %v3574_v27, -inf  ;;  %v3448_v51 = vsel %vm3444_vm15, %v3442_v38, -inf }
 0x7a4   : > { %v3437_v32 = vpop.f32.mrb[16].mxu1  ;;  %3580 = vmax.xlane.f32.xlu1 %v3579_v31  ;;  %v3569_v33 = vpop.f32.mrb[20].mxu0 }
 0x7a5   : > { %v3575_v34 = vmul.f32 0.35355338, %v3569_v33  ;;  %v9110_v49 = vpop.f32.mrb[17].mxu1  ;;  %v9125_v35 = vpop.f32.mrb[21].mxu0  ;;  %v3443_v39 = vmul.f32 0.35355338, %v3437_v32 }
 0x7a7   : > { %v3582_v41 = vsel %vm3444_vm15, %v3575_v34, -inf  ;;  %v3451_v47 = vsel %vm3444_vm15, %v3443_v39, -inf }
 0x7a8   : > { %3446 = vmax.xlane.f32.xlu1 %v3445_v40  ;;  %3583 = vmax.xlane.f32.xlu0 %v3582_v41  ;;  %v3868_v44 = vpop.f32.mrb[22].mxu0 }
 0x7a9   : > { %v9164_v45 = vpop.f32.mrb[23].mxu0  ;;  %v12713_v46 = vmul.f32 0.35355338, %v3868_v44 }
 0x7ab   : > { %v3885_v60 = vsel %vm3444_vm15, %v12713_v46, -inf }
 0x7ac   : > { %3452 = vmax.xlane.f32.xlu1 %v3451_v47  ;;  %3449 = vmax.xlane.f32.xlu0 %v3448_v51  ;;  %v3873_v52 = vpop.f32.mrb[24].mxu0 }
 0x7ad   : > { %v3883_v54 = vmul.f32 0.35355338, %v3873_v52  ;;  %v9167_v59 = vpop.f32.mrb[25].mxu0 }
 0x7af   : > { %v3888_v62 = vsel %vm3444_vm15, %v3883_v54, -inf }
 0x7b0   : > { %3886 = vmax.xlane.f32.xlu0 %v3885_v60  ;;  %3889 = vmax.xlane.f32.xlu1 %v3888_v62  ;;  %v3878_v1 = vpop.f32.mrb[26].mxu0 }
 0x7b1   : > { %v3884_v3 = vmul.f32 0.35355338, %v3878_v1  ;;  %v9170_v6 = vpop.f32.mrb[27].mxu0 }
 0x7b3   : > { %v3891_v7 = vsel %vm3444_vm15, %v3884_v3, -inf }
 0x7b4   : > { %3892 = vmax.xlane.f32.xlu0 %v3891_v7  ;;  %v4091_v30 = vpop.f32.mrb[28].mxu0 }
 0x7b5   : > { %v12721_v14 = vmul.f32 0.35355338, %v4091_v30  ;;  %v9194_v10 = vpop.f32.mrb[29].mxu0 }
 0x7b7   : > { %v4108_v12 = vsel %vm3444_vm15, %v12721_v14, -inf }
 0x7b8   : > { %4109 = vmax.xlane.f32.xlu1 %v4108_v12  ;;  %v4096_v13 = vpop.f32.mrb[30].mxu0 }
 0x7b9   : > { %v12725_v15 = vmul.f32 0.35355338, %v4096_v13  ;;  %v9197_v16 = vpop.f32.mrb[31].mxu0 }
 0x7bb   : > { %v4111_v17 = vsel %vm3444_vm15, %v12725_v15, -inf }
 0x7bc   : > { %4112 = vmax.xlane.f32.xlu0 %v4111_v17  ;;  %v4101_v18 = vpop.f32.mrb[32].mxu0 }
 0x7bd   : > { %v12729_v21 = vmul.f32 0.35355338, %v4101_v18  ;;  %v9200_v22 = vpop.f32.mrb[33].mxu0 }
 0x7bf   : > { %v4114_v23 = vsel %vm3444_vm15, %v12729_v21, -inf }
 0x7c0   : > { %4115 = vmax.xlane.f32.xlu1 %v4114_v23 }
 0x82d   : > { %v3578_v24 = vpop.xlane.xlu0 %3577 }
 0x82e   : > { %v3585_v25 = vsub.f32 %v3573_v20, %v3578_v24 }
 0x830   : > { %v3588_v28 = vmul.f32 1.442695, %v3585_v25 }
 0x831   : > { %v3581_v19 = vpop.xlane.xlu1 %3580 }
 0x832   : > { %10432 = vpow2.f32 %v3588_v28  ;;  %v3586_v31 = vsub.f32 %v3574_v27, %v3581_v19 }
 0x834   : > { %v3590_v32 = vmul.f32 1.442695, %v3586_v31 }
 0x835   : > { %v3447_v33 = vpop.xlane.xlu1 %3446  ;;  %v3584_v49 = vpop.xlane.xlu0 %3583 }
 0x836   : > { %10434 = vpow2.f32 %v3590_v32  ;;  %v3454_v35 = vsub.f32 %v3441_v29, %v3447_v33  ;;  %v3587_v40 = vsub.f32 %v3575_v34, %v3584_v49 }
 0x838   : > { %v3457_v41 = vmul.f32 1.442695, %v3454_v35  ;;  %v3592_v44 = vmul.f32 1.442695, %v3587_v40 }
 0x839   : > { %v3453_v45 = vpop.xlane.xlu1 %3452  ;;  %v3450_v47 = vpop.xlane.xlu0 %3449 }
 0x83a   : > { %10436 = vpow2.f32 %v3457_v41  ;;  %v3456_v51 = vsub.f32 %v3443_v39, %v3453_v45  ;;  %v3455_v52 = vsub.f32 %v3442_v38, %v3450_v47 }
 0x83b   : > { %10438 = vpow2.f32 %v3592_v44 }
 0x83c   : > { %v12733_v59 = vpop.eup %10432  ;;  %v3461_v20 = vmul.f32 1.442695, %v3456_v51  ;;  %v3459_v60 = vmul.f32 1.442695, %v3455_v52 }
 0x83d   : > { %v3887_v62 = vpop.xlane.xlu0 %3886  ;;  %v3890_v27 = vpop.xlane.xlu1 %3889  ;;  %v3594_v1 = vsel %vm3444_vm15, %v12733_v59, 0.0 }
 0x83e   : > { %10440 = vpow2.f32 %v3461_v20  ;;  %v3894_v29 = vsub.f32 %v12713_v46, %v3887_v62  ;;  %v3895_v34 = vsub.f32 %v3883_v54, %v3890_v27  ;;  %3595 = vadd.xlane.f32.xlu0 %v3594_v1  ;;  %v4237_v62 = vld [vmem:[%s13686_s2 + $0x8] sm:$0xff]  ;;  %v4238_v27 = vld [vmem:[%s13686_s2 + $0x10] sm:$0xff] }
 0x83f   : > { %10442 = vpow2.f32 %v3459_v60  ;;  %v4236_v60 = vld [vmem:[%s13686_s2] sm:$0xff] }
 0x840   : > { %v12738_v6 = vpop.eup %10434  ;;  %v3897_v39 = vmul.f32 1.442695, %v3894_v29  ;;  %v3899_v38 = vmul.f32 1.442695, %v3895_v34  ;;  %v9826_v1 = vpack.c.bf16 %v4237_v62, %v4236_v60  ;;  %v4239_v29 = vld [vmem:[%s13686_s2 + $0x18] sm:$0xff]  ;;  %s13691_s2 = sld [smem:[#allocation89_spill]] }
 0x841   : > { %v3893_v7 = vpop.xlane.xlu0 %3892  ;;  %v3597_v30 = vsel %vm3444_vm15, %v12738_v6, 0.0  ;;  %v9829_v34 = vpack.c.bf16 %v4239_v29, %v4238_v27 }
 0x842   : > { %10444 = vpow2.f32 %v3897_v39  ;;  %v3896_v10 = vsub.f32 %v3884_v3, %v3893_v7  ;;  %3598 = vadd.xlane.f32.xlu1 %v3597_v30  ;;  %9827 = vmatpush3.bf16.msra.mxu0 %v9826_v1 }
 0x843   : > { %10446 = vpow2.f32 %v3899_v38  ;;  %9828 = vmatprep.subr.bf16.mxu0 %v11549_v0 }
 0x844   : > { %v12742_v12 = vpop.eup %10436  ;;  %v3901_v13 = vmul.f32 1.442695, %v3896_v10 }
 0x845   : > { %v12744_v16 = vpop.eup %10438  ;;  %v4110_v46 = vpop.xlane.xlu1 %4109  ;;  %v3463_v54 = vsel %vm3444_vm15, %v12742_v12, 0.0 }
 0x846   : > { %10448 = vpow2.f32 %v3901_v13  ;;  %v4117_v17 = vsub.f32 %v12721_v14, %v4110_v46  ;;  %v3600_v18 = vsel %vm3444_vm15, %v12744_v16, 0.0  ;;  %3464 = vadd.xlane.f32.xlu1 %v3463_v54  ;;  %9830 = vmatpush3.bf16.msra.mxu0 %v9829_v34 }
 0x847   : > { %3601 = vadd.xlane.f32.xlu0 %v3600_v18  ;;  %9831 = vmatprep.subr.bf16.mxu0 %v11549_v0 }
 0x848   : > { %v12751_v3 = vpop.eup %10440  ;;  %v4120_v22 = vmul.f32 1.442695, %v4117_v17 }
 0x849   : > { %v12753_v23 = vpop.eup %10442  ;;  %v4113_v24 = vpop.xlane.xlu0 %4112  ;;  %v3469_v25 = vsel %vm3444_vm15, %v12751_v3, 0.0 }
 0x84a   : > { %10450 = vpow2.f32 %v4120_v22  ;;  %v4118_v28 = vsub.f32 %v12725_v15, %v4113_v24  ;;  %v3466_v14 = vsel %vm3444_vm15, %v12753_v23, 0.0  ;;  %3470 = vadd.xlane.f32.xlu1 %v3469_v25 }
 0x84b   : > { %3467 = vadd.xlane.f32.xlu0 %v3466_v14 }
 0x84c   : > { %v12760_v19 = vpop.eup %10444  ;;  %v4122_v31 = vmul.f32 1.442695, %v4118_v28 }
 0x84d   : > { %v12762_v32 = vpop.eup %10446  ;;  %v4116_v33 = vpop.xlane.xlu1 %4115  ;;  %v3903_v49 = vsel %vm3444_vm15, %v12760_v19, 0.0 }
 0x84e   : > { %10452 = vpow2.f32 %v4122_v31  ;;  %v4119_v35 = vsub.f32 %v12729_v21, %v4116_v33  ;;  %v3906_v15 = vsel %vm3444_vm15, %v12762_v32, 0.0 }
 0x84f   : > { %3904 = vadd.xlane.f32.xlu0 %v3903_v49  ;;  %3907 = vadd.xlane.f32.xlu1 %v3906_v15 }
 0x850   : > { %v12769_v40 = vpop.eup %10448  ;;  %v4124_v41 = vmul.f32 1.442695, %v4119_v35 }
 0x851   : > { %v3909_v44 = vsel %vm3444_vm15, %v12769_v40, 0.0 }
 0x852   : > { %10454 = vpow2.f32 %v4124_v41 }
 0x853   : > { %3910 = vadd.xlane.f32.xlu0 %v3909_v44 }
 0x854   : > { %v12773_v45 = vpop.eup %10450 }
 0x855   : > { %v4126_v21 = vsel %vm3444_vm15, %v12773_v45, 0.0 }
 0x856   : > { %4127 = vadd.xlane.f32.xlu1 %v4126_v21 }
 0x858   : > { %v12777_v47 = vpop.eup %10452 }
 0x859   : > { %v4129_v51 = vsel %vm3444_vm15, %v12777_v47, 0.0 }
 0x85a   : > { %4130 = vadd.xlane.f32.xlu0 %v4129_v51 }
 0x85c   : > { %v12781_v52 = vpop.eup %10454 }
 0x85d   : > { %v4132_v20 = vsel %vm3444_vm15, %v12781_v52, 0.0 }
 0x85e   : > { %4133 = vadd.xlane.f32.xlu1 %v4132_v20 }
 0x8cb   : > { %v3596_v39 = vpop.xlane.xlu0 %3595 }
 0x8cc   : > { %10456 = vrcp.f32 %v3596_v39 }
 0x8cf   : > { %v3599_v38 = vpop.xlane.xlu1 %3598 }
 0x8d0   : > { %10458 = vrcp.f32 %v3599_v38 }
 0x8d3   : > { %v3465_v30 = vpop.xlane.xlu1 %3464 }
 0x8d4   : > { %v3602_v7 = vpop.xlane.xlu0 %3601 }
 0x8d5   : > { %10460 = vrcp.f32 %v3602_v7 }
 0x8d6   : > { %v10457_v10 = vpop.eup %10456  ;;  %10462 = vrcp.f32 %v3465_v30 }
 0x8d7   : > { %v3606_v13 = vmul.f32 %v10457_v10, %v12733_v59  ;;  %v3471_v18 = vpop.xlane.xlu1 %3470  ;;  %v3480_v59 = vmul.f32 %v12637_v61, %v12586_v36 }
 0x8d8   : > { %v3468_v46 = vpop.xlane.xlu0 %3467 }
 0x8d9   : > { %9133 = vmatmul.mubr.msk.f32.vlgmr.msra.gmra.mrb[18].mxu1 %vm3444_vm15, %v3606_v13  ;;  %10464 = vrcp.f32 %v3468_v46 }
 0x8da   : > { %v10459_v54 = vpop.eup %10458  ;;  %9810 = vmatpush3.bf16.msra.mxu1 %v9809_v2  ;;  %9135 = vmatprep.mubr.msk.f32.mxu1 %vm11550_vm3, %v11551_v42  ;;  %10466 = vrcp.f32 %v3471_v18 }
 0x8db   : > { %9145 = vmatprep.subr.mxu1 %v11551_v42  ;;  %v3607_v17 = vmul.f32 %v10459_v54, %v12738_v6 }
 0x8dc   : > { %v3905_v53 = vpop.xlane.xlu0 %3904  ;;  %v3908_v24 = vpop.xlane.xlu1 %3907 }
 0x8dd   : > { %9136 = vmatmul.mubr.msk.f32.gmra.mrb[20].mxu1 %vm3444_vm15, %v3607_v17  ;;  %10468 = vrcp.f32 %v3905_v53 }
 0x8de   : > { %9146 = vmatpush3.msra.mxu1 %v3480_v59  ;;  %9138 = vmatprep.mubr.msk.f32.mxu1 %vm11550_vm3, %v11551_v42  ;;  %10470 = vrcp.f32 %v3908_v24 }
 0x8df   : > { %v10461_v50 = vpop.eup %10460  ;;  %9815 = vmatprep.subr.bf16.mxu1 %v11549_v0 }
 0x8e0   : > { %v3608_v2 = vmul.f32 %v10461_v50, %v12744_v16  ;;  %v10463_v22 = vpop.eup %10462  ;;  %v3911_v16 = vpop.xlane.xlu0 %3910 }
 0x8e1   : > { %v3475_v6 = vmul.f32 %v10463_v22, %v12742_v12  ;;  %v3920_v12 = vmul.f32 %v12637_v61, %v12596_v43  ;;  %10472 = vrcp.f32 %v3911_v16 }
 0x8e2   : > { %9139 = vmatmul.mubr.msk.f32.gmra.mrb[22].mxu1 %vm3444_vm15, %v3608_v2 }
 0x8e3   : > { %9147 = vmatprep.mubr.msk.f32.mxu1 %vm11550_vm3, %v11551_v42  ;;  %v10465_v25 = vpop.eup %10464  ;;  %v4128_v55 = vpop.xlane.xlu1 %4127 }
 0x8e4   : > { %v3476_v28 = vmul.f32 %v10465_v25, %v12753_v23  ;;  %v10467_v14 = vpop.eup %10466  ;;  %10474 = vrcp.f32 %v4128_v55 }
 0x8e5   : > { %v3477_v57 = vmul.f32 %v10467_v14, %v12751_v3  ;;  %v4398_v14 = vld [vmem:[%s13688_s7] sm:$0xff] }
 0x8e6   : > { %9148 = vmatmul.mubr.msk.f32.vlgmr.msra.gmra.mrb[18].mxu1 %vm3444_vm15, %v3475_v6 }
 0x8e7   : > { %9817 = vmatpush3.bf16.msra.mxu1 %v9816_v4  ;;  %9150 = vmatprep.mubr.msk.f32.mxu1 %vm11550_vm3, %v11551_v42  ;;  %v10469_v4 = vpop.eup %10468  ;;  %v4131_v31 = vpop.xlane.xlu0 %4130 }
 0x8e8   : > { %9175 = vmatprep.subr.mxu1 %v11551_v42  ;;  %v3915_v23 = vmul.f32 %v10469_v4, %v12760_v19  ;;  %v10471_v33 = vpop.eup %10470  ;;  %10476 = vrcp.f32 %v4131_v31  ;;  %v4143_v19 = vmul.f32 %v12637_v61, %v12607_v48  ;;  %v4401_v4 = vld [vmem:[%s13688_s7 + $0x18] sm:$0xff] }
 0x8e9   : > { %v3916_v49 = vmul.f32 %v10471_v33, %v12762_v32 }
 0x8ea   : > { %9151 = vmatmul.mubr.msk.f32.gmra.mrb[20].mxu1 %vm3444_vm15, %v3476_v28 }
 0x8eb   : > { %9176 = vmatpush3.msra.mxu1 %v3920_v12  ;;  %9153 = vmatprep.mubr.msk.f32.mxu1 %vm11550_vm3, %v11551_v42  ;;  %v4134_v3 = vpop.xlane.xlu1 %4133  ;;  %v10473_v35 = vpop.eup %10472  ;;  %v4399_v12 = vld [vmem:[%s13688_s7 + $0x8] sm:$0xff] }
 0x8ec   : > { %9822 = vmatprep.subr.bf16.mxu1 %v11549_v0  ;;  %10478 = vrcp.f32 %v4134_v3  ;;  %v3917_v56 = vmul.f32 %v10473_v35, %v12769_v40  ;;  %v9832_v55 = vpack.c.bf16 %v4399_v12, %v4398_v14 }
 0x8ee   : > { %9154 = vmatmul.mubr.msk.f32.gmra.mrb[22].mxu1 %vm3444_vm15, %v3477_v57  ;;  %v10475_v58 = vpop.eup %10474  ;;  %v4400_v57 = vld [vmem:[%s13688_s7 + $0x10] sm:$0xff] }
 0x8ef   : > { %9177 = vmatprep.mubr.msk.f32.mxu1 %vm11550_vm3, %v11551_v42 }
 0x8f2   : > { %9178 = vmatmul.mubr.msk.f32.vlgmr.msra.gmra.mrb[18].mxu1 %vm3444_vm15, %v3915_v23  ;;  %v10477_v61 = vpop.eup %10476  ;;  %v9835_v23 = vpack.c.bf16 %v4401_v4, %v4400_v57 }
 0x8f3   : > { %9824 = vmatpush3.bf16.msra.mxu1 %v9823_v5  ;;  %9180 = vmatprep.mubr.msk.f32.mxu1 %vm11550_vm3, %v11551_v42  ;;  %v4138_v5 = vmul.f32 %v10475_v58, %v12773_v45  ;;  %v4139_v32 = vmul.f32 %v10477_v61, %v12777_v47 }
 0x8f4   : > { %9205 = vmatprep.subr.mxu1 %v11551_v42 }
 0x8f6   : > { %9181 = vmatmul.mubr.msk.f32.gmra.mrb[20].mxu1 %vm3444_vm15, %v3916_v49  ;;  %v10479_v15 = vpop.eup %10478 }
 0x8f7   : > { %9206 = vmatpush3.msra.mxu1 %v4143_v19  ;;  %9183 = vmatprep.mubr.msk.f32.mxu1 %vm11550_vm3, %v11551_v42  ;;  %v4140_v40 = vmul.f32 %v10479_v15, %v12781_v52  ;;  %v8557_v52 = vld [vmem:[%s13687_s1] ss:$0 sm:$0xff]  ;;  %s13689_s1 = sld [smem:[#allocation82_spill]] }
 0x8f8   : > { %9837 = vmatprep.subr.bf16.mxu1 %v11549_v0 }
 0x8fa   : > { %9184 = vmatmul.mubr.msk.f32.gmra.mrb[22].mxu1 %vm3444_vm15, %v3917_v56 }
 0x8fb   : > { %9207 = vmatprep.mubr.msk.f32.mxu1 %vm11550_vm3, %v11551_v42 }
 0x8fe   : > { %9208 = vmatmul.mubr.msk.f32.vlgmr.msra.gmra.mrb[18].mxu1 %vm3444_vm15, %v4138_v5 }
 0x8ff   : > { %9210 = vmatprep.mubr.msk.f32.mxu1 %vm11550_vm3, %v11551_v42 }
 0x902   : > { %9211 = vmatmul.mubr.msk.f32.gmra.mrb[20].mxu1 %vm3444_vm15, %v4139_v32  ;;  %v8561_v32 = vld [vmem:[#allocation3] ss:$0 sm:$0xff] }
 0x903   : > { %9213 = vmatprep.mubr.msk.f32.mxu1 %vm11550_vm3, %v11551_v42 }
 0x906   : > { %9214 = vmatmul.mubr.msk.f32.gmra.mrb[22].mxu1 %vm3444_vm15, %v4140_v40  ;;  %v8562_v40 = vld [vmem:[#allocation5] ss:$0 sm:$0xff] }
 0x907   : > { %9266 = vmatprep.mubr.msk.f32.mxu1 %vm11550_vm3, %v11551_v42 }
 0x9d1   : > { %v4219_v41 = vpop.f32.mrb[18].mxu1 }
 0x9d2   : > { %v9209_v44 = vpop.f32.mrb[19].mxu1  ;;  %9225 = vmatmul.mubr.msk.f32.vlgmr.msra.gmra.mrb[34].mxu0 %vm2646_vm2, %v4219_v41 }
 0x9d3   : > { %9227 = vmatprep.mubr.msk.f32.mxu0 %vm11550_vm3, %v11551_v42  ;;  %9833 = vmatpush3.bf16.msra.mxu0 %v9832_v55 }
 0x9d4   : > { %9834 = vmatprep.subr.bf16.mxu0 %v11549_v0 }
 0x9d5   : > { %v4224_v45 = vpop.f32.mrb[20].mxu1 }
 0x9d6   : > { %v9212_v21 = vpop.f32.mrb[21].mxu1  ;;  %9228 = vmatmul.mubr.msk.f32.gmra.mrb[36].mxu0 %vm2646_vm2, %v4224_v45 }
 0x9d7   : > { %9230 = vmatprep.mubr.msk.f32.mxu0 %vm11550_vm3, %v11551_v42  ;;  %9836 = vmatpush3.bf16.msra.mxu0 %v9835_v23 }
 0x9d8   : > { %9849 = vmatprep.subr.bf16.mxu0 %v11549_v0 }
 0x9d9   : > { %v4229_v47 = vpop.f32.mrb[22].mxu1 }
 0x9da   : > { %v9215_v51 = vpop.f32.mrb[23].mxu1  ;;  %9231 = vmatmul.mubr.msk.f32.gmra.mrb[38].mxu0 %vm2646_vm2, %v4229_v47 }
 0x9db   : > { %9241 = vmatprep.mubr.msk.f32.mxu0 %vm11550_vm3, %v11551_v42 }
 0xaa5   : > { %v4322_v20 = vpop.f32.mrb[34].mxu0 }
 0xaa6   : > { %v4323_v60 = vadd.f32 %v8557_v52, %v4322_v20  ;;  %v9226_v62 = vpop.f32.mrb[35].mxu0 }
 0xaa8   : > { %v12871_v27 = vadd.f32 %v4323_v60, %v12481_v8 }
 0xaa9   : > { %v4327_v1 = vpop.f32.mrb[36].mxu0 }
 0xaaa   : > { %v4328_v29 = vadd.f32 %v8557_v52, %v4327_v1  ;;  %v9229_v34 = vpop.f32.mrb[37].mxu0  ;;  %v4339_v39 = vsel %vm2646_vm2, %v12871_v27, 0.0  ;;  %v4513_v1 = vld [vmem:[%s13689_s1] sm:$0xff] }
 0xaab   : > { %4340 = vadd.xlane.f32.xlu0 %v4339_v39  ;;  %v4515_v39 = vld [vmem:[%s13689_s1 + $0x10] sm:$0xff] }
 0xaac   : > { %v12876_v38 = vadd.f32 %v4328_v29, %v12492_v11  ;;  %v4514_v29 = vld [vmem:[%s13689_s1 + $0x8] sm:$0xff] }
 0xaad   : > { %v4332_v7 = vpop.f32.mrb[38].mxu0  ;;  %v9838_v34 = vpack.c.bf16 %v4514_v29, %v4513_v1 }
 0xaae   : > { %v4333_v30 = vadd.f32 %v8557_v52, %v4332_v7  ;;  %v9232_v10 = vpop.f32.mrb[39].mxu0  ;;  %v4342_v13 = vsel %vm2646_vm2, %v12876_v38, 0.0  ;;  %v4516_v7 = vld [vmem:[%s13689_s1 + $0x18] sm:$0xff] }
 0xaaf   : > { %4343 = vadd.xlane.f32.xlu1 %v4342_v13  ;;  %9839 = vmatpush3.bf16.msra.mxu1 %v9838_v34  ;;  %v4517_v10 = vld [vmem:[%s13689_s1 + $0x20] sm:$0xff]  ;;  %v4518_v13 = vld [vmem:[%s13689_s1 + $0x28] sm:$0xff] }
 0xab0   : > { %v12881_v8 = vadd.f32 %v4333_v30, %v12488_v9  ;;  %9840 = vmatprep.subr.bf16.mxu1 %v11549_v0  ;;  %v9841_v30 = vpack.c.bf16 %v4516_v7, %v4515_v39 }
 0xab2   : > { %v4345_v46 = vsel %vm2646_vm2, %v12881_v8, 0.0 }
 0xab3   : > { %4346 = vadd.xlane.f32.xlu0 %v4345_v46  ;;  %9842 = vmatpush3.bf16.msra.mxu1 %v9841_v30  ;;  %v9844_v46 = vpack.c.bf16 %v4518_v13, %v4517_v10 }
 0xab4   : > { %9843 = vmatprep.subr.bf16.mxu1 %v11549_v0 }
 0xab7   : > { %9845 = vmatpush3.bf16.msra.mxu1 %v9844_v46 }
 0xab8   : > { %9846 = vmatprep.subr.bf16.mxu1 %v11549_v0 }
 0xb38   : > { %v4341_v54 = vpop.xlane.xlu0 %4340 }
 0xb39   : > { %v4348_v17 = vmul.f32 0.03125, %v4341_v54  ;;  %v4519_v54 = vld [vmem:[%s13689_s1 + $0x30] sm:$0xff] }
 0xb3b   : > { %v4351_v18 = vsub.f32 %v12871_v27, %v4348_v17  ;;  %v4520_v17 = vld [vmem:[%s13689_s1 + $0x38] sm:$0xff]  ;;  %s13690_s1 = sld [smem:[#allocation86_spill]] }
 0xb3c   : > { %v4344_v11 = vpop.xlane.xlu1 %4343 }
 0xb3d   : > { %v4349_v59 = vmul.f32 0.03125, %v4344_v11  ;;  %v4354_v50 = vmul.f32 %v4351_v18, %v4351_v18  ;;  %v8563_v11 = vld [vmem:[#allocation7] ss:$0 sm:$0xff] }
 0xb3f   : > { %v4352_v53 = vsub.f32 %v12876_v38, %v4349_v59  ;;  %v4357_v2 = vsel %vm2646_vm2, %v4354_v50, 0.0 }
 0xb40   : > { %4358 = vadd.xlane.f32.xlu1 %v4357_v2  ;;  %v4347_v9 = vpop.xlane.xlu0 %4346 }
 0xb41   : > { %v4350_v22 = vmul.f32 0.03125, %v4347_v9  ;;  %v4355_v6 = vmul.f32 %v4352_v53, %v4352_v53 }
 0xb43   : > { %v4353_v24 = vsub.f32 %v12881_v8, %v4350_v22  ;;  %v4360_v25 = vsel %vm2646_vm2, %v4355_v6, 0.0 }
 0xb44   : > { %4361 = vadd.xlane.f32.xlu0 %v4360_v25 }
 0xb45   : > { %v4356_v16 = vmul.f32 %v4353_v24, %v4353_v24 }
 0xb47   : > { %v4363_v28 = vsel %vm2646_vm2, %v4356_v16, 0.0 }
 0xb48   : > { %4364 = vadd.xlane.f32.xlu1 %v4363_v28 }
 0xbcd   : > { %v4359_v31 = vpop.xlane.xlu1 %4358 }
 0xbce   : > { %v4366_v33 = vmul.f32 0.03125, %v4359_v31 }
 0xbd0   : > { %v4369_v3 = vadd.f32 1e-06, %v4366_v33 }
 0xbd1   : > { %v4362_v49 = vpop.xlane.xlu0 %4361 }
 0xbd2   : > { %10480 = vrsqrt.f32 %v4369_v3  ;;  %v4367_v35 = vmul.f32 0.03125, %v4362_v49 }
 0xbd4   : > { %v4370_v19 = vadd.f32 1e-06, %v4367_v35 }
 0xbd5   : > { %v4365_v56 = vpop.xlane.xlu1 %4364 }
 0xbd6   : > { %10482 = vrsqrt.f32 %v4370_v19  ;;  %v4368_v58 = vmul.f32 0.03125, %v4365_v56 }
 0xbd8   : > { %v4371_v5 = vadd.f32 1e-06, %v4368_v58  ;;  %v8567_v58 = vld [vmem:[#allocation8] ss:$0 sm:$0xff] }
 0xbda   : > { %10484 = vrsqrt.f32 %v4371_v5 }
 0xbdc   : > { %v10481_v61 = vpop.eup %10480 }
 0xbdd   : > { %v4375_v15 = vmul.f32 %v10481_v61, %v4351_v18  ;;  %v9847_v18 = vpack.c.bf16 %v4520_v17, %v4519_v54 }
 0xbdf   : > { %v4385_v41 = vmul.f32 %v8561_v32, %v4375_v15  ;;  %9848 = vmatpush3.bf16.msra.mxu1 %v9847_v18 }
 0xbe0   : > { %v10483_v44 = vpop.eup %10482  ;;  %9861 = vmatprep.subr.bf16.mxu1 %v11549_v0 }
 0xbe1   : > { %v4395_v45 = vadd.f32 %v8562_v40, %v4385_v41  ;;  %v4376_v21 = vmul.f32 %v10483_v44, %v4352_v53 }
 0xbe3   : > { %9242 = vmatmul.mubr.msk.f32.vlgmr.msra.gmra.mrb[40].mxu0 %vm2646_vm2, %v4395_v45  ;;  %v4386_v47 = vmul.f32 %v8561_v32, %v4376_v21 }
 0xbe4   : > { %v10485_v51 = vpop.eup %10484  ;;  %9244 = vmatprep.mubr.msk.f32.mxu0 %vm11550_vm3, %v11551_v42 }
 0xbe5   : > { %v4396_v52 = vadd.f32 %v8562_v40, %v4386_v47  ;;  %v4377_v20 = vmul.f32 %v10485_v51, %v4353_v24 }
 0xbe7   : > { %9245 = vmatmul.mubr.msk.f32.gmra.mrb[42].mxu0 %vm2646_vm2, %v4396_v52  ;;  %v4387_v60 = vmul.f32 %v8561_v32, %v4377_v20 }
 0xbe8   : > { %9247 = vmatprep.mubr.msk.f32.mxu0 %vm11550_vm3, %v11551_v42 }
 0xbe9   : > { %v4397_v62 = vadd.f32 %v8562_v40, %v4387_v60 }
 0xbeb   : > { %9248 = vmatmul.mubr.msk.f32.gmra.mrb[44].mxu0 %vm2646_vm2, %v4397_v62 }
 0xbec   : > { %9283 = vmatprep.mubr.msk.f32.mxu0 %vm11550_vm3, %v11551_v42 }
 0xcb6   : > { %v4484_v59 = vpop.f32.mrb[40].mxu0 }
 0xcb7   : > { %v4485_v50 = vadd.f32 %v8563_v11, %v4484_v59  ;;  %v9243_v53 = vpop.f32.mrb[41].mxu0 }
 0xcb9   : > { %v4501_v2 = vmul.f32 0.70710677, %v4485_v50  ;;  %v4498_v55 = vmul.f32 0.5, %v4485_v50 }
 0xcba   : > { %v4489_v9 = vpop.f32.mrb[42].mxu0 }
 0xcbb   : > { %10486 = verf.f32 %v4501_v2  ;;  %v4490_v22 = vadd.f32 %v8563_v11, %v4489_v9  ;;  %v9246_v6 = vpop.f32.mrb[43].mxu0 }
 0xcbd   : > { %v4502_v24 = vmul.f32 0.70710677, %v4490_v22  ;;  %v4499_v31 = vmul.f32 0.5, %v4490_v22 }
 0xcbe   : > { %v4494_v25 = vpop.f32.mrb[44].mxu0 }
 0xcbf   : > { %10488 = verf.f32 %v4502_v24  ;;  %v4495_v16 = vadd.f32 %v8563_v11, %v4494_v25  ;;  %v9249_v28 = vpop.f32.mrb[45].mxu0 }
 0xcc1   : > { %v4503_v14 = vmul.f32 0.70710677, %v4495_v16  ;;  %v4500_v35 = vmul.f32 0.5, %v4495_v16 }
 0xcc3   : > { %10490 = verf.f32 %v4503_v14 }
 0xcc5   : > { %v10487_v12 = vpop.eup %10486 }
 0xcc6   : > { %v4507_v57 = vadd.f32 1.0, %v10487_v12 }
 0xcc8   : > { %v4510_v4 = vmul.f32 %v4507_v57, %v4498_v55 }
 0xcc9   : > { %v10489_v23 = vpop.eup %10488 }
 0xcca   : > { %v4508_v33 = vadd.f32 1.0, %v10489_v23  ;;  %9267 = vmatmul.mubr.msk.f32.vlgmr.msra.gmra.mrb[24].mxu1 %vm2561_vm0, %v4510_v4  ;;  %v4671_v4 = vld [vmem:[%s13674_s3] sm:$0xff] }
 0xccb   : > { %9269 = vmatprep.mubr.msk.f32.mxu1 %vm11550_vm3, %v11551_v42 }
 0xccc   : > { %v4511_v3 = vmul.f32 %v4508_v33, %v4499_v31 }
 0xccd   : > { %v10491_v49 = vpop.eup %10490 }
 0xcce   : > { %v4509_v19 = vadd.f32 1.0, %v10491_v49  ;;  %9270 = vmatmul.mubr.msk.f32.gmra.mrb[26].mxu1 %vm2561_vm0, %v4511_v3  ;;  %v4672_v3 = vld [vmem:[%s13674_s3 + $0x8] sm:$0xff] }
 0xccf   : > { %9272 = vmatprep.mubr.msk.f32.mxu1 %vm11550_vm3, %v11551_v42 }
 0xcd0   : > { %v4512_v56 = vmul.f32 %v4509_v19, %v4500_v35 }
 0xcd2   : > { %9273 = vmatmul.mubr.msk.f32.gmra.mrb[28].mxu1 %vm2561_vm0, %v4512_v56  ;;  %v4673_v56 = vld [vmem:[%s13674_s3 + $0x10] sm:$0xff]  ;;  %s13692_s3 = sld [smem:[#allocation88_spill]] }
 0xcd3   : > { %9317 = vmatprep.mubr.msk.f32.mxu1 %vm11550_vm3, %v11551_v42 }
 0xd9d   : > { %v4603_v5 = vpop.f32.mrb[24].mxu1 }
 0xd9e   : > { %v4604_v61 = vadd.f32 %v8567_v58, %v4603_v5  ;;  %v9268_v32 = vpop.f32.mrb[25].mxu1 }
 0xda0   : > { %v4617_v15 = vadd.f32 %v4604_v61, %v12871_v27 }
 0xda1   : > { %v4608_v40 = vpop.f32.mrb[26].mxu1 }
 0xda2   : > { %4620 = vst.msk [vmem:[#allocation2] sm:$0xff] %vm2646_vm2, %v4617_v15  ;;  %v4609_v41 = vadd.f32 %v8567_v58, %v4608_v40  ;;  %v9271_v44 = vpop.f32.mrb[27].mxu1 }
 0xda4   : > { %v4618_v45 = vadd.f32 %v4609_v41, %v12876_v38 }
 0xda5   : > { %v4613_v21 = vpop.f32.mrb[28].mxu1 }
 0xda6   : > { %4621 = vst.msk [vmem:[#allocation2 + $0x8] sm:$0xff] %vm2646_vm2, %v4618_v45  ;;  %v4614_v47 = vadd.f32 %v8567_v58, %v4613_v21  ;;  %v9274_v51 = vpop.f32.mrb[29].mxu1 }
 0xda8   : > { %v4619_v52 = vadd.f32 %v4614_v47, %v12881_v8 }
 0xda9   : > { %v4623_v20 = vld [vmem:[#allocation2] sm:$0xff] }
 0xdaa   : > { %4622 = vst.msk [vmem:[#allocation2 + $0x10] sm:$0xff] %vm2646_vm2, %v4619_v52  ;;  %v4626_v60 = vadd.f32 %v4623_v20, %v12474_v63 }
 0xdac   : > { %v4629_v27 = vmul.f32 %v4626_v60, %v4626_v60 }
 0xdad   : > { %v4624_v62 = vld [vmem:[#allocation2 + $0x8] sm:$0xff] }
 0xdae   : > { %v4632_v1 = vsel %vm2646_vm2, %v4629_v27, 0.0  ;;  %v4627_v29 = vadd.f32 %v4624_v62, %v12474_v63 }
 0xdaf   : > { %4633 = vadd.xlane.f32.xlu0 %v4632_v1 }
 0xdb0   : > { %v4630_v38 = vmul.f32 %v4627_v29, %v4627_v29 }
 0xdb1   : > { %v4625_v34 = vld [vmem:[#allocation2 + $0x10] sm:$0xff] }
 0xdb2   : > { %v4635_v39 = vsel %vm2646_vm2, %v4630_v38, 0.0  ;;  %v4628_v7 = vadd.f32 %v4625_v34, %v12474_v63 }
 0xdb3   : > { %4636 = vadd.xlane.f32.xlu1 %v4635_v39 }
 0xdb4   : > { %v4631_v8 = vmul.f32 %v4628_v7, %v4628_v7 }
 0xdb6   : > { %v4638_v30 = vsel %vm2646_vm2, %v4631_v8, 0.0  ;;  %v4742_v8 = vld [vmem:[%s13690_s1] sm:$0xff] }
 0xdb7   : > { %4639 = vadd.xlane.f32.xlu0 %v4638_v30  ;;  %v4743_v30 = vld [vmem:[%s13690_s1 + $0x8] sm:$0xff] }
 0xe3c   : > { %v4634_v10 = vpop.xlane.xlu0 %4633 }
 0xe3d   : > { %10492 = vrsqrt.f32 %v4634_v10  ;;  %vm4643_vm5 = vcmp.eq.f32.partialorder %v4634_v10, inf  ;;  %v4646_v18 = vand.u32 2147483648, %v4634_v10  ;;  %vm4645_vm6 = vcmp.eq.f32.partialorder %v4634_v10, 0.0 }
 0xe40   : > { %v4637_v13 = vpop.xlane.xlu1 %4636 }
 0xe41   : > { %10494 = vrsqrt.f32 %v4637_v13  ;;  %vm4650_vm7 = vcmp.eq.f32.partialorder %v4637_v13, inf  ;;  %v4653_v9 = vand.u32 2147483648, %v4637_v13  ;;  %vm4652_vm8 = vcmp.eq.f32.partialorder %v4637_v13, 0.0 }
 0xe44   : > { %v4640_v46 = vpop.xlane.xlu0 %4639 }
 0xe45   : > { %10496 = vrsqrt.f32 %v4640_v46  ;;  %vm4657_vm9 = vcmp.eq.f32.partialorder %v4640_v46, inf  ;;  %v4660_v28 = vand.u32 2147483648, %v4640_v46  ;;  %vm4659_vm10 = vcmp.eq.f32.partialorder %v4640_v46, 0.0 }
 0xe47   : > { %v10493_v54 = vpop.eup %10492 }
 0xe48   : > { %v4642_v17 = vmul.f32 %v10493_v54, %v4634_v10 }
 0xe4a   : > { %v4644_v11 = vsel %vm4643_vm5, %v4634_v10, %v4642_v17  ;;  %v4933_v10 = vld [vmem:[%s13691_s2] sm:$0xff]  ;;  %v4744_v17 = vld [vmem:[%s13690_s1 + $0x10] sm:$0xff] }
 0xe4b   : > { %v10495_v59 = vpop.eup %10494  ;;  %v4647_v50 = vsel %vm4645_vm6, %v4646_v18, %v4644_v11  ;;  %v4745_v18 = vld [vmem:[%s13690_s1 + $0x18] sm:$0xff]  ;;  %v4935_v11 = vld [vmem:[%s13691_s2 + $0x10] sm:$0xff]  ;;  %s13693_s1 = sld [smem:[#allocation91_spill]] }
 0xe4c   : > { %v4662_v53 = vmax.f32 %v4647_v50, 1e-12  ;;  %v4649_v2 = vmul.f32 %v10495_v59, %v4637_v13  ;;  %v9853_v59 = vpack.c.bf16 %v4745_v18, %v4744_v17  ;;  %v4936_v50 = vld [vmem:[%s13691_s2 + $0x18] sm:$0xff] }
 0xe4e   : > { %10498 = vrcp.f32 %v4662_v53  ;;  %v4651_v22 = vsel %vm4650_vm7, %v4637_v13, %v4649_v2  ;;  %v9850_v13 = vpack.c.bf16 %v4743_v30, %v4742_v8  ;;  %v9865_v53 = vpack.c.bf16 %v4936_v50, %v4935_v11 }
 0xe4f   : > { %v10497_v6 = vpop.eup %10496  ;;  %v4654_v24 = vsel %vm4652_vm8, %v4653_v9, %v4651_v22 }
 0xe50   : > { %v4663_v25 = vmax.f32 %v4654_v24, 1e-12  ;;  %v4656_v16 = vmul.f32 %v10497_v6, %v4640_v46  ;;  %9851 = vmatpush3.bf16.msra.mxu0 %v9850_v13 }
 0xe51   : > { %9852 = vmatprep.subr.bf16.mxu0 %v11549_v0 }
 0xe52   : > { %10500 = vrcp.f32 %v4663_v25  ;;  %v4658_v14 = vsel %vm4657_vm9, %v4640_v46, %v4656_v16  ;;  %v4934_v46 = vld [vmem:[%s13691_s2 + $0x8] sm:$0xff]  ;;  %s13695_s2 = sld [smem:[#allocation96_spill]] }
 0xe53   : > { %v4661_v12 = vsel %vm4659_vm10, %v4660_v28, %v4658_v14  ;;  %v9862_v54 = vpack.c.bf16 %v4934_v46, %v4933_v10 }
 0xe54   : > { %v4664_v55 = vmax.f32 %v4661_v12, 1e-12  ;;  %9854 = vmatpush3.bf16.msra.mxu0 %v9853_v59 }
 0xe55   : > { %9863 = vmatpush3.bf16.msra.mxu1 %v9862_v54  ;;  %9855 = vmatprep.subr.bf16.mxu0 %v11549_v0 }
 0xe56   : > { %10502 = vrcp.f32 %v4664_v55  ;;  %9864 = vmatprep.subr.bf16.mxu1 %v11549_v0  ;;  %v8571_v55 = vld [vmem:[#allocation10] ss:$0 sm:$0xff] }
 0xe58   : > { %v10499_v57 = vpop.eup %10498 }
 0xe59   : > { %v4666_v23 = vmul.f32 %v10499_v57, %v4626_v60  ;;  %9866 = vmatpush3.bf16.msra.mxu1 %v9865_v53 }
 0xe5a   : > { %9871 = vmatprep.subr.bf16.mxu1 %v11549_v0 }
 0xe5b   : > { %v4674_v31 = vadd.f32 %v4671_v4, %v4666_v23  ;;  %v4842_v4 = vld [vmem:[%s13692_s3] sm:$0xff]  ;;  %v4843_v23 = vld [vmem:[%s13692_s3 + $0x8] sm:$0xff] }
 0xe5c   : > { %v10501_v33 = vpop.eup %10500 }
 0xe5d   : > { %4677 = vst.msk [vmem:[#allocation2] sm:$0xff] %vm2646_vm2, %v4674_v31  ;;  %v4668_v49 = vmul.f32 %v10501_v33, %v4627_v29  ;;  %v8572_v31 = vld [vmem:[#allocation11] ss:$0 sm:$0xff] }
 0xe5f   : > { %v4675_v35 = vadd.f32 %v4672_v3, %v4668_v49  ;;  %v9856_v49 = vpack.c.bf16 %v4843_v23, %v4842_v4  ;;  %v8573_v23 = vld [vmem:[#allocation13] ss:$0 sm:$0xff] }
 0xe60   : > { %v10503_v19 = vpop.eup %10502 }
 0xe61   : > { %4678 = vst.msk [vmem:[#allocation2 + $0x8] sm:$0xff] %vm2646_vm2, %v4675_v35  ;;  %v4670_v58 = vmul.f32 %v10503_v19, %v4628_v7 }
 0xe63   : > { %v4676_v5 = vadd.f32 %v4673_v56, %v4670_v58  ;;  %v4844_v56 = vld [vmem:[%s13692_s3 + $0x10] sm:$0xff]  ;;  %v4845_v58 = vld [vmem:[%s13692_s3 + $0x18] sm:$0xff] }
 0xe64   : > { %v12944_v61 = vld [vmem:[#allocation2] sm:$0xff] }
 0xe65   : > { %4679 = vst.msk [vmem:[#allocation2 + $0x10] sm:$0xff] %vm2646_vm2, %v4676_v5  ;;  %v4683_v32 = vsel %vm2646_vm2, %v12944_v61, 0.0 }
 0xe66   : > { %4684 = vadd.xlane.f32.xlu1 %v4683_v32 }
 0xe68   : > { %v12949_v15 = vld [vmem:[#allocation2 + $0x8] sm:$0xff] }
 0xe69   : > { %v4686_v40 = vsel %vm2646_vm2, %v12949_v15, 0.0 }
 0xe6a   : > { %4687 = vadd.xlane.f32.xlu0 %v4686_v40 }
 0xe6c   : > { %v12953_v41 = vld [vmem:[#allocation2 + $0x10] sm:$0xff] }
 0xe6d   : > { %v4689_v44 = vsel %vm2646_vm2, %v12953_v41, 0.0 }
 0xe6e   : > { %4690 = vadd.xlane.f32.xlu1 %v4689_v44 }
 0xef3   : > { %v4685_v45 = vpop.xlane.xlu1 %4684 }
 0xef4   : > { %v4692_v21 = vmul.f32 0.03125, %v4685_v45  ;;  %v9859_v45 = vpack.c.bf16 %v4845_v58, %v4844_v56 }
 0xef6   : > { %v4695_v47 = vsub.f32 %v12944_v61, %v4692_v21 }
 0xef7   : > { %v4688_v51 = vpop.xlane.xlu0 %4687 }
 0xef8   : > { %v4693_v52 = vmul.f32 0.03125, %v4688_v51  ;;  %v4698_v20 = vmul.f32 %v4695_v47, %v4695_v47  ;;  %v8581_v51 = vld [vmem:[#allocation16] ss:$0 sm:$0xff] }
 0xefa   : > { %v4696_v60 = vsub.f32 %v12949_v15, %v4693_v52  ;;  %v4701_v27 = vsel %vm2646_vm2, %v4698_v20, 0.0 }
 0xefb   : > { %4702 = vadd.xlane.f32.xlu0 %v4701_v27  ;;  %v4691_v62 = vpop.xlane.xlu1 %4690 }
 0xefc   : > { %v4694_v1 = vmul.f32 0.03125, %v4691_v62  ;;  %v4699_v29 = vmul.f32 %v4696_v60, %v4696_v60 }
 0xefe   : > { %v4697_v38 = vsub.f32 %v12953_v41, %v4694_v1  ;;  %v4704_v34 = vsel %vm2646_vm2, %v4699_v29, 0.0 }
 0xeff   : > { %4705 = vadd.xlane.f32.xlu1 %v4704_v34 }
 0xf00   : > { %v4700_v39 = vmul.f32 %v4697_v38, %v4697_v38 }
 0xf02   : > { %v4707_v7 = vsel %vm2646_vm2, %v4700_v39, 0.0 }
 0xf03   : > { %4708 = vadd.xlane.f32.xlu0 %v4707_v7 }
 0xf88   : > { %v4703_v2 = vpop.xlane.xlu0 %4702 }
 0xf89   : > { %v4710_v9 = vmul.f32 0.03125, %v4703_v2 }
 0xf8b   : > { %v4713_v22 = vadd.f32 1e-06, %v4710_v9 }
 0xf8c   : > { %v4706_v6 = vpop.xlane.xlu1 %4705 }
 0xf8d   : > { %10504 = vrsqrt.f32 %v4713_v22  ;;  %v4711_v24 = vmul.f32 0.03125, %v4706_v6 }
 0xf8f   : > { %v4714_v25 = vadd.f32 1e-06, %v4711_v24 }
 0xf90   : > { %v4709_v16 = vpop.xlane.xlu0 %4708 }
 0xf91   : > { %10506 = vrsqrt.f32 %v4714_v25  ;;  %v4712_v28 = vmul.f32 0.03125, %v4709_v16  ;;  %v8577_v25 = vld [vmem:[#allocation14] ss:$0 sm:$0xff] }
 0xf93   : > { %v4715_v14 = vadd.f32 1e-06, %v4712_v28 }
 0xf95   : > { %10508 = vrsqrt.f32 %v4715_v14 }
 0xf97   : > { %v10505_v12 = vpop.eup %10504 }
 0xf98   : > { %v4719_v57 = vmul.f32 %v10505_v12, %v4695_v47 }
 0xf9a   : > { %v4729_v33 = vmul.f32 %v8571_v55, %v4719_v57 }
 0xf9b   : > { %v10507_v3 = vpop.eup %10506 }
 0xf9c   : > { %v4739_v35 = vadd.f32 %v8572_v31, %v4729_v33  ;;  %v4720_v19 = vmul.f32 %v10507_v3, %v4696_v60 }
 0xf9e   : > { %9284 = vmatmul.mubr.msk.f32.vlgmr.msra.gmra.mrb[46].mxu0 %vm2646_vm2, %v4739_v35  ;;  %9318 = vmatmul.mubr.msk.f32.vlgmr.msra.gmra.mrb[30].mxu1 %vm2646_vm2, %v4739_v35  ;;  %v4730_v5 = vmul.f32 %v8571_v55, %v4720_v19 }
 0xf9f   : > { %v10509_v32 = vpop.eup %10508  ;;  %9286 = vmatprep.mubr.msk.f32.mxu0 %vm11550_vm3, %v11551_v42  ;;  %9857 = vmatpush3.bf16.msra.mxu0 %v9856_v49 }
 0xfa0   : > { %9320 = vmatprep.mubr.msk.f32.mxu1 %vm11550_vm3, %v11551_v42  ;;  %v4740_v40 = vadd.f32 %v8572_v31, %v4730_v5  ;;  %v4721_v44 = vmul.f32 %v10509_v32, %v4697_v38  ;;  %9858 = vmatprep.subr.bf16.mxu0 %v11549_v0 }
 0xfa2   : > { %9287 = vmatmul.mubr.msk.f32.gmra.mrb[48].mxu0 %vm2646_vm2, %v4740_v40  ;;  %9321 = vmatmul.mubr.msk.f32.gmra.mrb[32].mxu1 %vm2646_vm2, %v4740_v40  ;;  %v4731_v21 = vmul.f32 %v8571_v55, %v4721_v44 }
 0xfa3   : > { %9289 = vmatprep.mubr.msk.f32.mxu0 %vm11550_vm3, %v11551_v42  ;;  %9323 = vmatprep.mubr.msk.f32.mxu1 %vm11550_vm3, %v11551_v42 }
 0xfa4   : > { %v4741_v47 = vadd.f32 %v8572_v31, %v4731_v21  ;;  %9860 = vmatpush3.bf16.msra.mxu0 %v9859_v45 }
 0xfa5   : > { %9867 = vmatprep.subr.bf16.mxu0 %v11549_v0 }
 0xfa6   : > { %9290 = vmatmul.mubr.msk.f32.gmra.mrb[50].mxu0 %vm2646_vm2, %v4741_v47  ;;  %9324 = vmatmul.mubr.msk.f32.gmra.mrb[34].mxu1 %vm2646_vm2, %v4741_v47 }
 0xfa7   : > { %9300 = vmatprep.mubr.msk.f32.mxu0 %vm11550_vm3, %v11551_v42  ;;  %9347 = vmatprep.mubr.msk.f32.mxu1 %vm11550_vm3, %v11551_v42 }
 0xfaa   : > { %9301 = vmatmul.mubr.msk.f32.vlgmr.msra.gmra.mrb[52].mxu0 %vm2646_vm2, %v4739_v35 }
 0xfab   : > { %9303 = vmatprep.mubr.msk.f32.mxu0 %vm11550_vm3, %v11551_v42 }
 0xfae   : > { %9304 = vmatmul.mubr.msk.f32.gmra.mrb[54].mxu0 %vm2646_vm2, %v4740_v40 }
 0xfaf   : > { %9306 = vmatprep.mubr.msk.f32.mxu0 %vm11550_vm3, %v11551_v42 }
 0xfb2   : > { %9307 = vmatmul.mubr.msk.f32.gmra.mrb[56].mxu0 %vm2646_vm2, %v4741_v47 }
 0xfb3   : > { %9332 = vmatprep.mubr.msk.f32.mxu0 %vm11550_vm3, %v11551_v42 }
0x1071   : > { %v4828_v52 = vpop.f32.mrb[46].mxu0  ;;  %v5010_v20 = vpop.f32.mrb[30].mxu1 }
0x1072   : > { %v9285_v60 = vpop.f32.mrb[47].mxu0  ;;  %v9319_v27 = vpop.f32.mrb[31].mxu1  ;;  %v5011_v62 = vadd.f32 %v8581_v51, %v5010_v20  ;;  %v4829_v31 = vadd.f32 %v8573_v23, %v4828_v52 }
0x1074   : > { %v13009_v7 = vmul.f32 %v5011_v62, %v12586_v36  ;;  %v5292_v8 = vmul.f32 %v5011_v62, %v12589_v37  ;;  %v13023_v54 = vmul.f32 %v5011_v62, %v12596_v43  ;;  %v13026_v17 = vmul.f32 %v5011_v62, %v12607_v48 }
0x1075   : > { %v4833_v1 = vpop.f32.mrb[48].mxu0  ;;  %v5015_v29 = vpop.f32.mrb[32].mxu1  ;;  %v5024_v3 = vmul.f32 %v4829_v31, %v12586_v36  ;;  %v5164_v49 = vmul.f32 %v4829_v31, %v12589_v37  ;;  %v5473_v45 = vmul.f32 %v4829_v31, %v12596_v43  ;;  %v5696_v26 = vmul.f32 %v4829_v31, %v12607_v48 }
0x1076   : > { %v5016_v38 = vadd.f32 %v8581_v51, %v5015_v29  ;;  %v9288_v34 = vpop.f32.mrb[49].mxu0  ;;  %v9322_v39 = vpop.f32.mrb[33].mxu1  ;;  %v4834_v35 = vadd.f32 %v8573_v23, %v4833_v1 }
0x1078   : > { %v13013_v30 = vmul.f32 %v5016_v38, %v12586_v36  ;;  %v5293_v10 = vmul.f32 %v5016_v38, %v12589_v37  ;;  %v13017_v13 = vmul.f32 %v5016_v38, %v12596_v43  ;;  %v13020_v46 = vmul.f32 %v5016_v38, %v12607_v48 }
0x1079   : > { %v4838_v18 = vpop.f32.mrb[50].mxu0  ;;  %v5020_v11 = vpop.f32.mrb[34].mxu1  ;;  %v5025_v58 = vmul.f32 %v4834_v35, %v12586_v36  ;;  %v5165_v5 = vmul.f32 %v4834_v35, %v12589_v37  ;;  %v5697_v47 = vmul.f32 %v4834_v35, %v12607_v48 }
0x107a   : > { %v9291_v59 = vpop.f32.mrb[51].mxu0  ;;  %v9325_v50 = vpop.f32.mrb[35].mxu1  ;;  %v9876_v53 = vpack.c.bf16 %v5293_v10, %v5292_v8  ;;  %v9879_v2 = vpack.c.bf16 %v13013_v30, %v13009_v7  ;;  %v9886_v9 = vpack.c.bf16 %v13017_v13, %v13023_v54  ;;  %v9893_v22 = vpack.c.bf16 %v13020_v46, %v13026_v17 }
0x107b   : > { %v13046_v19 = vadd.f32 %v8581_v51, %v5020_v11  ;;  %v4839_v56 = vadd.f32 %v8573_v23, %v4838_v18 }
0x107d   : > { %v4919_v6 = vpop.f32.mrb[52].mxu0  ;;  %v5294_v32 = vmul.f32 %v13046_v19, %v12589_v37  ;;  %v5026_v40 = vmul.f32 %v4839_v56, %v12586_v36  ;;  %v5166_v44 = vmul.f32 %v4839_v56, %v12589_v37  ;;  %v5474_v37 = vmul.f32 %v4834_v35, %v12596_v43 }
0x107e   : > { %v9302_v24 = vpop.f32.mrb[53].mxu0  ;;  %v4920_v28 = vadd.f32 %v8577_v25, %v4919_v6  ;;  %v5475_v21 = vmul.f32 %v4839_v56, %v12596_v43  ;;  %v5698_v51 = vmul.f32 %v4839_v56, %v12607_v48 }
0x1081   : > { %v4924_v16 = vpop.f32.mrb[54].mxu0 }
0x1082   : > { %v4925_v14 = vadd.f32 %v8577_v25, %v4924_v16  ;;  %v9305_v12 = vpop.f32.mrb[55].mxu0 }
0x1084   : > { %v9868_v55 = vpack.c.bf16 %v4925_v14, %v4920_v28 }
0x1085   : > { %v4929_v57 = vpop.f32.mrb[56].mxu0 }
0x1086   : > { %v9308_v4 = vpop.f32.mrb[57].mxu0  ;;  %9870 = vmatpush3.bf16.xpose.msk.msra.mxu0 %vm12567_vm4, %v9868_v55  ;;  %9874 = vmatpush3.bf16.xpose.msk.msra.mxu1 %vm12567_vm4, %v9868_v55  ;;  %v4930_v33 = vadd.f32 %v8577_v25, %v4929_v57 }
0x1087   : > { %9330 = vmatprep.subr.mxu0 %v11551_v42  ;;  %9345 = vmatprep.subr.mxu1 %v11551_v42 }
0x108e   : > { %9331 = vmatpush3.xpose.msk.msra.mxu0 %vm2646_vm2, %v4930_v33  ;;  %9346 = vmatpush3.xpose.msk.msra.mxu1 %vm2646_vm2, %v4930_v33 }
0x108f   : > { %9875 = vmatprep.subr.bf16.mxu0 %v11549_v0  ;;  %9881 = vmatprep.subr.bf16.mxu1 %v11549_v0 }
0x1091   : > { %9333 = vmatmul.mubr.msk.f32.vlgmr.msra.gmra.mrb[58].mxu0 %vm2646_vm2, %v5024_v3  ;;  %9348 = vmatmul.mubr.msk.f32.vlgmr.msra.gmra.mrb[36].mxu1 %vm2646_vm2, %v5164_v49 }
0x1092   : > { %9877 = vmatpush3.bf16.msra.mxu0 %v9876_v53  ;;  %9884 = vmatpush3.bf16.xpose.msk.msra.mxu1 %vm12567_vm4, %v9868_v55 }
0x1093   : > { %9335 = vmatprep.mubr.msk.f32.mxu0 %vm11550_vm3, %v11551_v42  ;;  %9350 = vmatprep.mubr.msk.f32.mxu1 %vm11550_vm3, %v11551_v42 }
0x1094   : > { %9360 = vmatprep.subr.mxu0 %v11551_v42  ;;  %9390 = vmatprep.subr.mxu1 %v11551_v42 }
0x1095   : > { %9336 = vmatmul.mubr.msk.f32.gmra.mrb[60].mxu0 %vm2646_vm2, %v5025_v58  ;;  %9351 = vmatmul.mubr.msk.f32.gmra.mrb[38].mxu1 %vm2646_vm2, %v5165_v5 }
0x1096   : > { %9361 = vmatpush3.msra.mxu0 %v5294_v32  ;;  %9338 = vmatprep.mubr.msk.f32.mxu0 %vm11550_vm3, %v11551_v42 }
0x1097   : > { %9353 = vmatprep.mubr.msk.f32.mxu1 %vm11550_vm3, %v11551_v42  ;;  %9878 = vmatprep.subr.bf16.mxu0 %v11549_v0 }
0x1099   : > { %9339 = vmatmul.mubr.msk.f32.gmra.mrb[62].mxu0 %vm2646_vm2, %v5026_v40  ;;  %9354 = vmatmul.mubr.msk.f32.gmra.mrb[40].mxu1 %vm2646_vm2, %v5166_v44 }
0x109a   : > { %9391 = vmatpush3.xpose.msk.msra.mxu1 %vm2646_vm2, %v4930_v33  ;;  %9392 = vmatprep.mubr.msk.f32.mxu1 %vm11550_vm3, %v11551_v42 }
0x109b   : > { %9888 = vmatprep.subr.bf16.mxu1 %v11549_v0  ;;  %9362 = vmatprep.mubr.msk.f32.mxu0 %vm11550_vm3, %v11551_v42 }
0x109d   : > { %9393 = vmatmul.mubr.msk.f32.vlgmr.msra.gmra.mrb[42].mxu1 %vm2646_vm2, %v5473_v45 }
0x109e   : > { %9891 = vmatpush3.bf16.xpose.msk.msra.mxu1 %vm12567_vm4, %v9868_v55  ;;  %9395 = vmatprep.mubr.msk.f32.mxu1 %vm11550_vm3, %v11551_v42 }
0x109f   : > { %9420 = vmatprep.subr.mxu1 %v11551_v42 }
0x10a1   : > { %9396 = vmatmul.mubr.msk.f32.gmra.mrb[44].mxu1 %vm2646_vm2, %v5474_v37 }
0x10a2   : > { %9398 = vmatprep.mubr.msk.f32.mxu1 %vm11550_vm3, %v11551_v42 }
0x10a5   : > { %9399 = vmatmul.mubr.msk.f32.gmra.mrb[46].mxu1 %vm2646_vm2, %v5475_v21 }
0x10a6   : > { %9421 = vmatpush3.xpose.msk.msra.mxu1 %vm2646_vm2, %v4930_v33  ;;  %9422 = vmatprep.mubr.msk.f32.mxu1 %vm11550_vm3, %v11551_v42 }
0x10a7   : > { %9895 = vmatprep.subr.bf16.mxu1 %v11549_v0 }
0x10a9   : > { %9423 = vmatmul.mubr.msk.f32.vlgmr.msra.gmra.mrb[48].mxu1 %vm2646_vm2, %v5696_v26 }
0x10aa   : > { %9425 = vmatprep.mubr.msk.f32.mxu1 %vm11550_vm3, %v11551_v42 }
0x10ad   : > { %9426 = vmatmul.mubr.msk.f32.gmra.mrb[50].mxu1 %vm2646_vm2, %v5697_v47 }
0x10ae   : > { %9428 = vmatprep.mubr.msk.f32.mxu1 %vm11550_vm3, %v11551_v42 }
0x10b1   : > { %9429 = vmatmul.mubr.msk.f32.gmra.mrb[52].mxu1 %vm2646_vm2, %v5698_v51 }
0x10b2   : > { %9454 = vmatprep.mubr.msk.f32.mxu1 %vm11550_vm3, %v11551_v42 }
0x1164   : > { %v5111_v52 = vpop.f32.mrb[58].mxu0  ;;  %v5242_v20 = vpop.f32.mrb[36].mxu1 }
0x1165   : > { %v5256_v60 = vmul.f32 0.35355338, %v5242_v20  ;;  %v9334_v27 = vpop.f32.mrb[59].mxu0  ;;  %v9349_v62 = vpop.f32.mrb[37].mxu1  ;;  %v5125_v10 = vmul.f32 0.35355338, %v5111_v52 }
0x1167   : > { %v5259_v1 = vsel %vm3444_vm15, %v5256_v60, -inf  ;;  %v5128_v28 = vsel %vm3444_vm15, %v5125_v10, -inf }
0x1168   : > { %5260 = vmax.xlane.f32.xlu1 %v5259_v1  ;;  %v5116_v29 = vpop.f32.mrb[60].mxu0  ;;  %v5247_v38 = vpop.f32.mrb[38].mxu1 }
0x1169   : > { %v5257_v34 = vmul.f32 0.35355338, %v5247_v38  ;;  %v9337_v39 = vpop.f32.mrb[61].mxu0  ;;  %v9352_v8 = vpop.f32.mrb[39].mxu1  ;;  %v5126_v24 = vmul.f32 0.35355338, %v5116_v29 }
0x116b   : > { %v5262_v18 = vsel %vm3444_vm15, %v5257_v34, -inf  ;;  %v5131_v57 = vsel %vm3444_vm15, %v5126_v24, -inf }
0x116c   : > { %5263 = vmax.xlane.f32.xlu0 %v5262_v18  ;;  %v5121_v11 = vpop.f32.mrb[62].mxu0  ;;  %v5252_v59 = vpop.f32.mrb[40].mxu1 }
0x116d   : > { %v5258_v50 = vmul.f32 0.35355338, %v5252_v59  ;;  %v9340_v53 = vpop.f32.mrb[63].mxu0  ;;  %v9355_v6 = vpop.f32.mrb[41].mxu1  ;;  %v5127_v25 = vmul.f32 0.35355338, %v5121_v11 }
0x116f   : > { %v5265_v16 = vsel %vm3444_vm15, %v5258_v50, -inf  ;;  %v5134_v4 = vsel %vm3444_vm15, %v5127_v25, -inf }
0x1170   : > { %5266 = vmax.xlane.f32.xlu1 %v5265_v16  ;;  %v5551_v14 = vpop.f32.mrb[42].mxu1  ;;  %5129 = vmax.xlane.f32.xlu0 %v5128_v28 }
0x1171   : > { %v9394_v12 = vpop.f32.mrb[43].mxu1  ;;  %v5565_v55 = vmul.f32 0.35355338, %v5551_v14 }
0x1173   : > { %v5568_v3 = vsel %vm3444_vm15, %v5565_v55, -inf }
0x1174   : > { %v5556_v23 = vpop.f32.mrb[44].mxu1  ;;  %5132 = vmax.xlane.f32.xlu1 %v5131_v57  ;;  %5135 = vmax.xlane.f32.xlu0 %v5134_v4 }
0x1175   : > { %v5566_v31 = vmul.f32 0.35355338, %v5556_v23  ;;  %v9397_v33 = vpop.f32.mrb[45].mxu1 }
0x1177   : > { %v5571_v49 = vsel %vm3444_vm15, %v5566_v31, -inf }
0x1178   : > { %v5561_v35 = vpop.f32.mrb[46].mxu1  ;;  %5569 = vmax.xlane.f32.xlu1 %v5568_v3  ;;  %5572 = vmax.xlane.f32.xlu0 %v5571_v49 }
0x1179   : > { %v5567_v56 = vmul.f32 0.35355338, %v5561_v35  ;;  %v9400_v58 = vpop.f32.mrb[47].mxu1 }
0x117b   : > { %v5574_v5 = vsel %vm3444_vm15, %v5567_v56, -inf }
0x117c   : > { %v5774_v32 = vpop.f32.mrb[48].mxu1  ;;  %5575 = vmax.xlane.f32.xlu1 %v5574_v5 }
0x117d   : > { %v5788_v40 = vmul.f32 0.35355338, %v5774_v32  ;;  %v9424_v44 = vpop.f32.mrb[49].mxu1 }
0x117f   : > { %v5791_v45 = vsel %vm3444_vm15, %v5788_v40, -inf }
0x1180   : > { %v13118_v37 = vpop.f32.mrb[50].mxu1  ;;  %5792 = vmax.xlane.f32.xlu0 %v5791_v45 }
0x1181   : > { %v9427_v21 = vpop.f32.mrb[51].mxu1 }
0x1184   : > { %v13120_v26 = vpop.f32.mrb[52].mxu1 }
0x1185   : > { %v9430_v47 = vpop.f32.mrb[53].mxu1 }
0x11f5   : > { %v5261_v51 = vpop.xlane.xlu1 %5260 }
0x11f6   : > { %v5268_v52 = vsub.f32 %v5256_v60, %v5261_v51 }
0x11f8   : > { %v5271_v20 = vmul.f32 1.442695, %v5268_v52 }
0x11f9   : > { %v5264_v27 = vpop.xlane.xlu0 %5263 }
0x11fa   : > { %10510 = vpow2.f32 %v5271_v20  ;;  %v5269_v62 = vsub.f32 %v5257_v34, %v5264_v27 }
0x11fc   : > { %v5273_v1 = vmul.f32 1.442695, %v5269_v62  ;;  %v5789_v62 = vmul.f32 0.35355338, %v13118_v37 }
0x11fd   : > { %v5267_v29 = vpop.xlane.xlu1 %5266  ;;  %v5130_v38 = vpop.xlane.xlu0 %5129 }
0x11fe   : > { %10512 = vpow2.f32 %v5273_v1  ;;  %v5270_v39 = vsub.f32 %v5258_v50, %v5267_v29  ;;  %v5137_v8 = vsub.f32 %v5125_v10, %v5130_v38  ;;  %v5790_v38 = vmul.f32 0.35355338, %v13120_v26 }
0x1200   : > { %v5275_v18 = vmul.f32 1.442695, %v5270_v39  ;;  %v5140_v11 = vmul.f32 1.442695, %v5137_v8  ;;  %v5794_v39 = vsel %vm3444_vm15, %v5789_v62, -inf }
0x1201   : > { %v5133_v59 = vpop.xlane.xlu1 %5132  ;;  %v5136_v53 = vpop.xlane.xlu0 %5135 }
0x1202   : > { %10514 = vpow2.f32 %v5275_v18  ;;  %v5138_v6 = vsub.f32 %v5126_v24, %v5133_v59  ;;  %v5139_v16 = vsub.f32 %v5127_v25, %v5136_v53  ;;  %v5797_v18 = vsel %vm3444_vm15, %v5790_v38, -inf }
0x1203   : > { %10516 = vpow2.f32 %v5140_v11 }
0x1204   : > { %v13122_v28 = vpop.eup %10510  ;;  %v5142_v60 = vmul.f32 1.442695, %v5138_v6  ;;  %v5144_v14 = vmul.f32 1.442695, %v5139_v16 }
0x1205   : > { %v5570_v12 = vpop.xlane.xlu1 %5569  ;;  %v5573_v34 = vpop.xlane.xlu0 %5572  ;;  %v5277_v57 = vsel %vm3444_vm15, %v13122_v28, 0.0 }
0x1206   : > { %10518 = vpow2.f32 %v5142_v60  ;;  %v5577_v50 = vsub.f32 %v5565_v55, %v5570_v12  ;;  %v5578_v10 = vsub.f32 %v5566_v31, %v5573_v34  ;;  %5278 = vadd.xlane.f32.xlu1 %v5277_v57 }
0x1207   : > { %10520 = vpow2.f32 %v5144_v14 }
0x1208   : > { %v13126_v4 = vpop.eup %10512  ;;  %v5580_v23 = vmul.f32 1.442695, %v5577_v50  ;;  %v5582_v24 = vmul.f32 1.442695, %v5578_v10 }
0x1209   : > { %v5576_v25 = vpop.xlane.xlu1 %5575  ;;  %v5280_v33 = vsel %vm3444_vm15, %v13126_v4, 0.0 }
0x120a   : > { %10522 = vpow2.f32 %v5580_v23  ;;  %v5579_v3 = vsub.f32 %v5567_v56, %v5576_v25  ;;  %5281 = vadd.xlane.f32.xlu0 %v5280_v33 }
0x120b   : > { %10524 = vpow2.f32 %v5582_v24 }
0x120c   : > { %v13130_v49 = vpop.eup %10514  ;;  %v5584_v35 = vmul.f32 1.442695, %v5579_v3 }
0x120d   : > { %v13132_v58 = vpop.eup %10516  ;;  %v5793_v55 = vpop.xlane.xlu0 %5792  ;;  %v5283_v31 = vsel %vm3444_vm15, %v13130_v49, 0.0 }
0x120e   : > { %10526 = vpow2.f32 %v5584_v35  ;;  %v5800_v5 = vsub.f32 %v5788_v40, %v5793_v55  ;;  %5284 = vadd.xlane.f32.xlu1 %v5283_v31  ;;  %v5146_v32 = vsel %vm3444_vm15, %v13132_v58, 0.0 }
0x120f   : > { %5147 = vadd.xlane.f32.xlu0 %v5146_v32 }
0x1210   : > { %v13138_v44 = vpop.eup %10518  ;;  %v5803_v56 = vmul.f32 1.442695, %v5800_v5 }
0x1211   : > { %v13140_v45 = vpop.eup %10520  ;;  %v5149_v21 = vsel %vm3444_vm15, %v13138_v44, 0.0 }
0x1212   : > { %10528 = vpow2.f32 %v5803_v56  ;;  %5150 = vadd.xlane.f32.xlu1 %v5149_v21  ;;  %v5152_v47 = vsel %vm3444_vm15, %v13140_v45, 0.0  ;;  %v5826_v56 = vmul.f32 %v13046_v19, %v12607_v48  ;;  %v5920_v21 = vld [vmem:[%s13693_s1 + $0x8] sm:$0xff] }
0x1213   : > { %5153 = vadd.xlane.f32.xlu0 %v5152_v47  ;;  %v5921_v47 = vld [vmem:[%s13693_s1 + $0x10] sm:$0xff] }
0x1214   : > { %v13146_v40 = vpop.eup %10522 }
0x1215   : > { %v13148_v51 = vpop.eup %10524  ;;  %v5586_v52 = vsel %vm3444_vm15, %v13146_v40, 0.0 }
0x1216   : > { %5587 = vadd.xlane.f32.xlu1 %v5586_v52  ;;  %v5589_v20 = vsel %vm3444_vm15, %v13148_v51, 0.0 }
0x1217   : > { %5590 = vadd.xlane.f32.xlu0 %v5589_v20 }
0x1218   : > { %v13154_v27 = vpop.eup %10526 }
0x1219   : > { %v5592_v1 = vsel %vm3444_vm15, %v13154_v27, 0.0 }
0x121a   : > { %5593 = vadd.xlane.f32.xlu1 %v5592_v1 }
0x121c   : > { %v13159_v29 = vpop.eup %10528 }
0x121d   : > { %v5809_v8 = vsel %vm3444_vm15, %v13159_v29, 0.0 }
0x121e   : > { %5795 = vmax.xlane.f32.xlu1 %v5794_v39  ;;  %5810 = vadd.xlane.f32.xlu0 %v5809_v8 }
0x1222   : > { %5798 = vmax.xlane.f32.xlu0 %v5797_v18 }
0x1293   : > { %v5279_v11 = vpop.xlane.xlu1 %5278 }
0x1294   : > { %10530 = vrcp.f32 %v5279_v11 }
0x1297   : > { %v5282_v37 = vpop.xlane.xlu0 %5281 }
0x1298   : > { %10532 = vrcp.f32 %v5282_v37 }
0x129b   : > { %v5285_v59 = vpop.xlane.xlu1 %5284 }
0x129c   : > { %10534 = vrcp.f32 %v5285_v59  ;;  %v5148_v53 = vpop.xlane.xlu0 %5147 }
0x129d   : > { %10536 = vrcp.f32 %v5148_v53  ;;  %v8621_v53 = vld [vmem:[#allocation17] ss:$0 sm:$0xff] }
0x129e   : > { %v10531_v6 = vpop.eup %10530 }
0x129f   : > { %v5289_v26 = vmul.f32 %v10531_v6, %v13122_v28  ;;  %v5151_v16 = vpop.xlane.xlu1 %5150  ;;  %v5163_v28 = vmul.f32 %v13046_v19, %v12586_v36 }
0x12a0   : > { %v5154_v60 = vpop.xlane.xlu0 %5153  ;;  %10538 = vrcp.f32 %v5151_v16 }
0x12a1   : > { %9363 = vmatmul.mubr.msk.f32.vlgmr.msra.gmra.mrb[64].mxu0 %vm3444_vm15, %v5289_v26  ;;  %10540 = vrcp.f32 %v5154_v60 }
0x12a2   : > { %v10533_v14 = vpop.eup %10532  ;;  %9880 = vmatpush3.bf16.msra.mxu0 %v9879_v2  ;;  %9365 = vmatprep.mubr.msk.f32.mxu0 %vm11550_vm3, %v11551_v42 }
0x12a3   : > { %v5588_v12 = vpop.xlane.xlu1 %5587  ;;  %9375 = vmatprep.subr.mxu0 %v11551_v42  ;;  %v5290_v34 = vmul.f32 %v10533_v14, %v13126_v4 }
0x12a4   : > { %v5591_v7 = vpop.xlane.xlu0 %5590  ;;  %10542 = vrcp.f32 %v5588_v12 }
0x12a5   : > { %9366 = vmatmul.mubr.msk.f32.gmra.mrb[66].mxu0 %vm3444_vm15, %v5290_v34  ;;  %10544 = vrcp.f32 %v5591_v7 }
0x12a6   : > { %v10535_v57 = vpop.eup %10534  ;;  %9376 = vmatpush3.msra.mxu0 %v5163_v28  ;;  %9368 = vmatprep.mubr.msk.f32.mxu0 %vm11550_vm3, %v11551_v42 }
0x12a7   : > { %v5594_v30 = vpop.xlane.xlu1 %5593  ;;  %v5291_v2 = vmul.f32 %v10535_v57, %v13130_v49  ;;  %9885 = vmatprep.subr.bf16.mxu0 %v11549_v0  ;;  %v10537_v50 = vpop.eup %10536 }
0x12a8   : > { %v5158_v36 = vmul.f32 %v10537_v50, %v13132_v58  ;;  %v5603_v58 = vmul.f32 %v13046_v19, %v12596_v43  ;;  %v5919_v19 = vld [vmem:[%s13693_s1] sm:$0xff] }
0x12a9   : > { %9369 = vmatmul.mubr.msk.f32.gmra.mrb[68].mxu0 %vm3444_vm15, %v5291_v2 }
0x12aa   : > { %9377 = vmatprep.mubr.msk.f32.mxu0 %vm11550_vm3, %v11551_v42  ;;  %v10539_v23 = vpop.eup %10538 }
0x12ab   : > { %v5796_v10 = vpop.xlane.xlu1 %5795  ;;  %v5811_v4 = vpop.xlane.xlu0 %5810  ;;  %v5159_v3 = vmul.f32 %v10539_v23, %v13138_v44 }
0x12ac   : > { %v5801_v24 = vsub.f32 %v5789_v62, %v5796_v10  ;;  %v10541_v49 = vpop.eup %10540 }
0x12ad   : > { %9378 = vmatmul.mubr.msk.f32.vlgmr.msra.gmra.mrb[64].mxu0 %vm3444_vm15, %v5158_v36  ;;  %v5160_v13 = vmul.f32 %v10541_v49, %v13140_v45 }
0x12ae   : > { %v5805_v25 = vmul.f32 1.442695, %v5801_v24  ;;  %9887 = vmatpush3.bf16.msra.mxu0 %v9886_v9  ;;  %9380 = vmatprep.mubr.msk.f32.mxu0 %vm11550_vm3, %v11551_v42  ;;  %v10543_v54 = vpop.eup %10542 }
0x12af   : > { %v5799_v33 = vpop.xlane.xlu0 %5798  ;;  %9405 = vmatprep.subr.mxu0 %v11551_v42  ;;  %v5598_v43 = vmul.f32 %v10543_v54, %v13146_v40  ;;  %v10545_v9 = vpop.eup %10544  ;;  %v9896_v40 = vpack.c.bf16 %v5920_v21, %v5919_v19  ;;  %v8626_v19 = vld [vmem:[#allocation20] ss:$0 sm:$0xff] }
0x12b0   : > { %10546 = vpow2.f32 %v5805_v25  ;;  %v5802_v35 = vsub.f32 %v5790_v38, %v5799_v33  ;;  %v5599_v32 = vmul.f32 %v10545_v9, %v13148_v51  ;;  %v5922_v51 = vld [vmem:[%s13693_s1 + $0x18] sm:$0xff]  ;;  %s13694_s1 = sld [smem:[#allocation94_spill]] }
0x12b1   : > { %9381 = vmatmul.mubr.msk.f32.gmra.mrb[66].mxu0 %vm3444_vm15, %v5159_v3  ;;  %10548 = vrcp.f32 %v5594_v30  ;;  %9897 = vmatpush3.bf16.msra.mxu1 %v9896_v40  ;;  %v9899_v52 = vpack.c.bf16 %v5922_v51, %v5921_v47  ;;  %v6196_v40 = vld [vmem:[%s13695_s2] sm:$0xff]  ;;  %v6197_v51 = vld [vmem:[%s13695_s2 + $0x8] sm:$0xff] }
0x12b2   : > { %v5807_v55 = vmul.f32 1.442695, %v5802_v35  ;;  %9406 = vmatpush3.msra.mxu0 %v5603_v58  ;;  %9383 = vmatprep.mubr.msk.f32.mxu0 %vm11550_vm3, %v11551_v42 }
0x12b3   : > { %9892 = vmatprep.subr.bf16.mxu0 %v11549_v0  ;;  %9898 = vmatprep.subr.bf16.mxu1 %v11549_v0 }
0x12b4   : > { %10550 = vpow2.f32 %v5807_v55 }
0x12b5   : > { %9384 = vmatmul.mubr.msk.f32.gmra.mrb[68].mxu0 %vm3444_vm15, %v5160_v13  ;;  %10552 = vrcp.f32 %v5811_v4  ;;  %9900 = vmatpush3.bf16.msra.mxu1 %v9899_v52  ;;  %v9908_v52 = vpack.c.bf16 %v6197_v51, %v6196_v40 }
0x12b6   : > { %9407 = vmatprep.mubr.msk.f32.mxu0 %vm11550_vm3, %v11551_v42  ;;  %9901 = vmatprep.subr.bf16.mxu1 %v11549_v0  ;;  %v6081_v25 = vld [vmem:[%s13694_s1] sm:$0xff]  ;;  %v6082_v33 = vld [vmem:[%s13694_s1 + $0x8] sm:$0xff]  ;;  %v6083_v49 = vld [vmem:[%s13694_s1 + $0x10] sm:$0xff] }
0x12b7   : > { %v9902_v3 = vpack.c.bf16 %v6082_v33, %v6081_v25  ;;  %v6084_v35 = vld [vmem:[%s13694_s1 + $0x18] sm:$0xff]  ;;  %s13696_s1 = sld [smem:[#allocation100_spill]] }
0x12b8   : > { %v9905_v58 = vpack.c.bf16 %v6084_v35, %v6083_v49 }
0x12b9   : > { %9408 = vmatmul.mubr.msk.f32.vlgmr.msra.gmra.mrb[64].mxu0 %vm3444_vm15, %v5598_v43 }
0x12ba   : > { %v10547_v31 = vpop.eup %10546  ;;  %9894 = vmatpush3.bf16.msra.mxu0 %v9893_v22  ;;  %9410 = vmatprep.mubr.msk.f32.mxu0 %vm11550_vm3, %v11551_v42 }
0x12bb   : > { %v5812_v5 = vsel %vm3444_vm15, %v10547_v31, 0.0  ;;  %9435 = vmatprep.subr.mxu0 %v11551_v42  ;;  %v10549_v44 = vpop.eup %10548 }
0x12bc   : > { %5813 = vadd.xlane.f32.xlu1 %v5812_v5  ;;  %v5600_v22 = vmul.f32 %v10549_v44, %v13154_v27 }
0x12bd   : > { %9411 = vmatmul.mubr.msk.f32.gmra.mrb[66].mxu0 %vm3444_vm15, %v5599_v32  ;;  %v6307_v49 = vld [vmem:[%s13696_s1 + $0x8] sm:$0xff] }
0x12be   : > { %v10551_v46 = vpop.eup %10550  ;;  %9436 = vmatpush3.msra.mxu0 %v5826_v56  ;;  %9413 = vmatprep.mubr.msk.f32.mxu0 %vm11550_vm3, %v11551_v42 }
0x12bf   : > { %v5815_v17 = vsel %vm3444_vm15, %v10551_v46, 0.0  ;;  %9907 = vmatprep.subr.bf16.mxu0 %v11549_v0  ;;  %v10553_v45 = vpop.eup %10552 }
0x12c0   : > { %5816 = vadd.xlane.f32.xlu0 %v5815_v17  ;;  %v5821_v48 = vmul.f32 %v10553_v45, %v13159_v29  ;;  %v8625_v45 = vld [vmem:[#allocation19] ss:$0 sm:$0xff] }
0x12c1   : > { %9414 = vmatmul.mubr.msk.f32.gmra.mrb[68].mxu0 %vm3444_vm15, %v5600_v22 }
0x12c2   : > { %9437 = vmatprep.mubr.msk.f32.mxu0 %vm11550_vm3, %v11551_v42 }
0x12c5   : > { %9438 = vmatmul.mubr.msk.f32.vlgmr.msra.gmra.mrb[64].mxu0 %vm3444_vm15, %v5821_v48 }
0x12c6   : > { %9440 = vmatprep.mubr.msk.f32.mxu0 %vm11550_vm3, %v11551_v42  ;;  %9909 = vmatpush3.bf16.msra.mxu0 %v9908_v52 }
0x12c7   : > { %9910 = vmatprep.subr.bf16.mxu0 %v11549_v0 }
0x1349   : > { %v5814_v20 = vpop.xlane.xlu1 %5813 }
0x134a   : > { %10554 = vrcp.f32 %v5814_v20  ;;  %v6198_v20 = vld [vmem:[%s13695_s2 + $0x10] sm:$0xff] }
0x134d   : > { %v5817_v27 = vpop.xlane.xlu0 %5816 }
0x134e   : > { %10556 = vrcp.f32 %v5817_v27  ;;  %v6199_v27 = vld [vmem:[%s13695_s2 + $0x18] sm:$0xff] }
0x1354   : > { %v10555_v62 = vpop.eup %10554 }
0x1355   : > { %v5822_v1 = vmul.f32 %v10555_v62, %v10547_v31  ;;  %v9911_v62 = vpack.c.bf16 %v6199_v27, %v6198_v20 }
0x1357   : > { %9441 = vmatmul.mubr.msk.f32.gmra.mrb[66].mxu0 %vm3444_vm15, %v5822_v1  ;;  %v6200_v1 = vld [vmem:[%s13695_s2 + $0x20] sm:$0xff] }
0x1358   : > { %v10557_v29 = vpop.eup %10556  ;;  %9443 = vmatprep.mubr.msk.f32.mxu0 %vm11550_vm3, %v11551_v42  ;;  %9912 = vmatpush3.bf16.msra.mxu0 %v9911_v62 }
0x1359   : > { %v5823_v38 = vmul.f32 %v10557_v29, %v10551_v46  ;;  %9913 = vmatprep.subr.bf16.mxu0 %v11549_v0  ;;  %v6201_v29 = vld [vmem:[%s13695_s2 + $0x28] sm:$0xff] }
0x135b   : > { %9444 = vmatmul.mubr.msk.f32.gmra.mrb[68].mxu0 %vm3444_vm15, %v5823_v38  ;;  %v9914_v38 = vpack.c.bf16 %v6201_v29, %v6200_v1  ;;  %vm13401_vm15 = vmpackc.low %vm2894_vm1, %vm2894_vm1 }
0x135c   : > { %9496 = vmatprep.mubr.msk.f32.mxu0 %vm11550_vm3, %v11551_v42 }
0x135d   : > { %9915 = vmatpush3.bf16.msra.mxu0 %v9914_v38 }
0x135e   : > { %9916 = vmatprep.subr.bf16.mxu0 %v11549_v0 }
0x1398   : > { %v5902_v39 = vpop.f32.mrb[64].mxu0 }
0x1399   : > { %v9439_v8 = vpop.f32.mrb[65].mxu0  ;;  %9455 = vmatmul.mubr.msk.f32.vlgmr.msra.gmra.mrb[54].mxu1 %vm2646_vm2, %v5902_v39  ;;  %v6202_v39 = vld [vmem:[%s13695_s2 + $0x30] sm:$0xff] }
0x139a   : > { %9457 = vmatprep.mubr.msk.f32.mxu1 %vm11550_vm3, %v11551_v42  ;;  %9903 = vmatpush3.bf16.msra.mxu1 %v9902_v3  ;;  %v6203_v8 = vld [vmem:[%s13695_s2 + $0x38] sm:$0xff]  ;;  %s13697_s2 = sld [smem:[#allocation63_spill]]  ;;  %v6306_v3 = vld [vmem:[%s13696_s1] sm:$0xff]  ;;  %s13700_s1 = sld [smem:[#allocation106_spill]] }
0x139b   : > { %9904 = vmatprep.subr.bf16.mxu1 %v11549_v0  ;;  %v9919_v35 = vpack.c.bf16 %v6307_v49, %v6306_v3 }
0x139e   : > { %9906 = vmatpush3.bf16.msra.mxu1 %v9905_v58 }
0x139f   : > { %9920 = vmatprep.subr.bf16.mxu1 %v9919_v35 }
0x13a0   : > { %s2490_s3 = scalar_lea.vmem %s13697_s2, %s12456_s0  ;;  %s13699_s2 = sld [smem:[#allocation104_spill]] }
0x13a1   : > { %v2656_v58 = vld [vmem:[%s2490_s3] sm:$0xff] }
0x142a   : > { %v5907_v18 = vpop.f32.mrb[66].mxu0 }
0x142b   : > { %v9442_v11 = vpop.f32.mrb[67].mxu0  ;;  %9458 = vmatmul.mubr.msk.f32.gmra.mrb[56].mxu1 %vm2646_vm2, %v5907_v18  ;;  %v9917_v18 = vpack.c.bf16 %v6203_v8, %v6202_v39 }
0x142c   : > { %9460 = vmatprep.mubr.msk.f32.mxu1 %vm11550_vm3, %v11551_v42 }
0x142d   : > { %9918 = vmatpush3.bf16.msra.mxu0 %v9917_v18 }
0x142e   : > { %v5912_v37 = vpop.f32.mrb[68].mxu0  ;;  %9929 = vmatprep.subr.bf16.mxu0 %v11549_v0 }
0x142f   : > { %v9445_v59 = vpop.f32.mrb[69].mxu0  ;;  %9461 = vmatmul.mubr.msk.f32.gmra.mrb[58].mxu1 %vm2646_vm2, %v5912_v37 }
0x1430   : > { %9471 = vmatprep.mubr.msk.f32.mxu1 %vm11550_vm3, %v11551_v42 }
0x146c   : > { %v6005_v6 = vpop.f32.mrb[54].mxu1 }
0x146d   : > { %v6006_v26 = vadd.f32 %v8621_v53, %v6005_v6  ;;  %v9456_v16 = vpop.f32.mrb[55].mxu1 }
0x146f   : > { %v13251_v60 = vadd.f32 %v6006_v26, %v12944_v61 }
0x1471   : > { %v6022_v14 = vsel %vm2646_vm2, %v13251_v60, 0.0 }
0x1472   : > { %6023 = vadd.xlane.f32.xlu1 %v6022_v14 }
0x14fe   : > { %v6010_v12 = vpop.f32.mrb[56].mxu1 }
0x14ff   : > { %v6011_v34 = vadd.f32 %v8621_v53, %v6010_v12  ;;  %v6024_v28 = vpop.xlane.xlu1 %6023  ;;  %v9459_v57 = vpop.f32.mrb[57].mxu1 }
0x1500   : > { %v6031_v7 = vmul.f32 0.03125, %v6024_v28 }
0x1501   : > { %v13256_v30 = vadd.f32 %v6011_v34, %v12949_v15 }
0x1502   : > { %v6034_v2 = vsub.f32 %v13251_v60, %v6031_v7  ;;  %v6015_v50 = vpop.f32.mrb[58].mxu1 }
0x1503   : > { %v6016_v61 = vadd.f32 %v8621_v53, %v6015_v50  ;;  %v9462_v36 = vpop.f32.mrb[59].mxu1  ;;  %v6025_v10 = vsel %vm2646_vm2, %v13256_v30, 0.0  ;;  %v8627_v50 = vld [vmem:[#allocation22] ss:$0 sm:$0xff] }
0x1504   : > { %6026 = vadd.xlane.f32.xlu1 %v6025_v10  ;;  %v6037_v4 = vmul.f32 %v6034_v2, %v6034_v2 }
0x1505   : > { %v13262_v23 = vadd.f32 %v6016_v61, %v12953_v41 }
0x1506   : > { %v6040_v24 = vsel %vm2646_vm2, %v6037_v4, 0.0 }
0x1507   : > { %6041 = vadd.xlane.f32.xlu0 %v6040_v24  ;;  %v6028_v15 = vsel %vm2646_vm2, %v13262_v23, 0.0 }
0x150b   : > { %6029 = vadd.xlane.f32.xlu0 %v6028_v15 }
0x1591   : > { %v6027_v55 = vpop.xlane.xlu1 %6026 }
0x1592   : > { %v6032_v41 = vmul.f32 0.03125, %v6027_v55  ;;  %v2657_v55 = vld [vmem:[%s2490_s3 + $0x8] sm:$0xff]  ;;  %s13698_s3 = sld [smem:[#allocation103_spill]] }
0x1594   : > { %v6035_v13 = vsub.f32 %v13256_v30, %v6032_v41  ;;  %v6042_v54 = vpop.xlane.xlu0 %6041 }
0x1595   : > { %v6049_v43 = vmul.f32 0.03125, %v6042_v54 }
0x1596   : > { %v6038_v9 = vmul.f32 %v6035_v13, %v6035_v13 }
0x1597   : > { %v6052_v31 = vadd.f32 1e-06, %v6049_v43 }
0x1598   : > { %v6030_v5 = vpop.xlane.xlu0 %6029  ;;  %v6043_v32 = vsel %vm2646_vm2, %v6038_v9, 0.0  ;;  %v6450_v39 = vld [vmem:[%s13698_s3] sm:$0xff]  ;;  %v6451_v8 = vld [vmem:[%s13698_s3 + $0x8] sm:$0xff]  ;;  %v6452_v18 = vld [vmem:[%s13698_s3 + $0x10] sm:$0xff] }
0x1599   : > { %10558 = vrsqrt.f32 %v6052_v31  ;;  %v6033_v44 = vmul.f32 0.03125, %v6030_v5  ;;  %6044 = vadd.xlane.f32.xlu1 %v6043_v32 }
0x159b   : > { %v6036_v56 = vsub.f32 %v13262_v23, %v6033_v44 }
0x159d   : > { %v6039_v46 = vmul.f32 %v6036_v56, %v6036_v56 }
0x159f   : > { %v6046_v17 = vsel %vm2646_vm2, %v6039_v46, 0.0 }
0x15a0   : > { %6047 = vadd.xlane.f32.xlu0 %v6046_v17 }
0x15a3   : > { %v10559_v22 = vpop.eup %10558 }
0x15a4   : > { %v6058_v48 = vmul.f32 %v10559_v22, %v6034_v2 }
0x15a6   : > { %v6068_v21 = vmul.f32 %v8625_v45, %v6058_v48 }
0x15a8   : > { %v6078_v47 = vadd.f32 %v8626_v19, %v6068_v21  ;;  %v8631_v21 = vld [vmem:[#allocation23] ss:$0 sm:$0xff] }
0x15aa   : > { %9472 = vmatmul.mubr.msk.f32.vlgmr.msra.gmra.mrb[60].mxu1 %vm2646_vm2, %v6078_v47 }
0x15ab   : > { %9474 = vmatprep.mubr.msk.f32.mxu1 %vm11550_vm3, %v11551_v42  ;;  %9922 = vmatpush3.bf16.msra.mxu1 %v9919_v35 }
0x15ac   : > { %9923 = vmatprep.subr.bf16.mxu1 %v11549_v0 }
0x1626   : > { %v6045_v11 = vpop.xlane.xlu1 %6044 }
0x1627   : > { %v6050_v37 = vmul.f32 0.03125, %v6045_v11  ;;  %v9924_v11 = vpack.c.bf16 %v6451_v8, %v6450_v39  ;;  %v6786_v39 = vld [vmem:[%s13702_s5 + $0x8] sm:$0xff] }
0x1629   : > { %v6053_v59 = vadd.f32 1e-06, %v6050_v37  ;;  %v6453_v37 = vld [vmem:[%s13698_s3 + $0x18] sm:$0xff]  ;;  %s13701_s3 = sld [smem:[#allocation107_spill]] }
0x162b   : > { %10560 = vrsqrt.f32 %v6053_v59  ;;  %v9927_v59 = vpack.c.bf16 %v6453_v37, %v6452_v18 }
0x162d   : > { %v6048_v53 = vpop.xlane.xlu0 %6047 }
0x162e   : > { %v6051_v6 = vmul.f32 0.03125, %v6048_v53 }
0x1630   : > { %v6054_v26 = vadd.f32 1e-06, %v6051_v6 }
0x1632   : > { %10562 = vrsqrt.f32 %v6054_v26 }
0x1635   : > { %v10561_v16 = vpop.eup %10560 }
0x1636   : > { %v6059_v14 = vmul.f32 %v10561_v16, %v6035_v13  ;;  %v8635_v16 = vld [vmem:[#allocation26] ss:$0 sm:$0xff] }
0x1638   : > { %v6069_v12 = vmul.f32 %v8625_v45, %v6059_v14 }
0x163a   : > { %v6079_v34 = vadd.f32 %v8626_v19, %v6069_v12 }
0x163c   : > { %v10563_v28 = vpop.eup %10562  ;;  %9475 = vmatmul.mubr.msk.f32.gmra.mrb[62].mxu1 %vm2646_vm2, %v6079_v34 }
0x163d   : > { %9477 = vmatprep.mubr.msk.f32.mxu1 %vm11550_vm3, %v11551_v42  ;;  %v6060_v57 = vmul.f32 %v10563_v28, %v6036_v56 }
0x163f   : > { %v6070_v7 = vmul.f32 %v8625_v45, %v6060_v57 }
0x1641   : > { %v6080_v2 = vadd.f32 %v8626_v19, %v6070_v7 }
0x1643   : > { %9478 = vmatmul.mubr.msk.f32.gmra.mrb[64].mxu1 %vm2646_vm2, %v6080_v2 }
0x1644   : > { %9509 = vmatprep.mubr.msk.f32.mxu1 %vm2894_vm1, %v2656_v58 }
0x1647   : > { %9510 = vmatmul.mubr.msk.f32.vlgmr.msra.gmra.mrb[66].mxu1 %vm2894_vm1, %v2657_v55 }
0x1648   : > { %9520 = vmatprep.mubr.msk.f32.mxu1 %vm11550_vm3, %v11551_v42  ;;  %9925 = vmatpush3.bf16.msra.mxu1 %v9924_v11 }
0x1649   : > { %9926 = vmatprep.subr.bf16.mxu1 %v11549_v0 }
0x164c   : > { %9928 = vmatpush3.bf16.msra.mxu1 %v9927_v59 }
0x164d   : > { %9935 = vmatprep.subr.bf16.mxu1 %v11549_v0 }
0x167d   : > { %v6167_v61 = vpop.f32.mrb[60].mxu1 }
0x167e   : > { %v6168_v36 = vadd.f32 %v8627_v50, %v6167_v61  ;;  %v9473_v10 = vpop.f32.mrb[61].mxu1 }
0x1680   : > { %v6184_v4 = vmul.f32 0.70710677, %v6168_v36  ;;  %v6181_v15 = vmul.f32 0.5, %v6168_v36 }
0x1682   : > { %10564 = verf.f32 %v6184_v4 }
0x168c   : > { %v10565_v24 = vpop.eup %10564 }
0x168d   : > { %v6190_v25 = vadd.f32 1.0, %v10565_v24 }
0x168f   : > { %v6193_v33 = vmul.f32 %v6190_v25, %v6181_v15 }
0x1691   : > { %9497 = vmatmul.mubr.msk.f32.vlgmr.msra.gmra.mrb[70].mxu0 %vm2561_vm0, %v6193_v33 }
0x1692   : > { %9499 = vmatprep.mubr.msk.f32.mxu0 %vm11550_vm3, %v11551_v42 }
0x170f   : > { %v6172_v41 = vpop.f32.mrb[62].mxu1 }
0x1710   : > { %v6173_v13 = vadd.f32 %v8627_v50, %v6172_v41  ;;  %v9476_v54 = vpop.f32.mrb[63].mxu1 }
0x1712   : > { %v6185_v43 = vmul.f32 0.70710677, %v6173_v13  ;;  %v6182_v56 = vmul.f32 0.5, %v6173_v13 }
0x1714   : > { %10566 = verf.f32 %v6185_v43 }
0x1716   : > { %v6177_v9 = vpop.f32.mrb[64].mxu1 }
0x1717   : > { %v6178_v31 = vadd.f32 %v8627_v50, %v6177_v9  ;;  %v9479_v5 = vpop.f32.mrb[65].mxu1  ;;  %v6535_v9 = vld [vmem:[%s13699_s2] sm:$0xff] }
0x1718   : > { %v6537_v5 = vld [vmem:[%s13699_s2 + $0x10] sm:$0xff] }
0x1719   : > { %v6186_v32 = vmul.f32 0.70710677, %v6178_v31  ;;  %v6183_v45 = vmul.f32 0.5, %v6178_v31 }
0x171a   : > { %v9511_v29 = vpop.f32.mrb[66].mxu1 }
0x171b   : > { %10568 = verf.f32 %v6186_v32  ;;  %v6387_v38 = vpop.f32.mrb[67].mxu1  ;;  %v6393_v61 = vadd.f32 %v9511_v29, %v8635_v16  ;;  %v6538_v32 = vld [vmem:[%s13699_s2 + $0x18] sm:$0xff] }
0x171c   : > { %v6388_v28 = vadd.f32 %v8635_v16, %v6387_v38  ;;  %v6785_v38 = vld [vmem:[%s13702_s5] sm:$0xff] }
0x171d   : > { %v9947_v8 = vpack.c.bf16 %v6786_v39, %v6785_v38 }
0x171e   : > { %v10567_v44 = vpop.eup %10566 }
0x171f   : > { %v6191_v46 = vadd.f32 1.0, %v10567_v44  ;;  %v9933_v44 = vpack.c.bf16 %v6538_v32, %v6537_v5  ;;  %v8646_v5 = vld [vmem:[#allocation35] ss:$0 sm:$0xff] }
0x1721   : > { %v6194_v17 = vmul.f32 %v6191_v46, %v6182_v56  ;;  %v6620_v56 = vld [vmem:[%s13700_s1] sm:$0xff]  ;;  %v6621_v46 = vld [vmem:[%s13700_s1 + $0x8] sm:$0xff] }
0x1723   : > { %9500 = vmatmul.mubr.msk.f32.gmra.mrb[72].mxu0 %vm2561_vm0, %v6194_v17  ;;  %v9936_v17 = vpack.c.bf16 %v6621_v46, %v6620_v56 }
0x1724   : > { %9502 = vmatprep.mubr.msk.f32.mxu0 %vm11550_vm3, %v11551_v42 }
0x1725   : > { %v10569_v22 = vpop.eup %10568 }
0x1726   : > { %v6192_v48 = vadd.f32 1.0, %v10569_v22  ;;  %v8638_v22 = vld [vmem:[#allocation29] ss:$0 sm:$0xff] }
0x1728   : > { %v6195_v19 = vmul.f32 %v6192_v48, %v6183_v45  ;;  %v6704_v45 = vld [vmem:[%s13701_s3] sm:$0xff]  ;;  %v6705_v48 = vld [vmem:[%s13701_s3 + $0x8] sm:$0xff] }
0x172a   : > { %9503 = vmatmul.mubr.msk.f32.gmra.mrb[74].mxu0 %vm2561_vm0, %v6195_v19 }
0x172b   : > { %9531 = vmatprep.mubr.msk.f32.mxu0 %vm11550_vm3, %v11551_v42 }
0x1764   : > { %v6286_v47 = vpop.f32.mrb[70].mxu0 }
0x1765   : > { %v6287_v40 = vadd.f32 %v8631_v21, %v6286_v47  ;;  %v9498_v51 = vpop.f32.mrb[71].mxu0 }
0x1767   : > { %v6300_v52 = vadd.f32 %v6287_v40, %v13251_v60  ;;  %v9942_v40 = vpack.c.bf16 %v6705_v48, %v6704_v45 }
0x1769   : > { %6303 = vst.msk [vmem:[#allocation2] sm:$0xff] %vm2646_vm2, %v6300_v52  ;;  %v6622_v52 = vld [vmem:[%s13700_s1 + $0x10] sm:$0xff] }
0x1770   : > { %v6402_v20 = vld [vmem:[#allocation2] sm:$0xff] }
0x1771   : > { %v6405_v27 = vadd.f32 %v6402_v20, %v12474_v63  ;;  %v6623_v20 = vld [vmem:[%s13700_s1 + $0x18] sm:$0xff]  ;;  %s13703_s1 = sld [smem:[#allocation110_spill]] }
0x1773   : > { %v6408_v62 = vmul.f32 %v6405_v27, %v6405_v27 }
0x1775   : > { %v6411_v1 = vsel %vm2646_vm2, %v6408_v62, 0.0  ;;  %v6706_v62 = vld [vmem:[%s13701_s3 + $0x10] sm:$0xff] }
0x1776   : > { %6412 = vadd.xlane.f32.xlu1 %v6411_v1  ;;  %v6707_v1 = vld [vmem:[%s13701_s3 + $0x18] sm:$0xff]  ;;  %s13709_s3 = sld [smem:[#allocation117_spill]] }
0x1777   : > { %v9945_v29 = vpack.c.bf16 %v6707_v1, %v6706_v62  ;;  %v8652_v62 = vld [vmem:[#allocation38] ss:$0 sm:$0xff] }
0x17f6   : > { %v6291_v60 = vpop.f32.mrb[72].mxu0 }
0x17f7   : > { %v6292_v53 = vadd.f32 %v8631_v21, %v6291_v60  ;;  %v9501_v6 = vpop.f32.mrb[73].mxu0 }
0x17f9   : > { %v6301_v26 = vadd.f32 %v6292_v53, %v13256_v30 }
0x17fb   : > { %6304 = vst.msk [vmem:[#allocation2 + $0x8] sm:$0xff] %vm2646_vm2, %v6301_v26 }
0x17fd   : > { %v6296_v14 = vpop.f32.mrb[74].mxu0 }
0x17fe   : > { %v6297_v12 = vadd.f32 %v8631_v21, %v6296_v14  ;;  %v9504_v34 = vpop.f32.mrb[75].mxu0 }
0x1800   : > { %v6302_v57 = vadd.f32 %v6297_v12, %v13262_v23 }
0x1802   : > { %6305 = vst.msk [vmem:[#allocation2 + $0x10] sm:$0xff] %vm2646_vm2, %v6302_v57  ;;  %v6396_v7 = vld [vmem:[#allocation2 + $0x8] sm:$0xff] }
0x1803   : > { %v6398_v2 = vadd.f32 %v6396_v7, %v6388_v28  ;;  %v6413_v50 = vpop.xlane.xlu1 %6412  ;;  %v8640_v7 = vld [vmem:[#allocation31] ss:$0 sm:$0xff] }
0x1804   : > { %10570 = vrsqrt.f32 %v6413_v50  ;;  %vm6422_vm0 = vcmp.eq.f32.partialorder %v6413_v50, inf  ;;  %v6425_v25 = vand.u32 2147483648, %v6413_v50  ;;  %vm6424_vm4 = vcmp.eq.f32.partialorder %v6413_v50, 0.0 }
0x1805   : > { %6400 = vst.msk [vmem:[#allocation2 + $0x8] sm:$0xff] %vm2646_vm2, %v6398_v2 }
0x1809   : > { %v6397_v36 = vld [vmem:[#allocation2 + $0x10] sm:$0xff] }
0x180a   : > { %v6399_v30 = vadd.f32 %v6397_v36, %v6393_v61  ;;  %v6788_v61 = vld [vmem:[%s13702_s5 + $0x18] sm:$0xff] }
0x180c   : > { %6401 = vst.msk [vmem:[#allocation2 + $0x10] sm:$0xff] %vm2646_vm2, %v6399_v30  ;;  %v6403_v10 = vld [vmem:[#allocation2 + $0x8] sm:$0xff] }
0x180d   : > { %v13330_v4 = vadd.f32 %v6403_v10, %v12474_v63 }
0x180e   : > { %v10571_v24 = vpop.eup %10570 }
0x180f   : > { %v6421_v15 = vmul.f32 %v10571_v24, %v6413_v50  ;;  %v6409_v23 = vmul.f32 %v13330_v4, %v13330_v4 }
0x1811   : > { %v6423_v33 = vsel %vm6422_vm0, %v6413_v50, %v6421_v15  ;;  %v6414_v3 = vsel %vm2646_vm2, %v6409_v23, 0.0  ;;  %v6787_v50 = vld [vmem:[%s13702_s5 + $0x10] sm:$0xff] }
0x1812   : > { %v6426_v49 = vsel %vm6424_vm4, %v6425_v25, %v6423_v33  ;;  %6415 = vadd.xlane.f32.xlu0 %v6414_v3  ;;  %v9951_v15 = vpack.c.bf16 %v6788_v61, %v6787_v50  ;;  %v6880_v3 = vld [vmem:[%s13703_s1 + $0x8] sm:$0xff]  ;;  %v7403_v61 = vld [vmem:[%s13709_s3] sm:$0xff] }
0x1813   : > { %v6441_v35 = vmax.f32 %v6426_v49, 1e-12  ;;  %v6404_v58 = vld [vmem:[#allocation2 + $0x10] sm:$0xff] }
0x1814   : > { %v13336_v55 = vadd.f32 %v6404_v58, %v12474_v63  ;;  %v6536_v63 = vld [vmem:[%s13699_s2 + $0x8] sm:$0xff]  ;;  %s13704_s2 = sld [smem:[#allocation112_spill]]  ;;  %v6882_v58 = vld [vmem:[%s13703_s1 + $0x18] sm:$0xff] }
0x1815   : > { %10572 = vrcp.f32 %v6441_v35  ;;  %v9930_v31 = vpack.c.bf16 %v6536_v63, %v6535_v9  ;;  %v6881_v35 = vld [vmem:[%s13703_s1 + $0x10] sm:$0xff] }
0x1816   : > { %v6410_v41 = vmul.f32 %v13336_v55, %v13336_v55 }
0x1817   : > { %9931 = vmatpush3.bf16.msra.mxu0 %v9930_v31 }
0x1818   : > { %v6417_v13 = vsel %vm2646_vm2, %v6410_v41, 0.0  ;;  %9932 = vmatprep.subr.bf16.mxu0 %v11549_v0  ;;  %v9959_v41 = vpack.c.bf16 %v6882_v58, %v6881_v35 }
0x1819   : > { %6418 = vadd.xlane.f32.xlu1 %v6417_v13 }
0x181a   : > { %v6973_v13 = vld [vmem:[%s13704_s2] sm:$0xff]  ;;  %v6975_v45 = vld [vmem:[%s13704_s2 + $0x10] sm:$0xff]  ;;  %v6976_v48 = vld [vmem:[%s13704_s2 + $0x18] sm:$0xff] }
0x181b   : > { %9934 = vmatpush3.bf16.msra.mxu0 %v9933_v44 }
0x181c   : > { %9941 = vmatprep.subr.bf16.mxu0 %v11549_v0 }
0x181f   : > { %v10573_v54 = vpop.eup %10572 }
0x1820   : > { %v6445_v43 = vmul.f32 %v10573_v54, %v6405_v27  ;;  %v9939_v27 = vpack.c.bf16 %v6623_v20, %v6622_v52  ;;  %v6974_v54 = vld [vmem:[%s13704_s2 + $0x8] sm:$0xff]  ;;  %s13708_s2 = sld [smem:[#allocation116_spill]] }
0x1822   : > { %9521 = vmatmul.mubr.msk.f32.vlgmr.msra.gmra.mrb[68].mxu1 %vm2646_vm2, %v6445_v43  ;;  %v9963_v43 = vpack.c.bf16 %v6974_v54, %v6973_v13  ;;  %v7406_v13 = vld [vmem:[%s13709_s3 + $0x18] sm:$0xff] }
0x1823   : > { %9542 = vmatprep.mubr.msk.f32.mxu1 %vm11550_vm3, %v11551_v42  ;;  %9937 = vmatpush3.bf16.msra.mxu1 %v9936_v17 }
0x1824   : > { %9938 = vmatprep.subr.bf16.mxu1 %v11549_v0 }
0x1827   : > { %9940 = vmatpush3.bf16.msra.mxu1 %v9939_v27 }
0x1828   : > { %9948 = vmatprep.subr.bf16.mxu1 %v9947_v8 }
0x189f   : > { %v6416_v18 = vpop.xlane.xlu0 %6415 }
0x18a0   : > { %10574 = vrsqrt.f32 %v6416_v18  ;;  %vm6429_vm11 = vcmp.eq.f32.partialorder %v6416_v18, inf  ;;  %v6432_v6 = vand.u32 2147483648, %v6416_v18  ;;  %vm6431_vm12 = vcmp.eq.f32.partialorder %v6416_v18, 0.0 }
0x18a6   : > { %v6419_v11 = vpop.xlane.xlu1 %6418 }
0x18a7   : > { %10576 = vrsqrt.f32 %v6419_v11  ;;  %vm6436_vm13 = vcmp.eq.f32.partialorder %v6419_v11, inf  ;;  %v6439_v34 = vand.u32 2147483648, %v6419_v11  ;;  %vm6438_vm14 = vcmp.eq.f32.partialorder %v6419_v11, 0.0 }
0x18aa   : > { %v10575_v37 = vpop.eup %10574 }
0x18ab   : > { %v6428_v59 = vmul.f32 %v10575_v37, %v6416_v18 }
0x18ad   : > { %v6430_v53 = vsel %vm6429_vm11, %v6416_v18, %v6428_v59 }
0x18ae   : > { %v6433_v26 = vsel %vm6431_vm12, %v6432_v6, %v6430_v53  ;;  %v8644_v53 = vld [vmem:[#allocation34] ss:$0 sm:$0xff] }
0x18af   : > { %v6442_v14 = vmax.f32 %v6433_v26, 1e-12 }
0x18b1   : > { %v10577_v60 = vpop.eup %10576  ;;  %10578 = vrcp.f32 %v6442_v14 }
0x18b2   : > { %v6435_v16 = vmul.f32 %v10577_v60, %v6419_v11  ;;  %v8642_v60 = vld [vmem:[#allocation32] ss:$0 sm:$0xff] }
0x18b4   : > { %v6437_v12 = vsel %vm6436_vm13, %v6419_v11, %v6435_v16 }
0x18b5   : > { %v6440_v28 = vsel %vm6438_vm14, %v6439_v34, %v6437_v12  ;;  %v7307_v34 = vld [vmem:[%s13708_s2] sm:$0xff] }
0x18b6   : > { %v6443_v57 = vmax.f32 %v6440_v28, 1e-12  ;;  %v7308_v28 = vld [vmem:[%s13708_s2 + $0x8] sm:$0xff] }
0x18b8   : > { %10580 = vrcp.f32 %v6443_v57  ;;  %v9987_v57 = vpack.c.bf16 %v7308_v28, %v7307_v34  ;;  %v8675_v34 = vld [vmem:[#allocation44] ss:$0 sm:$0xff] }
0x18bb   : > { %v10579_v36 = vpop.eup %10578 }
0x18bc   : > { %v13368_v23 = vmul.f32 %v10579_v36, %v13330_v4  ;;  %v6879_v4 = vld [vmem:[%s13703_s1] sm:$0xff]  ;;  %s13705_s1 = sld [smem:[#allocation114_spill]]  ;;  %v7404_v36 = vld [vmem:[%s13709_s3 + $0x8] sm:$0xff] }
0x18bd   : > { %v9955_v49 = vpack.c.bf16 %v6880_v3, %v6879_v4 }
0x18c2   : > { %v10581_v25 = vpop.eup %10580  ;;  %v7220_v38 = vld [vmem:[%s13705_s1 + $0x8] sm:$0xff]  ;;  %v7221_v6 = vld [vmem:[%s13705_s1 + $0x10] sm:$0xff]  ;;  %v7222_v26 = vld [vmem:[%s13705_s1 + $0x18] sm:$0xff] }
0x18c3   : > { %v13375_v33 = vmul.f32 %v10581_v25, %v13336_v55  ;;  %v9983_v12 = vpack.c.bf16 %v7222_v26, %v7221_v6  ;;  %v8661_v25 = vld [vmem:[#allocation40] ss:$0 sm:$0xff] }
0x18f5   : > { %v6530_v19 = vpop.f32.mrb[68].mxu1 }
0x18f6   : > { %v6531_v21 = vadd.f32 %v8638_v22, %v6530_v19  ;;  %v9522_v47 = vpop.f32.mrb[69].mxu1  ;;  %v9967_v19 = vpack.c.bf16 %v6976_v48, %v6975_v45  ;;  %v7401_v48 = vld [vmem:[%s11900_s8] sm:$0xff] }
0x18f8   : > { %v6534_v51 = vmax.f32 %v6531_v21, 0.0  ;;  %v8649_v21 = vld [vmem:[#allocation37] ss:$0 sm:$0xff] }
0x18fa   : > { %9532 = vmatmul.mubr.msk.f32.vlgmr.msra.gmra.mrb[76].mxu0 %vm2646_vm2, %v6534_v51 }
0x18fb   : > { %9943 = vmatpush3.bf16.msra.mxu0 %v9942_v40  ;;  %9553 = vmatprep.mubr.msk.f32.mxu0 %vm11550_vm3, %v11551_v42 }
0x18fc   : > { %9944 = vmatprep.subr.bf16.mxu0 %v11549_v0 }
0x18ff   : > { %9946 = vmatpush3.bf16.msra.mxu0 %v9945_v29  ;;  %v7219_v29 = vld [vmem:[%s13705_s1] sm:$0xff]  ;;  %s8497_s1 = sshll.u32 %s13712_s26, 3  ;;  %s13461_s26 = scalar_lea.vmem %s11915_s4, %s12456_s0 }
0x1900   : > { %9956 = vmatprep.subr.bf16.mxu0 %v9955_v49  ;;  %v9979_v37 = vpack.c.bf16 %v7220_v38, %v7219_v29  ;;  %s2498_s5 = scalar_lea.vmem %s11905_s17, %s8497_s1  ;;  %s2502_s6 = scalar_lea.vmem %s11910_s9, %s8497_s1  ;;  %v7402_v29 = vld [vmem:[%s11900_s8 + $0x8] sm:$0xff] }
0x19cd   : > { %v6615_v2 = vpop.f32.mrb[76].mxu0 }
0x19ce   : > { %v6616_v30 = vadd.f32 %v8640_v7, %v6615_v2  ;;  %v9533_v10 = vpop.f32.mrb[77].mxu0  ;;  %v7309_v7 = vld [vmem:[%s13708_s2 + $0x10] sm:$0xff]  ;;  %v7310_v2 = vld [vmem:[%s13708_s2 + $0x18] sm:$0xff]  ;;  %s13710_s2 = sld [smem:[#allocation119_spill]] }
0x19cf   : > { %v9991_v50 = vpack.c.bf16 %v7310_v2, %v7309_v7 }
0x19d0   : > { %v6619_v24 = vmax.f32 %v6616_v30, 0.0  ;;  %v9995_v30 = vpack.c.bf16 %v7404_v36, %v7403_v61 }
0x19d2   : > { %9543 = vmatmul.mubr.msk.f32.vlgmr.msra.gmra.mrb[70].mxu1 %vm2646_vm2, %v6619_v24  ;;  %9554 = vmatmul.mubr.msk.f32.vlgmr.msra.gmra.mrb[78].mxu0 %vm2646_vm2, %v6619_v24 }
0x19d3   : > { %9950 = vmatpush3.bf16.msra.mxu1 %v9947_v8  ;;  %9564 = vmatprep.mubr.msk.f32.mxu1 %vm2646_vm2, %v13368_v23 }
0x19d4   : > { %9952 = vmatprep.subr.bf16.mxu1 %v9951_v15  ;;  %9958 = vmatpush3.bf16.msra.mxu0 %v9955_v49 }
0x19d5   : > { %9960 = vmatprep.subr.bf16.mxu0 %v9959_v41 }
0x19d7   : > { %9954 = vmatpush3.bf16.msra.mxu1 %v9951_v15 }
0x19d8   : > { %9962 = vmatpush3.bf16.msra.mxu0 %v9959_v41  ;;  %9964 = vmatprep.subr.bf16.mxu1 %v9963_v43  ;;  %v7405_v41 = vld [vmem:[%s13709_s3 + $0x10] sm:$0xff] }
0x19d9   : > { %9971 = vmatprep.subr.bf16.mxu0 %v11549_v0  ;;  %v9999_v54 = vpack.c.bf16 %v7406_v13, %v7405_v41 }
0x19da   : > { %9565 = vmatmul.mubr.msk.f32.vlgmr.msra.gmra.mrb[72].mxu1 %vm2646_vm2, %v13375_v33 }
0x19db   : > { %9966 = vmatpush3.bf16.msra.mxu1 %v9963_v43  ;;  %v7675_v43 = vld [vmem:[%s13710_s2] sm:$0xff] }
0x19dc   : > { %9968 = vmatprep.subr.bf16.mxu1 %v9967_v19 }
0x19df   : > { %9970 = vmatpush3.bf16.msra.mxu1 %v9967_v19  ;;  %v8667_v19 = vld [vmem:[#allocation43] ss:$0 sm:$0xff] }
0x19e0   : > { %9975 = vmatprep.subr.bf16.mxu1 %v11549_v0 }
0x1aa5   : > { %v6700_v55 = vpop.f32.mrb[70].mxu1  ;;  %v6781_v9 = vpop.f32.mrb[78].mxu0 }
0x1aa6   : > { %v9544_v63 = vpop.f32.mrb[71].mxu1  ;;  %v9555_v31 = vpop.f32.mrb[79].mxu0  ;;  %v13411_v16 = vadd.f32 %v8642_v60, %v6700_v55  ;;  %v6782_v14 = vadd.f32 %v8644_v53, %v6781_v9  ;;  %v7676_v55 = vld [vmem:[%s13710_s2 + $0x8] sm:$0xff] }
0x1aa7   : > { %v10011_v9 = vpack.c.bf16 %v7676_v55, %v7675_v43  ;;  %v8664_v63 = vld [vmem:[#allocation41] ss:$0 sm:$0xff] }
0x1aad   : > { %v9566_v32 = vpop.f32.mrb[72].mxu1 }
0x1aae   : > { %v6874_v44 = vadd.f32 %v9566_v32, %v8646_v5  ;;  %v6868_v56 = vpop.f32.mrb[73].mxu1 }
0x1aaf   : > { %v6869_v46 = vadd.f32 %v8646_v5, %v6868_v56  ;;  %v7677_v56 = vld [vmem:[%s13710_s2 + $0x10] sm:$0xff] }
0x1ab0   : > { %v6878_v22 = vmax.f32 %v6874_v44, 0.0 }
0x1ab1   : > { %v6877_v17 = vmax.f32 %v6869_v46, 0.0  ;;  %v7678_v46 = vld [vmem:[%s13710_s2 + $0x18] sm:$0xff] }
0x1ab2   : > { %v10015_v45 = vpack.c.bf16 %v7678_v46, %v7677_v56 }
0x1ab3   : > { %9575 = vmatprep.mubr.msk.f32.mxu0 %vm2646_vm2, %v6877_v17 }
0x1ab4   : > { %9576 = vmatmul.mubr.msk.f32.vlgmr.msra.gmra.mrb[80].mxu0 %vm2646_vm2, %v6878_v22 }
0x1ab5   : > { %9593 = vmatprep.mubr.msk.f32.mxu0 %vm11550_vm3, %v11551_v42 }
0x1b87   : > { %v9577_v47 = vpop.f32.mrb[80].mxu0 }
0x1b88   : > { %v6968_v40 = vadd.f32 %v9577_v47, %v8649_v21  ;;  %v6962_v51 = vpop.f32.mrb[81].mxu0 }
0x1b89   : > { %v6963_v52 = vadd.f32 %v8649_v21, %v6962_v51 }
0x1b8a   : > { %v6972_v27 = vmax.f32 %v6968_v40, 0.0 }
0x1b8b   : > { %v6971_v20 = vmax.f32 %v6963_v52, 0.0 }
0x1b8d   : > { %9586 = vmatprep.mubr.msk.f32.mxu1 %vm2646_vm2, %v6971_v20 }
0x1b8e   : > { %9587 = vmatmul.mubr.msk.f32.vlgmr.msra.gmra.mrb[74].mxu1 %vm2646_vm2, %v6972_v27 }
0x1b8f   : > { %9600 = vmatprep.mubr.msk.f32.mxu1 %vm11550_vm3, %v11551_v42 }
0x1c61   : > { %v9588_v1 = vpop.f32.mrb[74].mxu1 }
0x1c62   : > { %v7062_v39 = vadd.f32 %v9588_v1, %v8652_v62  ;;  %v7056_v8 = vpop.f32.mrb[75].mxu1 }
0x1c63   : > { %v7057_v18 = vadd.f32 %v8652_v62, %v7056_v8 }
0x1c65   : > { %v9972_v59 = vpack.c.bf16 %v7062_v39, %v7057_v18 }
0x1c67   : > { %9974 = vmatpush3.bf16.xpose.msk.msra.mxu0 %vm13401_vm15, %v9972_v59  ;;  %9978 = vmatpush3.bf16.xpose.msk.msra.mxu1 %vm13401_vm15, %v9972_v59 }
0x1c68   : > { %9980 = vmatprep.subr.bf16.mxu0 %v9979_v37  ;;  %9988 = vmatprep.subr.bf16.mxu1 %v9987_v57 }
0x1c6e   : > { %9594 = vmatmul.mubr.msk.f32.vlgmr.msra.gmra.mrb[82].mxu0 %vm2894_vm1, %v13411_v16  ;;  %9601 = vmatmul.mubr.msk.f32.vlgmr.msra.gmra.mrb[76].mxu1 %vm2894_vm1, %v6782_v14 }
0x1c6f   : > { %9982 = vmatpush3.bf16.msra.mxu0 %v9979_v37  ;;  %9611 = vmatprep.mubr.msk.f32.mxu0 %vm2646_vm2, %v13368_v23 }
0x1c70   : > { %9984 = vmatprep.subr.bf16.mxu0 %v9983_v12  ;;  %9990 = vmatpush3.bf16.msra.mxu1 %v9987_v57 }
0x1c71   : > { %9992 = vmatprep.subr.bf16.mxu1 %v9991_v50 }
0x1c73   : > { %9986 = vmatpush3.bf16.msra.mxu0 %v9983_v12 }
0x1c74   : > { %9994 = vmatpush3.bf16.msra.mxu1 %v9991_v50  ;;  %9996 = vmatprep.subr.bf16.mxu0 %v9995_v30 }
0x1c76   : > { %9612 = vmatmul.mubr.msk.f32.vlgmr.msra.gmra.mrb[84].mxu0 %vm2646_vm2, %v13375_v33 }
0x1c77   : > { %9998 = vmatpush3.bf16.msra.mxu0 %v9995_v30 }
0x1c78   : > { %10000 = vmatprep.subr.bf16.mxu0 %v9999_v54 }
0x1c7b   : > { %10002 = vmatpush3.bf16.msra.mxu0 %v9999_v54 }
0x1c7c   : > { %10012 = vmatprep.subr.bf16.mxu0 %v10011_v9 }
0x1d41   : > { %v7140_v10 = vpop.f32.mrb[82].mxu0  ;;  %v7213_v24 = vpop.f32.mrb[76].mxu1 }
0x1d42   : > { %7217 = vst.msk [vmem:[%s2498_s5] sm:$0xff] %vm2894_vm1, %v7140_v10  ;;  %7218 = vst.msk [vmem:[%s2502_s6] sm:$0xff] %vm2894_vm1, %v7213_v24  ;;  %v9595_v15 = vpop.f32.mrb[83].mxu0  ;;  %v9602_v23 = vpop.f32.mrb[77].mxu1 }
0x1d49   : > { %v9613_v33 = vpop.f32.mrb[84].mxu0 }
0x1d4a   : > { %v7302_v4 = vadd.f32 %v9613_v33, %v8661_v25  ;;  %v7296_v3 = vpop.f32.mrb[85].mxu0 }
0x1d4b   : > { %v7297_v49 = vadd.f32 %v8661_v25, %v7296_v3 }
0x1d4c   : > { %v7306_v58 = vmax.f32 %v7302_v4, 0.0 }
0x1d4d   : > { %v7305_v35 = vmax.f32 %v7297_v49, 0.0 }
0x1d4f   : > { %9622 = vmatprep.mubr.msk.f32.mxu1 %vm2646_vm2, %v7305_v35 }
0x1d50   : > { %9623 = vmatmul.mubr.msk.f32.vlgmr.msra.gmra.mrb[78].mxu1 %vm2646_vm2, %v7306_v58 }
0x1d51   : > { %9640 = vmatprep.mubr.msk.f32.mxu1 %vm2894_vm1, %v7401_v48 }
0x1e23   : > { %v9624_v31 = vpop.f32.mrb[78].mxu1 }
0x1e24   : > { %v7396_v5 = vadd.f32 %v9624_v31, %v8664_v63  ;;  %v7390_v32 = vpop.f32.mrb[79].mxu1 }
0x1e25   : > { %v7391_v44 = vadd.f32 %v8664_v63, %v7390_v32 }
0x1e26   : > { %v7400_v22 = vmax.f32 %v7396_v5, 0.0 }
0x1e27   : > { %v7399_v17 = vmax.f32 %v7391_v44, 0.0 }
0x1e29   : > { %9633 = vmatprep.mubr.msk.f32.mxu0 %vm2646_vm2, %v7399_v17 }
0x1e2a   : > { %9634 = vmatmul.mubr.msk.f32.vlgmr.msra.gmra.mrb[86].mxu0 %vm2646_vm2, %v7400_v22 }
0x1e2b   : > { %10014 = vmatpush3.bf16.msra.mxu0 %v10011_v9  ;;  %9658 = vmatprep.mubr.msk.f32.mxu0 %vm2646_vm2, %v7399_v17 }
0x1e2c   : > { %10016 = vmatprep.subr.bf16.mxu0 %v10015_v45 }
0x1e2f   : > { %10018 = vmatpush3.bf16.msra.mxu0 %v10015_v45 }
0x1e30   : > { %10023 = vmatprep.subr.bf16.mxu0 %v11549_v0 }
0x1e32   : > { %9659 = vmatmul.mubr.msk.f32.vlgmr.msra.gmra.mrb[88].mxu0 %vm2646_vm2, %v7400_v22 }
0x1e33   : > { %9672 = vmatprep.mubr.msk.f32.mxu0 %vm11550_vm3, %v11551_v42 }
0x1efd   : > { %v9635_v21 = vpop.f32.mrb[86].mxu0 }
0x1efe   : > { %v7492_v47 = vadd.f32 %v9635_v21, %v8667_v19  ;;  %v7486_v40 = vpop.f32.mrb[87].mxu0 }
0x1eff   : > { %v7487_v51 = vadd.f32 %v8667_v19, %v7486_v40 }
0x1f00   : > { %v7496_v52 = vmul.f32 %v7492_v47, %v7492_v47 }
0x1f01   : > { %v7495_v20 = vmul.f32 %v7487_v51, %v7487_v51 }
0x1f03   : > { %v10003_v27 = vpack.c.bf16 %v7496_v52, %v7495_v20 }
0x1f05   : > { %v9660_v62 = vpop.f32.mrb[88].mxu0  ;;  %10004 = vmatprep.subr.bf16.mxu1 %v10003_v27 }
0x1f06   : > { %v7752_v1 = vpop.f32.mrb[89].mxu0  ;;  %10006 = vmatpush3.bf16.msra.mxu1 %v10003_v27  ;;  %v7758_v28 = vadd.f32 %v9660_v62, %v8675_v34 }
0x1f07   : > { %10007 = vmatprep.subr.bf16.mxu1 %v11549_v0  ;;  %v7753_v57 = vadd.f32 %v8675_v34, %v7752_v1 }
0x1f08   : > { %v7762_v50 = vmul.f32 %v7758_v28, %v7758_v28 }
0x1f09   : > { %9641 = vmatmul.mubr.msk.f32.vlgmr.msra.gmra.mrb[80].mxu1 %vm2894_vm1, %v7402_v29  ;;  %v7761_v61 = vmul.f32 %v7753_v57, %v7753_v57 }
0x1f0a   : > { %9647 = vmatprep.mubr.msk.f32.mxu1 %vm11550_vm3, %v11551_v42 }
0x1f0b   : > { %v10019_v24 = vpack.c.bf16 %v7762_v50, %v7761_v61 }
0x1fdc   : > { %v9642_v38 = vpop.f32.mrb[80].mxu1 }
0x1fdd   : > { %10582 = vrsqrt.f32 %v9642_v38  ;;  %v7569_v39 = vpop.f32.mrb[81].mxu1  ;;  %vm7587_vm2 = vcmp.eq.f32.partialorder %v9642_v38, inf  ;;  %v7590_v59 = vand.u32 2147483648, %v9642_v38  ;;  %vm7589_vm5 = vcmp.eq.f32.partialorder %v9642_v38, 0.0 }
0x1fde   : > { %10584 = vrsqrt.f32 %v7569_v39  ;;  %vm7580_vm6 = vcmp.eq.f32.partialorder %v7569_v39, inf  ;;  %v7583_v6 = vand.u32 2147483648, %v7569_v39  ;;  %vm7582_vm7 = vcmp.eq.f32.partialorder %v7569_v39, 0.0 }
0x1fe7   : > { %v10583_v8 = vpop.eup %10582 }
0x1fe8   : > { %v10585_v18 = vpop.eup %10584  ;;  %v7586_v37 = vmul.f32 %v10583_v8, %v9642_v38 }
0x1fe9   : > { %v7579_v60 = vmul.f32 %v10585_v18, %v7569_v39 }
0x1fea   : > { %v7588_v53 = vsel %vm7587_vm2, %v9642_v38, %v7586_v37 }
0x1feb   : > { %v7591_v0 = vsel %vm7589_vm5, %v7590_v59, %v7588_v53  ;;  %v7581_v26 = vsel %vm7580_vm6, %v7569_v39, %v7579_v60 }
0x1fec   : > { %v7593_v14 = vmax.f32 %v7591_v0, 1e-12  ;;  %v7584_v12 = vsel %vm7582_vm7, %v7583_v6, %v7581_v26 }
0x1fed   : > { %v7592_v42 = vmax.f32 %v7584_v12, 1e-12 }
0x1fee   : > { %10586 = vrcp.f32 %v7593_v14 }
0x1fef   : > { %10588 = vrcp.f32 %v7592_v42 }
0x1ff8   : > { %v10587_v7 = vpop.eup %10586 }
0x1ff9   : > { %v10589_v2 = vpop.eup %10588  ;;  %v7597_v36 = vmul.f32 %v10587_v7, %v7492_v47 }
0x1ffa   : > { %v7595_v30 = vmul.f32 %v10589_v2, %v7487_v51 }
0x1ffc   : > { %v10008_v10 = vpack.c.bf16 %v7597_v36, %v7595_v30 }
0x1ffe   : > { %10010 = vmatpush3.bf16.xpose.msk.msra.mxu1 %vm13401_vm15, %v10008_v10 }
0x1fff   : > { %10020 = vmatprep.subr.bf16.mxu1 %v10019_v24 }
0x2005   : > { %9648 = vmatmul.mubr.msk.f32.vlgmr.msra.gmra.mrb[82].mxu1 %vm2894_vm1, %v13411_v16 }
0x2006   : > { %10022 = vmatpush3.bf16.msra.mxu1 %v10019_v24  ;;  %9665 = vmatprep.mubr.msk.f32.mxu1 %vm2894_vm1, %v7401_v48 }
0x2009   : > { %9666 = vmatmul.mubr.msk.f32.vlgmr.msra.gmra.mrb[84].mxu1 %vm2894_vm1, %v7402_v29 }
0x20d8   : > { %v7670_v15 = vpop.f32.mrb[82].mxu1 }
0x20d9   : > { %7674 = vst.msk [vmem:[%s13461_s26] sm:$0xff] %vm2894_vm1, %v7670_v15  ;;  %v9649_v23 = vpop.f32.mrb[83].mxu1 }
0x20dc   : > { %v9667_v25 = vpop.f32.mrb[84].mxu1 }
0x20dd   : > { %10590 = vrsqrt.f32 %v9667_v25  ;;  %v7829_v33 = vpop.f32.mrb[85].mxu1  ;;  %vm7847_vm3 = vcmp.eq.f32.partialorder %v9667_v25, inf  ;;  %v7850_v35 = vand.u32 2147483648, %v9667_v25  ;;  %vm7849_vm8 = vcmp.eq.f32.partialorder %v9667_v25, 0.0 }
0x20de   : > { %10592 = vrsqrt.f32 %v7829_v33  ;;  %vm7840_vm9 = vcmp.eq.f32.partialorder %v7829_v33, inf  ;;  %v7843_v13 = vand.u32 2147483648, %v7829_v33  ;;  %vm7842_vm10 = vcmp.eq.f32.partialorder %v7829_v33, 0.0 }
0x20e7   : > { %v10591_v4 = vpop.eup %10590 }
0x20e8   : > { %v10593_v3 = vpop.eup %10592  ;;  %v7846_v49 = vmul.f32 %v10591_v4, %v9667_v25 }
0x20e9   : > { %v7839_v58 = vmul.f32 %v10593_v3, %v7829_v33 }
0x20ea   : > { %v7848_v41 = vsel %vm7847_vm3, %v9667_v25, %v7846_v49 }
0x20eb   : > { %v7851_v54 = vsel %vm7849_vm8, %v7850_v35, %v7848_v41  ;;  %v7841_v43 = vsel %vm7840_vm9, %v7829_v33, %v7839_v58 }
0x20ec   : > { %v7853_v55 = vmax.f32 %v7851_v54, 1e-12  ;;  %v7844_v9 = vsel %vm7842_vm10, %v7843_v13, %v7841_v43 }
0x20ed   : > { %v7852_v63 = vmax.f32 %v7844_v9, 1e-12 }
0x20ee   : > { %10594 = vrcp.f32 %v7853_v55 }
0x20ef   : > { %10596 = vrcp.f32 %v7852_v63 }
0x20f8   : > { %v10595_v31 = vpop.eup %10594 }
0x20f9   : > { %v10597_v5 = vpop.eup %10596  ;;  %v7857_v32 = vmul.f32 %v10595_v31, %v7758_v28 }
0x20fa   : > { %v7855_v44 = vmul.f32 %v10597_v5, %v7753_v57 }
0x20fc   : > { %v10024_v56 = vpack.c.bf16 %v7857_v32, %v7855_v44 }
0x20fe   : > { %10026 = vmatpush3.bf16.xpose.msk.msra.mxu0 %vm13401_vm15, %v10024_v56 }
0x2105   : > { %9673 = vmatmul.mubr.msk.f32.vlgmr.msra.gmra.mrb[90].mxu0 %vm2894_vm1, %v13411_v16 }
0x21d8   : > { %v7930_v46 = vpop.f32.mrb[90].mxu0 }
0x21d9   : > { %8683 = vst.msk [vmem:[%s13461_s26 + $0x8] sm:$0xff] %vm2894_vm1, %v7930_v46  ;;  %v9674_v17 = vpop.f32.mrb[91].mxu0 }
0x21da PF: > { %s169_s22 = sadd.s32 1, %s11448_s22  }
0x21db   : > { %p166_p13 = scmp.ge.s32.totalorder %s169_s22, 4  }
0x21dd   :  { %168 = sbr.rel (!%p166_p13) target bundleno = 151 (0x97), region = 544 }
0x21e4   :  { %7985 = vsyncpa [#allocation4], 1 }
0x21e5   :  { %7987 = vsyncpa [#allocation4 + $0x1], 1 }
0x21e6   :  { %7988 = vsyncpa [#allocation6], 1 }
0x21e7   :  { %7989 = vsyncpa [#allocation9], 1 }
0x21e8   :  { %7990 = vsyncpa [#allocation12], 1 }
0x21e9   :  { %7991 = vsyncpa [#allocation15], 1 }
0x21ea   :  { %7992 = vsyncpa [#allocation18], 1 }
0x21eb   :  { %7993 = vsyncpa [#allocation21], 1 }
0x21ec   :  { %7994 = vsyncpa [#allocation24], 1 }
0x21ed   :  { %7995 = vsyncpa [#allocation27], 1 }
0x21ee   :  { %7996 = vsyncpa [#allocation30], 1 }
0x21ef   :  { %7997 = vsyncpa [#allocation33], 1 }
0x21f0   :  { %7998 = vsyncpa [#allocation36], 1 }
0x21f1   :  { %7999 = vsyncpa [#allocation39], 1 }
0x21f2   :  { %8000 = vsyncpa [#allocation42], 1 }
0x21f3   :  { %8001 = vsyncpa [#allocation45], 1 }

</bundles_post_ra>
